<compile_context>
chip_gen: v7x
topology: tpu7x:2x2x1
jax: 0.10.0
libtpu: 0.0.40
codegen_flags: <defaults>
</compile_context>

<pallas_src>
import jax
import jax.numpy as jnp
from jax import lax
from jax.experimental import pallas as pl
from jax.experimental.pallas import tpu as pltpu

EPS = 1e-5
LANES = 128


def _round_up(x, m):
    return (x + m - 1) // m * m


def double_conv_kernel(x_ref, w1_ref, g1_ref, b1_ref, w2_ref, g2_ref, b2_ref,
                       out_ref, slab_ref, mid_ref):
    # x_ref:    (N, H+2, W+2, C)   spatially pre-padded input, C = lane-padded
    # w*_ref:   (9*C, C)           im2col-reshaped conv weights
    # g/b:      (1, C)             BN gamma / beta (lane-padded)
    # out_ref:  (N, H, W, C)
    # slab_ref: (M, 9*C)           im2col patch slab (VMEM scratch, reused)
    # mid_ref:  (N, H+2, W+2, C)   padded intermediate (VMEM scratch)
    N, Hp, Wp, C = x_ref.shape
    H, W = Hp - 2, Wp - 2
    M = N * H * W
    inv_m = 1.0 / M

    taps = [(dy, dx) for dy in range(3) for dx in range(3)]

    # ---- conv1: im2col into slab (128-aligned blocks), ONE MXU matmul ----
    for k, (dy, dx) in enumerate(taps):
        slab_ref[:, k * C:(k + 1) * C] = (
            x_ref[:, dy:dy + H, dx:dx + W, :].reshape(M, C))
    acc = jnp.dot(slab_ref[...], w1_ref[...],
                  preferred_element_type=jnp.float32)          # (M, C)
    # conv bias intentionally omitted: batch-stat BN subtracts the per-channel
    # mean, so an additive per-channel bias cancels exactly.

    # ---- BN1 (single pass: sum & sum-of-squares, folded scale/shift) + ReLU
    mean = jnp.sum(acc, axis=0, keepdims=True) * inv_m
    var = jnp.maximum(
        jnp.sum(acc * acc, axis=0, keepdims=True) * inv_m - mean * mean, 0.0)
    scale = g1_ref[...] * lax.rsqrt(var + EPS)                 # rsqrt -> EUP
    shift = b1_ref[...] - mean * scale
    y = jnp.maximum(acc * scale + shift, 0.0)                  # (M, C)

    # ---- re-pad intermediate: write interior, zero only the 1-wide halo ----
    mid_ref[:, 1:H + 1, 1:W + 1, :] = y.reshape(N, H, W, C)
    zrow = jnp.zeros((N, 1, Wp, C), jnp.float32)
    mid_ref[:, 0:1, :, :] = zrow
    mid_ref[:, Hp - 1:Hp, :, :] = zrow
    zcol = jnp.zeros((N, H, 1, C), jnp.float32)
    mid_ref[:, 1:H + 1, 0:1, :] = zcol
    mid_ref[:, 1:H + 1, Wp - 1:Wp, :] = zcol

    # ---- conv2: same im2col slab (fully overwritten), one MXU matmul ----
    for k, (dy, dx) in enumerate(taps):
        slab_ref[:, k * C:(k + 1) * C] = (
            mid_ref[:, dy:dy + H, dx:dx + W, :].reshape(M, C))
    acc2 = jnp.dot(slab_ref[...], w2_ref[...],
                   preferred_element_type=jnp.float32)         # (M, C)

    # ---- BN2 + ReLU ----
    mean2 = jnp.sum(acc2, axis=0, keepdims=True) * inv_m
    var2 = jnp.maximum(
        jnp.sum(acc2 * acc2, axis=0, keepdims=True) * inv_m - mean2 * mean2,
        0.0)
    scale2 = g2_ref[...] * lax.rsqrt(var2 + EPS)
    shift2 = b2_ref[...] - mean2 * scale2
    z = jnp.maximum(acc2 * scale2 + shift2, 0.0)

    # lane-dense store: C is a multiple of 128
    out_ref[...] = z.reshape(N, H, W, C)


def double_conv(x_nchw, params):
    """x_nchw: (N, Cin, H, W) float32 -> (N, Cout, H, W) float32."""
    x = jnp.transpose(x_nchw, (0, 2, 3, 1)).astype(jnp.float32)  # NCHW -> NHWC
    N, H, W, Cin = x.shape
    Cout = params["w1"].shape[-1]
    # pad both channel counts to one common lane-width multiple
    Cp = _round_up(max(Cin, Cout), LANES)
    M = N * H * W

    # spatial pad by 1, channel pad to Cp (zeros)
    xp = jnp.pad(x, ((0, 0), (1, 1), (1, 1), (0, Cp - Cin)))

    def pad_weight(w, ci, co):  # (3,3,ci,co) -> (9*Cp, Cp), zero padded
        wp = jnp.pad(w, ((0, 0), (0, 0), (0, Cp - ci), (0, Cp - co)))
        return wp.reshape(9 * Cp, Cp)

    def pad_vec(v, fill):       # (1, Cout) -> (1, Cp)
        return jnp.pad(v, ((0, 0), (0, Cp - Cout)), constant_values=fill)

    w1p = pad_weight(params["w1"], Cin, Cout)
    w2p = pad_weight(params["w2"], Cout, Cout)
    g1p, b1p = pad_vec(params["g1"], 1.0), pad_vec(params["b1"], 0.0)
    g2p, b2p = pad_vec(params["g2"], 1.0), pad_vec(params["b2"], 0.0)

    # scoped VMEM sized from the actual resident buffers
    out_bytes = N * H * W * Cp * 4
    slab_bytes = M * 9 * Cp * 4
    mid_bytes = N * (H + 2) * (W + 2) * Cp * 4
    resident = (xp.nbytes + w1p.nbytes + w2p.nbytes + g1p.nbytes + b1p.nbytes +
                g2p.nbytes + b2p.nbytes + out_bytes + slab_bytes + mid_bytes)
    vmem_limit = int(min(56 * 1024 * 1024, max(24 * 1024 * 1024, 2 * resident)))

    out_padded = pl.pallas_call(
        double_conv_kernel,
        out_shape=jax.ShapeDtypeStruct((N, H, W, Cp), jnp.float32),
        in_specs=[pl.BlockSpec(memory_space=pltpu.MemorySpace.VMEM)] * 7,
        out_specs=pl.BlockSpec(memory_space=pltpu.MemorySpace.VMEM),
        scratch_shapes=[
            pltpu.VMEM((M, 9 * Cp), jnp.float32),            # im2col slab
            pltpu.VMEM((N, H + 2, W + 2, Cp), jnp.float32),  # padded mid
        ],
        compiler_params=pltpu.CompilerParams(vmem_limit_bytes=vmem_limit),
    )(xp, w1p, g1p, b1p, w2p, g2p, b2p)

    out = out_padded[..., :Cout]                 # drop lane padding
    return jnp.transpose(out, (0, 3, 1, 2))      # NHWC -> NCHW


def ref_double_conv(x_nchw, params):
    """Plain-JAX reference (PyTorch training-mode forward semantics)."""
    x = jnp.transpose(x_nchw, (0, 2, 3, 1)).astype(jnp.float32)

    def conv(x, w, b):
        y = lax.conv_general_dilated(
            x, w, window_strides=(1, 1), padding="SAME",
            dimension_numbers=("NHWC", "HWIO", "NHWC"))
        return y + b.reshape(1, 1, 1, -1)

    def bn_relu(y, g, be):
        mean = y.mean(axis=(0, 1, 2), keepdims=True)
        var = ((y - mean) ** 2).mean(axis=(0, 1, 2), keepdims=True)
        yn = (y - mean) * lax.rsqrt(var + EPS)
        return jnp.maximum(
            yn * g.reshape(1, 1, 1, -1) + be.reshape(1, 1, 1, -1), 0.0)

    y = bn_relu(conv(x, params["w1"], params["cb1"]), params["g1"], params["b1"])
    z = bn_relu(conv(y, params["w2"], params["cb2"]), params["g2"], params["b2"])
    return jnp.transpose(z, (0, 3, 1, 2))


def init_params(key, in_ch, out_ch):
    k = jax.random.split(key, 8)
    s1 = 1.0 / jnp.sqrt(in_ch * 9.0)
    s2 = 1.0 / jnp.sqrt(out_ch * 9.0)
    return {
        # conv weights stored HWIO (3,3,Cin,Cout) for the NHWC kernel
        "w1": jax.random.uniform(k[0], (3, 3, in_ch, out_ch), jnp.float32, -s1, s1),
        "cb1": jax.random.uniform(k[1], (1, out_ch), jnp.float32, -s1, s1),
        "g1": 1.0 + 0.1 * jax.random.normal(k[2], (1, out_ch), jnp.float32),
        "b1": 0.1 * jax.random.normal(k[3], (1, out_ch), jnp.float32),
        "w2": jax.random.uniform(k[4], (3, 3, out_ch, out_ch), jnp.float32, -s2, s2),
        "cb2": jax.random.uniform(k[5], (1, out_ch), jnp.float32, -s2, s2),
        "g2": 1.0 + 0.1 * jax.random.normal(k[6], (1, out_ch), jnp.float32),
        "b2": 0.1 * jax.random.normal(k[7], (1, out_ch), jnp.float32),
    }


if __name__ == "__main__":
    key = jax.random.PRNGKey(0)
    kx, kp = jax.random.split(key)

    N, Cin, Cout, H, W = 2, 4, 8, 16, 16
    x = jax.random.normal(kx, (N, Cin, H, W), jnp.float32)
    params = init_params(kp, Cin, Cout)

    out = jax.block_until_ready(double_conv(x, params))
    ref = jax.block_until_ready(ref_double_conv(x, params))

    assert out.shape == (N, Cout, H, W)
    max_err = float(jnp.max(jnp.abs(out - ref)))
    assert jnp.allclose(out, ref, atol=1e-4, rtol=1e-4), max_err

    print("KERNEL_OK")
</pallas_src>

<mosaic_0001>
module attributes {stable_mosaic.version = 11 : i64} {
  func.func @double_conv_kernel(%arg0: memref<2x18x18x128xf32, #tpu.memory_space<vmem>>, %arg1: memref<1152x128xf32, #tpu.memory_space<vmem>>, %arg2: memref<1x128xf32, #tpu.memory_space<vmem>>, %arg3: memref<1x128xf32, #tpu.memory_space<vmem>>, %arg4: memref<1152x128xf32, #tpu.memory_space<vmem>>, %arg5: memref<1x128xf32, #tpu.memory_space<vmem>>, %arg6: memref<1x128xf32, #tpu.memory_space<vmem>>, %arg7: memref<2x16x16x128xf32, #tpu.memory_space<vmem>>, %arg8: memref<512x1152xf32, #tpu.memory_space<vmem>>, %arg9: memref<2x18x18x128xf32, #tpu.memory_space<vmem>>) attributes {dimension_semantics = [], scalar_prefetch = 0 : i64, scratch_operands = 2 : i64, tpu.core_type = #tpu.core_type<tc>} {
    %c0 = arith.constant 0 : index
    %c0_0 = arith.constant 0 : index
    %c0_1 = arith.constant 0 : index
    %c0_2 = arith.constant 0 : index
    %0 = vector.load %arg0[%c0, %c0_0, %c0_1, %c0_2] : memref<2x18x18x128xf32, #tpu.memory_space<vmem>>, vector<2x16x16x128xf32>
    %1 = vector.shape_cast %0 : vector<2x16x16x128xf32> to vector<512x128xf32>
    %c0_3 = arith.constant 0 : index
    %c0_4 = arith.constant 0 : index
    %2 = vector.load %arg8[%c0_3, %c0_4] : memref<512x1152xf32, #tpu.memory_space<vmem>>, vector<512x128xf32>
    tpu.vector_store %arg8[%c0_3, %c0_4], %1 {strides = array<i32>} : memref<512x1152xf32, #tpu.memory_space<vmem>>, vector<512x128xf32>,
    %c0_5 = arith.constant 0 : index
    %c0_6 = arith.constant 0 : index
    %c1 = arith.constant 1 : index
    %c0_7 = arith.constant 0 : index
    %3 = vector.load %arg0[%c0_5, %c0_6, %c1, %c0_7] : memref<2x18x18x128xf32, #tpu.memory_space<vmem>>, vector<2x16x16x128xf32>
    %4 = vector.shape_cast %3 : vector<2x16x16x128xf32> to vector<512x128xf32>
    %c0_8 = arith.constant 0 : index
    %c128 = arith.constant 128 : index
    %5 = vector.load %arg8[%c0_8, %c128] : memref<512x1152xf32, #tpu.memory_space<vmem>>, vector<512x128xf32>
    tpu.vector_store %arg8[%c0_8, %c128], %4 {strides = array<i32>} : memref<512x1152xf32, #tpu.memory_space<vmem>>, vector<512x128xf32>,
    %c0_9 = arith.constant 0 : index
    %c0_10 = arith.constant 0 : index
    %c2 = arith.constant 2 : index
    %c0_11 = arith.constant 0 : index
    %6 = vector.load %arg0[%c0_9, %c0_10, %c2, %c0_11] : memref<2x18x18x128xf32, #tpu.memory_space<vmem>>, vector<2x16x16x128xf32>
    %7 = vector.shape_cast %6 : vector<2x16x16x128xf32> to vector<512x128xf32>
    %c0_12 = arith.constant 0 : index
    %c256 = arith.constant 256 : index
    %8 = vector.load %arg8[%c0_12, %c256] : memref<512x1152xf32, #tpu.memory_space<vmem>>, vector<512x128xf32>
    tpu.vector_store %arg8[%c0_12, %c256], %7 {strides = array<i32>} : memref<512x1152xf32, #tpu.memory_space<vmem>>, vector<512x128xf32>,
    %c0_13 = arith.constant 0 : index
    %c1_14 = arith.constant 1 : index
    %c0_15 = arith.constant 0 : index
    %c0_16 = arith.constant 0 : index
    %9 = vector.load %arg0[%c0_13, %c1_14, %c0_15, %c0_16] : memref<2x18x18x128xf32, #tpu.memory_space<vmem>>, vector<2x16x16x128xf32>
    %10 = vector.shape_cast %9 : vector<2x16x16x128xf32> to vector<512x128xf32>
    %c0_17 = arith.constant 0 : index
    %c384 = arith.constant 384 : index
    %11 = vector.load %arg8[%c0_17, %c384] : memref<512x1152xf32, #tpu.memory_space<vmem>>, vector<512x128xf32>
    tpu.vector_store %arg8[%c0_17, %c384], %10 {strides = array<i32>} : memref<512x1152xf32, #tpu.memory_space<vmem>>, vector<512x128xf32>,
    %c0_18 = arith.constant 0 : index
    %c1_19 = arith.constant 1 : index
    %c1_20 = arith.constant 1 : index
    %c0_21 = arith.constant 0 : index
    %12 = vector.load %arg0[%c0_18, %c1_19, %c1_20, %c0_21] : memref<2x18x18x128xf32, #tpu.memory_space<vmem>>, vector<2x16x16x128xf32>
    %13 = vector.shape_cast %12 : vector<2x16x16x128xf32> to vector<512x128xf32>
    %c0_22 = arith.constant 0 : index
    %c512 = arith.constant 512 : index
    %14 = vector.load %arg8[%c0_22, %c512] : memref<512x1152xf32, #tpu.memory_space<vmem>>, vector<512x128xf32>
    tpu.vector_store %arg8[%c0_22, %c512], %13 {strides = array<i32>} : memref<512x1152xf32, #tpu.memory_space<vmem>>, vector<512x128xf32>,
    %c0_23 = arith.constant 0 : index
    %c1_24 = arith.constant 1 : index
    %c2_25 = arith.constant 2 : index
    %c0_26 = arith.constant 0 : index
    %15 = vector.load %arg0[%c0_23, %c1_24, %c2_25, %c0_26] : memref<2x18x18x128xf32, #tpu.memory_space<vmem>>, vector<2x16x16x128xf32>
    %16 = vector.shape_cast %15 : vector<2x16x16x128xf32> to vector<512x128xf32>
    %c0_27 = arith.constant 0 : index
    %c640 = arith.constant 640 : index
    %17 = vector.load %arg8[%c0_27, %c640] : memref<512x1152xf32, #tpu.memory_space<vmem>>, vector<512x128xf32>
    tpu.vector_store %arg8[%c0_27, %c640], %16 {strides = array<i32>} : memref<512x1152xf32, #tpu.memory_space<vmem>>, vector<512x128xf32>,
    %c0_28 = arith.constant 0 : index
    %c2_29 = arith.constant 2 : index
    %c0_30 = arith.constant 0 : index
    %c0_31 = arith.constant 0 : index
    %18 = vector.load %arg0[%c0_28, %c2_29, %c0_30, %c0_31] : memref<2x18x18x128xf32, #tpu.memory_space<vmem>>, vector<2x16x16x128xf32>
    %19 = vector.shape_cast %18 : vector<2x16x16x128xf32> to vector<512x128xf32>
    %c0_32 = arith.constant 0 : index
    %c768 = arith.constant 768 : index
    %20 = vector.load %arg8[%c0_32, %c768] : memref<512x1152xf32, #tpu.memory_space<vmem>>, vector<512x128xf32>
    tpu.vector_store %arg8[%c0_32, %c768], %19 {strides = array<i32>} : memref<512x1152xf32, #tpu.memory_space<vmem>>, vector<512x128xf32>,
    %c0_33 = arith.constant 0 : index
    %c2_34 = arith.constant 2 : index
    %c1_35 = arith.constant 1 : index
    %c0_36 = arith.constant 0 : index
    %21 = vector.load %arg0[%c0_33, %c2_34, %c1_35, %c0_36] : memref<2x18x18x128xf32, #tpu.memory_space<vmem>>, vector<2x16x16x128xf32>
    %22 = vector.shape_cast %21 : vector<2x16x16x128xf32> to vector<512x128xf32>
    %c0_37 = arith.constant 0 : index
    %c896 = arith.constant 896 : index
    %23 = vector.load %arg8[%c0_37, %c896] : memref<512x1152xf32, #tpu.memory_space<vmem>>, vector<512x128xf32>
    tpu.vector_store %arg8[%c0_37, %c896], %22 {strides = array<i32>} : memref<512x1152xf32, #tpu.memory_space<vmem>>, vector<512x128xf32>,
    %c0_38 = arith.constant 0 : index
    %c2_39 = arith.constant 2 : index
    %c2_40 = arith.constant 2 : index
    %c0_41 = arith.constant 0 : index
    %24 = vector.load %arg0[%c0_38, %c2_39, %c2_40, %c0_41] : memref<2x18x18x128xf32, #tpu.memory_space<vmem>>, vector<2x16x16x128xf32>
    %25 = vector.shape_cast %24 : vector<2x16x16x128xf32> to vector<512x128xf32>
    %c0_42 = arith.constant 0 : index
    %c1024 = arith.constant 1024 : index
    %26 = vector.load %arg8[%c0_42, %c1024] : memref<512x1152xf32, #tpu.memory_space<vmem>>, vector<512x128xf32>
    tpu.vector_store %arg8[%c0_42, %c1024], %25 {strides = array<i32>} : memref<512x1152xf32, #tpu.memory_space<vmem>>, vector<512x128xf32>,
    %c0_43 = arith.constant 0 : index
    %c0_44 = arith.constant 0 : index
    %27 = vector.load %arg8[%c0_43, %c0_44] : memref<512x1152xf32, #tpu.memory_space<vmem>>, vector<512x1152xf32>
    %c0_45 = arith.constant 0 : index
    %c0_46 = arith.constant 0 : index
    %28 = vector.load %arg1[%c0_45, %c0_46] : memref<1152x128xf32, #tpu.memory_space<vmem>>, vector<1152x128xf32>
    %cst = arith.constant dense<0.000000e+00> : vector<512x128xf32>
    %29 = tpu.matmul %27, %28, %cst {dimension_numbers = #tpu.dot_dimension_numbers<[1], [0], [0], [1], [0, 0, 1, 1], [], []>} : vector<512x1152xf32>, vector<1152x128xf32>, vector<512x128xf32> -> vector<512x128xf32>
    %cst_47 = arith.constant dense<0.000000e+00> : vector<128xf32>
    %30 = vector.multi_reduction <add>, %29, %cst_47 [0] : vector<512x128xf32> to vector<128xf32>
    %31 = vector.shape_cast %30 : vector<128xf32> to vector<1x128xf32>
    %cst_48 = arith.constant 0.001953125 : f32
    %32 = vector.broadcast %cst_48 : f32 to vector<1x128xf32>
    %33 = arith.mulf %31, %32 : vector<1x128xf32>
    %34 = arith.mulf %29, %29 : vector<512x128xf32>
    %cst_49 = arith.constant dense<0.000000e+00> : vector<128xf32>
    %35 = vector.multi_reduction <add>, %34, %cst_49 [0] : vector<512x128xf32> to vector<128xf32>
    %36 = vector.shape_cast %35 : vector<128xf32> to vector<1x128xf32>
    %cst_50 = arith.constant 0.001953125 : f32
    %37 = vector.broadcast %cst_50 : f32 to vector<1x128xf32>
    %38 = arith.mulf %36, %37 : vector<1x128xf32>
    %39 = arith.mulf %33, %33 : vector<1x128xf32>
    %40 = arith.subf %38, %39 : vector<1x128xf32>
    %cst_51 = arith.constant 0.000000e+00 : f32
    %41 = vector.broadcast %cst_51 : f32 to vector<1x128xf32>
    %42 = arith.maximumf %40, %41 : vector<1x128xf32>
    %c0_52 = arith.constant 0 : index
    %c0_53 = arith.constant 0 : index
    %43 = vector.load %arg2[%c0_52, %c0_53] : memref<1x128xf32, #tpu.memory_space<vmem>>, vector<1x128xf32>
    %cst_54 = arith.constant 9.99999974E-6 : f32
    %44 = vector.broadcast %cst_54 : f32 to vector<1x128xf32>
    %45 = arith.addf %42, %44 : vector<1x128xf32>
    %46 = math.rsqrt %45 : vector<1x128xf32>
    %47 = arith.mulf %43, %46 : vector<1x128xf32>
    %c0_55 = arith.constant 0 : index
    %c0_56 = arith.constant 0 : index
    %48 = vector.load %arg3[%c0_55, %c0_56] : memref<1x128xf32, #tpu.memory_space<vmem>>, vector<1x128xf32>
    %49 = arith.mulf %33, %47 : vector<1x128xf32>
    %50 = arith.subf %48, %49 : vector<1x128xf32>
    %51 = vector.broadcast %47 : vector<1x128xf32> to vector<512x128xf32>
    %52 = arith.mulf %29, %51 : vector<512x128xf32>
    %53 = vector.broadcast %50 : vector<1x128xf32> to vector<512x128xf32>
    %54 = arith.addf %52, %53 : vector<512x128xf32>
    %cst_57 = arith.constant 0.000000e+00 : f32
    %55 = vector.broadcast %cst_57 : f32 to vector<512x128xf32>
    %56 = arith.maximumf %54, %55 : vector<512x128xf32>
    %57 = vector.shape_cast %56 : vector<512x128xf32> to vector<2x16x16x128xf32>
    %c0_58 = arith.constant 0 : index
    %c1_59 = arith.constant 1 : index
    %c1_60 = arith.constant 1 : index
    %c0_61 = arith.constant 0 : index
    %58 = vector.load %arg9[%c0_58, %c1_59, %c1_60, %c0_61] : memref<2x18x18x128xf32, #tpu.memory_space<vmem>>, vector<2x16x16x128xf32>
    tpu.vector_store %arg9[%c0_58, %c1_59, %c1_60, %c0_61], %57 {strides = array<i32>} : memref<2x18x18x128xf32, #tpu.memory_space<vmem>>, vector<2x16x16x128xf32>,
    %cst_62 = arith.constant 0.000000e+00 : f32
    %59 = vector.broadcast %cst_62 : f32 to vector<2x1x18x128xf32>
    %c0_63 = arith.constant 0 : index
    %c0_64 = arith.constant 0 : index
    %c0_65 = arith.constant 0 : index
    %c0_66 = arith.constant 0 : index
    %60 = vector.load %arg9[%c0_63, %c0_64, %c0_65, %c0_66] : memref<2x18x18x128xf32, #tpu.memory_space<vmem>>, vector<2x1x18x128xf32>
    tpu.vector_store %arg9[%c0_63, %c0_64, %c0_65, %c0_66], %59 {strides = array<i32>} : memref<2x18x18x128xf32, #tpu.memory_space<vmem>>, vector<2x1x18x128xf32>,
    %c0_67 = arith.constant 0 : index
    %c17 = arith.constant 17 : index
    %c0_68 = arith.constant 0 : index
    %c0_69 = arith.constant 0 : index
    %61 = vector.load %arg9[%c0_67, %c17, %c0_68, %c0_69] : memref<2x18x18x128xf32, #tpu.memory_space<vmem>>, vector<2x1x18x128xf32>
    tpu.vector_store %arg9[%c0_67, %c17, %c0_68, %c0_69], %59 {strides = array<i32>} : memref<2x18x18x128xf32, #tpu.memory_space<vmem>>, vector<2x1x18x128xf32>,
    %cst_70 = arith.constant 0.000000e+00 : f32
    %62 = vector.broadcast %cst_70 : f32 to vector<2x16x1x128xf32>
    %c0_71 = arith.constant 0 : index
    %c1_72 = arith.constant 1 : index
    %c0_73 = arith.constant 0 : index
    %c0_74 = arith.constant 0 : index
    %63 = vector.load %arg9[%c0_71, %c1_72, %c0_73, %c0_74] : memref<2x18x18x128xf32, #tpu.memory_space<vmem>>, vector<2x16x1x128xf32>
    tpu.vector_store %arg9[%c0_71, %c1_72, %c0_73, %c0_74], %62 {strides = array<i32>} : memref<2x18x18x128xf32, #tpu.memory_space<vmem>>, vector<2x16x1x128xf32>,
    %c0_75 = arith.constant 0 : index
    %c1_76 = arith.constant 1 : index
    %c17_77 = arith.constant 17 : index
    %c0_78 = arith.constant 0 : index
    %64 = vector.load %arg9[%c0_75, %c1_76, %c17_77, %c0_78] : memref<2x18x18x128xf32, #tpu.memory_space<vmem>>, vector<2x16x1x128xf32>
    tpu.vector_store %arg9[%c0_75, %c1_76, %c17_77, %c0_78], %62 {strides = array<i32>} : memref<2x18x18x128xf32, #tpu.memory_space<vmem>>, vector<2x16x1x128xf32>,
    %c0_79 = arith.constant 0 : index
    %c0_80 = arith.constant 0 : index
    %c0_81 = arith.constant 0 : index
    %c0_82 = arith.constant 0 : index
    %65 = vector.load %arg9[%c0_79, %c0_80, %c0_81, %c0_82] : memref<2x18x18x128xf32, #tpu.memory_space<vmem>>, vector<2x16x16x128xf32>
    %66 = vector.shape_cast %65 : vector<2x16x16x128xf32> to vector<512x128xf32>
    %c0_83 = arith.constant 0 : index
    %c0_84 = arith.constant 0 : index
    %67 = vector.load %arg8[%c0_83, %c0_84] : memref<512x1152xf32, #tpu.memory_space<vmem>>, vector<512x128xf32>
    tpu.vector_store %arg8[%c0_83, %c0_84], %66 {strides = array<i32>} : memref<512x1152xf32, #tpu.memory_space<vmem>>, vector<512x128xf32>,
    %c0_85 = arith.constant 0 : index
    %c0_86 = arith.constant 0 : index
    %c1_87 = arith.constant 1 : index
    %c0_88 = arith.constant 0 : index
    %68 = vector.load %arg9[%c0_85, %c0_86, %c1_87, %c0_88] : memref<2x18x18x128xf32, #tpu.memory_space<vmem>>, vector<2x16x16x128xf32>
    %69 = vector.shape_cast %68 : vector<2x16x16x128xf32> to vector<512x128xf32>
    %c0_89 = arith.constant 0 : index
    %c128_90 = arith.constant 128 : index
    %70 = vector.load %arg8[%c0_89, %c128_90] : memref<512x1152xf32, #tpu.memory_space<vmem>>, vector<512x128xf32>
    tpu.vector_store %arg8[%c0_89, %c128_90], %69 {strides = array<i32>} : memref<512x1152xf32, #tpu.memory_space<vmem>>, vector<512x128xf32>,
    %c0_91 = arith.constant 0 : index
    %c0_92 = arith.constant 0 : index
    %c2_93 = arith.constant 2 : index
    %c0_94 = arith.constant 0 : index
    %71 = vector.load %arg9[%c0_91, %c0_92, %c2_93, %c0_94] : memref<2x18x18x128xf32, #tpu.memory_space<vmem>>, vector<2x16x16x128xf32>
    %72 = vector.shape_cast %71 : vector<2x16x16x128xf32> to vector<512x128xf32>
    %c0_95 = arith.constant 0 : index
    %c256_96 = arith.constant 256 : index
    %73 = vector.load %arg8[%c0_95, %c256_96] : memref<512x1152xf32, #tpu.memory_space<vmem>>, vector<512x128xf32>
    tpu.vector_store %arg8[%c0_95, %c256_96], %72 {strides = array<i32>} : memref<512x1152xf32, #tpu.memory_space<vmem>>, vector<512x128xf32>,
    %c0_97 = arith.constant 0 : index
    %c1_98 = arith.constant 1 : index
    %c0_99 = arith.constant 0 : index
    %c0_100 = arith.constant 0 : index
    %74 = vector.load %arg9[%c0_97, %c1_98, %c0_99, %c0_100] : memref<2x18x18x128xf32, #tpu.memory_space<vmem>>, vector<2x16x16x128xf32>
    %75 = vector.shape_cast %74 : vector<2x16x16x128xf32> to vector<512x128xf32>
    %c0_101 = arith.constant 0 : index
    %c384_102 = arith.constant 384 : index
    %76 = vector.load %arg8[%c0_101, %c384_102] : memref<512x1152xf32, #tpu.memory_space<vmem>>, vector<512x128xf32>
    tpu.vector_store %arg8[%c0_101, %c384_102], %75 {strides = array<i32>} : memref<512x1152xf32, #tpu.memory_space<vmem>>, vector<512x128xf32>,
    %c0_103 = arith.constant 0 : index
    %c1_104 = arith.constant 1 : index
    %c1_105 = arith.constant 1 : index
    %c0_106 = arith.constant 0 : index
    %77 = vector.load %arg9[%c0_103, %c1_104, %c1_105, %c0_106] : memref<2x18x18x128xf32, #tpu.memory_space<vmem>>, vector<2x16x16x128xf32>
    %78 = vector.shape_cast %77 : vector<2x16x16x128xf32> to vector<512x128xf32>
    %c0_107 = arith.constant 0 : index
    %c512_108 = arith.constant 512 : index
    %79 = vector.load %arg8[%c0_107, %c512_108] : memref<512x1152xf32, #tpu.memory_space<vmem>>, vector<512x128xf32>
    tpu.vector_store %arg8[%c0_107, %c512_108], %78 {strides = array<i32>} : memref<512x1152xf32, #tpu.memory_space<vmem>>, vector<512x128xf32>,
    %c0_109 = arith.constant 0 : index
    %c1_110 = arith.constant 1 : index
    %c2_111 = arith.constant 2 : index
    %c0_112 = arith.constant 0 : index
    %80 = vector.load %arg9[%c0_109, %c1_110, %c2_111, %c0_112] : memref<2x18x18x128xf32, #tpu.memory_space<vmem>>, vector<2x16x16x128xf32>
    %81 = vector.shape_cast %80 : vector<2x16x16x128xf32> to vector<512x128xf32>
    %c0_113 = arith.constant 0 : index
    %c640_114 = arith.constant 640 : index
    %82 = vector.load %arg8[%c0_113, %c640_114] : memref<512x1152xf32, #tpu.memory_space<vmem>>, vector<512x128xf32>
    tpu.vector_store %arg8[%c0_113, %c640_114], %81 {strides = array<i32>} : memref<512x1152xf32, #tpu.memory_space<vmem>>, vector<512x128xf32>,
    %c0_115 = arith.constant 0 : index
    %c2_116 = arith.constant 2 : index
    %c0_117 = arith.constant 0 : index
    %c0_118 = arith.constant 0 : index
    %83 = vector.load %arg9[%c0_115, %c2_116, %c0_117, %c0_118] : memref<2x18x18x128xf32, #tpu.memory_space<vmem>>, vector<2x16x16x128xf32>
    %84 = vector.shape_cast %83 : vector<2x16x16x128xf32> to vector<512x128xf32>
    %c0_119 = arith.constant 0 : index
    %c768_120 = arith.constant 768 : index
    %85 = vector.load %arg8[%c0_119, %c768_120] : memref<512x1152xf32, #tpu.memory_space<vmem>>, vector<512x128xf32>
    tpu.vector_store %arg8[%c0_119, %c768_120], %84 {strides = array<i32>} : memref<512x1152xf32, #tpu.memory_space<vmem>>, vector<512x128xf32>,
    %c0_121 = arith.constant 0 : index
    %c2_122 = arith.constant 2 : index
    %c1_123 = arith.constant 1 : index
    %c0_124 = arith.constant 0 : index
    %86 = vector.load %arg9[%c0_121, %c2_122, %c1_123, %c0_124] : memref<2x18x18x128xf32, #tpu.memory_space<vmem>>, vector<2x16x16x128xf32>
    %87 = vector.shape_cast %86 : vector<2x16x16x128xf32> to vector<512x128xf32>
    %c0_125 = arith.constant 0 : index
    %c896_126 = arith.constant 896 : index
    %88 = vector.load %arg8[%c0_125, %c896_126] : memref<512x1152xf32, #tpu.memory_space<vmem>>, vector<512x128xf32>
    tpu.vector_store %arg8[%c0_125, %c896_126], %87 {strides = array<i32>} : memref<512x1152xf32, #tpu.memory_space<vmem>>, vector<512x128xf32>,
    %c0_127 = arith.constant 0 : index
    %c2_128 = arith.constant 2 : index
    %c2_129 = arith.constant 2 : index
    %c0_130 = arith.constant 0 : index
    %89 = vector.load %arg9[%c0_127, %c2_128, %c2_129, %c0_130] : memref<2x18x18x128xf32, #tpu.memory_space<vmem>>, vector<2x16x16x128xf32>
    %90 = vector.shape_cast %89 : vector<2x16x16x128xf32> to vector<512x128xf32>
    %c0_131 = arith.constant 0 : index
    %c1024_132 = arith.constant 1024 : index
    %91 = vector.load %arg8[%c0_131, %c1024_132] : memref<512x1152xf32, #tpu.memory_space<vmem>>, vector<512x128xf32>
    tpu.vector_store %arg8[%c0_131, %c1024_132], %90 {strides = array<i32>} : memref<512x1152xf32, #tpu.memory_space<vmem>>, vector<512x128xf32>,
    %c0_133 = arith.constant 0 : index
    %c0_134 = arith.constant 0 : index
    %92 = vector.load %arg8[%c0_133, %c0_134] : memref<512x1152xf32, #tpu.memory_space<vmem>>, vector<512x1152xf32>
    %c0_135 = arith.constant 0 : index
    %c0_136 = arith.constant 0 : index
    %93 = vector.load %arg4[%c0_135, %c0_136] : memref<1152x128xf32, #tpu.memory_space<vmem>>, vector<1152x128xf32>
    %cst_137 = arith.constant dense<0.000000e+00> : vector<512x128xf32>
    %94 = tpu.matmul %92, %93, %cst_137 {dimension_numbers = #tpu.dot_dimension_numbers<[1], [0], [0], [1], [0, 0, 1, 1], [], []>} : vector<512x1152xf32>, vector<1152x128xf32>, vector<512x128xf32> -> vector<512x128xf32>
    %cst_138 = arith.constant dense<0.000000e+00> : vector<128xf32>
    %95 = vector.multi_reduction <add>, %94, %cst_138 [0] : vector<512x128xf32> to vector<128xf32>
    %96 = vector.shape_cast %95 : vector<128xf32> to vector<1x128xf32>
    %cst_139 = arith.constant 0.001953125 : f32
    %97 = vector.broadcast %cst_139 : f32 to vector<1x128xf32>
    %98 = arith.mulf %96, %97 : vector<1x128xf32>
    %99 = arith.mulf %94, %94 : vector<512x128xf32>
    %cst_140 = arith.constant dense<0.000000e+00> : vector<128xf32>
    %100 = vector.multi_reduction <add>, %99, %cst_140 [0] : vector<512x128xf32> to vector<128xf32>
    %101 = vector.shape_cast %100 : vector<128xf32> to vector<1x128xf32>
    %cst_141 = arith.constant 0.001953125 : f32
    %102 = vector.broadcast %cst_141 : f32 to vector<1x128xf32>
    %103 = arith.mulf %101, %102 : vector<1x128xf32>
    %104 = arith.mulf %98, %98 : vector<1x128xf32>
    %105 = arith.subf %103, %104 : vector<1x128xf32>
    %cst_142 = arith.constant 0.000000e+00 : f32
    %106 = vector.broadcast %cst_142 : f32 to vector<1x128xf32>
    %107 = arith.maximumf %105, %106 : vector<1x128xf32>
    %c0_143 = arith.constant 0 : index
    %c0_144 = arith.constant 0 : index
    %108 = vector.load %arg5[%c0_143, %c0_144] : memref<1x128xf32, #tpu.memory_space<vmem>>, vector<1x128xf32>
    %cst_145 = arith.constant 9.99999974E-6 : f32
    %109 = vector.broadcast %cst_145 : f32 to vector<1x128xf32>
    %110 = arith.addf %107, %109 : vector<1x128xf32>
    %111 = math.rsqrt %110 : vector<1x128xf32>
    %112 = arith.mulf %108, %111 : vector<1x128xf32>
    %c0_146 = arith.constant 0 : index
    %c0_147 = arith.constant 0 : index
    %113 = vector.load %arg6[%c0_146, %c0_147] : memref<1x128xf32, #tpu.memory_space<vmem>>, vector<1x128xf32>
    %114 = arith.mulf %98, %112 : vector<1x128xf32>
    %115 = arith.subf %113, %114 : vector<1x128xf32>
    %116 = vector.broadcast %112 : vector<1x128xf32> to vector<512x128xf32>
    %117 = arith.mulf %94, %116 : vector<512x128xf32>
    %118 = vector.broadcast %115 : vector<1x128xf32> to vector<512x128xf32>
    %119 = arith.addf %117, %118 : vector<512x128xf32>
    %cst_148 = arith.constant 0.000000e+00 : f32
    %120 = vector.broadcast %cst_148 : f32 to vector<512x128xf32>
    %121 = arith.maximumf %119, %120 : vector<512x128xf32>
    %122 = vector.shape_cast %121 : vector<512x128xf32> to vector<2x16x16x128xf32>
    %c0_149 = arith.constant 0 : index
    %c0_150 = arith.constant 0 : index
    %c0_151 = arith.constant 0 : index
    %c0_152 = arith.constant 0 : index
    %123 = vector.load %arg7[%c0_149, %c0_150, %c0_151, %c0_152] : memref<2x16x16x128xf32, #tpu.memory_space<vmem>>, vector<2x16x16x128xf32>
    tpu.vector_store %arg7[%c0_149, %c0_150, %c0_151, %c0_152], %122 {strides = array<i32>} : memref<2x16x16x128xf32, #tpu.memory_space<vmem>>, vector<2x16x16x128xf32>,
    return
  }
}

</mosaic_0001>

<bundles_post_ra>
// kernel: tpu_custom_call.1
= control target key start
LH: loop header
LB: loop body
LE: loop exit
PB: predicated region body
PF: predicated region fallthrough
CT: control target
= control target key end

     0   :  { %12 = vsyncpa [#allocation5], 0  ;;  %s16541_s0 = inlined_call_operand.vmem [shape: f32[2,18,18,128], index: 0, kind: input, shape index: {}]   ;;  %s16542_s1 = inlined_call_operand.vmem [shape: f32[1152,128], index: 1, kind: input, shape index: {}]   ;;  %s16543_s2 = inlined_call_operand.vmem [shape: f32[1,128], index: 2, kind: input, shape index: {}]   ;;  %s16544_s3 = inlined_call_operand.vmem [shape: f32[1,128], index: 3, kind: input, shape index: {}]   ;;  %s16545_s4 = inlined_call_operand.hbm [shape: f32[1152,128], index: 4, kind: input, shape index: {}]   ;;  %s16546_s5 = inlined_call_operand.vmem [shape: f32[1,128], index: 5, kind: input, shape index: {}]   ;;  %s16547_s6 = inlined_call_operand.vmem [shape: f32[1,128], index: 6, kind: input, shape index: {}]   ;;  %s16548_s7 = inlined_call_operand.hbm [shape: f32[2,16,16,128], index: 7, kind: output, shape index: {}]  }
   0x1   :  { %13 = vsyncpa [#allocation6], 0  ;;  %s10789_s24 = smov [#allocation4]   ;;  %s10741_s28 = scalar_lea.hbm %s16545_s4, 18432 }
   0x2   :  { %s27_s25 = sshll.u32 %s10789_s24, 4  ;;  %p10742_p0 = scmp.ne.s32.totalorder %s16545_s4, %s10741_s28  ;;  %s28_s25 = int_to_ptr.vmem [resolvable:$true] %s27_s25 }
   0x3   :  { %p10745_p1 = scmp.lt.u32.totalorder %s10741_s28, %s16545_s4 }
   0x5   :  { %p10747_p2 = pnand %p10745_p1, %p10742_p0 }
   0x7   :  { %10750 = shalt.err (!%p10747_p2)
}
   0x8   :  { %s10751_s10 = scalar_lea.vmem %s28_s25, 18432  ;;  %p10756_p4 = scmp.lt.s32.totalorder %s28_s25, %s28_s25 }
   0x9   :  { %p10752_p3 = scmp.ne.s32.totalorder %s28_s25, %s10751_s10  ;;  %p10757_p5 = scmp.lt.s32.totalorder %s10751_s10, %s10751_s10 }
   0xb   :  { %p10758_p6 = por %p10757_p5, %p10756_p4 }
   0xd   :  { %p10759_p7 = pnand %p10758_p6, %p10752_p3 }
   0xf   :  { %10762 = shalt.err (!%p10759_p7)
}
  0x10   :  { %s10790_s11 = smov 128   ;;  %s10791_s12 = smov 8  }
  0x11   :  { %33 = dma.hbm_to_vmem [thread:$0]  %s16545_s4, 18432, %s28_s25, [#allocation5], %s10790_s11, %s10790_s11, %s10791_s12  }
  0x12   :  { %10785 = dma.done.wait [#allocation5], 18432  }
  0x13   :  { %10786 = vsyncadd [#allocation5], 4294948864  ;;  %v16549_v0 = vmov 0.0|0.0   ;;  %v1771_v1 = vld [vmem:[%s16542_s1] sm:$0xff]  ;;  %v1772_v2 = vld [vmem:[%s16542_s1 + $0x8] sm:$0xff] }
  0x14   :  { %9497 = vmatprep.subr.bf16.mxu0 %v16549_v0  ;;  %v1773_v3 = vld [vmem:[%s16542_s1 + $0x10] sm:$0xff]  ;;  %v9498_v4 = vpack.c.bf16 %v1772_v2, %v1771_v1  ;;  %v1774_v5 = vld [vmem:[%s16542_s1 + $0x18] sm:$0xff]  ;;  %v1775_v7 = vld [vmem:[%s16542_s1 + $0x20] sm:$0xff] }
  0x15   :  { %v9501_v6 = vpack.c.bf16 %v1774_v5, %v1773_v3  ;;  %v1776_v8 = vld [vmem:[%s16542_s1 + $0x28] sm:$0xff]  ;;  %v1777_v10 = vld [vmem:[%s16542_s1 + $0x30] sm:$0xff]  ;;  %v1778_v11 = vld [vmem:[%s16542_s1 + $0x38] sm:$0xff] }
  0x16   :  { %9499 = vmatpush1.bf16.msra.mxu0 %v9498_v4  ;;  %v9504_v9 = vpack.c.bf16 %v1776_v8, %v1775_v7  ;;  %v169_v12 = vld [vmem:[%s16541_s0 + $0x1] sm:$0xff]  ;;  %v9507_v13 = vpack.c.bf16 %v1778_v11, %v1777_v10  ;;  %v1781_v17 = vld [vmem:[%s16542_s1 + $0x50] sm:$0xff]  ;;  %v1782_v18 = vld [vmem:[%s16542_s1 + $0x58] sm:$0xff] }
  0x17   :  { %9500 = vmatprep.subr.bf16.mxu0 %v16549_v0  ;;  %1979 = vmatprep.mubr.f32.mxu0 %v169_v12  ;;  %v1779_v14 = vld [vmem:[%s16542_s1 + $0x40] sm:$0xff]  ;;  %v1780_v15 = vld [vmem:[%s16542_s1 + $0x48] sm:$0xff]  ;;  %v9513_v19 = vpack.c.bf16 %v1782_v18, %v1781_v17  ;;  %v1785_v23 = vld [vmem:[%s16542_s1 + $0x70] sm:$0xff] }
  0x18   :  { %v9510_v16 = vpack.c.bf16 %v1780_v15, %v1779_v14  ;;  %v1783_v20 = vld [vmem:[%s16542_s1 + $0x60] sm:$0xff]  ;;  %v1784_v21 = vld [vmem:[%s16542_s1 + $0x68] sm:$0xff]  ;;  %v1786_v24 = vld [vmem:[%s16542_s1 + $0x78] sm:$0xff] }
  0x19   :  { %v9516_v22 = vpack.c.bf16 %v1784_v21, %v1783_v20  ;;  %v9519_v25 = vpack.c.bf16 %v1786_v24, %v1785_v23  ;;  %v1787_v26 = vld [vmem:[%s16542_s1 + $0x80] sm:$0xff]  ;;  %v1788_v27 = vld [vmem:[%s16542_s1 + $0x88] sm:$0xff]  ;;  %v1789_v29 = vld [vmem:[%s16542_s1 + $0x90] sm:$0xff] }
  0x1a   :  { %9502 = vmatpush1.bf16.msra.mxu0 %v9501_v6  ;;  %v9522_v28 = vpack.c.bf16 %v1788_v27, %v1787_v26  ;;  %v1790_v30 = vld [vmem:[%s16542_s1 + $0x98] sm:$0xff]  ;;  %v1791_v32 = vld [vmem:[%s16542_s1 + $0xa0] sm:$0xff]  ;;  %v1792_v33 = vld [vmem:[%s16542_s1 + $0xa8] sm:$0xff] }
  0x1b   :  { %9503 = vmatprep.subr.bf16.mxu0 %v16549_v0  ;;  %v9525_v31 = vpack.c.bf16 %v1790_v30, %v1789_v29  ;;  %v9528_v34 = vpack.c.bf16 %v1792_v33, %v1791_v32  ;;  %v1793_v35 = vld [vmem:[%s16542_s1 + $0xb0] sm:$0xff]  ;;  %v1794_v36 = vld [vmem:[%s16542_s1 + $0xb8] sm:$0xff]  ;;  %v1795_v38 = vld [vmem:[%s16542_s1 + $0xc0] sm:$0xff] }
  0x1c   :  { %v9531_v37 = vpack.c.bf16 %v1794_v36, %v1793_v35  ;;  %v1796_v39 = vld [vmem:[%s16542_s1 + $0xc8] sm:$0xff]  ;;  %v1797_v41 = vld [vmem:[%s16542_s1 + $0xd0] sm:$0xff]  ;;  %v1798_v42 = vld [vmem:[%s16542_s1 + $0xd8] sm:$0xff] }
  0x1d   :  { %v9534_v40 = vpack.c.bf16 %v1796_v39, %v1795_v38  ;;  %v9537_v43 = vpack.c.bf16 %v1798_v42, %v1797_v41  ;;  %v1799_v44 = vld [vmem:[%s16542_s1 + $0xe0] sm:$0xff]  ;;  %v1800_v45 = vld [vmem:[%s16542_s1 + $0xe8] sm:$0xff]  ;;  %v1801_v47 = vld [vmem:[%s16542_s1 + $0xf0] sm:$0xff] }
  0x1e   :  { %9505 = vmatpush1.bf16.msra.mxu0 %v9504_v9  ;;  %v9540_v46 = vpack.c.bf16 %v1800_v45, %v1799_v44  ;;  %v1802_v48 = vld [vmem:[%s16542_s1 + $0xf8] sm:$0xff]  ;;  %v1803_v50 = vld [vmem:[%s16542_s1 + $0x100] sm:$0xff]  ;;  %v1804_v51 = vld [vmem:[%s16542_s1 + $0x108] sm:$0xff] }
  0x1f   :  { %9506 = vmatprep.subr.bf16.mxu0 %v16549_v0  ;;  %v9543_v49 = vpack.c.bf16 %v1802_v48, %v1801_v47  ;;  %v41_v52 = vld [vmem:[%s16541_s0] sm:$0xff]  ;;  %v9546_v53 = vpack.c.bf16 %v1804_v51, %v1803_v50  ;;  %v170_v54 = vld [vmem:[%s16541_s0 + $0x9] sm:$0xff]  ;;  %v1806_v56 = vld [vmem:[%s16542_s1 + $0x118] sm:$0xff] }
  0x20   :  { %v1805_v55 = vld [vmem:[%s16542_s1 + $0x110] sm:$0xff]  ;;  %v42_v57 = vld [vmem:[%s16541_s0 + $0x8] sm:$0xff]  ;;  %v171_v59 = vld [vmem:[%s16541_s0 + $0x19] sm:$0xff] }
  0x21   :  { %v9549_v58 = vpack.c.bf16 %v1806_v56, %v1805_v55  ;;  %v1807_v60 = vld [vmem:[%s16542_s1 + $0x120] sm:$0xff]  ;;  %v1808_v61 = vld [vmem:[%s16542_s1 + $0x128] sm:$0xff]  ;;  %v11000_v62 = vld [vmem:[%s16541_s0 + $0x18] sm:$0xff] }
  0x22   :  { %9508 = vmatpush1.bf16.msra.mxu0 %v9507_v13  ;;  %v9552_v63 = vpack.c.bf16 %v1808_v61, %v1807_v60  ;;  %v172_v1 = vld [vmem:[%s16541_s0 + $0x21] sm:$0xff]  ;;  %v1809_v2 = vld [vmem:[%s16542_s1 + $0x130] sm:$0xff]  ;;  %v1810_v3 = vld [vmem:[%s16542_s1 + $0x138] sm:$0xff] }
  0x23   :  { %9509 = vmatprep.subr.bf16.mxu0 %v16549_v0  ;;  %v11016_v4 = vld [vmem:[%s16541_s0 + $0x20] sm:$0xff]  ;;  %v9555_v5 = vpack.c.bf16 %v1810_v3, %v1809_v2  ;;  %v173_v6 = vld [vmem:[%s16541_s0 + $0x31] sm:$0xff]  ;;  %v1812_v8 = vld [vmem:[%s16542_s1 + $0x148] sm:$0xff] }
  0x24   :  { %v1811_v7 = vld [vmem:[%s16542_s1 + $0x140] sm:$0xff]  ;;  %v11032_v9 = vld [vmem:[%s16541_s0 + $0x30] sm:$0xff]  ;;  %v1814_v13 = vld [vmem:[%s16542_s1 + $0x158] sm:$0xff] }
  0x25   :  { %v9558_v10 = vpack.c.bf16 %v1812_v8, %v1811_v7  ;;  %v174_v11 = vld [vmem:[%s16541_s0 + $0x39] sm:$0xff]  ;;  %v1813_v12 = vld [vmem:[%s16542_s1 + $0x150] sm:$0xff]  ;;  %v1816_v18 = vld [vmem:[%s16542_s1 + $0x168] sm:$0xff] }
  0x26   :  { %9511 = vmatpush1.bf16.msra.mxu0 %v9510_v16  ;;  %v11048_v14 = vld [vmem:[%s16541_s0 + $0x38] sm:$0xff]  ;;  %v9561_v15 = vpack.c.bf16 %v1814_v13, %v1813_v12  ;;  %v175_v16 = vld [vmem:[%s16541_s0 + $0x49] sm:$0xff]  ;;  %v1815_v17 = vld [vmem:[%s16542_s1 + $0x160] sm:$0xff] }
  0x27   :  { %9512 = vmatprep.subr.bf16.mxu0 %v16549_v0  ;;  %v9564_v20 = vpack.c.bf16 %v1816_v18, %v1815_v17  ;;  %v176_v21 = vld [vmem:[%s16541_s0 + $0x51] sm:$0xff]  ;;  %v177_v26 = vld [vmem:[%s16541_s0 + $0x61] sm:$0xff]  ;;  %v179_v36 = vld [vmem:[%s16541_s0 + $0x79] sm:$0xff] }
  0x28   :  { %v1818_v23 = vld [vmem:[%s16542_s1 + $0x178] sm:$0xff]  ;;  %v11080_v24 = vld [vmem:[%s16541_s0 + $0x50] sm:$0xff]  ;;  %v1819_v27 = vld [vmem:[%s16542_s1 + $0x180] sm:$0xff] }
  0x29   :  { %v11096_v29 = vld [vmem:[%s16541_s0 + $0x60] sm:$0xff]  ;;  %v1821_v32 = vld [vmem:[%s16542_s1 + $0x190] sm:$0xff]  ;;  %v1822_v33 = vld [vmem:[%s16542_s1 + $0x198] sm:$0xff] }
  0x2a   :  { %9514 = vmatpush1.bf16.msra.mxu0 %v9513_v19  ;;  %v11064_v19 = vld [vmem:[%s16541_s0 + $0x48] sm:$0xff]  ;;  %v9573_v35 = vpack.c.bf16 %v1822_v33, %v1821_v32  ;;  %v11128_v39 = vld [vmem:[%s16541_s0 + $0x78] sm:$0xff]  ;;  %v11138_v42 = vld [vmem:[%s16541_s0 + $0x80] sm:$0xff] }
  0x2b   :  { %9515 = vmatprep.subr.bf16.mxu0 %v16549_v0  ;;  %v1824_v38 = vld [vmem:[%s16542_s1 + $0x1a8] sm:$0xff]  ;;  %v11148_v44 = vld [vmem:[%s16541_s0 + $0x90] sm:$0xff]  ;;  %v182_v45 = vld [vmem:[%s16541_s0 + $0x99] sm:$0xff] }
  0x2c   :  { %v180_v41 = vld [vmem:[%s16541_s0 + $0x81] sm:$0xff]  ;;  %v1826_v47 = vld [vmem:[%s16542_s1 + $0x1b8] sm:$0xff]  ;;  %v183_v50 = vld [vmem:[%s16541_s0 + $0xa9] sm:$0xff] }
  0x2d   :  { %v11163_v48 = vld [vmem:[%s16541_s0 + $0x98] sm:$0xff]  ;;  %v11173_v51 = vld [vmem:[%s16541_s0 + $0xa8] sm:$0xff]  ;;  %v11191_v55 = vld [vmem:[%s16541_s0 + $0xc0] sm:$0xff] }
  0x2e   :  { %9517 = vmatpush1.bf16.msra.mxu0 %v9516_v22  ;;  %v1817_v22 = vld [vmem:[%s16542_s1 + $0x170] sm:$0xff]  ;;  %v187_v61 = vld [vmem:[%s16541_s0 + $0xd9] sm:$0xff]  ;;  %v11259_v13 = vld [vmem:[%s16541_s0 + $0x108] sm:$0xff] }
  0x2f   :  { %9518 = vmatprep.subr.bf16.mxu0 %v16549_v0  ;;  %v186_v56 = vld [vmem:[%s16541_s0 + $0xc9] sm:$0xff]  ;;  %v11225_v2 = vld [vmem:[%s16541_s0 + $0xe0] sm:$0xff]  ;;  %v189_v3 = vld [vmem:[%s16541_s0 + $0xf1] sm:$0xff] }
  0x30   :  { %v1829_v7 = vld [vmem:[%s16542_s1 + $0x1d0] sm:$0xff]  ;;  %v1830_v8 = vld [vmem:[%s16542_s1 + $0x1d8] sm:$0xff]  ;;  %v193_v17 = vld [vmem:[%s16541_s0 + $0x121] sm:$0xff] }
  0x31   :  { %v191_v12 = vld [vmem:[%s16541_s0 + $0x109] sm:$0xff]  ;;  %v11277_v18 = vld [vmem:[%s16541_s0 + $0x120] sm:$0xff] }
  0x32   :  { %9520 = vmatpush1.bf16.msra.mxu0 %v9519_v25  ;;  %v9567_v25 = vpack.c.bf16 %v1818_v23, %v1817_v22  ;;  %v1832_v22 = vld [vmem:[%s16542_s1 + $0x1e8] sm:$0xff]  ;;  %v11320_v32 = vld [vmem:[%s16541_s0 + $0x150] sm:$0xff]  ;;  %v198_v33 = vld [vmem:[%s16541_s0 + $0x159] sm:$0xff] }
  0x33   :  { %9521 = vmatprep.subr.bf16.mxu0 %v16549_v0  ;;  %v11292_v23 = vld [vmem:[%s16541_s0 + $0x128] sm:$0xff] }
  0x36   :  { %9523 = vmatpush1.bf16.msra.mxu0 %v9522_v28  ;;  %v1820_v28 = vld [vmem:[%s16542_s1 + $0x188] sm:$0xff] }
  0x37   :  { %9524 = vmatprep.subr.bf16.mxu0 %v16549_v0  ;;  %v9570_v30 = vpack.c.bf16 %v1820_v28, %v1819_v27  ;;  %v11302_v27 = vld [vmem:[%s16541_s0 + $0x138] sm:$0xff]  ;;  %v196_v28 = vld [vmem:[%s16541_s0 + $0x141] sm:$0xff] }
  0x3a   :  { %9526 = vmatpush1.bf16.msra.mxu0 %v9525_v31  ;;  %v178_v31 = vld [vmem:[%s16541_s0 + $0x69] sm:$0xff] }
  0x3b   :  { %9527 = vmatprep.subr.bf16.mxu0 %v16549_v0 }
  0x3e   :  { %9529 = vmatpush1.bf16.msra.mxu0 %v9528_v34  ;;  %v11112_v34 = vld [vmem:[%s16541_s0 + $0x68] sm:$0xff] }
  0x3f   :  { %9530 = vmatprep.subr.bf16.mxu0 %v16549_v0 }
  0x42   :  { %9532 = vmatpush1.bf16.msra.mxu0 %v9531_v37  ;;  %v1823_v37 = vld [vmem:[%s16542_s1 + $0x1a0] sm:$0xff] }
  0x43   :  { %9533 = vmatprep.subr.bf16.mxu0 %v16549_v0 }
  0x46   :  { %9535 = vmatpush1.bf16.msra.mxu0 %v9534_v40  ;;  %v9576_v40 = vpack.c.bf16 %v1824_v38, %v1823_v37  ;;  %v11335_v37 = vld [vmem:[%s16541_s0 + $0x158] sm:$0xff] }
  0x47   :  { %9536 = vmatprep.subr.bf16.mxu0 %v16549_v0 }
  0x4a   :  { %9538 = vmatpush1.bf16.msra.mxu0 %v9537_v43  ;;  %v181_v43 = vld [vmem:[%s16541_s0 + $0x91] sm:$0xff] }
  0x4b   :  { %9539 = vmatprep.subr.bf16.mxu0 %v16549_v0 }
  0x4e   :  { %9541 = vmatpush1.bf16.msra.mxu0 %v9540_v46  ;;  %v1825_v46 = vld [vmem:[%s16542_s1 + $0x1b0] sm:$0xff] }
  0x4f   :  { %9542 = vmatprep.subr.bf16.mxu0 %v16549_v0 }
  0x52   :  { %9544 = vmatpush1.bf16.msra.mxu0 %v9543_v49  ;;  %v9579_v49 = vpack.c.bf16 %v1826_v47, %v1825_v46  ;;  %v201_v46 = vld [vmem:[%s16541_s0 + $0x1b1] sm:$0xff] }
  0x53   :  { %9545 = vmatprep.subr.bf16.mxu0 %v16549_v0  ;;  %v73_v47 = vld [vmem:[%s16541_s0 + $0x1b0] sm:$0xff] }
  0x55   :  { %1980 = vmatmul.mubr.f32.vlgmr.msra.gmra.mrb[0].mxu0 %v41_v52  ;;  %v184_v52 = vld [vmem:[%s16541_s0 + $0xb1] sm:$0xff] }
  0x56   :  { %9547 = vmatpush1.bf16.msra.mxu0 %v9546_v53  ;;  %1984 = vmatprep.mubr.f32.mxu0 %v170_v54  ;;  %v11182_v53 = vld [vmem:[%s16541_s0 + $0xb0] sm:$0xff]  ;;  %v185_v54 = vld [vmem:[%s16541_s0 + $0xc1] sm:$0xff] }
  0x57   :  { %9548 = vmatprep.subr.bf16.mxu0 %v16549_v0 }
  0x59   :  { %1985 = vmatmul.mubr.f32.gmra.mrb[2].mxu0 %v42_v57  ;;  %v1827_v57 = vld [vmem:[%s16542_s1 + $0x1c0] sm:$0xff] }
  0x5a   :  { %1989 = vmatprep.mubr.f32.mxu0 %v171_v59  ;;  %9550 = vmatpush1.bf16.msra.mxu0 %v9549_v58  ;;  %v1828_v58 = vld [vmem:[%s16542_s1 + $0x1c8] sm:$0xff] }
  0x5b   :  { %9551 = vmatprep.subr.bf16.mxu0 %v16549_v0  ;;  %v11206_v59 = vld [vmem:[%s16541_s0 + $0xc8] sm:$0xff]  ;;  %v9582_v60 = vpack.c.bf16 %v1828_v58, %v1827_v57  ;;  %v11384_v57 = vld [vmem:[%s16541_s0 + $0x1d0] sm:$0xff] }
  0x5c   :  { %v205_v58 = vld [vmem:[%s16541_s0 + $0x1e1] sm:$0xff] }
  0x5d   :  { %1990 = vmatmul.mubr.f32.gmra.mrb[4].mxu0 %v11000_v62 }
  0x5e   :  { %1994 = vmatprep.mubr.f32.mxu0 %v172_v1  ;;  %9553 = vmatpush1.bf16.msra.mxu0 %v9552_v63  ;;  %v11216_v63 = vld [vmem:[%s16541_s0 + $0xd8] sm:$0xff]  ;;  %v188_v1 = vld [vmem:[%s16541_s0 + $0xe1] sm:$0xff] }
  0x5f   :  { %9554 = vmatprep.subr.bf16.mxu0 %v16549_v0 }
  0x61   :  { %1995 = vmatmul.mubr.f32.gmra.mrb[6].mxu0 %v11016_v4 }
  0x62   :  { %1999 = vmatprep.mubr.f32.mxu0 %v173_v6  ;;  %9556 = vmatpush1.bf16.msra.mxu0 %v9555_v5  ;;  %v11234_v5 = vld [vmem:[%s16541_s0 + $0xf0] sm:$0xff]  ;;  %v190_v6 = vld [vmem:[%s16541_s0 + $0xf9] sm:$0xff] }
  0x63   :  { %9557 = vmatprep.subr.bf16.mxu0 %v16549_v0 }
  0x65   :  { %2000 = vmatmul.mubr.f32.gmra.mrb[8].mxu0 %v11032_v9 }
  0x66   :  { %2004 = vmatprep.mubr.f32.mxu0 %v174_v11  ;;  %9559 = vmatpush1.bf16.msra.mxu0 %v9558_v10  ;;  %v11249_v10 = vld [vmem:[%s16541_s0 + $0xf8] sm:$0xff]  ;;  %v9585_v11 = vpack.c.bf16 %v1830_v8, %v1829_v7  ;;  %v208_v7 = vld [vmem:[%s16541_s0 + $0x201] sm:$0xff] }
  0x67   :  { %9560 = vmatprep.subr.bf16.mxu0 %v16549_v0  ;;  %v11420_v8 = vld [vmem:[%s16541_s0 + $0x200] sm:$0xff] }
  0x69   :  { %2005 = vmatmul.mubr.f32.gmra.mrb[10].mxu0 %v11048_v14 }
  0x6a   :  { %2009 = vmatprep.mubr.f32.mxu0 %v175_v16  ;;  %9562 = vmatpush1.bf16.msra.mxu0 %v9561_v15  ;;  %v192_v15 = vld [vmem:[%s16541_s0 + $0x111] sm:$0xff] }
  0x6b   :  { %9563 = vmatprep.subr.bf16.mxu0 %v16549_v0  ;;  %v11268_v16 = vld [vmem:[%s16541_s0 + $0x110] sm:$0xff] }
  0x6d   :  { %2010 = vmatmul.mubr.f32.gmra.mrb[12].mxu0 %v11064_v19 }
  0x6e   :  { %2014 = vmatprep.mubr.f32.mxu0 %v176_v21  ;;  %9565 = vmatpush1.bf16.msra.mxu0 %v9564_v20  ;;  %v194_v20 = vld [vmem:[%s16541_s0 + $0x129] sm:$0xff]  ;;  %v1831_v21 = vld [vmem:[%s16542_s1 + $0x1e0] sm:$0xff] }
  0x6f   :  { %9566 = vmatprep.subr.bf16.mxu0 %v16549_v0 }
  0x71   :  { %2015 = vmatmul.mubr.f32.gmra.mrb[14].mxu0 %v11080_v24 }
  0x72   :  { %2019 = vmatprep.mubr.f32.mxu0 %v177_v26  ;;  %9568 = vmatpush1.bf16.msra.mxu0 %v9567_v25  ;;  %v9588_v25 = vpack.c.bf16 %v1832_v22, %v1831_v21  ;;  %v195_v26 = vld [vmem:[%s16541_s0 + $0x139] sm:$0xff]  ;;  %v11447_v21 = vld [vmem:[%s16541_s0 + $0x228] sm:$0xff]  ;;  %v212_v22 = vld [vmem:[%s16541_s0 + $0x231] sm:$0xff] }
  0x73   :  { %9569 = vmatprep.subr.bf16.mxu0 %v16549_v0 }
  0x75   :  { %2020 = vmatmul.mubr.f32.gmra.mrb[16].mxu0 %v11096_v29 }
  0x76   :  { %2024 = vmatprep.mubr.f32.mxu0 %v178_v31  ;;  %9571 = vmatpush1.bf16.msra.mxu0 %v9570_v30  ;;  %v11311_v30 = vld [vmem:[%s16541_s0 + $0x140] sm:$0xff]  ;;  %v197_v31 = vld [vmem:[%s16541_s0 + $0x151] sm:$0xff] }
  0x77   :  { %9572 = vmatprep.subr.bf16.mxu0 %v16549_v0 }
  0x79   :  { %2025 = vmatmul.mubr.f32.gmra.mrb[18].mxu0 %v11112_v34 }
  0x7a   :  { %2029 = vmatprep.mubr.f32.mxu0 %v179_v36  ;;  %9574 = vmatpush1.bf16.msra.mxu0 %v9573_v35  ;;  %v1833_v35 = vld [vmem:[%s16542_s1 + $0x1f0] sm:$0xff]  ;;  %v1834_v36 = vld [vmem:[%s16542_s1 + $0x1f8] sm:$0xff] }
  0x7b   :  { %9575 = vmatprep.subr.bf16.mxu0 %v16549_v0  ;;  %v9591_v38 = vpack.c.bf16 %v1834_v36, %v1833_v35  ;;  %v215_v35 = vld [vmem:[%s16541_s0 + $0x259] sm:$0xff] }
  0x7c   :  { %v11483_v36 = vld [vmem:[%s16541_s0 + $0x258] sm:$0xff] }
  0x7d   :  { %2030 = vmatmul.mubr.f32.gmra.mrb[20].mxu0 %v11128_v39 }
  0x7e   :  { %2034 = vmatprep.mubr.f32.mxu0 %v180_v41  ;;  %9577 = vmatpush1.bf16.msra.mxu0 %v9576_v40  ;;  %v199_v40 = vld [vmem:[%s16541_s0 + $0x169] sm:$0xff] }
  0x7f   :  { %9578 = vmatprep.subr.bf16.mxu0 %v16549_v0  ;;  %v11345_v41 = vld [vmem:[%s16541_s0 + $0x168] sm:$0xff] }
  0x81   :  { %2035 = vmatmul.mubr.f32.gmra.mrb[22].mxu0 %v11138_v42 }
  0x82   :  { %2039 = vmatprep.mubr.f32.mxu0 %v181_v43  ;;  %9580 = vmatpush1.bf16.msra.mxu0 %v9579_v49  ;;  %v200_v43 = vld [vmem:[%s16541_s0 + $0x171] sm:$0xff]  ;;  %v202_v49 = vld [vmem:[%s16541_s0 + $0x1b9] sm:$0xff] }
  0x83   :  { %9581 = vmatprep.subr.bf16.mxu0 %v16549_v0 }
  0x85   :  { %2040 = vmatmul.mubr.f32.gmra.mrb[24].mxu0 %v11148_v44 }
  0x86   :  { %2044 = vmatprep.mubr.f32.mxu0 %v182_v45  ;;  %9583 = vmatpush1.bf16.msra.mxu0 %v9582_v60  ;;  %v11354_v45 = vld [vmem:[%s16541_s0 + $0x170] sm:$0xff]  ;;  %v11393_v60 = vld [vmem:[%s16541_s0 + $0x1e0] sm:$0xff] }
  0x87   :  { %9584 = vmatprep.subr.bf16.mxu0 %v16549_v0 }
  0x89   :  { %2045 = vmatmul.mubr.f32.gmra.mrb[26].mxu0 %v11163_v48 }
  0x8a   :  { %2049 = vmatprep.mubr.f32.mxu0 %v183_v50  ;;  %9586 = vmatpush1.bf16.msra.mxu0 %v9585_v11  ;;  %v74_v50 = vld [vmem:[%s16541_s0 + $0x1b8] sm:$0xff] }
  0x8b   :  { %9587 = vmatprep.subr.bf16.mxu0 %v16549_v0  ;;  %v209_v11 = vld [vmem:[%s16541_s0 + $0x211] sm:$0xff] }
  0x8d   :  { %2050 = vmatmul.mubr.f32.gmra.mrb[28].mxu0 %v11173_v51 }
  0x8e   :  { %2054 = vmatprep.mubr.f32.mxu0 %v184_v52  ;;  %9589 = vmatpush1.bf16.msra.mxu0 %v9588_v25  ;;  %v203_v52 = vld [vmem:[%s16541_s0 + $0x1c9] sm:$0xff] }
  0x8f   :  { %9590 = vmatprep.subr.bf16.mxu0 %v16549_v0  ;;  %v11456_v25 = vld [vmem:[%s16541_s0 + $0x230] sm:$0xff] }
  0x91   :  { %2055 = vmatmul.mubr.f32.gmra.mrb[30].mxu0 %v11182_v53 }
  0x92   :  { %2059 = vmatprep.mubr.f32.mxu0 %v185_v54  ;;  %9592 = vmatpush1.bf16.msra.mxu0 %v9591_v38  ;;  %v11375_v54 = vld [vmem:[%s16541_s0 + $0x1c8] sm:$0xff] }
  0x93   :  { %9593 = vmatprep.subr.bf16.mxu0 %v16549_v0  ;;  %v216_v38 = vld [vmem:[%s16541_s0 + $0x261] sm:$0xff] }
  0x95   :  { %2060 = vmatmul.mubr.f32.gmra.mrb[32].mxu0 %v11191_v55 }
  0x96   :  { %2064 = vmatprep.mubr.f32.mxu0 %v186_v56  ;;  %v204_v56 = vld [vmem:[%s16541_s0 + $0x1d1] sm:$0xff] }
  0x99   :  { %2065 = vmatmul.mubr.f32.gmra.mrb[34].mxu0 %v11206_v59 }
  0x9a   :  { %2069 = vmatprep.mubr.f32.mxu0 %v187_v61  ;;  %v206_v61 = vld [vmem:[%s16541_s0 + $0x1e9] sm:$0xff] }
  0x9d   :  { %2070 = vmatmul.mubr.f32.gmra.mrb[36].mxu0 %v11216_v63 }
  0x9e   :  { %2074 = vmatprep.mubr.f32.mxu0 %v188_v1  ;;  %v11402_v1 = vld [vmem:[%s16541_s0 + $0x1e8] sm:$0xff] }
  0xa1   :  { %2075 = vmatmul.mubr.f32.gmra.mrb[38].mxu0 %v11225_v2 }
  0xa2   :  { %2079 = vmatprep.mubr.f32.mxu0 %v189_v3  ;;  %v207_v3 = vld [vmem:[%s16541_s0 + $0x1f9] sm:$0xff] }
  0xa5   :  { %2080 = vmatmul.mubr.f32.gmra.mrb[40].mxu0 %v11234_v5 }
  0xa6   :  { %2084 = vmatprep.mubr.f32.mxu0 %v190_v6  ;;  %v11411_v6 = vld [vmem:[%s16541_s0 + $0x1f8] sm:$0xff] }
  0xa9   :  { %2085 = vmatmul.mubr.f32.gmra.mrb[42].mxu0 %v11249_v10 }
  0xaa   :  { %2089 = vmatprep.mubr.f32.mxu0 %v191_v12  ;;  %v11429_v12 = vld [vmem:[%s16541_s0 + $0x210] sm:$0xff] }
  0xad   :  { %2090 = vmatmul.mubr.f32.gmra.mrb[44].mxu0 %v11259_v13 }
  0xae   :  { %2094 = vmatprep.mubr.f32.mxu0 %v192_v15  ;;  %v210_v15 = vld [vmem:[%s16541_s0 + $0x219] sm:$0xff] }
  0xb1   :  { %2095 = vmatmul.mubr.f32.gmra.mrb[46].mxu0 %v11268_v16 }
  0xb2   :  { %2099 = vmatprep.mubr.f32.mxu0 %v193_v17  ;;  %v11438_v17 = vld [vmem:[%s16541_s0 + $0x218] sm:$0xff] }
  0xb5   :  { %2100 = vmatmul.mubr.f32.gmra.mrb[48].mxu0 %v11277_v18 }
  0xb6   :  { %2104 = vmatprep.mubr.f32.mxu0 %v194_v20  ;;  %v211_v20 = vld [vmem:[%s16541_s0 + $0x229] sm:$0xff] }
  0xb9   :  { %2105 = vmatmul.mubr.f32.gmra.mrb[50].mxu0 %v11292_v23 }
  0xba   :  { %2109 = vmatprep.mubr.f32.mxu0 %v195_v26  ;;  %v213_v26 = vld [vmem:[%s16541_s0 + $0x241] sm:$0xff] }
  0xbd   :  { %2110 = vmatmul.mubr.f32.gmra.mrb[52].mxu0 %v11302_v27 }
  0xbe   :  { %2114 = vmatprep.mubr.f32.mxu0 %v196_v28  ;;  %v11465_v28 = vld [vmem:[%s16541_s0 + $0x240] sm:$0xff] }
  0xc1   :  { %2115 = vmatmul.mubr.f32.gmra.mrb[54].mxu0 %v11311_v30 }
  0xc2   :  { %2119 = vmatprep.mubr.f32.mxu0 %v197_v31  ;;  %v214_v31 = vld [vmem:[%s16541_s0 + $0x249] sm:$0xff] }
  0xc5   :  { %2120 = vmatmul.mubr.f32.gmra.mrb[56].mxu0 %v11320_v32 }
  0xc6   :  { %2124 = vmatprep.mubr.f32.mxu0 %v198_v33  ;;  %v11474_v33 = vld [vmem:[%s16541_s0 + $0x248] sm:$0xff] }
  0xc9   :  { %2125 = vmatmul.mubr.f32.gmra.mrb[58].mxu0 %v11335_v37 }
  0xca   :  { %2129 = vmatprep.mubr.f32.mxu0 %v199_v40  ;;  %v11492_v40 = vld [vmem:[%s16541_s0 + $0x260] sm:$0xff] }
  0xcd   :  { %2130 = vmatmul.mubr.f32.gmra.mrb[60].mxu0 %v11345_v41 }
  0xce   :  { %2134 = vmatprep.mubr.f32.mxu0 %v200_v43  ;;  %v217_v43 = vld [vmem:[%s16541_s0 + $0x271] sm:$0xff] }
  0xd1   :  { %2135 = vmatmul.mubr.f32.gmra.mrb[62].mxu0 %v11354_v45 }
  0xd2   :  { %2139 = vmatprep.mubr.f32.mxu0 %v201_v46  ;;  %v11501_v46 = vld [vmem:[%s16541_s0 + $0x270] sm:$0xff] }
  0xd5   :  { %2140 = vmatmul.mubr.f32.gmra.mrb[64].mxu0 %v73_v47  ;;  %v218_v47 = vld [vmem:[%s16541_s0 + $0x279] sm:$0xff] }
  0xd6   :  { %2144 = vmatprep.mubr.f32.mxu0 %v202_v49  ;;  %v11510_v49 = vld [vmem:[%s16541_s0 + $0x278] sm:$0xff] }
  0xd9   :  { %2145 = vmatmul.mubr.f32.gmra.mrb[66].mxu0 %v74_v50  ;;  %v219_v50 = vld [vmem:[%s16541_s0 + $0x289] sm:$0xff] }
  0xda   :  { %2149 = vmatprep.mubr.f32.mxu0 %v203_v52  ;;  %v11519_v52 = vld [vmem:[%s16541_s0 + $0x288] sm:$0xff] }
  0xdd   :  { %2150 = vmatmul.mubr.f32.gmra.mrb[68].mxu0 %v11375_v54 }
  0xde   :  { %2154 = vmatprep.mubr.f32.mxu0 %v204_v56  ;;  %v220_v56 = vld [vmem:[%s16541_s0 + $0x291] sm:$0xff] }
  0xe1   :  { %2155 = vmatmul.mubr.f32.gmra.mrb[70].mxu0 %v11384_v57 }
  0xe2   :  { %2159 = vmatprep.mubr.f32.mxu0 %v205_v58  ;;  %v11528_v58 = vld [vmem:[%s16541_s0 + $0x290] sm:$0xff] }
  0xe5   :  { %2160 = vmatmul.mubr.f32.gmra.mrb[72].mxu0 %v11393_v60 }
  0xe6   :  { %2164 = vmatprep.mubr.f32.mxu0 %v206_v61  ;;  %v221_v61 = vld [vmem:[%s16541_s0 + $0x2a1] sm:$0xff] }
  0xe9   :  { %2165 = vmatmul.mubr.f32.gmra.mrb[74].mxu0 %v11402_v1 }
  0xea   :  { %2169 = vmatprep.mubr.f32.mxu0 %v207_v3  ;;  %v11537_v3 = vld [vmem:[%s16541_s0 + $0x2a0] sm:$0xff] }
  0xed   :  { %2170 = vmatmul.mubr.f32.gmra.mrb[76].mxu0 %v11411_v6 }
  0xee   :  { %2174 = vmatprep.mubr.f32.mxu0 %v208_v7  ;;  %v222_v7 = vld [vmem:[%s16541_s0 + $0x2a9] sm:$0xff] }
  0xf1   :  { %2175 = vmatmul.mubr.f32.gmra.mrb[78].mxu0 %v11420_v8 }
  0xf2   :  { %2179 = vmatprep.mubr.f32.mxu0 %v209_v11  ;;  %v11546_v11 = vld [vmem:[%s16541_s0 + $0x2a8] sm:$0xff] }
  0xf5   :  { %2180 = vmatmul.mubr.f32.gmra.mrb[80].mxu0 %v11429_v12 }
  0xf6   :  { %2184 = vmatprep.mubr.f32.mxu0 %v210_v15  ;;  %v223_v15 = vld [vmem:[%s16541_s0 + $0x2b9] sm:$0xff] }
  0xf9   :  { %2185 = vmatmul.mubr.f32.gmra.mrb[82].mxu0 %v11438_v17 }
  0xfa   :  { %2189 = vmatprep.mubr.f32.mxu0 %v211_v20  ;;  %v11555_v20 = vld [vmem:[%s16541_s0 + $0x2b8] sm:$0xff] }
  0xfd   :  { %2190 = vmatmul.mubr.f32.gmra.mrb[84].mxu0 %v11447_v21 }
  0xfe   :  { %2194 = vmatprep.mubr.f32.mxu0 %v212_v22  ;;  %v224_v22 = vld [vmem:[%s16541_s0 + $0x2c1] sm:$0xff] }
 0x101   :  { %2195 = vmatmul.mubr.f32.gmra.mrb[86].mxu0 %v11456_v25 }
 0x102   :  { %2199 = vmatprep.mubr.f32.mxu0 %v213_v26  ;;  %v11564_v26 = vld [vmem:[%s16541_s0 + $0x2c0] sm:$0xff] }
 0x105   :  { %2200 = vmatmul.mubr.f32.gmra.mrb[88].mxu0 %v11465_v28 }
 0x106   :  { %2204 = vmatprep.mubr.f32.mxu0 %v214_v31  ;;  %v225_v31 = vld [vmem:[%s16541_s0 + $0x2d1] sm:$0xff] }
 0x109   :  { %2205 = vmatmul.mubr.f32.gmra.mrb[90].mxu0 %v11474_v33 }
 0x10a   :  { %2209 = vmatprep.mubr.f32.mxu0 %v215_v35  ;;  %v11573_v35 = vld [vmem:[%s16541_s0 + $0x2d0] sm:$0xff] }
 0x10d   :  { %2210 = vmatmul.mubr.f32.gmra.mrb[92].mxu0 %v11483_v36 }
 0x10e   :  { %2214 = vmatprep.mubr.f32.mxu0 %v216_v38  ;;  %v226_v38 = vld [vmem:[%s16541_s0 + $0x2d9] sm:$0xff] }
 0x111   :  { %2215 = vmatmul.mubr.f32.gmra.mrb[94].mxu0 %v11492_v40 }
 0x112   :  { %2219 = vmatprep.mubr.f32.mxu0 %v217_v43  ;;  %v11582_v43 = vld [vmem:[%s16541_s0 + $0x2d8] sm:$0xff] }
 0x115   :  { %2220 = vmatmul.mubr.f32.gmra.mrb[96].mxu0 %v11501_v46 }
 0x116   :  { %2224 = vmatprep.mubr.f32.mxu0 %v218_v47  ;;  %v227_v47 = vld [vmem:[%s16541_s0 + $0x2e9] sm:$0xff] }
 0x119   :  { %2225 = vmatmul.mubr.f32.gmra.mrb[98].mxu0 %v11510_v49 }
 0x11a   :  { %2229 = vmatprep.mubr.f32.mxu0 %v219_v50  ;;  %v11591_v50 = vld [vmem:[%s16541_s0 + $0x2e8] sm:$0xff] }
 0x11d   :  { %2230 = vmatmul.mubr.f32.gmra.mrb[100].mxu0 %v11519_v52 }
 0x11e   :  { %2234 = vmatprep.mubr.f32.mxu0 %v220_v56  ;;  %v228_v56 = vld [vmem:[%s16541_s0 + $0x2f1] sm:$0xff] }
 0x121   :  { %2235 = vmatmul.mubr.f32.gmra.mrb[102].mxu0 %v11528_v58 }
 0x122   :  { %2239 = vmatprep.mubr.f32.mxu0 %v221_v61  ;;  %v11600_v61 = vld [vmem:[%s16541_s0 + $0x2f0] sm:$0xff] }
 0x125   :  { %2240 = vmatmul.mubr.f32.gmra.mrb[104].mxu0 %v11537_v3 }
 0x126   :  { %2244 = vmatprep.mubr.f32.mxu0 %v222_v7  ;;  %v229_v7 = vld [vmem:[%s16541_s0 + $0x301] sm:$0xff] }
 0x129   :  { %2245 = vmatmul.mubr.f32.gmra.mrb[106].mxu0 %v11546_v11 }
 0x12a   :  { %2249 = vmatprep.mubr.f32.mxu0 %v223_v15  ;;  %v11609_v15 = vld [vmem:[%s16541_s0 + $0x300] sm:$0xff] }
 0x12b   :  { %16675 = vst [vmem:[#allocation10_spill] sm:$0xff] %v11609_v15 }
 0x12d   :  { %2250 = vmatmul.mubr.f32.gmra.mrb[108].mxu0 %v11555_v20 }
 0x12e   :  { %2254 = vmatprep.mubr.f32.mxu0 %v224_v22  ;;  %v230_v22 = vld [vmem:[%s16541_s0 + $0x309] sm:$0xff] }
 0x131   :  { %2255 = vmatmul.mubr.f32.gmra.mrb[110].mxu0 %v11564_v26 }
 0x132   :  { %2259 = vmatprep.mubr.f32.mxu0 %v225_v31  ;;  %v11618_v31 = vld [vmem:[%s16541_s0 + $0x308] sm:$0xff] }
 0x133   :  { %16676 = vst [vmem:[#allocation11_spill] sm:$0xff] %v11618_v31 }
 0x135   :  { %2260 = vmatmul.mubr.f32.gmra.mrb[112].mxu0 %v11573_v35 }
 0x136   :  { %2264 = vmatprep.mubr.f32.mxu0 %v226_v38  ;;  %v231_v38 = vld [vmem:[%s16541_s0 + $0x319] sm:$0xff] }
 0x139   :  { %2265 = vmatmul.mubr.f32.gmra.mrb[114].mxu0 %v11582_v43 }
 0x13a   :  { %2269 = vmatprep.mubr.f32.mxu0 %v227_v47  ;;  %v11627_v47 = vld [vmem:[%s16541_s0 + $0x318] sm:$0xff] }
 0x13b   :  { %16677 = vst [vmem:[#allocation12_spill] sm:$0xff] %v11627_v47 }
 0x13d   :  { %2270 = vmatmul.mubr.f32.gmra.mrb[116].mxu0 %v11591_v50 }
 0x13e   :  { %2274 = vmatprep.mubr.f32.mxu0 %v228_v56  ;;  %v232_v56 = vld [vmem:[%s16541_s0 + $0x321] sm:$0xff] }
 0x141   :  { %2275 = vmatmul.mubr.f32.gmra.mrb[118].mxu0 %v11600_v61 }
 0x142   :  { %2279 = vmatprep.mubr.f32.mxu0 %v229_v7  ;;  %v11636_v7 = vld [vmem:[%s16541_s0 + $0x320] sm:$0xff] }
 0x143   :  { %16678 = vst [vmem:[#allocation13_spill] sm:$0xff] %v11636_v7 }
 0x145   :  { %2280 = vmatmul.mubr.f32.gmra.mrb[120].mxu0 %v11609_v15  ;;  %v16679_v15 = vmov 0.0|0.0  }
 0x146   :  { %2284 = vmatprep.mubr.f32.mxu0 %v230_v22  ;;  %v1835_v22 = vld [vmem:[%s16542_s1 + $0x200] sm:$0xff] }
 0x149   :  { %2285 = vmatmul.mubr.f32.gmra.mrb[122].mxu0 %v11618_v31  ;;  %v1838_v31 = vld [vmem:[%s16542_s1 + $0x218] sm:$0xff] }
 0x14a   :  { %2289 = vmatprep.mubr.f32.mxu0 %v231_v38  ;;  %v1836_v38 = vld [vmem:[%s16542_s1 + $0x208] sm:$0xff] }
 0x14b   :  { %v9594_v0 = vpack.c.bf16 %v1836_v38, %v1835_v22  ;;  %v1839_v22 = vld [vmem:[%s16542_s1 + $0x220] sm:$0xff]  ;;  %v1840_v38 = vld [vmem:[%s16542_s1 + $0x228] sm:$0xff] }
 0x14d   :  { %2290 = vmatmul.mubr.f32.gmra.mrb[124].mxu0 %v11627_v47  ;;  %v1837_v47 = vld [vmem:[%s16542_s1 + $0x210] sm:$0xff] }
 0x14e   :  { %2294 = vmatprep.mubr.f32.mxu0 %v232_v56  ;;  %v297_v56 = vld [vmem:[%s16541_s0 + $0x2] sm:$0xff] }
 0x151   :  { %2295 = vmatmul.mubr.f32.gmra.mrb[126].mxu0 %v11636_v7  ;;  %v9597_v7 = vpack.c.bf16 %v1838_v31, %v1837_v47  ;;  %v1841_v31 = vld [vmem:[%s16542_s1 + $0x230] sm:$0xff]  ;;  %v1842_v47 = vld [vmem:[%s16542_s1 + $0x238] sm:$0xff] }
 0x152   :  { %2364 = vmatprep.mubr.f32.mxu0 %v11000_v62  ;;  %v298_v62 = vld [vmem:[%s16541_s0 + $0xa] sm:$0xff] }
 0x155   :  { %2365 = vmatmul.mubr.f32.vlgmr.msra.gmra.mrb[0].mxu0 %v297_v56  ;;  %v1843_v56 = vld [vmem:[%s16542_s1 + $0x240] sm:$0xff] }
 0x156   :  { %9595 = vmatpush1.bf16.msra.mxu0 %v9594_v0  ;;  %2369 = vmatprep.mubr.f32.mxu0 %v11016_v4  ;;  %v11670_v0 = vld [vmem:[%s16541_s0 + $0x1a] sm:$0xff]  ;;  %v9600_v4 = vpack.c.bf16 %v1840_v38, %v1839_v22  ;;  %v1845_v38 = vld [vmem:[%s16542_s1 + $0x250] sm:$0xff] }
 0x157   :  { %9596 = vmatprep.subr.bf16.mxu0 %v16679_v15 }
 0x159   :  { %2370 = vmatmul.mubr.f32.gmra.mrb[2].mxu0 %v298_v62  ;;  %v1844_v62 = vld [vmem:[%s16542_s1 + $0x248] sm:$0xff] }
 0x15a   :  { %2374 = vmatprep.mubr.f32.mxu0 %v11032_v9  ;;  %9598 = vmatpush1.bf16.msra.mxu0 %v9597_v7  ;;  %v11684_v9 = vld [vmem:[%s16541_s0 + $0x22] sm:$0xff]  ;;  %v9603_v7 = vpack.c.bf16 %v1842_v47, %v1841_v31  ;;  %v9606_v22 = vpack.c.bf16 %v1844_v62, %v1843_v56  ;;  %v1849_v62 = vld [vmem:[%s16542_s1 + $0x270] sm:$0xff] }
 0x15b   :  { %9599 = vmatprep.subr.bf16.mxu0 %v16679_v15  ;;  %v1847_v47 = vld [vmem:[%s16542_s1 + $0x260] sm:$0xff] }
 0x15d   :  { %2375 = vmatmul.mubr.f32.gmra.mrb[4].mxu0 %v11670_v0 }
 0x15e   :  { %2379 = vmatprep.mubr.f32.mxu0 %v11048_v14  ;;  %9601 = vmatpush1.bf16.msra.mxu0 %v9600_v4  ;;  %v11698_v14 = vld [vmem:[%s16541_s0 + $0x32] sm:$0xff] }
 0x15f   :  { %9602 = vmatprep.subr.bf16.mxu0 %v16679_v15  ;;  %v1846_v4 = vld [vmem:[%s16542_s1 + $0x258] sm:$0xff] }
 0x160   :  { %v9609_v31 = vpack.c.bf16 %v1846_v4, %v1845_v38  ;;  %v1851_v4 = vld [vmem:[%s16542_s1 + $0x280] sm:$0xff] }
 0x161   :  { %2380 = vmatmul.mubr.f32.gmra.mrb[6].mxu0 %v11684_v9 }
 0x162   :  { %2384 = vmatprep.mubr.f32.mxu0 %v11064_v19  ;;  %9604 = vmatpush1.bf16.msra.mxu0 %v9603_v7  ;;  %v11712_v19 = vld [vmem:[%s16541_s0 + $0x3a] sm:$0xff]  ;;  %v1848_v7 = vld [vmem:[%s16542_s1 + $0x268] sm:$0xff] }
 0x163   :  { %9605 = vmatprep.subr.bf16.mxu0 %v16679_v15  ;;  %v9612_v56 = vpack.c.bf16 %v1848_v7, %v1847_v47  ;;  %v1853_v7 = vld [vmem:[%s16542_s1 + $0x290] sm:$0xff] }
 0x165   :  { %2385 = vmatmul.mubr.f32.gmra.mrb[8].mxu0 %v11698_v14 }
 0x166   :  { %2389 = vmatprep.mubr.f32.mxu0 %v11080_v24  ;;  %9607 = vmatpush1.bf16.msra.mxu0 %v9606_v22  ;;  %v11726_v24 = vld [vmem:[%s16541_s0 + $0x4a] sm:$0xff]  ;;  %v1850_v22 = vld [vmem:[%s16542_s1 + $0x278] sm:$0xff] }
 0x167   :  { %9608 = vmatprep.subr.bf16.mxu0 %v16679_v15  ;;  %v9615_v38 = vpack.c.bf16 %v1850_v22, %v1849_v62  ;;  %v1855_v22 = vld [vmem:[%s16542_s1 + $0x2a0] sm:$0xff] }
 0x169   :  { %2390 = vmatmul.mubr.f32.gmra.mrb[10].mxu0 %v11712_v19 }
 0x16a   :  { %2394 = vmatprep.mubr.f32.mxu0 %v11096_v29  ;;  %9610 = vmatpush1.bf16.msra.mxu0 %v9609_v31  ;;  %v11740_v29 = vld [vmem:[%s16541_s0 + $0x52] sm:$0xff]  ;;  %v1852_v31 = vld [vmem:[%s16542_s1 + $0x288] sm:$0xff] }
 0x16b   :  { %9611 = vmatprep.subr.bf16.mxu0 %v16679_v15  ;;  %v9618_v47 = vpack.c.bf16 %v1852_v31, %v1851_v4  ;;  %v11790_v31 = vld [vmem:[%s16541_s0 + $0x82] sm:$0xff] }
 0x16d   :  { %2395 = vmatmul.mubr.f32.gmra.mrb[12].mxu0 %v11726_v24 }
 0x16e   :  { %2399 = vmatprep.mubr.f32.mxu0 %v11112_v34  ;;  %9613 = vmatpush1.bf16.msra.mxu0 %v9612_v56  ;;  %v11754_v34 = vld [vmem:[%s16541_s0 + $0x62] sm:$0xff]  ;;  %v1854_v56 = vld [vmem:[%s16542_s1 + $0x298] sm:$0xff] }
 0x16f   :  { %9614 = vmatprep.subr.bf16.mxu0 %v16679_v15  ;;  %v9621_v62 = vpack.c.bf16 %v1854_v56, %v1853_v7  ;;  %v11819_v56 = vld [vmem:[%s16541_s0 + $0xaa] sm:$0xff] }
 0x171   :  { %2400 = vmatmul.mubr.f32.gmra.mrb[14].mxu0 %v11740_v29 }
 0x172   :  { %2404 = vmatprep.mubr.f32.mxu0 %v11128_v39  ;;  %9616 = vmatpush1.bf16.msra.mxu0 %v9615_v38  ;;  %v11768_v39 = vld [vmem:[%s16541_s0 + $0x6a] sm:$0xff] }
 0x173   :  { %9617 = vmatprep.subr.bf16.mxu0 %v16679_v15  ;;  %v1856_v38 = vld [vmem:[%s16542_s1 + $0x2a8] sm:$0xff] }
 0x174   :  { %v9624_v4 = vpack.c.bf16 %v1856_v38, %v1855_v22  ;;  %v11854_v38 = vld [vmem:[%s16541_s0 + $0xda] sm:$0xff] }
 0x175   :  { %2405 = vmatmul.mubr.f32.gmra.mrb[16].mxu0 %v11754_v34 }
 0x176   :  { %2409 = vmatprep.mubr.f32.mxu0 %v11138_v42  ;;  %9619 = vmatpush1.bf16.msra.mxu0 %v9618_v47  ;;  %v11782_v42 = vld [vmem:[%s16541_s0 + $0x7a] sm:$0xff] }
 0x177   :  { %9620 = vmatprep.subr.bf16.mxu0 %v16679_v15  ;;  %v1858_v47 = vld [vmem:[%s16542_s1 + $0x2b8] sm:$0xff] }
 0x179   :  { %2410 = vmatmul.mubr.f32.gmra.mrb[18].mxu0 %v11768_v39 }
 0x17a   :  { %2414 = vmatprep.mubr.f32.mxu0 %v11148_v44  ;;  %9622 = vmatpush1.bf16.msra.mxu0 %v9621_v62  ;;  %v11798_v44 = vld [vmem:[%s16541_s0 + $0x92] sm:$0xff]  ;;  %v1860_v62 = vld [vmem:[%s16542_s1 + $0x2c8] sm:$0xff] }
 0x17b   :  { %9623 = vmatprep.subr.bf16.mxu0 %v16679_v15 }
 0x17d   :  { %2415 = vmatmul.mubr.f32.gmra.mrb[20].mxu0 %v11782_v42 }
 0x17e   :  { %2419 = vmatprep.mubr.f32.mxu0 %v11163_v48  ;;  %9625 = vmatpush1.bf16.msra.mxu0 %v9624_v4  ;;  %v1857_v48 = vld [vmem:[%s16542_s1 + $0x2b0] sm:$0xff]  ;;  %v1862_v4 = vld [vmem:[%s16542_s1 + $0x2d8] sm:$0xff] }
 0x17f   :  { %9626 = vmatprep.subr.bf16.mxu0 %v16679_v15  ;;  %v9627_v7 = vpack.c.bf16 %v1858_v47, %v1857_v48  ;;  %v11889_v47 = vld [vmem:[%s16541_s0 + $0x10a] sm:$0xff] }
 0x181   :  { %2420 = vmatmul.mubr.f32.gmra.mrb[22].mxu0 %v11790_v31 }
 0x182   :  { %2424 = vmatprep.mubr.f32.mxu0 %v11173_v51  ;;  %v11811_v51 = vld [vmem:[%s16541_s0 + $0x9a] sm:$0xff]  ;;  %9628 = vmatpush1.bf16.msra.mxu0 %v9627_v7  ;;  %v1864_v7 = vld [vmem:[%s16542_s1 + $0x2e8] sm:$0xff] }
 0x183   :  { %9629 = vmatprep.subr.bf16.mxu0 %v16679_v15 }
 0x185   :  { %2425 = vmatmul.mubr.f32.gmra.mrb[24].mxu0 %v11798_v44 }
 0x186   :  { %2429 = vmatprep.mubr.f32.mxu0 %v11182_v53  ;;  %v11826_v53 = vld [vmem:[%s16541_s0 + $0xb2] sm:$0xff] }
 0x189   :  { %2430 = vmatmul.mubr.f32.gmra.mrb[26].mxu0 %v11811_v51 }
 0x18a   :  { %2434 = vmatprep.mubr.f32.mxu0 %v11191_v55  ;;  %v11833_v55 = vld [vmem:[%s16541_s0 + $0xc2] sm:$0xff] }
 0x18d   :  { %2435 = vmatmul.mubr.f32.gmra.mrb[28].mxu0 %v11819_v56 }
 0x18e   :  { %2439 = vmatprep.mubr.f32.mxu0 %v11206_v59  ;;  %v1859_v59 = vld [vmem:[%s16542_s1 + $0x2c0] sm:$0xff] }
 0x18f   :  { %v9630_v22 = vpack.c.bf16 %v1860_v62, %v1859_v59  ;;  %v11924_v62 = vld [vmem:[%s16541_s0 + $0x13a] sm:$0xff] }
 0x191   :  { %2440 = vmatmul.mubr.f32.gmra.mrb[30].mxu0 %v11826_v53 }
 0x192   :  { %2444 = vmatprep.mubr.f32.mxu0 %v11216_v63  ;;  %v11846_v63 = vld [vmem:[%s16541_s0 + $0xca] sm:$0xff]  ;;  %9631 = vmatpush1.bf16.msra.mxu0 %v9630_v22  ;;  %v1866_v22 = vld [vmem:[%s16542_s1 + $0x2f8] sm:$0xff] }
 0x193   :  { %9632 = vmatprep.subr.bf16.mxu0 %v16679_v15 }
 0x195   :  { %2445 = vmatmul.mubr.f32.gmra.mrb[32].mxu0 %v11833_v55 }
 0x196   :  { %2449 = vmatprep.mubr.f32.mxu0 %v11225_v2  ;;  %v11861_v2 = vld [vmem:[%s16541_s0 + $0xe2] sm:$0xff] }
 0x199   :  { %2450 = vmatmul.mubr.f32.gmra.mrb[34].mxu0 %v11846_v63 }
 0x19a   :  { %2454 = vmatprep.mubr.f32.mxu0 %v11234_v5  ;;  %v11868_v5 = vld [vmem:[%s16541_s0 + $0xf2] sm:$0xff] }
 0x19d   :  { %2455 = vmatmul.mubr.f32.gmra.mrb[36].mxu0 %v11854_v38 }
 0x19e   :  { %2459 = vmatprep.mubr.f32.mxu0 %v11249_v10  ;;  %v1861_v10 = vld [vmem:[%s16542_s1 + $0x2d0] sm:$0xff] }
 0x19f   :  { %v9633_v48 = vpack.c.bf16 %v1862_v4, %v1861_v10  ;;  %v8727_v4 = vld [vmem:[%s16541_s0 + $0x180] sm:$0xff] }
 0x1a1   :  { %2460 = vmatmul.mubr.f32.gmra.mrb[38].mxu0 %v11861_v2 }
 0x1a2   :  { %2464 = vmatprep.mubr.f32.mxu0 %v11259_v13  ;;  %v11881_v13 = vld [vmem:[%s16541_s0 + $0xfa] sm:$0xff]  ;;  %9634 = vmatpush1.bf16.msra.mxu0 %v9633_v48  ;;  %v8728_v48 = vld [vmem:[%s16541_s0 + $0x188] sm:$0xff] }
 0x1a3   :  { %9635 = vmatprep.subr.bf16.mxu0 %v16679_v15 }
 0x1a5   :  { %2465 = vmatmul.mubr.f32.gmra.mrb[40].mxu0 %v11868_v5 }
 0x1a6   :  { %2469 = vmatprep.mubr.f32.mxu0 %v11268_v16  ;;  %v11896_v16 = vld [vmem:[%s16541_s0 + $0x112] sm:$0xff] }
 0x1a9   :  { %2470 = vmatmul.mubr.f32.gmra.mrb[42].mxu0 %v11881_v13 }
 0x1aa   :  { %2474 = vmatprep.mubr.f32.mxu0 %v11277_v18  ;;  %v11903_v18 = vld [vmem:[%s16541_s0 + $0x122] sm:$0xff] }
 0x1ad   :  { %2475 = vmatmul.mubr.f32.gmra.mrb[44].mxu0 %v11889_v47 }
 0x1ae   :  { %2479 = vmatprep.mubr.f32.mxu0 %v11292_v23  ;;  %v1863_v23 = vld [vmem:[%s16542_s1 + $0x2e0] sm:$0xff] }
 0x1af   :  { %v9636_v59 = vpack.c.bf16 %v1864_v7, %v1863_v23  ;;  %v11970_v23 = vld [vmem:[%s16541_s0 + $0x172] sm:$0xff] }
 0x1b0   :  { %v329_v7 = vld [vmem:[%s16541_s0 + $0x1b2] sm:$0xff] }
 0x1b1   :  { %2480 = vmatmul.mubr.f32.gmra.mrb[46].mxu0 %v11896_v16 }
 0x1b2   :  { %2484 = vmatprep.mubr.f32.mxu0 %v11302_v27  ;;  %v11916_v27 = vld [vmem:[%s16541_s0 + $0x12a] sm:$0xff]  ;;  %9637 = vmatpush1.bf16.msra.mxu0 %v9636_v59  ;;  %v330_v59 = vld [vmem:[%s16541_s0 + $0x1ba] sm:$0xff] }
 0x1b3   :  { %9638 = vmatprep.subr.bf16.mxu0 %v16679_v15 }
 0x1b5   :  { %2485 = vmatmul.mubr.f32.gmra.mrb[48].mxu0 %v11903_v18 }
 0x1b6   :  { %2489 = vmatprep.mubr.f32.mxu0 %v11311_v30  ;;  %v11931_v30 = vld [vmem:[%s16541_s0 + $0x142] sm:$0xff] }
 0x1b9   :  { %2490 = vmatmul.mubr.f32.gmra.mrb[50].mxu0 %v11916_v27 }
 0x1ba   :  { %2494 = vmatprep.mubr.f32.mxu0 %v11320_v32  ;;  %v11938_v32 = vld [vmem:[%s16541_s0 + $0x152] sm:$0xff] }
 0x1bd   :  { %2495 = vmatmul.mubr.f32.gmra.mrb[52].mxu0 %v11924_v62 }
 0x1be   :  { %2499 = vmatprep.mubr.f32.mxu0 %v11335_v37  ;;  %v1865_v37 = vld [vmem:[%s16542_s1 + $0x2f0] sm:$0xff] }
 0x1bf   :  { %v9639_v10 = vpack.c.bf16 %v1866_v22, %v1865_v37  ;;  %v11985_v37 = vld [vmem:[%s16541_s0 + $0x1ca] sm:$0xff] }
 0x1c0   :  { %v16681_v22 = vld [vmem:[#allocation11_spill] sm:$0xff] }
 0x1c1   :  { %2500 = vmatmul.mubr.f32.gmra.mrb[54].mxu0 %v11931_v30 }
 0x1c2   :  { %2504 = vmatprep.mubr.f32.mxu0 %v11345_v41  ;;  %v11951_v41 = vld [vmem:[%s16541_s0 + $0x15a] sm:$0xff]  ;;  %9640 = vmatpush1.bf16.msra.mxu0 %v9639_v10  ;;  %v16682_v10 = vld [vmem:[#allocation12_spill] sm:$0xff] }
 0x1c3   :  { %9641 = vmatprep.subr.bf16.mxu0 %v16679_v15 }
 0x1c5   :  { %2505 = vmatmul.mubr.f32.gmra.mrb[56].mxu0 %v11938_v32 }
 0x1c6   :  { %2509 = vmatprep.mubr.f32.mxu0 %v11354_v45  ;;  %v11961_v45 = vld [vmem:[%s16541_s0 + $0x16a] sm:$0xff] }
 0x1c9   :  { %2510 = vmatmul.mubr.f32.gmra.mrb[58].mxu0 %v11951_v41 }
 0x1ca   :  { %2514 = vmatprep.mubr.f32.mxu0 %v8727_v4  ;;  %v12167_v4 = vld [vmem:[%s16541_s0 + $0x302] sm:$0xff] }
 0x1cd   :  { %2515 = vmatmul.mubr.f32.gmra.mrb[60].mxu0 %v11961_v45 }
 0x1ce   :  { %2519 = vmatprep.mubr.f32.mxu0 %v8728_v48  ;;  %v16684_v48 = vld [vmem:[#allocation13_spill] sm:$0xff] }
 0x1d1   :  { %2520 = vmatmul.mubr.f32.gmra.mrb[62].mxu0 %v11970_v23 }
 0x1d2   :  { %2524 = vmatprep.mubr.f32.mxu0 %v11375_v54  ;;  %v11992_v54 = vld [vmem:[%s16541_s0 + $0x1d2] sm:$0xff] }
 0x1d5   :  { %2525 = vmatmul.mubr.f32.gmra.mrb[64].mxu0 %v329_v7  ;;  %v12174_v7 = vld [vmem:[%s16541_s0 + $0x30a] sm:$0xff] }
 0x1d6   :  { %2529 = vmatprep.mubr.f32.mxu0 %v11384_v57  ;;  %v11999_v57 = vld [vmem:[%s16541_s0 + $0x1e2] sm:$0xff]  ;;  %16685 = vst [vmem:[#allocation11_spill] sm:$0xff] %v12174_v7 }
 0x1d9   :  { %2530 = vmatmul.mubr.f32.gmra.mrb[66].mxu0 %v330_v59  ;;  %v8759_v59 = vld [vmem:[%s16541_s0 + $0x330] sm:$0xff] }
 0x1da   :  { %2534 = vmatprep.mubr.f32.mxu0 %v11393_v60  ;;  %v12006_v60 = vld [vmem:[%s16541_s0 + $0x1ea] sm:$0xff] }
 0x1dd   :  { %2535 = vmatmul.mubr.f32.gmra.mrb[68].mxu0 %v11985_v37 }
 0x1de   :  { %2539 = vmatprep.mubr.f32.mxu0 %v11402_v1  ;;  %v12013_v1 = vld [vmem:[%s16541_s0 + $0x1fa] sm:$0xff] }
 0x1e1   :  { %2540 = vmatmul.mubr.f32.gmra.mrb[70].mxu0 %v11992_v54 }
 0x1e2   :  { %2544 = vmatprep.mubr.f32.mxu0 %v11411_v6  ;;  %v12020_v6 = vld [vmem:[%s16541_s0 + $0x202] sm:$0xff] }
 0x1e5   :  { %2545 = vmatmul.mubr.f32.gmra.mrb[72].mxu0 %v11999_v57 }
 0x1e6   :  { %2549 = vmatprep.mubr.f32.mxu0 %v11420_v8  ;;  %v12027_v8 = vld [vmem:[%s16541_s0 + $0x212] sm:$0xff] }
 0x1e9   :  { %2550 = vmatmul.mubr.f32.gmra.mrb[74].mxu0 %v12006_v60 }
 0x1ea   :  { %2554 = vmatprep.mubr.f32.mxu0 %v11429_v12  ;;  %v12034_v12 = vld [vmem:[%s16541_s0 + $0x21a] sm:$0xff] }
 0x1ed   :  { %2555 = vmatmul.mubr.f32.gmra.mrb[76].mxu0 %v12013_v1 }
 0x1ee   :  { %2559 = vmatprep.mubr.f32.mxu0 %v11438_v17  ;;  %v12041_v17 = vld [vmem:[%s16541_s0 + $0x22a] sm:$0xff] }
 0x1f1   :  { %2560 = vmatmul.mubr.f32.gmra.mrb[78].mxu0 %v12020_v6 }
 0x1f2   :  { %2564 = vmatprep.mubr.f32.mxu0 %v11447_v21  ;;  %v12048_v21 = vld [vmem:[%s16541_s0 + $0x232] sm:$0xff] }
 0x1f5   :  { %2565 = vmatmul.mubr.f32.gmra.mrb[80].mxu0 %v12027_v8 }
 0x1f6   :  { %2569 = vmatprep.mubr.f32.mxu0 %v11456_v25  ;;  %v12055_v25 = vld [vmem:[%s16541_s0 + $0x242] sm:$0xff] }
 0x1f9   :  { %2570 = vmatmul.mubr.f32.gmra.mrb[82].mxu0 %v12034_v12 }
 0x1fa   :  { %2574 = vmatprep.mubr.f32.mxu0 %v11465_v28  ;;  %v12062_v28 = vld [vmem:[%s16541_s0 + $0x24a] sm:$0xff] }
 0x1fd   :  { %2575 = vmatmul.mubr.f32.gmra.mrb[84].mxu0 %v12041_v17 }
 0x1fe   :  { %2579 = vmatprep.mubr.f32.mxu0 %v11474_v33  ;;  %v12069_v33 = vld [vmem:[%s16541_s0 + $0x25a] sm:$0xff] }
 0x201   :  { %2580 = vmatmul.mubr.f32.gmra.mrb[86].mxu0 %v12048_v21 }
 0x202   :  { %2584 = vmatprep.mubr.f32.mxu0 %v11483_v36  ;;  %v12076_v36 = vld [vmem:[%s16541_s0 + $0x262] sm:$0xff] }
 0x205   :  { %2585 = vmatmul.mubr.f32.gmra.mrb[88].mxu0 %v12055_v25 }
 0x206   :  { %2589 = vmatprep.mubr.f32.mxu0 %v11492_v40  ;;  %v12083_v40 = vld [vmem:[%s16541_s0 + $0x272] sm:$0xff] }
 0x209   :  { %2590 = vmatmul.mubr.f32.gmra.mrb[90].mxu0 %v12062_v28 }
 0x20a   :  { %2594 = vmatprep.mubr.f32.mxu0 %v11501_v46  ;;  %v12090_v46 = vld [vmem:[%s16541_s0 + $0x27a] sm:$0xff] }
 0x20d   :  { %2595 = vmatmul.mubr.f32.gmra.mrb[92].mxu0 %v12069_v33 }
 0x20e   :  { %2599 = vmatprep.mubr.f32.mxu0 %v11510_v49  ;;  %v12097_v49 = vld [vmem:[%s16541_s0 + $0x28a] sm:$0xff] }
 0x211   :  { %2600 = vmatmul.mubr.f32.gmra.mrb[94].mxu0 %v12076_v36 }
 0x212   :  { %2604 = vmatprep.mubr.f32.mxu0 %v11519_v52  ;;  %v12104_v52 = vld [vmem:[%s16541_s0 + $0x292] sm:$0xff] }
 0x215   :  { %2605 = vmatmul.mubr.f32.gmra.mrb[96].mxu0 %v12083_v40 }
 0x216   :  { %2609 = vmatprep.mubr.f32.mxu0 %v11528_v58  ;;  %v12111_v58 = vld [vmem:[%s16541_s0 + $0x2a2] sm:$0xff] }
 0x219   :  { %2610 = vmatmul.mubr.f32.gmra.mrb[98].mxu0 %v12090_v46 }
 0x21a   :  { %2614 = vmatprep.mubr.f32.mxu0 %v11537_v3  ;;  %v12118_v3 = vld [vmem:[%s16541_s0 + $0x2aa] sm:$0xff] }
 0x21d   :  { %2615 = vmatmul.mubr.f32.gmra.mrb[100].mxu0 %v12097_v49 }
 0x21e   :  { %2619 = vmatprep.mubr.f32.mxu0 %v11546_v11  ;;  %v12125_v11 = vld [vmem:[%s16541_s0 + $0x2ba] sm:$0xff] }
 0x221   :  { %2620 = vmatmul.mubr.f32.gmra.mrb[102].mxu0 %v12104_v52 }
 0x222   :  { %2624 = vmatprep.mubr.f32.mxu0 %v11555_v20  ;;  %v12132_v20 = vld [vmem:[%s16541_s0 + $0x2c2] sm:$0xff] }
 0x225   :  { %2625 = vmatmul.mubr.f32.gmra.mrb[104].mxu0 %v12111_v58 }
 0x226   :  { %2629 = vmatprep.mubr.f32.mxu0 %v11564_v26  ;;  %v12139_v26 = vld [vmem:[%s16541_s0 + $0x2d2] sm:$0xff] }
 0x229   :  { %2630 = vmatmul.mubr.f32.gmra.mrb[106].mxu0 %v12118_v3 }
 0x22a   :  { %2634 = vmatprep.mubr.f32.mxu0 %v11573_v35  ;;  %v12146_v35 = vld [vmem:[%s16541_s0 + $0x2da] sm:$0xff] }
 0x22d   :  { %2635 = vmatmul.mubr.f32.gmra.mrb[108].mxu0 %v12125_v11 }
 0x22e   :  { %2639 = vmatprep.mubr.f32.mxu0 %v11582_v43  ;;  %v16680_v43 = vld [vmem:[#allocation10_spill] sm:$0xff] }
 0x22f   :  { %16683 = vst [vmem:[#allocation10_spill] sm:$0xff] %v12167_v4 }
 0x231   :  { %2640 = vmatmul.mubr.f32.gmra.mrb[110].mxu0 %v12132_v20 }
 0x232   :  { %2644 = vmatprep.mubr.f32.mxu0 %v11591_v50  ;;  %v12153_v50 = vld [vmem:[%s16541_s0 + $0x2ea] sm:$0xff] }
 0x235   :  { %2645 = vmatmul.mubr.f32.gmra.mrb[112].mxu0 %v12139_v26 }
 0x236   :  { %2649 = vmatprep.mubr.f32.mxu0 %v11600_v61  ;;  %v12160_v61 = vld [vmem:[%s16541_s0 + $0x2f2] sm:$0xff] }
 0x239   :  { %2650 = vmatmul.mubr.f32.gmra.mrb[114].mxu0 %v12146_v35 }
 0x23a   :  { %2654 = vmatprep.mubr.f32.mxu0 %v16680_v43  ;;  %v12183_v43 = vld [vmem:[%s16541_s0 + $0x31a] sm:$0xff] }
 0x23b   :  { %16686 = vst [vmem:[#allocation12_spill] sm:$0xff] %v12183_v43 }
 0x23d   :  { %2655 = vmatmul.mubr.f32.gmra.mrb[116].mxu0 %v12153_v50 }
 0x23e   :  { %2659 = vmatprep.mubr.f32.mxu0 %v16681_v22  ;;  %v8760_v22 = vld [vmem:[%s16541_s0 + $0x338] sm:$0xff] }
 0x241   :  { %2660 = vmatmul.mubr.f32.gmra.mrb[118].mxu0 %v12160_v61 }
 0x242   :  { %2664 = vmatprep.mubr.f32.mxu0 %v16682_v10  ;;  %v12192_v10 = vld [vmem:[%s16541_s0 + $0x322] sm:$0xff] }
 0x243   :  { %16687 = vst [vmem:[#allocation13_spill] sm:$0xff] %v12192_v10 }
 0x245   :  { %2665 = vmatmul.mubr.f32.gmra.mrb[120].mxu0 %v12167_v4  ;;  %v1870_v4 = vld [vmem:[%s16542_s1 + $0x318] sm:$0xff] }
 0x246   :  { %2669 = vmatprep.mubr.f32.mxu0 %v16684_v48  ;;  %v1867_v48 = vld [vmem:[%s16542_s1 + $0x300] sm:$0xff] }
 0x249   :  { %2670 = vmatmul.mubr.f32.gmra.mrb[122].mxu0 %v12174_v7  ;;  %v1869_v7 = vld [vmem:[%s16542_s1 + $0x310] sm:$0xff] }
 0x24a   :  { %2674 = vmatprep.mubr.f32.mxu0 %v8759_v59  ;;  %v1868_v59 = vld [vmem:[%s16542_s1 + $0x308] sm:$0xff] }
 0x24d   :  { %2675 = vmatmul.mubr.f32.gmra.mrb[124].mxu0 %v12183_v43  ;;  %v9642_v43 = vpack.c.bf16 %v1868_v59, %v1867_v48  ;;  %v1871_v48 = vld [vmem:[%s16542_s1 + $0x320] sm:$0xff]  ;;  %v1872_v59 = vld [vmem:[%s16542_s1 + $0x328] sm:$0xff] }
 0x24e   :  { %2679 = vmatprep.mubr.f32.mxu0 %v8760_v22  ;;  %v8761_v22 = vld [vmem:[%s16541_s0 + $0x19] sm:$0xff] }
 0x251   :  { %2680 = vmatmul.mubr.f32.gmra.mrb[126].mxu0 %v12192_v10  ;;  %v9645_v10 = vpack.c.bf16 %v1870_v4, %v1869_v7  ;;  %v9648_v4 = vpack.c.bf16 %v1872_v59, %v1871_v48  ;;  %v1873_v7 = vld [vmem:[%s16542_s1 + $0x330] sm:$0xff] }
 0x252   :  { %2749 = vmatprep.mubr.f32.mxu0 %v11670_v0  ;;  %v8762_v0 = vld [vmem:[%s16541_s0 + $0x21] sm:$0xff]  ;;  %v1877_v59 = vld [vmem:[%s16542_s1 + $0x350] sm:$0xff] }
 0x255   :  { %2750 = vmatmul.mubr.f32.vlgmr.msra.gmra.mrb[0].mxu0 %v8761_v22  ;;  %v1875_v22 = vld [vmem:[%s16542_s1 + $0x340] sm:$0xff] }
 0x256   :  { %9643 = vmatpush1.bf16.msra.mxu0 %v9642_v43  ;;  %2754 = vmatprep.mubr.f32.mxu0 %v11684_v9  ;;  %v12226_v9 = vld [vmem:[%s16541_s0 + $0x31] sm:$0xff] }
 0x257   :  { %9644 = vmatprep.subr.bf16.mxu0 %v16679_v15  ;;  %v1874_v43 = vld [vmem:[%s16542_s1 + $0x338] sm:$0xff] }
 0x259   :  { %2755 = vmatmul.mubr.f32.gmra.mrb[2].mxu0 %v8762_v0  ;;  %v1876_v0 = vld [vmem:[%s16542_s1 + $0x348] sm:$0xff] }
 0x25a   :  { %2759 = vmatprep.mubr.f32.mxu0 %v11698_v14  ;;  %9646 = vmatpush1.bf16.msra.mxu0 %v9645_v10  ;;  %v12240_v14 = vld [vmem:[%s16541_s0 + $0x39] sm:$0xff]  ;;  %v9651_v10 = vpack.c.bf16 %v1874_v43, %v1873_v7  ;;  %v9654_v48 = vpack.c.bf16 %v1876_v0, %v1875_v22  ;;  %v1881_v0 = vld [vmem:[%s16542_s1 + $0x370] sm:$0xff] }
 0x25b   :  { %9647 = vmatprep.subr.bf16.mxu0 %v16679_v15  ;;  %v1879_v43 = vld [vmem:[%s16542_s1 + $0x360] sm:$0xff] }
 0x25d   :  { %2760 = vmatmul.mubr.f32.gmra.mrb[4].mxu0 %v12226_v9 }
 0x25e   :  { %2764 = vmatprep.mubr.f32.mxu0 %v11712_v19  ;;  %9649 = vmatpush1.bf16.msra.mxu0 %v9648_v4  ;;  %v12254_v19 = vld [vmem:[%s16541_s0 + $0x49] sm:$0xff]  ;;  %v1878_v4 = vld [vmem:[%s16542_s1 + $0x358] sm:$0xff] }
 0x25f   :  { %9650 = vmatprep.subr.bf16.mxu0 %v16679_v15  ;;  %v9657_v7 = vpack.c.bf16 %v1878_v4, %v1877_v59  ;;  %v1883_v4 = vld [vmem:[%s16542_s1 + $0x380] sm:$0xff] }
 0x261   :  { %2765 = vmatmul.mubr.f32.gmra.mrb[6].mxu0 %v12240_v14 }
 0x262   :  { %2769 = vmatprep.mubr.f32.mxu0 %v11726_v24  ;;  %9652 = vmatpush1.bf16.msra.mxu0 %v9651_v10  ;;  %v12268_v24 = vld [vmem:[%s16541_s0 + $0x51] sm:$0xff]  ;;  %v1880_v10 = vld [vmem:[%s16542_s1 + $0x368] sm:$0xff] }
 0x263   :  { %9653 = vmatprep.subr.bf16.mxu0 %v16679_v15  ;;  %v9660_v22 = vpack.c.bf16 %v1880_v10, %v1879_v43  ;;  %v1885_v10 = vld [vmem:[%s16542_s1 + $0x390] sm:$0xff] }
 0x265   :  { %2770 = vmatmul.mubr.f32.gmra.mrb[8].mxu0 %v12254_v19 }
 0x266   :  { %2774 = vmatprep.mubr.f32.mxu0 %v11740_v29  ;;  %9655 = vmatpush1.bf16.msra.mxu0 %v9654_v48  ;;  %v12282_v29 = vld [vmem:[%s16541_s0 + $0x61] sm:$0xff]  ;;  %v1882_v48 = vld [vmem:[%s16542_s1 + $0x378] sm:$0xff] }
 0x267   :  { %9656 = vmatprep.subr.bf16.mxu0 %v16679_v15  ;;  %v9663_v59 = vpack.c.bf16 %v1882_v48, %v1881_v0  ;;  %v1887_v48 = vld [vmem:[%s16542_s1 + $0x3a0] sm:$0xff] }
 0x269   :  { %2775 = vmatmul.mubr.f32.gmra.mrb[10].mxu0 %v12268_v24 }
 0x26a   :  { %2779 = vmatprep.mubr.f32.mxu0 %v11754_v34  ;;  %9658 = vmatpush1.bf16.msra.mxu0 %v9657_v7  ;;  %v12296_v34 = vld [vmem:[%s16541_s0 + $0x69] sm:$0xff] }
 0x26b   :  { %9659 = vmatprep.subr.bf16.mxu0 %v16679_v15  ;;  %v1884_v7 = vld [vmem:[%s16542_s1 + $0x388] sm:$0xff] }
 0x26c   :  { %v9666_v43 = vpack.c.bf16 %v1884_v7, %v1883_v4  ;;  %v12346_v7 = vld [vmem:[%s16541_s0 + $0x99] sm:$0xff] }
 0x26d   :  { %2780 = vmatmul.mubr.f32.gmra.mrb[12].mxu0 %v12282_v29 }
 0x26e   :  { %2784 = vmatprep.mubr.f32.mxu0 %v11768_v39  ;;  %9661 = vmatpush1.bf16.msra.mxu0 %v9660_v22  ;;  %v12310_v39 = vld [vmem:[%s16541_s0 + $0x79] sm:$0xff] }
 0x26f   :  { %9662 = vmatprep.subr.bf16.mxu0 %v16679_v15  ;;  %v1886_v22 = vld [vmem:[%s16542_s1 + $0x398] sm:$0xff] }
 0x270   :  { %v9669_v0 = vpack.c.bf16 %v1886_v22, %v1885_v10  ;;  %v12375_v22 = vld [vmem:[%s16541_s0 + $0xc1] sm:$0xff] }
 0x271   :  { %2785 = vmatmul.mubr.f32.gmra.mrb[14].mxu0 %v12296_v34 }
 0x272   :  { %2789 = vmatprep.mubr.f32.mxu0 %v11782_v42  ;;  %9664 = vmatpush1.bf16.msra.mxu0 %v9663_v59  ;;  %v12324_v42 = vld [vmem:[%s16541_s0 + $0x81] sm:$0xff] }
 0x273   :  { %9665 = vmatprep.subr.bf16.mxu0 %v16679_v15  ;;  %v1888_v59 = vld [vmem:[%s16542_s1 + $0x3a8] sm:$0xff] }
 0x274   :  { %v9672_v4 = vpack.c.bf16 %v1888_v59, %v1887_v48  ;;  %v12410_v59 = vld [vmem:[%s16541_s0 + $0xf1] sm:$0xff] }
 0x275   :  { %2790 = vmatmul.mubr.f32.gmra.mrb[16].mxu0 %v12310_v39 }
 0x276   :  { %2794 = vmatprep.mubr.f32.mxu0 %v11790_v31  ;;  %9667 = vmatpush1.bf16.msra.mxu0 %v9666_v43  ;;  %v12338_v31 = vld [vmem:[%s16541_s0 + $0x91] sm:$0xff] }
 0x277   :  { %9668 = vmatprep.subr.bf16.mxu0 %v16679_v15  ;;  %v1890_v43 = vld [vmem:[%s16542_s1 + $0x3b8] sm:$0xff] }
 0x279   :  { %2795 = vmatmul.mubr.f32.gmra.mrb[18].mxu0 %v12324_v42 }
 0x27a   :  { %2799 = vmatprep.mubr.f32.mxu0 %v11798_v44  ;;  %9670 = vmatpush1.bf16.msra.mxu0 %v9669_v0  ;;  %v12354_v44 = vld [vmem:[%s16541_s0 + $0xa9] sm:$0xff] }
 0x27b   :  { %9671 = vmatprep.subr.bf16.mxu0 %v16679_v15  ;;  %v1892_v0 = vld [vmem:[%s16542_s1 + $0x3c8] sm:$0xff] }
 0x27d   :  { %2800 = vmatmul.mubr.f32.gmra.mrb[20].mxu0 %v12338_v31 }
 0x27e   :  { %2804 = vmatprep.mubr.f32.mxu0 %v11811_v51  ;;  %9673 = vmatpush1.bf16.msra.mxu0 %v9672_v4  ;;  %v1889_v51 = vld [vmem:[%s16542_s1 + $0x3b0] sm:$0xff]  ;;  %v1894_v4 = vld [vmem:[%s16542_s1 + $0x3d8] sm:$0xff] }
 0x27f   :  { %9674 = vmatprep.subr.bf16.mxu0 %v16679_v15  ;;  %v9675_v10 = vpack.c.bf16 %v1890_v43, %v1889_v51  ;;  %v12445_v43 = vld [vmem:[%s16541_s0 + $0x121] sm:$0xff] }
 0x281   :  { %2805 = vmatmul.mubr.f32.gmra.mrb[22].mxu0 %v12346_v7 }
 0x282   :  { %2809 = vmatprep.mubr.f32.mxu0 %v11819_v56  ;;  %v12367_v56 = vld [vmem:[%s16541_s0 + $0xb1] sm:$0xff]  ;;  %9676 = vmatpush1.bf16.msra.mxu0 %v9675_v10  ;;  %v1900_v10 = vld [vmem:[%s16542_s1 + $0x408] sm:$0xff] }
 0x283   :  { %9677 = vmatprep.subr.bf16.mxu0 %v16679_v15 }
 0x285   :  { %2810 = vmatmul.mubr.f32.gmra.mrb[24].mxu0 %v12354_v44 }
 0x286   :  { %2814 = vmatprep.mubr.f32.mxu0 %v11826_v53  ;;  %v12382_v53 = vld [vmem:[%s16541_s0 + $0xc9] sm:$0xff] }
 0x289   :  { %2815 = vmatmul.mubr.f32.gmra.mrb[26].mxu0 %v12367_v56 }
 0x28a   :  { %2819 = vmatprep.mubr.f32.mxu0 %v11833_v55  ;;  %v12389_v55 = vld [vmem:[%s16541_s0 + $0xd9] sm:$0xff] }
 0x28d   :  { %2820 = vmatmul.mubr.f32.gmra.mrb[28].mxu0 %v12375_v22 }
 0x28e   :  { %2824 = vmatprep.mubr.f32.mxu0 %v11846_v63  ;;  %v1891_v63 = vld [vmem:[%s16542_s1 + $0x3c0] sm:$0xff] }
 0x28f   :  { %v9678_v48 = vpack.c.bf16 %v1892_v0, %v1891_v63  ;;  %v1895_v0 = vld [vmem:[%s16542_s1 + $0x3e0] sm:$0xff] }
 0x291   :  { %2825 = vmatmul.mubr.f32.gmra.mrb[30].mxu0 %v12382_v53 }
 0x292   :  { %2829 = vmatprep.mubr.f32.mxu0 %v11854_v38  ;;  %v12402_v38 = vld [vmem:[%s16541_s0 + $0xe1] sm:$0xff]  ;;  %9679 = vmatpush1.bf16.msra.mxu0 %v9678_v48 }
 0x293   :  { %9680 = vmatprep.subr.bf16.mxu0 %v16679_v15  ;;  %v1896_v48 = vld [vmem:[%s16542_s1 + $0x3e8] sm:$0xff] }
 0x295   :  { %2830 = vmatmul.mubr.f32.gmra.mrb[32].mxu0 %v12389_v55 }
 0x296   :  { %2834 = vmatprep.mubr.f32.mxu0 %v11861_v2  ;;  %v12417_v2 = vld [vmem:[%s16541_s0 + $0xf9] sm:$0xff] }
 0x299   :  { %2835 = vmatmul.mubr.f32.gmra.mrb[34].mxu0 %v12402_v38 }
 0x29a   :  { %2839 = vmatprep.mubr.f32.mxu0 %v11868_v5  ;;  %v12424_v5 = vld [vmem:[%s16541_s0 + $0x109] sm:$0xff] }
 0x29d   :  { %2840 = vmatmul.mubr.f32.gmra.mrb[36].mxu0 %v12410_v59 }
 0x29e   :  { %2844 = vmatprep.mubr.f32.mxu0 %v11881_v13  ;;  %v1893_v13 = vld [vmem:[%s16542_s1 + $0x3d0] sm:$0xff] }
 0x29f   :  { %v9681_v51 = vpack.c.bf16 %v1894_v4, %v1893_v13  ;;  %v12481_v13 = vld [vmem:[%s16541_s0 + $0x141] sm:$0xff]  ;;  %v9684_v4 = vpack.c.bf16 %v1896_v48, %v1895_v0  ;;  %v1905_v48 = vld [vmem:[%s16542_s1 + $0x430] sm:$0xff] }
 0x2a1   :  { %2845 = vmatmul.mubr.f32.gmra.mrb[38].mxu0 %v12417_v2 }
 0x2a2   :  { %2849 = vmatprep.mubr.f32.mxu0 %v11889_v47  ;;  %v12437_v47 = vld [vmem:[%s16541_s0 + $0x111] sm:$0xff]  ;;  %9682 = vmatpush1.bf16.msra.mxu0 %v9681_v51 }
 0x2a3   :  { %9683 = vmatprep.subr.bf16.mxu0 %v16679_v15  ;;  %v1902_v51 = vld [vmem:[%s16542_s1 + $0x418] sm:$0xff] }
 0x2a5   :  { %2850 = vmatmul.mubr.f32.gmra.mrb[40].mxu0 %v12424_v5 }
 0x2a6   :  { %2854 = vmatprep.mubr.f32.mxu0 %v11896_v16  ;;  %v12452_v16 = vld [vmem:[%s16541_s0 + $0x129] sm:$0xff]  ;;  %9685 = vmatpush1.bf16.msra.mxu0 %v9684_v4 }
 0x2a7   :  { %9686 = vmatprep.subr.bf16.mxu0 %v16679_v15 }
 0x2a9   :  { %2855 = vmatmul.mubr.f32.gmra.mrb[42].mxu0 %v12437_v47 }
 0x2aa   :  { %2859 = vmatprep.mubr.f32.mxu0 %v11903_v18  ;;  %v1899_v18 = vld [vmem:[%s16542_s1 + $0x400] sm:$0xff] }
 0x2ab   :  { %v9689_v63 = vpack.c.bf16 %v1900_v10, %v1899_v18  ;;  %v1903_v10 = vld [vmem:[%s16542_s1 + $0x420] sm:$0xff] }
 0x2ad   :  { %2860 = vmatmul.mubr.f32.gmra.mrb[44].mxu0 %v12445_v43  ;;  %9690 = vmatprep.subr.bf16.mxu1 %v9689_v63 }
 0x2ae   :  { %2864 = vmatprep.mubr.f32.mxu0 %v11916_v27  ;;  %v12465_v27 = vld [vmem:[%s16541_s0 + $0x139] sm:$0xff]  ;;  %9692 = vmatpush3.bf16.msra.mxu1 %v9689_v63  ;;  %v12497_v63 = vld [vmem:[%s16541_s0 + $0x151] sm:$0xff] }
 0x2b1   :  { %2865 = vmatmul.mubr.f32.gmra.mrb[46].mxu0 %v12452_v16 }
 0x2b2   :  { %2869 = vmatprep.mubr.f32.mxu0 %v11924_v62  ;;  %v1901_v62 = vld [vmem:[%s16542_s1 + $0x410] sm:$0xff] }
 0x2b3   :  { %v9693_v18 = vpack.c.bf16 %v1902_v51, %v1901_v62  ;;  %v12511_v62 = vld [vmem:[%s16541_s0 + $0x159] sm:$0xff] }
 0x2b4   :  { %v1907_v51 = vld [vmem:[%s16542_s1 + $0x440] sm:$0xff] }
 0x2b5   :  { %2870 = vmatmul.mubr.f32.gmra.mrb[48].mxu0 %v12465_v27  ;;  %9694 = vmatprep.subr.bf16.mxu1 %v9693_v18 }
 0x2b6   :  { %2874 = vmatprep.mubr.f32.mxu0 %v11931_v30  ;;  %v1904_v30 = vld [vmem:[%s16542_s1 + $0x428] sm:$0xff]  ;;  %9696 = vmatpush3.bf16.msra.mxu1 %v9693_v18 }
 0x2b7   :  { %v9697_v0 = vpack.c.bf16 %v1904_v30, %v1903_v10  ;;  %v1908_v18 = vld [vmem:[%s16542_s1 + $0x448] sm:$0xff]  ;;  %v1897_v30 = vld [vmem:[%s16542_s1 + $0x3f0] sm:$0xff] }
 0x2b8   :  { %v9705_v10 = vpack.c.bf16 %v1908_v18, %v1907_v51  ;;  %v12548_v51 = vld [vmem:[%s16541_s0 + $0x182] sm:$0xff] }
 0x2b9   :  { %2875 = vmatmul.mubr.f32.gmra.mrb[50].mxu0 %v12481_v13  ;;  %9698 = vmatprep.subr.bf16.mxu1 %v9697_v0 }
 0x2ba   :  { %2879 = vmatprep.mubr.f32.mxu0 %v11938_v32  ;;  %v1906_v32 = vld [vmem:[%s16542_s1 + $0x438] sm:$0xff]  ;;  %9700 = vmatpush3.bf16.msra.mxu1 %v9697_v0 }
 0x2bb   :  { %v9701_v4 = vpack.c.bf16 %v1906_v32, %v1905_v48  ;;  %v1898_v0 = vld [vmem:[%s16542_s1 + $0x3f8] sm:$0xff] }
 0x2bc   :  { %v12540_v48 = vld [vmem:[%s16541_s0 + $0x171] sm:$0xff]  ;;  %v9687_v32 = vpack.c.bf16 %v1898_v0, %v1897_v30  ;;  %v12561_v30 = vld [vmem:[%s16541_s0 + $0x181] sm:$0xff] }
 0x2bd   :  { %2880 = vmatmul.mubr.f32.gmra.mrb[52].mxu0 %v12497_v63  ;;  %9702 = vmatprep.subr.bf16.mxu1 %v9701_v4  ;;  %16688 = vst [vmem:[#allocation14_spill] sm:$0xff] %v12540_v48  ;;  %16689 = vst [vmem:[#allocation15_spill] sm:$0xff] %v12561_v30 }
 0x2be   :  { %2884 = vmatprep.mubr.f32.mxu0 %v11951_v41  ;;  %v12524_v41 = vld [vmem:[%s16541_s0 + $0x169] sm:$0xff]  ;;  %9704 = vmatpush3.bf16.msra.mxu1 %v9701_v4  ;;  %v1910_v4 = vld [vmem:[%s16542_s1 + $0x458] sm:$0xff] }
 0x2bf   :  { %9706 = vmatprep.subr.bf16.mxu1 %v9705_v10  ;;  %9688 = vmatpush1.bf16.msra.mxu0 %v9687_v32  ;;  %v1913_v32 = vld [vmem:[%s16542_s1 + $0x470] sm:$0xff] }
 0x2c1   :  { %2885 = vmatmul.mubr.f32.gmra.mrb[54].mxu0 %v12511_v62 }
 0x2c2   :  { %2889 = vmatprep.mubr.f32.mxu0 %v11961_v45  ;;  %v1909_v45 = vld [vmem:[%s16542_s1 + $0x450] sm:$0xff]  ;;  %9708 = vmatpush3.bf16.msra.mxu1 %v9705_v10  ;;  %v1912_v10 = vld [vmem:[%s16542_s1 + $0x468] sm:$0xff] }
 0x2c3   :  { %v9709_v18 = vpack.c.bf16 %v1910_v4, %v1909_v45  ;;  %v12566_v45 = vld [vmem:[%s16541_s0 + $0x18a] sm:$0xff]  ;;  %v1914_v4 = vld [vmem:[%s16542_s1 + $0x478] sm:$0xff] }
 0x2c5   :  { %2890 = vmatmul.mubr.f32.gmra.mrb[56].mxu0 %v12524_v41  ;;  %9710 = vmatprep.subr.bf16.mxu1 %v9709_v18 }
 0x2c6   :  { %2894 = vmatprep.mubr.f32.mxu0 %v11970_v23  ;;  %v1911_v23 = vld [vmem:[%s16542_s1 + $0x460] sm:$0xff]  ;;  %9712 = vmatpush3.bf16.msra.mxu1 %v9709_v18  ;;  %v12579_v18 = vld [vmem:[%s16541_s0 + $0x189] sm:$0xff] }
 0x2c7   :  { %v9713_v0 = vpack.c.bf16 %v1912_v10, %v1911_v23  ;;  %v9717_v23 = vpack.c.bf16 %v1914_v4, %v1913_v32  ;;  %v9017_v10 = vld [vmem:[%s16541_s0 + $0x32] sm:$0xff]  ;;  %v12604_v32 = vld [vmem:[%s16541_s0 + $0x1e1] sm:$0xff] }
 0x2c8   :  { %9273 = vmatprep.mubr.f32.mxu1 %v9017_v10  ;;  %v12634_v4 = vld [vmem:[%s16541_s0 + $0x201] sm:$0xff]  ;;  %v12654_v10 = vld [vmem:[%s16541_s0 + $0x219] sm:$0xff] }
 0x2c9   :  { %2895 = vmatmul.mubr.f32.gmra.mrb[58].mxu0 %v12540_v48  ;;  %9714 = vmatprep.subr.bf16.mxu1 %v9713_v0  ;;  %v9018_v48 = vld [vmem:[%s16541_s0 + $0x3a] sm:$0xff] }
 0x2ca   :  { %2899 = vmatprep.mubr.f32.mxu0 %v12548_v51  ;;  %9716 = vmatpush3.bf16.msra.mxu1 %v9713_v0  ;;  %v9019_v0 = vld [vmem:[%s16541_s0 + $0x4a] sm:$0xff] }
 0x2cb   :  { %9718 = vmatprep.subr.bf16.mxu1 %v9717_v23 }
 0x2cd   :  { %2900 = vmatmul.mubr.f32.gmra.mrb[60].mxu0 %v12561_v30  ;;  %v8793_v30 = vld [vmem:[%s16541_s0 + $0x1c9] sm:$0xff] }
 0x2ce   :  { %2904 = vmatprep.mubr.f32.mxu0 %v12566_v45  ;;  %9720 = vmatpush3.bf16.msra.mxu1 %v9717_v23  ;;  %v12644_v23 = vld [vmem:[%s16541_s0 + $0x211] sm:$0xff] }
 0x2cf   :  { %9721 = vmatprep.subr.bf16.mxu1 %v16679_v15  ;;  %v8890_v15 = vld [vmem:[%s16541_s0 + $0x38] sm:$0xff] }
 0x2d1   :  { %2905 = vmatmul.mubr.f32.gmra.mrb[62].mxu0 %v12579_v18  ;;  %9274 = vmatmul.mubr.f32.vlgmr.msra.gmra.mrb[0].mxu1 %v9018_v48  ;;  %v12614_v48 = vld [vmem:[%s16541_s0 + $0x1e9] sm:$0xff] }
 0x2d2   :  { %2909 = vmatprep.mubr.f32.mxu0 %v11985_v37  ;;  %v8794_v37 = vld [vmem:[%s16541_s0 + $0x1d1] sm:$0xff]  ;;  %9276 = vmatprep.mubr.f32.mxu1 %v9019_v0 }
 0x2d3   :  { %v12674_v0 = vld [vmem:[%s16541_s0 + $0x231] sm:$0xff] }
 0x2d5   :  { %2910 = vmatmul.mubr.f32.gmra.mrb[64].mxu0 %v8793_v30  ;;  %v12624_v30 = vld [vmem:[%s16541_s0 + $0x1f9] sm:$0xff] }
 0x2d6   :  { %2914 = vmatprep.mubr.f32.mxu0 %v11992_v54  ;;  %v9020_v54 = vld [vmem:[%s16541_s0 + $0x52] sm:$0xff] }
 0x2d7   :  { %9277 = vmatmul.mubr.f32.gmra.mrb[2].mxu1 %v9020_v54  ;;  %v12684_v54 = vld [vmem:[%s16541_s0 + $0x241] sm:$0xff] }
 0x2d9   :  { %2915 = vmatmul.mubr.f32.gmra.mrb[66].mxu0 %v8794_v37  ;;  %v12664_v37 = vld [vmem:[%s16541_s0 + $0x229] sm:$0xff] }
 0x2da   :  { %2919 = vmatprep.mubr.f32.mxu0 %v11999_v57  ;;  %v9021_v57 = vld [vmem:[%s16541_s0 + $0x62] sm:$0xff] }
 0x2db   :  { %9279 = vmatprep.mubr.f32.mxu1 %v9021_v57  ;;  %v12694_v57 = vld [vmem:[%s16541_s0 + $0x249] sm:$0xff] }
 0x2dd   :  { %2920 = vmatmul.mubr.f32.gmra.mrb[68].mxu0 %v12604_v32 }
 0x2de   :  { %2924 = vmatprep.mubr.f32.mxu0 %v12006_v60  ;;  %v9022_v60 = vld [vmem:[%s16541_s0 + $0x6a] sm:$0xff] }
 0x2df   :  { %9280 = vmatmul.mubr.f32.gmra.mrb[4].mxu1 %v9022_v60  ;;  %v12704_v60 = vld [vmem:[%s16541_s0 + $0x259] sm:$0xff] }
 0x2e1   :  { %2925 = vmatmul.mubr.f32.gmra.mrb[70].mxu0 %v12614_v48 }
 0x2e2   :  { %2929 = vmatprep.mubr.f32.mxu0 %v12013_v1  ;;  %v9023_v1 = vld [vmem:[%s16541_s0 + $0x7a] sm:$0xff] }
 0x2e3   :  { %9282 = vmatprep.mubr.f32.mxu1 %v9023_v1  ;;  %v12714_v1 = vld [vmem:[%s16541_s0 + $0x261] sm:$0xff] }
 0x2e5   :  { %2930 = vmatmul.mubr.f32.gmra.mrb[72].mxu0 %v12624_v30 }
 0x2e6   :  { %2934 = vmatprep.mubr.f32.mxu0 %v12020_v6  ;;  %v9024_v6 = vld [vmem:[%s16541_s0 + $0x82] sm:$0xff] }
 0x2e7   :  { %9283 = vmatmul.mubr.f32.gmra.mrb[6].mxu1 %v9024_v6  ;;  %v12724_v6 = vld [vmem:[%s16541_s0 + $0x271] sm:$0xff] }
 0x2e9   :  { %2935 = vmatmul.mubr.f32.gmra.mrb[74].mxu0 %v12634_v4 }
 0x2ea   :  { %2939 = vmatprep.mubr.f32.mxu0 %v12027_v8  ;;  %v9025_v8 = vld [vmem:[%s16541_s0 + $0x92] sm:$0xff] }
 0x2eb   :  { %9285 = vmatprep.mubr.f32.mxu1 %v9025_v8  ;;  %v12734_v8 = vld [vmem:[%s16541_s0 + $0x279] sm:$0xff] }
 0x2ed   :  { %2940 = vmatmul.mubr.f32.gmra.mrb[76].mxu0 %v12644_v23 }
 0x2ee   :  { %2944 = vmatprep.mubr.f32.mxu0 %v12034_v12  ;;  %v9026_v12 = vld [vmem:[%s16541_s0 + $0x9a] sm:$0xff] }
 0x2ef   :  { %9286 = vmatmul.mubr.f32.gmra.mrb[8].mxu1 %v9026_v12  ;;  %v12744_v12 = vld [vmem:[%s16541_s0 + $0x289] sm:$0xff] }
 0x2f1   :  { %2945 = vmatmul.mubr.f32.gmra.mrb[78].mxu0 %v12654_v10 }
 0x2f2   :  { %2949 = vmatprep.mubr.f32.mxu0 %v12041_v17  ;;  %v9027_v17 = vld [vmem:[%s16541_s0 + $0xaa] sm:$0xff] }
 0x2f3   :  { %9288 = vmatprep.mubr.f32.mxu1 %v9027_v17  ;;  %v12754_v17 = vld [vmem:[%s16541_s0 + $0x291] sm:$0xff] }
 0x2f5   :  { %2950 = vmatmul.mubr.f32.gmra.mrb[80].mxu0 %v12664_v37 }
 0x2f6   :  { %2954 = vmatprep.mubr.f32.mxu0 %v12048_v21  ;;  %v9028_v21 = vld [vmem:[%s16541_s0 + $0xb2] sm:$0xff] }
 0x2f7   :  { %9289 = vmatmul.mubr.f32.gmra.mrb[10].mxu1 %v9028_v21  ;;  %v12764_v21 = vld [vmem:[%s16541_s0 + $0x2a1] sm:$0xff] }
 0x2f9   :  { %2955 = vmatmul.mubr.f32.gmra.mrb[82].mxu0 %v12674_v0 }
 0x2fa   :  { %2959 = vmatprep.mubr.f32.mxu0 %v12055_v25  ;;  %v9029_v25 = vld [vmem:[%s16541_s0 + $0xc2] sm:$0xff] }
 0x2fb   :  { %9291 = vmatprep.mubr.f32.mxu1 %v9029_v25  ;;  %v12774_v25 = vld [vmem:[%s16541_s0 + $0x2a9] sm:$0xff] }
 0x2fd   :  { %2960 = vmatmul.mubr.f32.gmra.mrb[84].mxu0 %v12684_v54 }
 0x2fe   :  { %2964 = vmatprep.mubr.f32.mxu0 %v12062_v28  ;;  %v9030_v28 = vld [vmem:[%s16541_s0 + $0xca] sm:$0xff] }
 0x2ff   :  { %9292 = vmatmul.mubr.f32.gmra.mrb[12].mxu1 %v9030_v28  ;;  %v12784_v28 = vld [vmem:[%s16541_s0 + $0x2b9] sm:$0xff] }
 0x301   :  { %2965 = vmatmul.mubr.f32.gmra.mrb[86].mxu0 %v12694_v57 }
 0x302   :  { %2969 = vmatprep.mubr.f32.mxu0 %v12069_v33  ;;  %v9031_v33 = vld [vmem:[%s16541_s0 + $0xda] sm:$0xff] }
 0x303   :  { %9294 = vmatprep.mubr.f32.mxu1 %v9031_v33  ;;  %v12794_v33 = vld [vmem:[%s16541_s0 + $0x2c1] sm:$0xff] }
 0x305   :  { %2970 = vmatmul.mubr.f32.gmra.mrb[88].mxu0 %v12704_v60 }
 0x306   :  { %2974 = vmatprep.mubr.f32.mxu0 %v12076_v36  ;;  %v9032_v36 = vld [vmem:[%s16541_s0 + $0xe2] sm:$0xff] }
 0x307   :  { %9295 = vmatmul.mubr.f32.gmra.mrb[14].mxu1 %v9032_v36  ;;  %v12804_v36 = vld [vmem:[%s16541_s0 + $0x2d1] sm:$0xff] }
 0x309   :  { %2975 = vmatmul.mubr.f32.gmra.mrb[90].mxu0 %v12714_v1 }
 0x30a   :  { %2979 = vmatprep.mubr.f32.mxu0 %v12083_v40  ;;  %v9033_v40 = vld [vmem:[%s16541_s0 + $0xf2] sm:$0xff] }
 0x30b   :  { %9297 = vmatprep.mubr.f32.mxu1 %v9033_v40  ;;  %v12814_v40 = vld [vmem:[%s16541_s0 + $0x2d9] sm:$0xff] }
 0x30d   :  { %2980 = vmatmul.mubr.f32.gmra.mrb[92].mxu0 %v12724_v6 }
 0x30e   :  { %2984 = vmatprep.mubr.f32.mxu0 %v12090_v46  ;;  %v9034_v46 = vld [vmem:[%s16541_s0 + $0xfa] sm:$0xff] }
 0x30f   :  { %9298 = vmatmul.mubr.f32.gmra.mrb[16].mxu1 %v9034_v46  ;;  %v12824_v46 = vld [vmem:[%s16541_s0 + $0x2e9] sm:$0xff] }
 0x311   :  { %2985 = vmatmul.mubr.f32.gmra.mrb[94].mxu0 %v12734_v8 }
 0x312   :  { %2989 = vmatprep.mubr.f32.mxu0 %v12097_v49  ;;  %v9035_v49 = vld [vmem:[%s16541_s0 + $0x10a] sm:$0xff] }
 0x313   :  { %9300 = vmatprep.mubr.f32.mxu1 %v9035_v49  ;;  %v12834_v49 = vld [vmem:[%s16541_s0 + $0x2f1] sm:$0xff] }
 0x315   :  { %2990 = vmatmul.mubr.f32.gmra.mrb[96].mxu0 %v12744_v12 }
 0x316   :  { %2994 = vmatprep.mubr.f32.mxu0 %v12104_v52  ;;  %v9036_v52 = vld [vmem:[%s16541_s0 + $0x112] sm:$0xff] }
 0x317   :  { %9301 = vmatmul.mubr.f32.gmra.mrb[18].mxu1 %v9036_v52  ;;  %v16690_v52 = vld [vmem:[#allocation10_spill] sm:$0xff] }
 0x319   :  { %2995 = vmatmul.mubr.f32.gmra.mrb[98].mxu0 %v12754_v17 }
 0x31a   :  { %2999 = vmatprep.mubr.f32.mxu0 %v12111_v58  ;;  %v9037_v58 = vld [vmem:[%s16541_s0 + $0x122] sm:$0xff] }
 0x31b   :  { %9303 = vmatprep.mubr.f32.mxu1 %v9037_v58  ;;  %v12844_v58 = vld [vmem:[%s16541_s0 + $0x301] sm:$0xff] }
 0x31d   :  { %3000 = vmatmul.mubr.f32.gmra.mrb[100].mxu0 %v12764_v21 }
 0x31e   :  { %3004 = vmatprep.mubr.f32.mxu0 %v12118_v3  ;;  %v9038_v3 = vld [vmem:[%s16541_s0 + $0x12a] sm:$0xff] }
 0x31f   :  { %9304 = vmatmul.mubr.f32.gmra.mrb[20].mxu1 %v9038_v3  ;;  %v16691_v3 = vld [vmem:[#allocation11_spill] sm:$0xff] }
 0x321   :  { %3005 = vmatmul.mubr.f32.gmra.mrb[102].mxu0 %v12774_v25 }
 0x322   :  { %3009 = vmatprep.mubr.f32.mxu0 %v12125_v11  ;;  %v9039_v11 = vld [vmem:[%s16541_s0 + $0x13a] sm:$0xff] }
 0x323   :  { %9306 = vmatprep.mubr.f32.mxu1 %v9039_v11  ;;  %v12855_v11 = vld [vmem:[%s16541_s0 + $0x309] sm:$0xff] }
 0x325   :  { %3010 = vmatmul.mubr.f32.gmra.mrb[104].mxu0 %v12784_v28 }
 0x326   :  { %3014 = vmatprep.mubr.f32.mxu0 %v12132_v20  ;;  %v9040_v20 = vld [vmem:[%s16541_s0 + $0x142] sm:$0xff] }
 0x327   :  { %9307 = vmatmul.mubr.f32.gmra.mrb[22].mxu1 %v9040_v20  ;;  %v16692_v20 = vld [vmem:[#allocation12_spill] sm:$0xff] }
 0x329   :  { %3015 = vmatmul.mubr.f32.gmra.mrb[106].mxu0 %v12794_v33 }
 0x32a   :  { %3019 = vmatprep.mubr.f32.mxu0 %v12139_v26  ;;  %v9041_v26 = vld [vmem:[%s16541_s0 + $0x152] sm:$0xff] }
 0x32b   :  { %9309 = vmatprep.mubr.f32.mxu1 %v9041_v26  ;;  %v12863_v26 = vld [vmem:[%s16541_s0 + $0x319] sm:$0xff] }
 0x32d   :  { %3020 = vmatmul.mubr.f32.gmra.mrb[108].mxu0 %v12804_v36 }
 0x32e   :  { %3024 = vmatprep.mubr.f32.mxu0 %v12146_v35  ;;  %v9042_v35 = vld [vmem:[%s16541_s0 + $0x15a] sm:$0xff] }
 0x32f   :  { %9310 = vmatmul.mubr.f32.gmra.mrb[24].mxu1 %v9042_v35  ;;  %v12870_v35 = vld [vmem:[%s16541_s0 + $0x321] sm:$0xff] }
 0x331   :  { %3025 = vmatmul.mubr.f32.gmra.mrb[110].mxu0 %v12814_v40 }
 0x332   :  { %3029 = vmatprep.mubr.f32.mxu0 %v12153_v50  ;;  %v9043_v50 = vld [vmem:[%s16541_s0 + $0x16a] sm:$0xff] }
 0x333   :  { %9312 = vmatprep.mubr.f32.mxu1 %v9043_v50  ;;  %v9047_v50 = vld [vmem:[%s16541_s0 + $0x19a] sm:$0xff] }
 0x335   :  { %3030 = vmatmul.mubr.f32.gmra.mrb[112].mxu0 %v12824_v46 }
 0x336   :  { %3034 = vmatprep.mubr.f32.mxu0 %v12160_v61  ;;  %v9044_v61 = vld [vmem:[%s16541_s0 + $0x172] sm:$0xff] }
 0x337   :  { %9313 = vmatmul.mubr.f32.gmra.mrb[26].mxu1 %v9044_v61  ;;  %v9048_v61 = vld [vmem:[%s16541_s0 + $0x1a2] sm:$0xff] }
 0x338   :  { %9315 = vmatprep.mubr.f32.mxu1 %v12548_v51  ;;  %v16693_v51 = vld [vmem:[#allocation13_spill] sm:$0xff] }
 0x339   :  { %3035 = vmatmul.mubr.f32.gmra.mrb[114].mxu0 %v12834_v49 }
 0x33a   :  { %3039 = vmatprep.mubr.f32.mxu0 %v16690_v52  ;;  %v12885_v52 = vld [vmem:[%s16541_s0 + $0x331] sm:$0xff] }
 0x33b   :  { %9316 = vmatmul.mubr.f32.gmra.mrb[28].mxu1 %v12566_v45  ;;  %v12875_v45 = vld [vmem:[%s16541_s0 + $0x332] sm:$0xff] }
 0x33c   :  { %9318 = vmatprep.mubr.f32.mxu1 %v9047_v50  ;;  %v8889_v50 = vld [vmem:[%s16541_s0 + $0x30] sm:$0xff] }
 0x33d   :  { %3040 = vmatmul.mubr.f32.gmra.mrb[116].mxu0 %v12844_v58 }
 0x33e   :  { %3044 = vmatprep.mubr.f32.mxu0 %v16691_v3  ;;  %v12893_v3 = vld [vmem:[%s16541_s0 + $0x33a] sm:$0xff] }
 0x33f   :  { %9319 = vmatmul.mubr.f32.gmra.mrb[30].mxu1 %v9048_v61  ;;  %v9050_v61 = vld [vmem:[%s16541_s0 + $0x1ea] sm:$0xff] }
 0x341   :  { %3045 = vmatmul.mubr.f32.gmra.mrb[118].mxu0 %v12855_v11 }
 0x342   :  { %3049 = vmatprep.mubr.f32.mxu0 %v16692_v20  ;;  %v12900_v20 = vld [vmem:[%s16541_s0 + $0x339] sm:$0xff] }
 0x345   :  { %3050 = vmatmul.mubr.f32.gmra.mrb[120].mxu0 %v12863_v26 }
 0x346   :  { %3054 = vmatprep.mubr.f32.mxu0 %v16693_v51  ;;  %v9049_v51 = vld [vmem:[%s16541_s0 + $0x1e2] sm:$0xff] }
 0x347   :  { %9321 = vmatprep.mubr.f32.mxu1 %v9049_v51  ;;  %v8891_v51 = vld [vmem:[%s16541_s0 + $0x48] sm:$0xff] }
 0x348   :  { %9322 = vmatmul.mubr.f32.gmra.mrb[32].mxu1 %v9050_v61  ;;  %v8894_v61 = vld [vmem:[%s16541_s0 + $0x68] sm:$0xff] }
 0x349   :  { %3055 = vmatmul.mubr.f32.gmra.mrb[122].mxu0 %v12870_v35 }
 0x34a   :  { %3059 = vmatprep.mubr.f32.mxu0 %v12875_v45 }
 0x34d   :  { %3060 = vmatmul.mubr.f32.gmra.mrb[124].mxu0 %v12885_v52 }
 0x34e   :  { %3064 = vmatprep.mubr.f32.mxu0 %v12893_v3 }
 0x351   :  { %3065 = vmatmul.mubr.f32.gmra.mrb[126].mxu0 %v12900_v20 }
 0x352   :  { %3134 = vmatprep.mubr.f32.mxu0 %v12226_v9  ;;  %v9051_v9 = vld [vmem:[%s16541_s0 + $0x1fa] sm:$0xff] }
 0x353   :  { %9324 = vmatprep.mubr.f32.mxu1 %v9051_v9  ;;  %v8895_v9 = vld [vmem:[%s16541_s0 + $0x78] sm:$0xff] }
 0x355   :  { %3135 = vmatmul.mubr.f32.vlgmr.msra.gmra.mrb[0].mxu0 %v8889_v50  ;;  %v8893_v50 = vld [vmem:[%s16541_s0 + $0x60] sm:$0xff] }
 0x356   :  { %3139 = vmatprep.mubr.f32.mxu0 %v12240_v14  ;;  %v9052_v14 = vld [vmem:[%s16541_s0 + $0x202] sm:$0xff] }
 0x357   :  { %9325 = vmatmul.mubr.f32.gmra.mrb[34].mxu1 %v9052_v14  ;;  %v8897_v14 = vld [vmem:[%s16541_s0 + $0x90] sm:$0xff] }
 0x359   :  { %3140 = vmatmul.mubr.f32.gmra.mrb[2].mxu0 %v8890_v15  ;;  %v8892_v15 = vld [vmem:[%s16541_s0 + $0x50] sm:$0xff] }
 0x35a   :  { %3144 = vmatprep.mubr.f32.mxu0 %v12254_v19  ;;  %v9053_v19 = vld [vmem:[%s16541_s0 + $0x212] sm:$0xff] }
 0x35b   :  { %9327 = vmatprep.mubr.f32.mxu1 %v9053_v19  ;;  %v8899_v19 = vld [vmem:[%s16541_s0 + $0xa8] sm:$0xff] }
 0x35d   :  { %3145 = vmatmul.mubr.f32.gmra.mrb[4].mxu0 %v8891_v51  ;;  %v8896_v51 = vld [vmem:[%s16541_s0 + $0x80] sm:$0xff] }
 0x35e   :  { %3149 = vmatprep.mubr.f32.mxu0 %v12268_v24  ;;  %v9054_v24 = vld [vmem:[%s16541_s0 + $0x21a] sm:$0xff] }
 0x35f   :  { %9328 = vmatmul.mubr.f32.gmra.mrb[36].mxu1 %v9054_v24  ;;  %v8901_v24 = vld [vmem:[%s16541_s0 + $0xc0] sm:$0xff] }
 0x361   :  { %3150 = vmatmul.mubr.f32.gmra.mrb[6].mxu0 %v8892_v15  ;;  %v8898_v15 = vld [vmem:[%s16541_s0 + $0x98] sm:$0xff] }
 0x362   :  { %3154 = vmatprep.mubr.f32.mxu0 %v12282_v29  ;;  %v9055_v29 = vld [vmem:[%s16541_s0 + $0x22a] sm:$0xff] }
 0x363   :  { %9330 = vmatprep.mubr.f32.mxu1 %v9055_v29  ;;  %v8903_v29 = vld [vmem:[%s16541_s0 + $0xd8] sm:$0xff] }
 0x365   :  { %3155 = vmatmul.mubr.f32.gmra.mrb[8].mxu0 %v8893_v50  ;;  %v8900_v50 = vld [vmem:[%s16541_s0 + $0xb0] sm:$0xff] }
 0x366   :  { %3159 = vmatprep.mubr.f32.mxu0 %v12296_v34  ;;  %v9056_v34 = vld [vmem:[%s16541_s0 + $0x232] sm:$0xff] }
 0x367   :  { %9331 = vmatmul.mubr.f32.gmra.mrb[38].mxu1 %v9056_v34  ;;  %v8905_v34 = vld [vmem:[%s16541_s0 + $0xf0] sm:$0xff] }
 0x369   :  { %3160 = vmatmul.mubr.f32.gmra.mrb[10].mxu0 %v8894_v61  ;;  %v8902_v61 = vld [vmem:[%s16541_s0 + $0xc8] sm:$0xff] }
 0x36a   :  { %3164 = vmatprep.mubr.f32.mxu0 %v12310_v39  ;;  %v9057_v39 = vld [vmem:[%s16541_s0 + $0x242] sm:$0xff] }
 0x36b   :  { %9333 = vmatprep.mubr.f32.mxu1 %v9057_v39  ;;  %v8907_v39 = vld [vmem:[%s16541_s0 + $0x108] sm:$0xff] }
 0x36d   :  { %3165 = vmatmul.mubr.f32.gmra.mrb[12].mxu0 %v8895_v9  ;;  %v8904_v9 = vld [vmem:[%s16541_s0 + $0xe0] sm:$0xff] }
 0x36e   :  { %3169 = vmatprep.mubr.f32.mxu0 %v12324_v42  ;;  %v9058_v42 = vld [vmem:[%s16541_s0 + $0x24a] sm:$0xff] }
 0x36f   :  { %9334 = vmatmul.mubr.f32.gmra.mrb[40].mxu1 %v9058_v42  ;;  %v8909_v42 = vld [vmem:[%s16541_s0 + $0x120] sm:$0xff] }
 0x371   :  { %3170 = vmatmul.mubr.f32.gmra.mrb[14].mxu0 %v8896_v51  ;;  %v8906_v51 = vld [vmem:[%s16541_s0 + $0xf8] sm:$0xff] }
 0x372   :  { %3174 = vmatprep.mubr.f32.mxu0 %v12338_v31  ;;  %v9059_v31 = vld [vmem:[%s16541_s0 + $0x25a] sm:$0xff] }
 0x373   :  { %9336 = vmatprep.mubr.f32.mxu1 %v9059_v31 }
 0x375   :  { %3175 = vmatmul.mubr.f32.gmra.mrb[16].mxu0 %v8897_v14  ;;  %v8908_v14 = vld [vmem:[%s16541_s0 + $0x110] sm:$0xff] }
 0x376   :  { %3179 = vmatprep.mubr.f32.mxu0 %v12346_v7  ;;  %v9060_v7 = vld [vmem:[%s16541_s0 + $0x262] sm:$0xff] }
 0x377   :  { %9337 = vmatmul.mubr.f32.gmra.mrb[42].mxu1 %v9060_v7  ;;  %v9071_v7 = vld [vmem:[%s16541_s0 + $0x2ea] sm:$0xff] }
 0x379   :  { %3180 = vmatmul.mubr.f32.gmra.mrb[18].mxu0 %v8898_v15  ;;  %v8910_v15 = vld [vmem:[%s16541_s0 + $0x128] sm:$0xff] }
 0x37a   :  { %3184 = vmatprep.mubr.f32.mxu0 %v12354_v44  ;;  %v9061_v44 = vld [vmem:[%s16541_s0 + $0x272] sm:$0xff] }
 0x37b   :  { %9339 = vmatprep.mubr.f32.mxu1 %v9061_v44 }
 0x37d   :  { %3185 = vmatmul.mubr.f32.gmra.mrb[20].mxu0 %v8899_v19  ;;  %v8911_v19 = vld [vmem:[%s16541_s0 + $0x138] sm:$0xff] }
 0x37e   :  { %3189 = vmatprep.mubr.f32.mxu0 %v12367_v56  ;;  %v9062_v56 = vld [vmem:[%s16541_s0 + $0x27a] sm:$0xff] }
 0x37f   :  { %9340 = vmatmul.mubr.f32.gmra.mrb[44].mxu1 %v9062_v56  ;;  %v9073_v56 = vld [vmem:[%s16541_s0 + $0x302] sm:$0xff] }
 0x381   :  { %3190 = vmatmul.mubr.f32.gmra.mrb[22].mxu0 %v8900_v50 }
 0x382   :  { %3194 = vmatprep.mubr.f32.mxu0 %v12375_v22  ;;  %v9063_v22 = vld [vmem:[%s16541_s0 + $0x28a] sm:$0xff] }
 0x383   :  { %9342 = vmatprep.mubr.f32.mxu1 %v9063_v22 }
 0x385   :  { %3195 = vmatmul.mubr.f32.gmra.mrb[24].mxu0 %v8901_v24  ;;  %v8913_v24 = vld [vmem:[%s16541_s0 + $0x150] sm:$0xff] }
 0x386   :  { %3199 = vmatprep.mubr.f32.mxu0 %v12382_v53  ;;  %v9064_v53 = vld [vmem:[%s16541_s0 + $0x292] sm:$0xff] }
 0x387   :  { %9343 = vmatmul.mubr.f32.gmra.mrb[46].mxu1 %v9064_v53  ;;  %v9075_v53 = vld [vmem:[%s16541_s0 + $0x31a] sm:$0xff] }
 0x389   :  { %3200 = vmatmul.mubr.f32.gmra.mrb[26].mxu0 %v8902_v61 }
 0x38a   :  { %3204 = vmatprep.mubr.f32.mxu0 %v12389_v55  ;;  %v9065_v55 = vld [vmem:[%s16541_s0 + $0x2a2] sm:$0xff] }
 0x38b   :  { %9345 = vmatprep.mubr.f32.mxu1 %v9065_v55 }
 0x38d   :  { %3205 = vmatmul.mubr.f32.gmra.mrb[28].mxu0 %v8903_v29  ;;  %v8915_v29 = vld [vmem:[%s16541_s0 + $0x168] sm:$0xff] }
 0x38e   :  { %3209 = vmatprep.mubr.f32.mxu0 %v12402_v38  ;;  %v9066_v38 = vld [vmem:[%s16541_s0 + $0x2aa] sm:$0xff] }
 0x38f   :  { %9346 = vmatmul.mubr.f32.gmra.mrb[48].mxu1 %v9066_v38  ;;  %v16695_v38 = vld [vmem:[#allocation15_spill] sm:$0xff] }
 0x391   :  { %3210 = vmatmul.mubr.f32.gmra.mrb[30].mxu0 %v8904_v9  ;;  %v16694_v9 = vld [vmem:[#allocation14_spill] sm:$0xff] }
 0x392   :  { %3214 = vmatprep.mubr.f32.mxu0 %v12410_v59  ;;  %v9067_v59 = vld [vmem:[%s16541_s0 + $0x2ba] sm:$0xff] }
 0x393   :  { %9348 = vmatprep.mubr.f32.mxu1 %v9067_v59  ;;  %v8983_v59 = vld [vmem:[%s16541_s0 + $0x199] sm:$0xff] }
 0x395   :  { %3215 = vmatmul.mubr.f32.gmra.mrb[32].mxu0 %v8905_v34 }
 0x396   :  { %3219 = vmatprep.mubr.f32.mxu0 %v12417_v2  ;;  %v9068_v2 = vld [vmem:[%s16541_s0 + $0x2c2] sm:$0xff] }
 0x397   :  { %9349 = vmatmul.mubr.f32.gmra.mrb[50].mxu1 %v9068_v2  ;;  %v8919_v2 = vld [vmem:[%s16541_s0 + $0x198] sm:$0xff] }
 0x399   :  { %3220 = vmatmul.mubr.f32.gmra.mrb[34].mxu0 %v8906_v51  ;;  %v8917_v51 = vld [vmem:[%s16541_s0 + $0x180] sm:$0xff] }
 0x39a   :  { %3224 = vmatprep.mubr.f32.mxu0 %v12424_v5  ;;  %v9069_v5 = vld [vmem:[%s16541_s0 + $0x2d2] sm:$0xff] }
 0x39b   :  { %9351 = vmatprep.mubr.f32.mxu1 %v9069_v5  ;;  %v9080_v5 = vld [vmem:[%s16541_s0 + $0x352] sm:$0xff] }
 0x39d   :  { %3225 = vmatmul.mubr.f32.gmra.mrb[36].mxu0 %v8907_v39 }
 0x39e   :  { %3229 = vmatprep.mubr.f32.mxu0 %v12437_v47  ;;  %v9070_v47 = vld [vmem:[%s16541_s0 + $0x2da] sm:$0xff] }
 0x39f   :  { %9352 = vmatmul.mubr.f32.gmra.mrb[52].mxu1 %v9070_v47 }
 0x3a0   :  { %9354 = vmatprep.mubr.f32.mxu1 %v9071_v7  ;;  %v8922_v7 = vld [vmem:[%s16541_s0 + $0x1e8] sm:$0xff] }
 0x3a1   :  { %3230 = vmatmul.mubr.f32.gmra.mrb[38].mxu0 %v8908_v14  ;;  %v8984_v14 = vld [vmem:[%s16541_s0 + $0x1a1] sm:$0xff] }
 0x3a2   :  { %3234 = vmatprep.mubr.f32.mxu0 %v12445_v43 }
 0x3a4   :  { %v13057_v31 = vpop.f32.mrb[0].mxu1 }
 0x3a5   :  { %3235 = vmatmul.mubr.f32.gmra.mrb[40].mxu0 %v8909_v42  ;;  %v13059_v43 = vpop.f32.mrb[1].mxu1  ;;  %v8920_v42 = vld [vmem:[%s16541_s0 + $0x1a0] sm:$0xff] }
 0x3a6   :  { %3239 = vmatprep.mubr.f32.mxu0 %v12452_v16  ;;  %v9072_v16 = vld [vmem:[%s16541_s0 + $0x2f2] sm:$0xff] }
 0x3a7   :  { %9355 = vmatmul.mubr.f32.gmra.mrb[54].mxu1 %v9072_v16 }
 0x3a8   :  { %9357 = vmatprep.mubr.f32.mxu1 %v9073_v56 }
 0x3a9   :  { %3240 = vmatmul.mubr.f32.gmra.mrb[42].mxu0 %v8910_v15 }
 0x3aa   :  { %3244 = vmatprep.mubr.f32.mxu0 %v12465_v27  ;;  %v8912_v27 = vld [vmem:[%s16541_s0 + $0x140] sm:$0xff]  ;;  %v13075_v50 = vpop.f32.mrb[2].mxu1 }
 0x3ab   :  { %v13077_v44 = vpop.f32.mrb[3].mxu1 }
 0x3ad   :  { %3245 = vmatmul.mubr.f32.gmra.mrb[44].mxu0 %v8911_v19  ;;  %v8921_v19 = vld [vmem:[%s16541_s0 + $0x1e0] sm:$0xff] }
 0x3ae   :  { %3249 = vmatprep.mubr.f32.mxu0 %v12481_v13  ;;  %v9074_v13 = vld [vmem:[%s16541_s0 + $0x30a] sm:$0xff] }
 0x3af   :  { %9358 = vmatmul.mubr.f32.gmra.mrb[56].mxu1 %v9074_v13 }
 0x3b0   :  { %9360 = vmatprep.mubr.f32.mxu1 %v9075_v53 }
 0x3b1   :  { %3250 = vmatmul.mubr.f32.gmra.mrb[46].mxu0 %v8912_v27 }
 0x3b2   :  { %3254 = vmatprep.mubr.f32.mxu0 %v12497_v63  ;;  %v8914_v63 = vld [vmem:[%s16541_s0 + $0x158] sm:$0xff]  ;;  %v13093_v61 = vpop.f32.mrb[4].mxu1 }
 0x3b3   :  { %v13095_v22 = vpop.f32.mrb[5].mxu1 }
 0x3b5   :  { %3255 = vmatmul.mubr.f32.gmra.mrb[48].mxu0 %v8913_v24 }
 0x3b6   :  { %3259 = vmatprep.mubr.f32.mxu0 %v12511_v62  ;;  %v9076_v62 = vld [vmem:[%s16541_s0 + $0x322] sm:$0xff] }
 0x3b7   :  { %9361 = vmatmul.mubr.f32.gmra.mrb[58].mxu1 %v9076_v62 }
 0x3b8   :  { %9363 = vmatprep.mubr.f32.mxu1 %v12875_v45  ;;  %v8918_v45 = vld [vmem:[%s16541_s0 + $0x188] sm:$0xff] }
 0x3b9   :  { %3260 = vmatmul.mubr.f32.gmra.mrb[50].mxu0 %v8914_v63 }
 0x3ba   :  { %3264 = vmatprep.mubr.f32.mxu0 %v12524_v41  ;;  %v8916_v41 = vld [vmem:[%s16541_s0 + $0x170] sm:$0xff]  ;;  %v13112_v55 = vpop.f32.mrb[6].mxu1 }
 0x3bb   :  { %v13114_v34 = vpop.f32.mrb[7].mxu1  ;;  %9364 = vmatmul.mubr.f32.gmra.mrb[60].mxu1 %v12893_v3 }
 0x3bd   :  { %3265 = vmatmul.mubr.f32.gmra.mrb[52].mxu0 %v8915_v29 }
 0x3be   :  { %3269 = vmatprep.mubr.f32.mxu0 %v16694_v9 }
 0x3c1   :  { %3270 = vmatmul.mubr.f32.gmra.mrb[54].mxu0 %v8916_v41 }
 0x3c2   :  { %3274 = vmatprep.mubr.f32.mxu0 %v16695_v38  ;;  %v13128_v39 = vpop.f32.mrb[8].mxu1 }
 0x3c3   :  { %v13130_v3 = vpop.f32.mrb[9].mxu1 }
 0x3c5   :  { %3275 = vmatmul.mubr.f32.gmra.mrb[56].mxu0 %v8917_v51 }
 0x3c6   :  { %3279 = vmatprep.mubr.f32.mxu0 %v12579_v18  ;;  %v9079_v18 = vld [vmem:[%s16541_s0 + $0x34a] sm:$0xff] }
 0x3c7   :  { %9366 = vmatprep.mubr.f32.mxu1 %v9079_v18 }
 0x3c8   :  { %9367 = vmatmul.mubr.f32.gmra.mrb[62].mxu1 %v9080_v5 }
 0x3c9   :  { %3280 = vmatmul.mubr.f32.gmra.mrb[58].mxu0 %v8918_v45 }
 0x3ca   :  { %3284 = vmatprep.mubr.f32.mxu0 %v8983_v59  ;;  %v13147_v47 = vpop.f32.mrb[10].mxu1 }
 0x3cb   :  { %v13149_v15 = vpop.f32.mrb[11].mxu1 }
 0x3cd   :  { %3285 = vmatmul.mubr.f32.gmra.mrb[60].mxu0 %v8919_v2 }
 0x3ce   :  { %3289 = vmatprep.mubr.f32.mxu0 %v8984_v14 }
 0x3d1   :  { %3290 = vmatmul.mubr.f32.gmra.mrb[62].mxu0 %v8920_v42 }
 0x3d2   :  { %3294 = vmatprep.mubr.f32.mxu0 %v12604_v32  ;;  %v13159_v16 = vpop.f32.mrb[12].mxu1  ;;  %v8923_v32 = vld [vmem:[%s16541_s0 + $0x1f8] sm:$0xff] }
 0x3d3   :  { %v13161_v27 = vpop.f32.mrb[13].mxu1 }
 0x3d5   :  { %3295 = vmatmul.mubr.f32.gmra.mrb[64].mxu0 %v8921_v19 }
 0x3d6   :  { %3299 = vmatprep.mubr.f32.mxu0 %v12614_v48  ;;  %v8924_v48 = vld [vmem:[%s16541_s0 + $0x200] sm:$0xff] }
 0x3d9   :  { %3300 = vmatmul.mubr.f32.gmra.mrb[66].mxu0 %v8922_v7 }
 0x3da   :  { %3304 = vmatprep.mubr.f32.mxu0 %v12624_v30  ;;  %v13171_v24 = vpop.f32.mrb[14].mxu1  ;;  %v8925_v30 = vld [vmem:[%s16541_s0 + $0x210] sm:$0xff] }
 0x3db   :  { %v13173_v56 = vpop.f32.mrb[15].mxu1 }
 0x3dd   :  { %3305 = vmatmul.mubr.f32.gmra.mrb[68].mxu0 %v8923_v32 }
 0x3de   :  { %3309 = vmatprep.mubr.f32.mxu0 %v12634_v4  ;;  %v8926_v4 = vld [vmem:[%s16541_s0 + $0x218] sm:$0xff] }
 0x3e1   :  { %3310 = vmatmul.mubr.f32.gmra.mrb[70].mxu0 %v8924_v48 }
 0x3e2   :  { %3314 = vmatprep.mubr.f32.mxu0 %v12644_v23  ;;  %v13183_v13 = vpop.f32.mrb[16].mxu1  ;;  %v8927_v23 = vld [vmem:[%s16541_s0 + $0x228] sm:$0xff] }
 0x3e3   :  { %v13185_v63 = vpop.f32.mrb[17].mxu1 }
 0x3e5   :  { %3315 = vmatmul.mubr.f32.gmra.mrb[72].mxu0 %v8925_v30 }
 0x3e6   :  { %3319 = vmatprep.mubr.f32.mxu0 %v12654_v10  ;;  %v8928_v10 = vld [vmem:[%s16541_s0 + $0x230] sm:$0xff] }
 0x3e9   :  { %3320 = vmatmul.mubr.f32.gmra.mrb[74].mxu0 %v8926_v4 }
 0x3ea   :  { %3324 = vmatprep.mubr.f32.mxu0 %v12664_v37  ;;  %v13195_v29 = vpop.f32.mrb[18].mxu1  ;;  %v8929_v37 = vld [vmem:[%s16541_s0 + $0x240] sm:$0xff] }
 0x3eb   :  { %v13197_v53 = vpop.f32.mrb[19].mxu1 }
 0x3ed   :  { %3325 = vmatmul.mubr.f32.gmra.mrb[76].mxu0 %v8927_v23 }
 0x3ee   :  { %3329 = vmatprep.mubr.f32.mxu0 %v12674_v0  ;;  %v8930_v0 = vld [vmem:[%s16541_s0 + $0x248] sm:$0xff] }
 0x3f1   :  { %3330 = vmatmul.mubr.f32.gmra.mrb[78].mxu0 %v8928_v10 }
 0x3f2   :  { %3334 = vmatprep.mubr.f32.mxu0 %v12684_v54  ;;  %v13207_v62 = vpop.f32.mrb[20].mxu1  ;;  %v8931_v54 = vld [vmem:[%s16541_s0 + $0x258] sm:$0xff] }
 0x3f3   :  { %v13209_v9 = vpop.f32.mrb[21].mxu1 }
 0x3f5   :  { %3335 = vmatmul.mubr.f32.gmra.mrb[80].mxu0 %v8929_v37 }
 0x3f6   :  { %3339 = vmatprep.mubr.f32.mxu0 %v12694_v57  ;;  %v8932_v57 = vld [vmem:[%s16541_s0 + $0x260] sm:$0xff] }
 0x3f9   :  { %3340 = vmatmul.mubr.f32.gmra.mrb[82].mxu0 %v8930_v0 }
 0x3fa   :  { %3344 = vmatprep.mubr.f32.mxu0 %v12704_v60  ;;  %v13219_v41 = vpop.f32.mrb[22].mxu1  ;;  %v8933_v60 = vld [vmem:[%s16541_s0 + $0x270] sm:$0xff] }
 0x3fb   :  { %v13221_v38 = vpop.f32.mrb[23].mxu1 }
 0x3fd   :  { %3345 = vmatmul.mubr.f32.gmra.mrb[84].mxu0 %v8931_v54 }
 0x3fe   :  { %3349 = vmatprep.mubr.f32.mxu0 %v12714_v1  ;;  %v8934_v1 = vld [vmem:[%s16541_s0 + $0x278] sm:$0xff] }
 0x401   :  { %3350 = vmatmul.mubr.f32.gmra.mrb[86].mxu0 %v8932_v57 }
 0x402   :  { %3354 = vmatprep.mubr.f32.mxu0 %v12724_v6  ;;  %v13231_v51 = vpop.f32.mrb[24].mxu1  ;;  %v8935_v6 = vld [vmem:[%s16541_s0 + $0x288] sm:$0xff] }
 0x403   :  { %v13233_v45 = vpop.f32.mrb[25].mxu1 }
 0x405   :  { %3355 = vmatmul.mubr.f32.gmra.mrb[88].mxu0 %v8933_v60 }
 0x406   :  { %3359 = vmatprep.mubr.f32.mxu0 %v12734_v8  ;;  %v8936_v8 = vld [vmem:[%s16541_s0 + $0x290] sm:$0xff] }
 0x409   :  { %3360 = vmatmul.mubr.f32.gmra.mrb[90].mxu0 %v8934_v1 }
 0x40a   :  { %3364 = vmatprep.mubr.f32.mxu0 %v12744_v12  ;;  %v13243_v59 = vpop.f32.mrb[26].mxu1  ;;  %v8937_v12 = vld [vmem:[%s16541_s0 + $0x2a0] sm:$0xff] }
 0x40b   :  { %v13245_v2 = vpop.f32.mrb[27].mxu1 }
 0x40d   :  { %3365 = vmatmul.mubr.f32.gmra.mrb[92].mxu0 %v8935_v6 }
 0x40e   :  { %3369 = vmatprep.mubr.f32.mxu0 %v12754_v17  ;;  %v8938_v17 = vld [vmem:[%s16541_s0 + $0x2a8] sm:$0xff]  ;;  %v13255_v18 = vpop.f32.mrb[28].mxu1 }
 0x40f   :  { %v13257_v14 = vpop.f32.mrb[29].mxu1 }
 0x411   :  { %3370 = vmatmul.mubr.f32.gmra.mrb[94].mxu0 %v8936_v8 }
 0x412   :  { %3374 = vmatprep.mubr.f32.mxu0 %v12764_v21  ;;  %v8939_v21 = vld [vmem:[%s16541_s0 + $0x2b8] sm:$0xff]  ;;  %v13267_v5 = vpop.f32.mrb[30].mxu1 }
 0x413   :  { %v13269_v42 = vpop.f32.mrb[31].mxu1 }
 0x415   :  { %3375 = vmatmul.mubr.f32.gmra.mrb[96].mxu0 %v8937_v12 }
 0x416   :  { %3379 = vmatprep.mubr.f32.mxu0 %v12774_v25  ;;  %v8940_v25 = vld [vmem:[%s16541_s0 + $0x2c0] sm:$0xff] }
 0x419   :  { %3380 = vmatmul.mubr.f32.gmra.mrb[98].mxu0 %v8938_v17 }
 0x41a   :  { %3384 = vmatprep.mubr.f32.mxu0 %v12784_v28  ;;  %v8941_v28 = vld [vmem:[%s16541_s0 + $0x2d0] sm:$0xff] }
 0x41b   :  { %v13279_v19 = vpop.f32.mrb[32].mxu1 }
 0x41c   :  { %v13281_v32 = vpop.f32.mrb[33].mxu1 }
 0x41d   :  { %3385 = vmatmul.mubr.f32.gmra.mrb[100].mxu0 %v8939_v21 }
 0x41e   :  { %3389 = vmatprep.mubr.f32.mxu0 %v12794_v33  ;;  %v8942_v33 = vld [vmem:[%s16541_s0 + $0x2d8] sm:$0xff] }
 0x421   :  { %3390 = vmatmul.mubr.f32.gmra.mrb[102].mxu0 %v8940_v25 }
 0x422   :  { %3394 = vmatprep.mubr.f32.mxu0 %v12804_v36 }
 0x425   :  { %3395 = vmatmul.mubr.f32.gmra.mrb[104].mxu0 %v8941_v28 }
 0x426   :  { %3399 = vmatprep.mubr.f32.mxu0 %v12814_v40  ;;  %v8943_v40 = vld [vmem:[%s16541_s0 + $0x2e8] sm:$0xff] }
 0x428   :  { %v3136_v7 = vpop.f32.mrb[0].mxu0 }
 0x429   :  { %v13284_v48 = vadd.f32 %v13059_v43, %v3136_v7  ;;  %v3138_v36 = vpop.f32.mrb[1].mxu0  ;;  %3400 = vmatmul.mubr.f32.gmra.mrb[106].mxu0 %v8942_v33  ;;  %v8944_v43 = vld [vmem:[%s16541_s0 + $0x2f0] sm:$0xff] }
 0x42a   :  { %3404 = vmatprep.mubr.f32.mxu0 %v12824_v46  ;;  %v13297_v10 = vpop.f32.mrb[34].mxu1 }
 0x42b   :  { %v13299_v46 = vpop.f32.mrb[35].mxu1 }
 0x42c   :  { %v3141_v30 = vpop.f32.mrb[2].mxu0 }
 0x42d   :  { %v13291_v4 = vadd.f32 %v13057_v31, %v3141_v30  ;;  %v3143_v23 = vpop.f32.mrb[3].mxu0  ;;  %3405 = vmatmul.mubr.f32.gmra.mrb[108].mxu0 %v8943_v40 }
 0x42e   :  { %3409 = vmatprep.mubr.f32.mxu0 %v12834_v49  ;;  %v8945_v49 = vld [vmem:[%s16541_s0 + $0x300] sm:$0xff] }
 0x42f   :  { %16696 = vst [vmem:[#allocation10_spill] sm:$0xff] %v13291_v4 }
 0x430   :  { %v3146_v37 = vpop.f32.mrb[4].mxu0 }
 0x431   :  { %v13302_v0 = vadd.f32 %v13077_v44, %v3146_v37  ;;  %v3148_v54 = vpop.f32.mrb[5].mxu0  ;;  %3410 = vmatmul.mubr.f32.gmra.mrb[110].mxu0 %v8944_v43  ;;  %v8946_v44 = vld [vmem:[%s16541_s0 + $0x308] sm:$0xff] }
 0x432   :  { %3414 = vmatprep.mubr.f32.mxu0 %v12844_v58  ;;  %v13315_v1 = vpop.f32.mrb[36].mxu1  ;;  %v9016_v54 = vld [vmem:[%s16541_s0 + $0x351] sm:$0xff] }
 0x433   :  { %16697 = vst [vmem:[#allocation11_spill] sm:$0xff] %v13302_v0  ;;  %v13317_v58 = vpop.f32.mrb[37].mxu1 }
 0x434   :  { %v3151_v31 = vpop.f32.mrb[6].mxu0 }
 0x435   :  { %v13309_v57 = vadd.f32 %v13075_v50, %v3151_v31  ;;  %v3153_v60 = vpop.f32.mrb[7].mxu0  ;;  %3415 = vmatmul.mubr.f32.gmra.mrb[112].mxu0 %v8945_v49 }
 0x436   :  { %3419 = vmatprep.mubr.f32.mxu0 %v12855_v11  ;;  %v8947_v11 = vld [vmem:[%s16541_s0 + $0x318] sm:$0xff] }
 0x438   :  { %v3156_v6 = vpop.f32.mrb[8].mxu0 }
 0x439   :  { %v13320_v8 = vadd.f32 %v13095_v22, %v3156_v6  ;;  %v3158_v12 = vpop.f32.mrb[9].mxu0  ;;  %3420 = vmatmul.mubr.f32.gmra.mrb[114].mxu0 %v8946_v44  ;;  %v8948_v22 = vld [vmem:[%s16541_s0 + $0x320] sm:$0xff] }
 0x43a   :  { %3424 = vmatprep.mubr.f32.mxu0 %v12863_v26  ;;  %v13333_v25 = vpop.f32.mrb[38].mxu1 }
 0x43b   :  { %v13335_v26 = vpop.f32.mrb[39].mxu1 }
 0x43c   :  { %v3161_v50 = vpop.f32.mrb[10].mxu0 }
 0x43d   :  { %v13327_v17 = vadd.f32 %v13093_v61, %v3161_v50  ;;  %v3163_v21 = vpop.f32.mrb[11].mxu0  ;;  %3425 = vmatmul.mubr.f32.gmra.mrb[116].mxu0 %v8947_v11 }
 0x43e   :  { %3429 = vmatprep.mubr.f32.mxu0 %v12870_v35  ;;  %v8949_v35 = vld [vmem:[%s16541_s0 + $0x330] sm:$0xff] }
 0x440   :  { %v3166_v28 = vpop.f32.mrb[12].mxu0 }
 0x441   :  { %v13338_v33 = vadd.f32 %v13114_v34, %v3166_v28  ;;  %v3168_v7 = vpop.f32.mrb[13].mxu0  ;;  %3430 = vmatmul.mubr.f32.gmra.mrb[118].mxu0 %v8948_v22  ;;  %v8950_v34 = vld [vmem:[%s16541_s0 + $0x338] sm:$0xff] }
 0x442   :  { %3434 = vmatprep.mubr.f32.mxu0 %v12885_v52  ;;  %v9015_v52 = vld [vmem:[%s16541_s0 + $0x349] sm:$0xff]  ;;  %v13354_v30 = vpop.f32.mrb[40].mxu1 }
 0x443   :  { %v13356_v43 = vpop.f32.mrb[41].mxu1 }
 0x444   :  { %v3171_v61 = vpop.f32.mrb[14].mxu0 }
 0x445   :  { %v13345_v36 = vadd.f32 %v13112_v55, %v3171_v61  ;;  %v3173_v40 = vpop.f32.mrb[15].mxu0  ;;  %3435 = vmatmul.mubr.f32.gmra.mrb[120].mxu0 %v8949_v35 }
 0x446   :  { %3439 = vmatprep.mubr.f32.mxu0 %v12900_v20  ;;  %v8951_v20 = vld [vmem:[%s16541_s0 + $0x348] sm:$0xff] }
 0x448   :  { %v3176_v23 = vpop.f32.mrb[16].mxu0 }
 0x449   :  { %v13359_v55 = vadd.f32 %v13130_v3, %v3176_v23  ;;  %v3178_v37 = vpop.f32.mrb[17].mxu0  ;;  %3440 = vmatmul.mubr.f32.gmra.mrb[122].mxu0 %v8950_v34  ;;  %v8952_v3 = vld [vmem:[%s16541_s0 + $0x350] sm:$0xff]  ;;  %v6129_v23 = vld [vmem:[#allocation4] sm:$0xff] }
 0x44a   :  { %3444 = vmatprep.mubr.f32.mxu0 %v9015_v52  ;;  %v13373_v44 = vpop.f32.mrb[42].mxu1  ;;  %v6130_v37 = vld [vmem:[#allocation4 + $0x8] sm:$0xff] }
 0x44b   :  { %v13375_v12 = vpop.f32.mrb[43].mxu1 }
 0x44c   :  { %v3181_v49 = vpop.f32.mrb[18].mxu0 }
 0x44d   :  { %v13368_v31 = vadd.f32 %v13128_v39, %v3181_v49  ;;  %v3183_v60 = vpop.f32.mrb[19].mxu0  ;;  %3445 = vmatmul.mubr.f32.gmra.mrb[124].mxu0 %v8951_v20  ;;  %v9722_v20 = vpack.c.bf16 %v6130_v37, %v6129_v23 }
 0x44e   :  { %3449 = vmatprep.mubr.f32.mxu0 %v9016_v54 }
 0x44f   :  { %9723 = vmatpush1.bf16.msra.mxu1 %v9722_v20 }
 0x450   :  { %v3186_v6 = vpop.f32.mrb[20].mxu0 }
 0x451   :  { %v13378_v11 = vadd.f32 %v13149_v15, %v3186_v6  ;;  %v3188_v50 = vpop.f32.mrb[21].mxu0  ;;  %3450 = vmatmul.mubr.f32.gmra.mrb[126].mxu0 %v8952_v3  ;;  %v16698_v3 = vmov 0.0|0.0  }
 0x452   :  { %v13383_v28 = vpop.f32.mrb[44].mxu1  ;;  %9724 = vmatprep.subr.bf16.mxu1 %v16698_v3 }
 0x453   :  { %v13385_v35 = vpop.f32.mrb[45].mxu1 }
 0x454   :  { %v3191_v21 = vpop.f32.mrb[22].mxu0 }
 0x455   :  { %v13381_v39 = vadd.f32 %v13147_v47, %v3191_v21  ;;  %v3193_v22 = vpop.f32.mrb[23].mxu0  ;;  %v6131_v21 = vld [vmem:[#allocation4 + $0x10] sm:$0xff] }
 0x456   :  { %v6132_v22 = vld [vmem:[#allocation4 + $0x18] sm:$0xff] }
 0x458   :  { %v3196_v7 = vpop.f32.mrb[24].mxu0 }
 0x459   :  { %v13388_v61 = vadd.f32 %v13161_v27, %v3196_v7  ;;  %v3198_v40 = vpop.f32.mrb[25].mxu0  ;;  %v9725_v7 = vpack.c.bf16 %v6132_v22, %v6131_v21 }
 0x45a   :  { %v13393_v47 = vpop.f32.mrb[46].mxu1 }
 0x45b   :  { %v13395_v49 = vpop.f32.mrb[47].mxu1  ;;  %9726 = vmatpush1.bf16.msra.mxu1 %v9725_v7 }
 0x45c   :  { %v3201_v34 = vpop.f32.mrb[26].mxu0  ;;  %9727 = vmatprep.subr.bf16.mxu1 %v16698_v3 }
 0x45d   :  { %v13391_v15 = vadd.f32 %v13159_v16, %v3201_v34  ;;  %v3203_v52 = vpop.f32.mrb[27].mxu0 }
 0x460   :  { %v3206_v54 = vpop.f32.mrb[28].mxu0 }
 0x461   :  { %v13398_v60 = vadd.f32 %v13173_v56, %v3206_v54  ;;  %v3208_v27 = vpop.f32.mrb[29].mxu0  ;;  %v6133_v54 = vld [vmem:[#allocation4 + $0x20] sm:$0xff] }
 0x462   :  { %v13404_v40 = vpop.f32.mrb[48].mxu1  ;;  %v6134_v27 = vld [vmem:[#allocation4 + $0x28] sm:$0xff] }
 0x463   :  { %16699 = vst [vmem:[#allocation12_spill] sm:$0xff] %v13404_v40  ;;  %v13406_v52 = vpop.f32.mrb[49].mxu1 }
 0x464   :  { %v3211_v6 = vpop.f32.mrb[30].mxu0 }
 0x465   :  { %v13402_v16 = vadd.f32 %v13171_v24, %v3211_v6  ;;  %v3213_v50 = vpop.f32.mrb[31].mxu0  ;;  %v9728_v6 = vpack.c.bf16 %v6134_v27, %v6133_v54 }
 0x467   :  { %9729 = vmatpush1.bf16.msra.mxu1 %v9728_v6 }
 0x468   :  { %v3216_v34 = vpop.f32.mrb[32].mxu0  ;;  %9730 = vmatprep.subr.bf16.mxu1 %v16698_v3 }
 0x469   :  { %v13409_v56 = vadd.f32 %v13185_v63, %v3216_v34  ;;  %v3218_v23 = vpop.f32.mrb[33].mxu0 }
 0x46a   :  { %v13415_v50 = vpop.f32.mrb[50].mxu1 }
 0x46b   :  { %16700 = vst [vmem:[#allocation13_spill] sm:$0xff] %v13415_v50  ;;  %v13417_v22 = vpop.f32.mrb[51].mxu1 }
 0x46c   :  { %v3221_v37 = vpop.f32.mrb[34].mxu0  ;;  %16701 = vst [vmem:[#allocation14_spill] sm:$0xff] %v13417_v22  ;;  %v6138_v22 = vld [vmem:[#allocation4 + $0x48] sm:$0xff] }
 0x46d   :  { %v13413_v24 = vadd.f32 %v13183_v13, %v3221_v37  ;;  %v3223_v20 = vpop.f32.mrb[35].mxu0  ;;  %v6135_v37 = vld [vmem:[#allocation4 + $0x30] sm:$0xff] }
 0x46e   :  { %v6136_v20 = vld [vmem:[#allocation4 + $0x38] sm:$0xff] }
 0x46f   :  { %v9731_v54 = vpack.c.bf16 %v6136_v20, %v6135_v37 }
 0x470   :  { %v3226_v21 = vpop.f32.mrb[36].mxu0 }
 0x471   :  { %v13420_v63 = vadd.f32 %v13197_v53, %v3226_v21  ;;  %v3228_v7 = vpop.f32.mrb[37].mxu0  ;;  %9732 = vmatpush1.bf16.msra.mxu1 %v9731_v54 }
 0x472   :  { %v13426_v27 = vpop.f32.mrb[52].mxu1  ;;  %9733 = vmatprep.subr.bf16.mxu1 %v16698_v3 }
 0x473   :  { %16702 = vst [vmem:[#allocation15_spill] sm:$0xff] %v13426_v27  ;;  %v13428_v6 = vpop.f32.mrb[53].mxu1 }
 0x474   :  { %v3231_v34 = vpop.f32.mrb[38].mxu0  ;;  %16703 = vst [vmem:[#allocation16_spill] sm:$0xff] %v13428_v6  ;;  %v6140_v6 = vld [vmem:[#allocation4 + $0x58] sm:$0xff] }
 0x475   :  { %v13424_v13 = vadd.f32 %v13195_v29, %v3231_v34  ;;  %v3233_v23 = vpop.f32.mrb[39].mxu0 }
 0x476   :  { %v6137_v23 = vld [vmem:[#allocation4 + $0x40] sm:$0xff] }
 0x477   :  { %v9734_v37 = vpack.c.bf16 %v6138_v22, %v6137_v23 }
 0x478   :  { %v3236_v50 = vpop.f32.mrb[40].mxu0 }
 0x479   :  { %v13431_v53 = vadd.f32 %v13209_v9, %v3236_v50  ;;  %v3238_v21 = vpop.f32.mrb[41].mxu0  ;;  %9735 = vmatpush1.bf16.msra.mxu1 %v9734_v37 }
 0x47a   :  { %v13437_v20 = vpop.f32.mrb[54].mxu1  ;;  %9736 = vmatprep.subr.bf16.mxu1 %v16698_v3 }
 0x47b   :  { %16704 = vst [vmem:[#allocation17_spill] sm:$0xff] %v13437_v20  ;;  %v13439_v54 = vpop.f32.mrb[55].mxu1 }
 0x47c   :  { %v3241_v7 = vpop.f32.mrb[42].mxu0  ;;  %16705 = vst [vmem:[#allocation18_spill] sm:$0xff] %v13439_v54  ;;  %v6142_v54 = vld [vmem:[#allocation4 + $0x68] sm:$0xff] }
 0x47d   :  { %v13435_v29 = vadd.f32 %v13207_v62, %v3241_v7  ;;  %v3243_v34 = vpop.f32.mrb[43].mxu0 }
 0x47e   :  { %v6139_v34 = vld [vmem:[#allocation4 + $0x50] sm:$0xff] }
 0x47f   :  { %v9737_v22 = vpack.c.bf16 %v6140_v6, %v6139_v34 }
 0x480   :  { %v3246_v27 = vpop.f32.mrb[44].mxu0 }
 0x481   :  { %v13442_v9 = vadd.f32 %v13221_v38, %v3246_v27  ;;  %v3248_v50 = vpop.f32.mrb[45].mxu0  ;;  %9738 = vmatpush1.bf16.msra.mxu1 %v9737_v22 }
 0x482   :  { %v13448_v23 = vpop.f32.mrb[56].mxu1  ;;  %9739 = vmatprep.subr.bf16.mxu1 %v16698_v3 }
 0x483   :  { %16706 = vst [vmem:[#allocation19_spill] sm:$0xff] %v13448_v23  ;;  %v13450_v37 = vpop.f32.mrb[57].mxu1 }
 0x484   :  { %v3251_v21 = vpop.f32.mrb[46].mxu0  ;;  %16707 = vst [vmem:[#allocation20_spill] sm:$0xff] %v13450_v37  ;;  %v6144_v37 = vld [vmem:[#allocation4 + $0x78] sm:$0xff] }
 0x485   :  { %v13446_v62 = vadd.f32 %v13219_v41, %v3251_v21  ;;  %v3253_v7 = vpop.f32.mrb[47].mxu0 }
 0x486   :  { %v6141_v7 = vld [vmem:[#allocation4 + $0x60] sm:$0xff] }
 0x487   :  { %v9740_v6 = vpack.c.bf16 %v6142_v54, %v6141_v7 }
 0x488   :  { %v3256_v20 = vpop.f32.mrb[48].mxu0 }
 0x489   :  { %v13453_v38 = vadd.f32 %v13233_v45, %v3256_v20  ;;  %v3258_v27 = vpop.f32.mrb[49].mxu0  ;;  %9741 = vmatpush1.bf16.msra.mxu1 %v9740_v6 }
 0x48a   :  { %v13459_v34 = vpop.f32.mrb[58].mxu1  ;;  %9742 = vmatprep.subr.bf16.mxu1 %v16698_v3 }
 0x48b   :  { %16708 = vst [vmem:[#allocation21_spill] sm:$0xff] %v13459_v34  ;;  %v13461_v22 = vpop.f32.mrb[59].mxu1 }
 0x48c   :  { %v3261_v50 = vpop.f32.mrb[50].mxu0  ;;  %16709 = vst [vmem:[#allocation22_spill] sm:$0xff] %v13461_v22  ;;  %v6146_v22 = vld [vmem:[#allocation4 + $0x88] sm:$0xff] }
 0x48d   :  { %v13457_v41 = vadd.f32 %v13231_v51, %v3261_v50  ;;  %v3263_v21 = vpop.f32.mrb[51].mxu0 }
 0x48e   :  { %v6143_v21 = vld [vmem:[#allocation4 + $0x70] sm:$0xff]  ;;  %v13470_v7 = vpop.f32.mrb[60].mxu1 }
 0x48f   :  { %v9743_v54 = vpack.c.bf16 %v6144_v37, %v6143_v21  ;;  %16710 = vst [vmem:[#allocation23_spill] sm:$0xff] %v13470_v7  ;;  %v13472_v6 = vpop.f32.mrb[61].mxu1 }
 0x490   :  { %v3266_v23 = vpop.f32.mrb[52].mxu0  ;;  %16711 = vst [vmem:[#allocation24_spill] sm:$0xff] %v13472_v6  ;;  %v6148_v6 = vld [vmem:[#allocation4 + $0x98] sm:$0xff] }
 0x491   :  { %v13464_v45 = vadd.f32 %v13245_v2, %v3266_v23  ;;  %v3268_v20 = vpop.f32.mrb[53].mxu0  ;;  %9744 = vmatpush1.bf16.msra.mxu1 %v9743_v54 }
 0x492   :  { %9745 = vmatprep.subr.bf16.mxu1 %v16698_v3 }
 0x494   :  { %v3271_v27 = vpop.f32.mrb[54].mxu0 }
 0x495   :  { %v13468_v51 = vadd.f32 %v13243_v59, %v3271_v27  ;;  %v3273_v50 = vpop.f32.mrb[55].mxu0 }
 0x496   :  { %v6145_v50 = vld [vmem:[#allocation4 + $0x80] sm:$0xff] }
 0x497   :  { %v9746_v37 = vpack.c.bf16 %v6146_v22, %v6145_v50  ;;  %v3911_v22 = vmul.f32 %v13291_v4, %v13291_v4 }
 0x498   :  { %v3276_v34 = vpop.f32.mrb[56].mxu0 }
 0x499   :  { %v13475_v2 = vadd.f32 %v13257_v14, %v3276_v34  ;;  %v3278_v23 = vpop.f32.mrb[57].mxu0  ;;  %9747 = vmatpush1.bf16.msra.mxu1 %v9746_v37  ;;  %v3910_v37 = vmul.f32 %v13284_v48, %v13284_v48 }
 0x49a   :  { %9748 = vmatprep.subr.bf16.mxu1 %v16698_v3 }
 0x49b   :  { %16712 = vst [vmem:[#allocation25_spill] sm:$0xff] %v13475_v2  ;;  %v13481_v21 = vpop.f32.mrb[62].mxu1 }
 0x49c   :  { %v3281_v20 = vpop.f32.mrb[58].mxu0  ;;  %16713 = vst [vmem:[#allocation26_spill] sm:$0xff] %v13481_v21  ;;  %v13483_v54 = vpop.f32.mrb[63].mxu1 }
 0x49d   :  { %v13479_v59 = vadd.f32 %v13255_v18, %v3281_v20  ;;  %v3283_v27 = vpop.f32.mrb[59].mxu0  ;;  %16714 = vst [vmem:[#allocation27_spill] sm:$0xff] %v13483_v54  ;;  %v3914_v54 = vmul.f32 %v13320_v8, %v13320_v8 }
 0x49e   :  { %v6147_v27 = vld [vmem:[#allocation4 + $0x90] sm:$0xff] }
 0x49f   :  { %v9749_v50 = vpack.c.bf16 %v6148_v6, %v6147_v27  ;;  %v3913_v6 = vmul.f32 %v13309_v57, %v13309_v57 }
 0x4a0   :  { %v3286_v7 = vpop.f32.mrb[60].mxu0 }
 0x4a1   :  { %v13486_v14 = vadd.f32 %v13269_v42, %v3286_v7  ;;  %v3288_v34 = vpop.f32.mrb[61].mxu0  ;;  %v3912_v42 = vmul.f32 %v13302_v0, %v13302_v0  ;;  %9750 = vmatpush1.bf16.msra.mxu1 %v9749_v50 }
 0x4a2   :  { %v3840_v34 = vadd.f32 %v13291_v4, %v13284_v48  ;;  %9751 = vmatprep.subr.bf16.mxu1 %v16698_v3 }
 0x4a4   :  { %v3291_v23 = vpop.f32.mrb[62].mxu0  ;;  %v3841_v27 = vadd.f32 %v3840_v34, %v13302_v0 }
 0x4a5   :  { %v13490_v18 = vadd.f32 %v13267_v5, %v3291_v23  ;;  %v3293_v20 = vpop.f32.mrb[63].mxu0 }
 0x4a6   :  { %v3974_v20 = vadd.f32 %v3911_v22, %v3910_v37  ;;  %v3842_v40 = vadd.f32 %v3841_v27, %v13309_v57  ;;  %v3915_v22 = vmul.f32 %v13327_v17, %v13327_v17 }
 0x4a8   :  { %v3296_v7 = vpop.f32.mrb[64].mxu0  ;;  %v3975_v21 = vadd.f32 %v3974_v20, %v3912_v42  ;;  %v3843_v37 = vadd.f32 %v3842_v40, %v13320_v8  ;;  %v3916_v42 = vmul.f32 %v13338_v33, %v13338_v33  ;;  %v3918_v40 = vmul.f32 %v13359_v55, %v13359_v55 }
 0x4a9   :  { %v13501_v5 = vadd.f32 %v13281_v32, %v3296_v7  ;;  %v3298_v23 = vpop.f32.mrb[65].mxu0 }
 0x4aa   :  { %v3976_v7 = vadd.f32 %v3975_v21, %v3913_v6  ;;  %v3844_v20 = vadd.f32 %v3843_v37, %v13327_v17  ;;  %v3917_v21 = vmul.f32 %v13345_v36, %v13345_v36 }
 0x4ac   :  { %v3301_v50 = vpop.f32.mrb[66].mxu0  ;;  %v3977_v23 = vadd.f32 %v3976_v7, %v3914_v54  ;;  %v3845_v6 = vadd.f32 %v3844_v20, %v13338_v33 }
 0x4ad   :  { %v13511_v4 = vadd.f32 %v13279_v19, %v3301_v50  ;;  %v3303_v32 = vpop.f32.mrb[67].mxu0 }
 0x4ae   :  { %v3978_v19 = vadd.f32 %v3977_v23, %v3915_v22  ;;  %v3846_v32 = vadd.f32 %v3845_v6, %v13345_v36  ;;  %v3919_v22 = vmul.f32 %v13368_v31, %v13368_v31 }
 0x4af   :  { %16715 = vst [vmem:[#allocation28_spill] sm:$0xff] %v13511_v4 }
 0x4b0   :  { %v3306_v34 = vpop.f32.mrb[68].mxu0  ;;  %v3979_v50 = vadd.f32 %v3978_v19, %v3916_v42  ;;  %v3847_v23 = vadd.f32 %v3846_v32, %v13359_v55  ;;  %v3920_v42 = vmul.f32 %v13378_v11, %v13378_v11 }
 0x4b1   :  { %v13520_v0 = vadd.f32 %v13299_v46, %v3306_v34  ;;  %v3308_v27 = vpop.f32.mrb[69].mxu0 }
 0x4b2   :  { %v3980_v46 = vadd.f32 %v3979_v50, %v3917_v21  ;;  %v3848_v27 = vadd.f32 %v3847_v23, %v13368_v31  ;;  %v3921_v21 = vmul.f32 %v13381_v39, %v13381_v39 }
 0x4b4   :  { %v3311_v54 = vpop.f32.mrb[70].mxu0  ;;  %v3981_v34 = vadd.f32 %v3980_v46, %v3918_v40  ;;  %v3849_v50 = vadd.f32 %v3848_v27, %v13378_v11  ;;  %v3922_v40 = vmul.f32 %v13388_v61, %v13388_v61 }
 0x4b5   :  { %v13529_v7 = vadd.f32 %v13297_v10, %v3311_v54  ;;  %v3313_v37 = vpop.f32.mrb[71].mxu0 }
 0x4b6   :  { %v3982_v10 = vadd.f32 %v3981_v34, %v3919_v22  ;;  %v3850_v37 = vadd.f32 %v3849_v50, %v13381_v39  ;;  %v3923_v22 = vmul.f32 %v13391_v15, %v13391_v15 }
 0x4b8   :  { %v3316_v20 = vpop.f32.mrb[72].mxu0  ;;  %v3983_v54 = vadd.f32 %v3982_v10, %v3920_v42  ;;  %v3851_v34 = vadd.f32 %v3850_v37, %v13388_v61  ;;  %v3924_v42 = vmul.f32 %v13398_v60, %v13398_v60 }
 0x4b9   :  { %v13538_v19 = vadd.f32 %v13317_v58, %v3316_v20  ;;  %v3318_v6 = vpop.f32.mrb[73].mxu0 }
 0x4ba   :  { %v3984_v58 = vadd.f32 %v3983_v54, %v3921_v21  ;;  %v3852_v6 = vadd.f32 %v3851_v34, %v13391_v15  ;;  %v3925_v21 = vmul.f32 %v13402_v16, %v13402_v16 }
 0x4bb   :  { %16716 = vst [vmem:[#allocation29_spill] sm:$0xff] %v13538_v19 }
 0x4bc   :  { %v3321_v32 = vpop.f32.mrb[74].mxu0  ;;  %v3985_v20 = vadd.f32 %v3984_v58, %v3922_v40  ;;  %v3853_v54 = vadd.f32 %v3852_v6, %v13398_v60  ;;  %v3926_v40 = vmul.f32 %v13409_v56, %v13409_v56 }
 0x4bd   :  { %v13547_v46 = vadd.f32 %v13315_v1, %v3321_v32  ;;  %v3323_v23 = vpop.f32.mrb[75].mxu0 }
 0x4be   :  { %v3986_v1 = vadd.f32 %v3985_v20, %v3923_v22  ;;  %v3854_v23 = vadd.f32 %v3853_v54, %v13402_v16  ;;  %v3927_v22 = vmul.f32 %v13413_v24, %v13413_v24 }
 0x4bf   :  { %16717 = vst [vmem:[#allocation30_spill] sm:$0xff] %v13547_v46 }
 0x4c0   :  { %v3326_v27 = vpop.f32.mrb[76].mxu0  ;;  %v3987_v32 = vadd.f32 %v3986_v1, %v3924_v42  ;;  %v3855_v20 = vadd.f32 %v3854_v23, %v13409_v56  ;;  %v3928_v42 = vmul.f32 %v13420_v63, %v13420_v63 }
 0x4c1   :  { %v13556_v10 = vadd.f32 %v13335_v26, %v3326_v27  ;;  %v3328_v50 = vpop.f32.mrb[77].mxu0 }
 0x4c2   :  { %v3988_v26 = vadd.f32 %v3987_v32, %v3925_v21  ;;  %v3856_v50 = vadd.f32 %v3855_v20, %v13413_v24  ;;  %v3929_v21 = vmul.f32 %v13424_v13, %v13424_v13 }
 0x4c3   :  { %16718 = vst [vmem:[#allocation31_spill] sm:$0xff] %v13556_v10 }
 0x4c4   :  { %v3331_v37 = vpop.f32.mrb[78].mxu0  ;;  %v3989_v27 = vadd.f32 %v3988_v26, %v3926_v40  ;;  %v3857_v32 = vadd.f32 %v3856_v50, %v13420_v63  ;;  %v3930_v40 = vmul.f32 %v13431_v53, %v13431_v53 }
 0x4c5   :  { %v13565_v58 = vadd.f32 %v13333_v25, %v3331_v37  ;;  %v3333_v34 = vpop.f32.mrb[79].mxu0 }
 0x4c6   :  { %v3990_v25 = vadd.f32 %v3989_v27, %v3927_v22  ;;  %v3858_v34 = vadd.f32 %v3857_v32, %v13424_v13  ;;  %v3931_v22 = vmul.f32 %v13435_v29, %v13435_v29 }
 0x4c7   :  { %16719 = vst [vmem:[#allocation32_spill] sm:$0xff] %v13565_v58 }
 0x4c8   :  { %v3336_v6 = vpop.f32.mrb[80].mxu0  ;;  %v3991_v37 = vadd.f32 %v3990_v25, %v3928_v42  ;;  %v3859_v27 = vadd.f32 %v3858_v34, %v13431_v53  ;;  %v3932_v42 = vmul.f32 %v13442_v9, %v13442_v9 }
 0x4c9   :  { %v13574_v1 = vadd.f32 %v13356_v43, %v3336_v6  ;;  %v3338_v54 = vpop.f32.mrb[81].mxu0 }
 0x4ca   :  { %v3992_v43 = vadd.f32 %v3991_v37, %v3929_v21  ;;  %v3860_v54 = vadd.f32 %v3859_v27, %v13435_v29  ;;  %v3933_v21 = vmul.f32 %v13446_v62, %v13446_v62 }
 0x4cc   :  { %v3341_v23 = vpop.f32.mrb[82].mxu0  ;;  %v3993_v6 = vadd.f32 %v3992_v43, %v3930_v40  ;;  %v3861_v37 = vadd.f32 %v3860_v54, %v13442_v9  ;;  %v3934_v40 = vmul.f32 %v13453_v38, %v13453_v38 }
 0x4cd   :  { %v13583_v26 = vadd.f32 %v13354_v30, %v3341_v23  ;;  %v3343_v20 = vpop.f32.mrb[83].mxu0 }
 0x4ce   :  { %v3994_v30 = vadd.f32 %v3993_v6, %v3931_v22  ;;  %v3862_v20 = vadd.f32 %v3861_v37, %v13446_v62  ;;  %v3935_v22 = vmul.f32 %v13457_v41, %v13457_v41 }
 0x4d0   :  { %v3346_v50 = vpop.f32.mrb[84].mxu0  ;;  %v3995_v23 = vadd.f32 %v3994_v30, %v3932_v42  ;;  %v3863_v6 = vadd.f32 %v3862_v20, %v13453_v38  ;;  %v3936_v42 = vmul.f32 %v13464_v45, %v13464_v45 }
 0x4d1   :  { %v13592_v25 = vadd.f32 %v13375_v12, %v3346_v50  ;;  %v3348_v32 = vpop.f32.mrb[85].mxu0 }
 0x4d2   :  { %v3996_v12 = vadd.f32 %v3995_v23, %v3933_v21  ;;  %v3864_v32 = vadd.f32 %v3863_v6, %v13457_v41  ;;  %v3937_v21 = vmul.f32 %v13468_v51, %v13468_v51 }
 0x4d4   :  { %v3351_v34 = vpop.f32.mrb[86].mxu0  ;;  %v3997_v50 = vadd.f32 %v3996_v12, %v3934_v40  ;;  %v3865_v23 = vadd.f32 %v3864_v32, %v13464_v45  ;;  %v3938_v40 = vmul.f32 %v13475_v2, %v13475_v2 }
 0x4d5   :  { %v13601_v43 = vadd.f32 %v13373_v44, %v3351_v34  ;;  %v3353_v27 = vpop.f32.mrb[87].mxu0 }
 0x4d6   :  { %v3998_v44 = vadd.f32 %v3997_v50, %v3935_v22  ;;  %v3866_v27 = vadd.f32 %v3865_v23, %v13468_v51  ;;  %v3939_v22 = vmul.f32 %v13479_v59, %v13479_v59 }
 0x4d7   :  { %16720 = vst [vmem:[#allocation33_spill] sm:$0xff] %v13601_v43 }
 0x4d8   :  { %v3356_v54 = vpop.f32.mrb[88].mxu0  ;;  %v3999_v34 = vadd.f32 %v3998_v44, %v3936_v42  ;;  %v3867_v50 = vadd.f32 %v3866_v27, %v13475_v2  ;;  %v3940_v42 = vmul.f32 %v13486_v14, %v13486_v14 }
 0x4d9   :  { %v13610_v30 = vadd.f32 %v13385_v35, %v3356_v54  ;;  %v3358_v37 = vpop.f32.mrb[89].mxu0 }
 0x4da   :  { %v4000_v35 = vadd.f32 %v3999_v34, %v3937_v21  ;;  %v3868_v37 = vadd.f32 %v3867_v50, %v13479_v59  ;;  %v3941_v21 = vmul.f32 %v13490_v18, %v13490_v18 }
 0x4db   :  { %16721 = vst [vmem:[#allocation34_spill] sm:$0xff] %v13610_v30 }
 0x4dc   :  { %v3361_v20 = vpop.f32.mrb[90].mxu0  ;;  %v4001_v54 = vadd.f32 %v4000_v35, %v3938_v40  ;;  %v3869_v27 = vadd.f32 %v3868_v37, %v13486_v14  ;;  %v3942_v35 = vmul.f32 %v13501_v5, %v13501_v5  ;;  %v3943_v37 = vmul.f32 %v13511_v4, %v13511_v4 }
 0x4dd   :  { %v13619_v12 = vadd.f32 %v13383_v28, %v3361_v20  ;;  %v3363_v6 = vpop.f32.mrb[91].mxu0  ;;  %v6149_v28 = vld [vmem:[#allocation4 + $0xa0] sm:$0xff]  ;;  %v6150_v20 = vld [vmem:[#allocation4 + $0xa8] sm:$0xff] }
 0x4de   :  { %v4002_v6 = vadd.f32 %v4001_v54, %v3939_v22  ;;  %v9752_v34 = vpack.c.bf16 %v6150_v20, %v6149_v28  ;;  %v3870_v50 = vadd.f32 %v3869_v27, %v13490_v18  ;;  %v6151_v22 = vld [vmem:[#allocation4 + $0xb0] sm:$0xff]  ;;  %v6152_v54 = vld [vmem:[#allocation4 + $0xb8] sm:$0xff]  ;;  %v6257_v28 = vld [vmem:[#allocation4 + $0x400] sm:$0xff] }
 0x4df   :  { %16722 = vst [vmem:[#allocation35_spill] sm:$0xff] %v13619_v12  ;;  %v6258_v20 = vld [vmem:[#allocation4 + $0x408] sm:$0xff] }
 0x4e0   :  { %v3366_v32 = vpop.f32.mrb[92].mxu0  ;;  %v4003_v40 = vadd.f32 %v4002_v6, %v3940_v42  ;;  %9753 = vmatpush1.bf16.msra.mxu1 %v9752_v34  ;;  %v9755_v42 = vpack.c.bf16 %v6152_v54, %v6151_v22  ;;  %v3871_v6 = vadd.f32 %v3870_v50, %v13501_v5  ;;  %v13643_v34 = vpack.c.bf16 %v6258_v20, %v6257_v28  ;;  %v6153_v22 = vld [vmem:[#allocation4 + $0xc0] sm:$0xff]  ;;  %v6154_v54 = vld [vmem:[#allocation4 + $0xc8] sm:$0xff]  ;;  %v6260_v28 = vld [vmem:[#allocation4 + $0x418] sm:$0xff] }
 0x4e1   :  { %v13628_v44 = vadd.f32 %v13395_v49, %v3366_v32  ;;  %v3368_v23 = vpop.f32.mrb[93].mxu0  ;;  %9754 = vmatprep.subr.bf16.mxu1 %v16698_v3 }
 0x4e2   :  { %v4004_v23 = vadd.f32 %v4003_v40, %v3941_v21  ;;  %16723 = vst [vmem:[#allocation36_spill] sm:$0xff] %v13643_v34  ;;  %9914 = vmatprep.subr.bf16.mxu0 %v13643_v34 }
 0x4e3   :  { %9916 = vmatpush3.bf16.msra.mxu0 %v13643_v34  ;;  %v6156_v34 = vld [vmem:[#allocation4 + $0xd8] sm:$0xff] }
 0x4e4   :  { %v3371_v2 = vpop.f32.mrb[94].mxu0  ;;  %v4005_v27 = vadd.f32 %v4004_v23, %v3942_v35  ;;  %9756 = vmatpush1.bf16.msra.mxu1 %v9755_v42  ;;  %v3945_v35 = vmul.f32 %v13529_v7, %v13529_v7  ;;  %v9758_v23 = vpack.c.bf16 %v6154_v54, %v6153_v22  ;;  %v6259_v42 = vld [vmem:[#allocation4 + $0x410] sm:$0xff] }
 0x4e5   :  { %v13637_v49 = vadd.f32 %v13393_v47, %v3371_v2  ;;  %v3373_v32 = vpop.f32.mrb[95].mxu0  ;;  %v3944_v47 = vmul.f32 %v13520_v0, %v13520_v0  ;;  %9757 = vmatprep.subr.bf16.mxu1 %v16698_v3  ;;  %v6155_v54 = vld [vmem:[#allocation4 + $0xd0] sm:$0xff] }
 0x4e6   :  { %v3872_v32 = vadd.f32 %v3871_v6, %v13511_v4  ;;  %v4006_v50 = vadd.f32 %v4005_v27, %v3943_v37  ;;  %v16725_v27 = vld [vmem:[#allocation12_spill] sm:$0xff] }
 0x4e8   :  { %v3376_v2 = vpop.f32.mrb[96].mxu0  ;;  %v3873_v20 = vadd.f32 %v3872_v32, %v13520_v0  ;;  %v4007_v6 = vadd.f32 %v4006_v50, %v3944_v47  ;;  %9759 = vmatpush1.bf16.msra.mxu1 %v9758_v23  ;;  %v3947_v47 = vmul.f32 %v13547_v46, %v13547_v46  ;;  %v9761_v50 = vpack.c.bf16 %v6156_v34, %v6155_v54  ;;  %v6261_v23 = vld [vmem:[#allocation4 + $0x420] sm:$0xff] }
 0x4e9   :  { %v13649_v21 = vadd.f32 %v13406_v52, %v3376_v2  ;;  %v3378_v40 = vpop.f32.mrb[97].mxu0  ;;  %v13657_v52 = vpack.c.bf16 %v6260_v28, %v6259_v42  ;;  %v3946_v2 = vmul.f32 %v13538_v19, %v13538_v19  ;;  %9760 = vmatprep.subr.bf16.mxu1 %v16698_v3  ;;  %v6262_v42 = vld [vmem:[#allocation4 + $0x428] sm:$0xff] }
 0x4ea   :  { %v3874_v37 = vadd.f32 %v3873_v20, %v13529_v7  ;;  %v4008_v32 = vadd.f32 %v4007_v6, %v3945_v35  ;;  %v13671_v20 = vpack.c.bf16 %v6262_v42, %v6261_v23  ;;  %v16727_v6 = vld [vmem:[#allocation14_spill] sm:$0xff]  ;;  %v13698_v42 = vld [vmem:[#allocation4 + $0x430] sm:$0xff] }
 0x4eb   :  { %16724 = vst [vmem:[#allocation37_spill] sm:$0xff] %v13657_v52  ;;  %9918 = vmatprep.subr.bf16.mxu0 %v13657_v52 }
 0x4ec   :  { %v3381_v40 = vpop.f32.mrb[98].mxu0  ;;  %9920 = vmatpush3.bf16.msra.mxu0 %v13657_v52  ;;  %v3875_v28 = vadd.f32 %v3874_v37, %v13538_v19  ;;  %16726 = vst [vmem:[#allocation12_spill] sm:$0xff] %v13671_v20  ;;  %9762 = vmatpush1.bf16.msra.mxu1 %v9761_v50  ;;  %v13685_v37 = vld [vmem:[#allocation4 + $0xe0] sm:$0xff]  ;;  %v13693_v50 = vmul.f32 %v13565_v58, %v13565_v58  ;;  %v16730_v52 = vld [vmem:[#allocation13_spill] sm:$0xff] }
 0x4ed   :  { %v13663_v4 = vadd.f32 %v16725_v27, %v3381_v40  ;;  %v3383_v22 = vpop.f32.mrb[99].mxu0  ;;  %v4009_v40 = vadd.f32 %v4008_v32, %v3946_v2  ;;  %v13675_v27 = vmul.f32 %v13556_v10, %v13556_v10  ;;  %9763 = vmatprep.subr.bf16.mxu1 %v16698_v3  ;;  %9922 = vmatprep.subr.bf16.mxu0 %v13671_v20  ;;  %v13687_v2 = vld [vmem:[#allocation4 + $0xe8] sm:$0xff] }
 0x4ee   :  { %v13678_v35 = vadd.f32 %v3875_v28, %v13547_v46  ;;  %v13700_v28 = vld [vmem:[#allocation4 + $0x438] sm:$0xff] }
 0x4ef   :  { %v13689_v32 = vadd.f32 %v4009_v40, %v3947_v47  ;;  %v13782_v40 = vpack.c.bf16 %v13700_v28, %v13698_v42  ;;  %v6159_v42 = vld [vmem:[#allocation4 + $0xf0] sm:$0xff]  ;;  %v3951_v28 = vmul.f32 %v13583_v26, %v13583_v26 }
 0x4f0   :  { %v3386_v22 = vpop.f32.mrb[100].mxu0  ;;  %9924 = vmatpush3.bf16.msra.mxu0 %v13671_v20  ;;  %v3877_v47 = vadd.f32 %v13678_v35, %v13556_v10  ;;  %v16729_v20 = vpack.c.bf16 %v13687_v2, %v13685_v37  ;;  %v6266_v37 = vld [vmem:[#allocation4 + $0x448] sm:$0xff] }
 0x4f1   :  { %v13681_v34 = vadd.f32 %v16727_v6, %v3386_v22  ;;  %v3388_v54 = vpop.f32.mrb[101].mxu0  ;;  %v16570_v22 = vmov 0.0   ;;  %16728 = vst [vmem:[#allocation14_spill] sm:$0xff] %v13782_v40  ;;  %v4011_v6 = vadd.f32 %v13689_v32, %v13675_v27  ;;  %9926 = vmatprep.subr.bf16.mxu0 %v13782_v40  ;;  %v6160_v27 = vld [vmem:[#allocation4 + $0xf8] sm:$0xff] }
 0x4f2   :  { %4323 = vst [vmem:[#allocation3] sm:$0xff] %v16570_v22  ;;  %4324 = vst [vmem:[#allocation3 + $0x8] sm:$0xff] %v16570_v22  ;;  %v3950_v54 = vmul.f32 %v13574_v1, %v13574_v1  ;;  %9765 = vmatpush1.bf16.msra.mxu1 %v16729_v20  ;;  %v6265_v20 = vld [vmem:[#allocation4 + $0x440] sm:$0xff]  ;;  %v9767_v2 = vpack.c.bf16 %v6160_v27, %v6159_v42  ;;  %v6267_v42 = vld [vmem:[#allocation4 + $0x450] sm:$0xff] }
 0x4f3   :  { %4325 = vst [vmem:[#allocation3 + $0x10] sm:$0x3] %v16570_v22  ;;  %4326 = vst [vmem:[#allocation3 + $0x1b0] sm:$0xff] %v16570_v22  ;;  %9766 = vmatprep.subr.bf16.mxu1 %v16698_v3  ;;  %v4012_v32 = vadd.f32 %v4011_v6, %v13693_v50  ;;  %v16733_v6 = vld [vmem:[#allocation16_spill] sm:$0xff]  ;;  %v6268_v27 = vld [vmem:[#allocation4 + $0x458] sm:$0xff] }
 0x4f4   :  { %4327 = vst [vmem:[#allocation3 + $0x1b8] sm:$0xff] %v16570_v22  ;;  %4328 = vst [vmem:[#allocation3 + $0x1c0] sm:$0x3] %v16570_v22  ;;  %v3391_v23 = vpop.f32.mrb[102].mxu0  ;;  %9928 = vmatpush3.bf16.msra.mxu0 %v13782_v40 }
 0x4f5   :  { %4330 = vst [vmem:[#allocation3 + $0x198] sm:$0xff] %v16570_v22  ;;  %4331 = vst [vmem:[#allocation3 + $0x1a0] sm:$0xff] %v16570_v22  ;;  %v13793_v46 = vadd.f32 %v16730_v52, %v3391_v23  ;;  %v3393_v35 = vpop.f32.mrb[103].mxu0  ;;  %v13802_v23 = vpack.c.bf16 %v6266_v37, %v6265_v20  ;;  %v13816_v20 = vpack.c.bf16 %v6268_v27, %v6267_v42  ;;  %v6270_v42 = vld [vmem:[#allocation4 + $0x468] sm:$0xff] }
 0x4f6   :  { %4332 = vst [vmem:[#allocation3 + $0x1a8] sm:$0x3] %v16570_v22  ;;  %4333 = vst [vmem:[#allocation3 + $0x348] sm:$0xff] %v16570_v22  ;;  %v3952_v35 = vmul.f32 %v13592_v25, %v13592_v25  ;;  %9768 = vmatpush1.bf16.msra.mxu1 %v9767_v2  ;;  %v3954_v37 = vmul.f32 %v13610_v30, %v13610_v30 }
 0x4f7   :  { %4334 = vst [vmem:[#allocation3 + $0x350] sm:$0xff] %v16570_v22  ;;  %4335 = vst [vmem:[#allocation3 + $0x358] sm:$0x3] %v16570_v22  ;;  %9930 = vmatprep.subr.bf16.mxu0 %v13802_v23  ;;  %9769 = vmatprep.subr.bf16.mxu1 %v16698_v3 }
 0x4f8   :  { %4336 = vst [vmem:[#allocation3 + $0x18] sm:$0x1] %v16570_v22  ;;  %4337 = vst [vmem:[#allocation3 + $0x30] sm:$0x1] %v16570_v22  ;;  %9932 = vmatpush3.bf16.msra.mxu0 %v13802_v23 }
 0x4f9   :  { %4338 = vst [vmem:[#allocation3 + $0x48] sm:$0x1] %v16570_v22  ;;  %4339 = vst [vmem:[#allocation3 + $0x60] sm:$0x1] %v16570_v22  ;;  %v4528_v40 = vld [vmem:[#allocation3 + $0x1] sm:$0xff]  ;;  %9934 = vmatprep.subr.bf16.mxu0 %v13816_v20 }
 0x4fa   :  { %4340 = vst [vmem:[#allocation3 + $0x78] sm:$0x1] %v16570_v22  ;;  %4341 = vst [vmem:[#allocation3 + $0x90] sm:$0x1] %v16570_v22  ;;  %6337 = vmatprep.mubr.f32.mxu1 %v4528_v40  ;;  %v4529_v40 = vld [vmem:[#allocation3 + $0x9] sm:$0xff] }
 0x4fb   :  { %4342 = vst [vmem:[#allocation3 + $0xa8] sm:$0x1] %v16570_v22  ;;  %4343 = vst [vmem:[#allocation3 + $0xc0] sm:$0x1] %v16570_v22 }
 0x4fc   :  { %4344 = vst [vmem:[#allocation3 + $0xd8] sm:$0x1] %v16570_v22  ;;  %4345 = vst [vmem:[#allocation3 + $0xf0] sm:$0x1] %v16570_v22  ;;  %9936 = vmatpush3.bf16.msra.mxu0 %v13816_v20 }
 0x4fd   :  { %4346 = vst [vmem:[#allocation3 + $0x108] sm:$0x1] %v16570_v22  ;;  %4347 = vst [vmem:[#allocation3 + $0x120] sm:$0x1] %v16570_v22 }
 0x4fe   :  { %4348 = vst [vmem:[#allocation3 + $0x138] sm:$0x1] %v16570_v22  ;;  %4349 = vst [vmem:[#allocation3 + $0x150] sm:$0x1] %v16570_v22 }
 0x4ff   :  { %4350 = vst [vmem:[#allocation3 + $0x168] sm:$0x1] %v16570_v22  ;;  %4351 = vst [vmem:[#allocation3 + $0x180] sm:$0x1] %v16570_v22 }
 0x500   :  { %4352 = vst [vmem:[#allocation3 + $0x1c8] sm:$0x1] %v16570_v22  ;;  %4353 = vst [vmem:[#allocation3 + $0x1e0] sm:$0x1] %v16570_v22 }
 0x501   :  { %4354 = vst [vmem:[#allocation3 + $0x1f8] sm:$0x1] %v16570_v22  ;;  %4355 = vst [vmem:[#allocation3 + $0x210] sm:$0x1] %v16570_v22 }
 0x502   :  { %4356 = vst [vmem:[#allocation3 + $0x228] sm:$0x1] %v16570_v22  ;;  %4357 = vst [vmem:[#allocation3 + $0x240] sm:$0x1] %v16570_v22 }
 0x503   :  { %4358 = vst [vmem:[#allocation3 + $0x258] sm:$0x1] %v16570_v22  ;;  %4359 = vst [vmem:[#allocation3 + $0x270] sm:$0x1] %v16570_v22 }
 0x504   :  { %4360 = vst [vmem:[#allocation3 + $0x288] sm:$0x1] %v16570_v22  ;;  %4361 = vst [vmem:[#allocation3 + $0x2a0] sm:$0x1] %v16570_v22 }
 0x505   :  { %4362 = vst [vmem:[#allocation3 + $0x2b8] sm:$0x1] %v16570_v22  ;;  %4363 = vst [vmem:[#allocation3 + $0x2d0] sm:$0x1] %v16570_v22 }
 0x506   :  { %4364 = vst [vmem:[#allocation3 + $0x2e8] sm:$0x1] %v16570_v22  ;;  %4365 = vst [vmem:[#allocation3 + $0x300] sm:$0x1] %v16570_v22 }
 0x507   :  { %4366 = vst [vmem:[#allocation3 + $0x318] sm:$0x1] %v16570_v22  ;;  %4367 = vst [vmem:[#allocation3 + $0x330] sm:$0x1] %v16570_v22 }
 0x508   :  { %4368 = vst [vmem:[#allocation3 + $0x29] sm:$0x1] %v16570_v22  ;;  %4369 = vst [vmem:[#allocation3 + $0x41] sm:$0x1] %v16570_v22 }
 0x509   :  { %4370 = vst [vmem:[#allocation3 + $0x59] sm:$0x1] %v16570_v22  ;;  %4371 = vst [vmem:[#allocation3 + $0x71] sm:$0x1] %v16570_v22 }
 0x50a   :  { %4372 = vst [vmem:[#allocation3 + $0x89] sm:$0x1] %v16570_v22  ;;  %4373 = vst [vmem:[#allocation3 + $0xa1] sm:$0x1] %v16570_v22 }
 0x50b   :  { %4374 = vst [vmem:[#allocation3 + $0xb9] sm:$0x1] %v16570_v22  ;;  %4375 = vst [vmem:[#allocation3 + $0xd1] sm:$0x1] %v16570_v22 }
 0x50c   :  { %4376 = vst [vmem:[#allocation3 + $0xe9] sm:$0x1] %v16570_v22  ;;  %4377 = vst [vmem:[#allocation3 + $0x101] sm:$0x1] %v16570_v22 }
 0x50d   :  { %4378 = vst [vmem:[#allocation3 + $0x119] sm:$0x1] %v16570_v22  ;;  %4379 = vst [vmem:[#allocation3 + $0x131] sm:$0x1] %v16570_v22 }
 0x50e   :  { %4380 = vst [vmem:[#allocation3 + $0x149] sm:$0x1] %v16570_v22  ;;  %4381 = vst [vmem:[#allocation3 + $0x161] sm:$0x1] %v16570_v22 }
 0x50f   :  { %4382 = vst [vmem:[#allocation3 + $0x179] sm:$0x1] %v16570_v22  ;;  %4383 = vst [vmem:[#allocation3 + $0x191] sm:$0x1] %v16570_v22 }
 0x510   :  { %4384 = vst [vmem:[#allocation3 + $0x1d9] sm:$0x1] %v16570_v22  ;;  %4385 = vst [vmem:[#allocation3 + $0x1f1] sm:$0x1] %v16570_v22 }
 0x511   :  { %4386 = vst [vmem:[#allocation3 + $0x209] sm:$0x1] %v16570_v22  ;;  %4387 = vst [vmem:[#allocation3 + $0x221] sm:$0x1] %v16570_v22 }
 0x512   :  { %4388 = vst [vmem:[#allocation3 + $0x239] sm:$0x1] %v16570_v22  ;;  %4389 = vst [vmem:[#allocation3 + $0x251] sm:$0x1] %v16570_v22 }
 0x513   :  { %4390 = vst [vmem:[#allocation3 + $0x269] sm:$0x1] %v16570_v22  ;;  %4391 = vst [vmem:[#allocation3 + $0x281] sm:$0x1] %v16570_v22 }
 0x514   :  { %4392 = vst [vmem:[#allocation3 + $0x299] sm:$0x1] %v16570_v22  ;;  %4393 = vst [vmem:[#allocation3 + $0x2b1] sm:$0x1] %v16570_v22 }
 0x515   :  { %4394 = vst [vmem:[#allocation3 + $0x2c9] sm:$0x1] %v16570_v22  ;;  %4395 = vst [vmem:[#allocation3 + $0x2e1] sm:$0x1] %v16570_v22 }
 0x516   :  { %4396 = vst [vmem:[#allocation3 + $0x2f9] sm:$0x1] %v16570_v22  ;;  %4397 = vst [vmem:[#allocation3 + $0x311] sm:$0x1] %v16570_v22 }
 0x517   :  { %4398 = vst [vmem:[#allocation3 + $0x329] sm:$0x1] %v16570_v22  ;;  %4399 = vst [vmem:[#allocation3 + $0x341] sm:$0x1] %v16570_v22  ;;  %v3878_v22 = vadd.f32 %v3877_v47, %v13565_v58  ;;  %v4013_v47 = vadd.f32 %v4012_v32, %v3950_v54  ;;  %v3396_v58 = vpop.f32.mrb[104].mxu0  ;;  %v3953_v54 = vmul.f32 %v13601_v43, %v13601_v43 }
 0x518   :  { %16731 = vst [vmem:[#allocation13_spill] sm:$0xff] %v13793_v46  ;;  %16732 = vst [vmem:[#allocation38_spill] sm:$0xff] %v13802_v23  ;;  %v13808_v10 = vadd.f32 %v16733_v6, %v3396_v58  ;;  %v3398_v19 = vpop.f32.mrb[105].mxu0  ;;  %v16736_v58 = vmov 0.0  }
 0x519   :  { %v3879_v52 = vadd.f32 %v3878_v22, %v13574_v1  ;;  %v4014_v22 = vadd.f32 %v4013_v47, %v3951_v28  ;;  %16735 = vst [vmem:[#allocation39_spill] sm:$0xff] %v13816_v20  ;;  %6338 = vmatmul.mubr.f32.vlgmr.msra.gmra.mrb[64].mxu1 %v16736_v58  ;;  %v3401_v2 = vpop.f32.mrb[106].mxu0 }
 0x51a   :  { %16734 = vst [vmem:[#allocation16_spill] sm:$0xff] %v13808_v10  ;;  %v3403_v6 = vpop.f32.mrb[107].mxu0  ;;  %6342 = vmatprep.mubr.f32.mxu1 %v4529_v40  ;;  %v16740_v40 = vld [vmem:[#allocation18_spill] sm:$0xff] }
 0x51b   :  { %v3880_v50 = vadd.f32 %v3879_v52, %v13583_v26  ;;  %v4015_v19 = vadd.f32 %v4014_v22, %v3952_v35  ;;  %v16737_v52 = vld [vmem:[#allocation15_spill] sm:$0xff]  ;;  %v3955_v22 = vmul.f32 %v13619_v12, %v13619_v12 }
 0x51c   :  { %v13823_v47 = vadd.f32 %v16737_v52, %v3401_v2  ;;  %v3406_v2 = vpop.f32.mrb[108].mxu0  ;;  %v6161_v52 = vld [vmem:[#allocation4 + $0x100] sm:$0xff]  ;;  %v6162_v6 = vld [vmem:[#allocation4 + $0x108] sm:$0xff] }
 0x51d   :  { %v3881_v32 = vadd.f32 %v3880_v50, %v13592_v25  ;;  %v4016_v23 = vadd.f32 %v4015_v19, %v3953_v54  ;;  %v6269_v50 = vld [vmem:[#allocation4 + $0x460] sm:$0xff]  ;;  %6343 = vmatmul.mubr.f32.gmra.mrb[66].mxu1 %v16736_v58  ;;  %v3956_v19 = vmul.f32 %v13628_v44, %v13628_v44  ;;  %v13837_v20 = vadd.f32 %v16740_v40, %v3406_v2  ;;  %v6163_v58 = vld [vmem:[#allocation4 + $0x110] sm:$0xff] }
 0x51e   :  { %16738 = vst [vmem:[#allocation15_spill] sm:$0xff] %v13823_v47  ;;  %v13830_v27 = vpack.c.bf16 %v6270_v42, %v6269_v50  ;;  %v9770_v50 = vpack.c.bf16 %v6162_v6, %v6161_v52  ;;  %v6272_v42 = vld [vmem:[#allocation4 + $0x478] sm:$0xff] }
 0x51f   :  { %v3882_v28 = vadd.f32 %v3881_v32, %v13601_v43  ;;  %v4017_v32 = vadd.f32 %v4016_v23, %v3954_v37  ;;  %v6271_v43 = vld [vmem:[#allocation4 + $0x470] sm:$0xff]  ;;  %v6164_v37 = vld [vmem:[#allocation4 + $0x118] sm:$0xff] }
 0x520   :  { %16739 = vst [vmem:[#allocation40_spill] sm:$0xff] %v13830_v27  ;;  %9938 = vmatprep.subr.bf16.mxu0 %v13830_v27  ;;  %v13841_v23 = vpack.c.bf16 %v6272_v42, %v6271_v43  ;;  %9771 = vmatpush1.bf16.msra.mxu1 %v9770_v50  ;;  %v9773_v2 = vpack.c.bf16 %v6164_v37, %v6163_v58 }
 0x521   :  { %v3883_v35 = vadd.f32 %v3882_v28, %v13610_v30  ;;  %v3408_v28 = vpop.f32.mrb[109].mxu0  ;;  %9940 = vmatpush3.bf16.msra.mxu0 %v13830_v27  ;;  %v4018_v30 = vadd.f32 %v4017_v32, %v3955_v22  ;;  %9772 = vmatprep.subr.bf16.mxu1 %v16698_v3  ;;  %v3958_v43 = vmul.f32 %v13649_v21, %v13649_v21 }
 0x522   :  { %16741 = vst [vmem:[#allocation18_spill] sm:$0xff] %v13841_v23  ;;  %v3411_v40 = vpop.f32.mrb[110].mxu0  ;;  %9942 = vmatprep.subr.bf16.mxu0 %v13841_v23  ;;  %v16742_v28 = vld [vmem:[#allocation17_spill] sm:$0xff]  ;;  %v3959_v42 = vmul.f32 %v13663_v4, %v13663_v4  ;;  %v3960_v37 = vmul.f32 %v13681_v34, %v13681_v34 }
 0x523   :  { %v3884_v54 = vadd.f32 %v3883_v35, %v13619_v12  ;;  %v3957_v12 = vmul.f32 %v13637_v49, %v13637_v49  ;;  %v4019_v52 = vadd.f32 %v4018_v30, %v3956_v19  ;;  %v13852_v22 = vadd.f32 %v16742_v28, %v3411_v40  ;;  %v3413_v32 = vpop.f32.mrb[111].mxu0 }
 0x524   :  { %9774 = vmatpush1.bf16.msra.mxu1 %v9773_v2  ;;  %v3416_v58 = vpop.f32.mrb[112].mxu0 }
 0x525   :  { %v3885_v35 = vadd.f32 %v3884_v54, %v13628_v44  ;;  %16743 = vst [vmem:[#allocation17_spill] sm:$0xff] %v13852_v22  ;;  %9944 = vmatpush3.bf16.msra.mxu0 %v13841_v23  ;;  %v4020_v54 = vadd.f32 %v4019_v52, %v3957_v12  ;;  %9775 = vmatprep.subr.bf16.mxu1 %v16698_v3  ;;  %v3418_v28 = vpop.f32.mrb[113].mxu0 }
 0x526   :  { %v3421_v2 = vpop.f32.mrb[114].mxu0 }
 0x527   :  { %v3886_v6 = vadd.f32 %v3885_v35, %v13637_v49  ;;  %v4021_v30 = vadd.f32 %v4020_v54, %v3958_v43  ;;  %v16744_v35 = vld [vmem:[#allocation20_spill] sm:$0xff]  ;;  %v3962_v43 = vmul.f32 %v13808_v10, %v13808_v10  ;;  %v16746_v54 = vld [vmem:[#allocation19_spill] sm:$0xff]  ;;  %v3423_v27 = vpop.f32.mrb[115].mxu0 }
 0x528   :  { %v13863_v40 = vadd.f32 %v16744_v35, %v3416_v58 }
 0x529   :  { %v3887_v50 = vadd.f32 %v3886_v6, %v13649_v21  ;;  %v4022_v12 = vadd.f32 %v4021_v30, %v3959_v42  ;;  %v3961_v6 = vmul.f32 %v13793_v46, %v13793_v46  ;;  %v3963_v42 = vmul.f32 %v13823_v47, %v13823_v47  ;;  %v3426_v30 = vpop.f32.mrb[116].mxu0 }
 0x52a   :  { %16745 = vst [vmem:[#allocation20_spill] sm:$0xff] %v13863_v40 }
 0x52b   :  { %v3888_v19 = vadd.f32 %v3887_v50, %v13663_v4  ;;  %v4023_v32 = vadd.f32 %v4022_v12, %v3960_v37  ;;  %v13872_v50 = vadd.f32 %v16746_v54, %v3421_v2  ;;  %v3964_v37 = vmul.f32 %v13837_v20, %v13837_v20  ;;  %v16748_v12 = vld [vmem:[#allocation22_spill] sm:$0xff]  ;;  %v6166_v54 = vld [vmem:[#allocation4 + $0x128] sm:$0xff] }
 0x52c   :  { %v6165_v2 = vld [vmem:[#allocation4 + $0x120] sm:$0xff] }
 0x52d   :  { %v3889_v52 = vadd.f32 %v3888_v19, %v13681_v34  ;;  %16747 = vst [vmem:[#allocation19_spill] sm:$0xff] %v13872_v50  ;;  %v4024_v58 = vadd.f32 %v4023_v32, %v3961_v6  ;;  %v9776_v32 = vpack.c.bf16 %v6166_v54, %v6165_v2 }
 0x52f   :  { %v3890_v23 = vadd.f32 %v3889_v52, %v13793_v46  ;;  %v4025_v19 = vadd.f32 %v4024_v58, %v3962_v43  ;;  %v13881_v52 = vadd.f32 %v16748_v12, %v3426_v30  ;;  %v3428_v46 = vpop.f32.mrb[117].mxu0  ;;  %9777 = vmatpush1.bf16.msra.mxu1 %v9776_v32 }
 0x530   :  { %9778 = vmatprep.subr.bf16.mxu1 %v16698_v3 }
 0x531   :  { %v3891_v35 = vadd.f32 %v3890_v23, %v13808_v10  ;;  %16749 = vst [vmem:[#allocation22_spill] sm:$0xff] %v13881_v52  ;;  %v4026_v27 = vadd.f32 %v4025_v19, %v3963_v42  ;;  %v3965_v23 = vmul.f32 %v13852_v22, %v13852_v22  ;;  %v3431_v10 = vpop.f32.mrb[118].mxu0  ;;  %v3968_v54 = vmul.f32 %v13881_v52, %v13881_v52 }
 0x532   :  { %v3433_v46 = vpop.f32.mrb[119].mxu0 }
 0x533   :  { %v3892_v28 = vadd.f32 %v3891_v35, %v13823_v47  ;;  %v4027_v43 = vadd.f32 %v4026_v27, %v3964_v37  ;;  %v3966_v35 = vmul.f32 %v13863_v40, %v13863_v40  ;;  %v16750_v47 = vld [vmem:[#allocation21_spill] sm:$0xff]  ;;  %v3436_v12 = vpop.f32.mrb[120].mxu0  ;;  %v16752_v27 = vld [vmem:[#allocation24_spill] sm:$0xff] }
 0x534   :  { %v13890_v30 = vadd.f32 %v16750_v47, %v3431_v10  ;;  %v13900_v10 = vadd.f32 %v16752_v27, %v3436_v12  ;;  %v3438_v47 = vpop.f32.mrb[121].mxu0 }
 0x535   :  { %v3893_v6 = vadd.f32 %v3892_v28, %v13837_v20  ;;  %v4028_v42 = vadd.f32 %v4027_v43, %v3965_v23  ;;  %v3967_v28 = vmul.f32 %v13872_v50, %v13872_v50  ;;  %v3441_v43 = vpop.f32.mrb[122].mxu0 }
 0x536   :  { %16751 = vst [vmem:[#allocation21_spill] sm:$0xff] %v13890_v30  ;;  %16753 = vst [vmem:[#allocation24_spill] sm:$0xff] %v13900_v10  ;;  %v3969_v23 = vmul.f32 %v13890_v30, %v13890_v30 }
 0x537   :  { %v3894_v58 = vadd.f32 %v3893_v6, %v13852_v22  ;;  %v4029_v37 = vadd.f32 %v4028_v42, %v3966_v35  ;;  %v3970_v35 = vmul.f32 %v13900_v10, %v13900_v10  ;;  %v16754_v42 = vld [vmem:[#allocation23_spill] sm:$0xff] }
 0x539   :  { %v3895_v19 = vadd.f32 %v3894_v58, %v13863_v40  ;;  %v4030_v6 = vadd.f32 %v4029_v37, %v3967_v28 }
 0x53b   :  { %v3896_v2 = vadd.f32 %v3895_v19, %v13872_v50  ;;  %v4031_v58 = vadd.f32 %v4030_v6, %v3968_v54  ;;  %v13909_v19 = vadd.f32 %v16754_v42, %v3441_v43  ;;  %v3443_v50 = vpop.f32.mrb[123].mxu0  ;;  %v16756_v54 = vld [vmem:[#allocation27_spill] sm:$0xff]  ;;  %v16758_v42 = vld [vmem:[#allocation26_spill] sm:$0xff] }
 0x53c   :  { %v3446_v37 = vpop.f32.mrb[124].mxu0 }
 0x53d   :  { %v3897_v32 = vadd.f32 %v3896_v2, %v13881_v52  ;;  %16755 = vst [vmem:[#allocation23_spill] sm:$0xff] %v13909_v19  ;;  %v4032_v12 = vadd.f32 %v4031_v58, %v3969_v23  ;;  %v3971_v28 = vmul.f32 %v13909_v19, %v13909_v19  ;;  %v13916_v6 = vadd.f32 %v16756_v54, %v3446_v37  ;;  %v6168_v52 = vld [vmem:[#allocation4 + $0x138] sm:$0xff] }
 0x53f   :  { %v3898_v46 = vadd.f32 %v3897_v32, %v13890_v30  ;;  %v4033_v2 = vadd.f32 %v4032_v12, %v3970_v35  ;;  %16757 = vst [vmem:[#allocation27_spill] sm:$0xff] %v13916_v6  ;;  %v3448_v32 = vpop.f32.mrb[125].mxu0  ;;  %v6167_v30 = vld [vmem:[#allocation4 + $0x130] sm:$0xff]  ;;  %v3972_v50 = vmul.f32 %v13916_v6, %v13916_v6 }
 0x540   :  { %v9779_v23 = vpack.c.bf16 %v6168_v52, %v6167_v30  ;;  %v3451_v58 = vpop.f32.mrb[126].mxu0  ;;  %v6169_v30 = vld [vmem:[#allocation4 + $0x140] sm:$0xff] }
 0x541   :  { %v3899_v27 = vadd.f32 %v3898_v46, %v13900_v10  ;;  %v4034_v40 = vadd.f32 %v4033_v2, %v3971_v28  ;;  %v3837_v10 = vadd.f32 %v16758_v42, %v3451_v58  ;;  %v3453_v35 = vpop.f32.mrb[127].mxu0 }
 0x542   :  { %9780 = vmatpush1.bf16.msra.mxu1 %v9779_v23 }
 0x543   :  { %v3900_v47 = vadd.f32 %v3899_v27, %v13909_v19  ;;  %v4035_v46 = vadd.f32 %v4034_v40, %v3972_v50  ;;  %9781 = vmatprep.subr.bf16.mxu1 %v16698_v3  ;;  %v3973_v27 = vmul.f32 %v3837_v10, %v3837_v10  ;;  %v6170_v40 = vld [vmem:[#allocation4 + $0x148] sm:$0xff] }
 0x544   :  { %v9782_v42 = vpack.c.bf16 %v6170_v40, %v6169_v30  ;;  %v4051_v30 = vld [vmem:[%s16544_s3] sm:$0x1] }
 0x545   :  { %v3901_v43 = vadd.f32 %v3900_v47, %v13916_v6  ;;  %v4036_v54 = vadd.f32 %v4035_v46, %v3973_v27 }
 0x546   :  { %9783 = vmatpush1.bf16.msra.mxu1 %v9782_v42 }
 0x547   :  { %v3902_v12 = vadd.f32 %v3901_v43, %v3837_v10  ;;  %v4037_v28 = vrot.slane %v4036_v54, 4  ;;  %9784 = vmatprep.subr.bf16.mxu1 %v16698_v3 }
 0x549   :  { %v3903_v37 = vrot.slane %v3902_v12, 4  ;;  %v4038_v47 = vadd.f32 %v4037_v28, %v4036_v54  ;;  %v4055_v54 = vlaneseq  ;;  %v6172_v28 = vld [vmem:[#allocation4 + $0x158] sm:$0xff] }
 0x54b   :  { %v3904_v32 = vadd.f32 %v3903_v37, %v3902_v12  ;;  %v4039_v22 = vrot.slane %v4038_v47, 2 }
 0x54d   :  { %v3905_v2 = vrot.slane %v3904_v32, 2  ;;  %v4040_v52 = vadd.f32 %v4039_v22, %v4038_v47 }
 0x54f   :  { %v3906_v19 = vadd.f32 %v3905_v2, %v3904_v32  ;;  %v4041_v58 = vrot.slane %v4040_v52, 1  ;;  %v6171_v32 = vld [vmem:[#allocation4 + $0x150] sm:$0xff]  ;;  %v4056_v2 = vshrl.u32 %v4055_v54, 7 }
 0x550   :  { %v9785_v22 = vpack.c.bf16 %v6172_v28, %v6171_v32 }
 0x551   :  { %v3907_v6 = vrot.slane %v3906_v19, 1  ;;  %v4042_v35 = vadd.f32 %v4041_v58, %v4040_v52 }
 0x552   :  { %9786 = vmatpush1.bf16.msra.mxu1 %v9785_v22 }
 0x553   :  { %v3908_v50 = vadd.f32 %v3907_v6, %v3906_v19  ;;  %v4043_v43 = vmul.f32 0.001953125, %v4042_v35  ;;  %9787 = vmatprep.subr.bf16.mxu1 %v16698_v3  ;;  %v4047_v19 = vld [vmem:[%s16543_s2] sm:$0x1]  ;;  %v13928_v6 = vsub.s32 0, %v4056_v2  ;;  %v16762_v2 = vld [vmem:[#allocation25_spill] sm:$0xff]  ;;  %v16780_v3 = vld [vmem:[#allocation20_spill] sm:$0xff] }
 0x555   :  { %v3909_v23 = vmul.f32 0.001953125, %v3908_v50  ;;  %16759 = vst [vmem:[#allocation26_spill] sm:$0xff] %v13928_v6 }
 0x557   :  { %v4044_v46 = vmul.f32 %v3909_v23, %v3909_v23 }
 0x559   :  { %v4045_v12 = vsub.f32 %v4043_v43, %v4044_v46  ;;  %v16760_v43 = vld [vmem:[#allocation10_spill] sm:$0xff] }
 0x55b   :  { %v4046_v27 = vmax.f32 %v4045_v12, 0.0  ;;  %v16761_v12 = vld [vmem:[#allocation11_spill] sm:$0xff] }
 0x55d   :  { %v4048_v37 = vadd.f32 1e-05, %v4046_v27 }
 0x55f   :  { %10735 = vrsqrt.f32 %v4048_v37 }
 0x569   :  { %v10736_v47 = vpop.eup %10735 }
 0x56a   :  { %v4050_v52 = vmul.f32 %v10736_v47, %v4047_v19  ;;  %v16763_v19 = vld [vmem:[#allocation28_spill] sm:$0xff] }
 0x56c   :  { %v4052_v40 = vmul.f32 %v4050_v52, %v3909_v23  ;;  %v13934_v50 = vrot.slane %v4050_v52, %v13928_v6  ;;  %v16764_v52 = vld [vmem:[#allocation29_spill] sm:$0xff] }
 0x56e   :  { %v4053_v58 = vsub.f32 %v4051_v30, %v4052_v40  ;;  %v4123_v42 = vmul.f32 %v13934_v50, %v3837_v10  ;;  %v13939_v35 = vmul.f32 %v13934_v50, %v13284_v48  ;;  %v13943_v46 = vmul.f32 %v13934_v50, %v16760_v43  ;;  %v16765_v30 = vld [vmem:[#allocation30_spill] sm:$0xff]  ;;  %v16766_v40 = vld [vmem:[#allocation31_spill] sm:$0xff] }
 0x56f   :  { %v13947_v27 = vmul.f32 %v13934_v50, %v16761_v12  ;;  %v13951_v23 = vmul.f32 %v13934_v50, %v13309_v57  ;;  %v13955_v37 = vmul.f32 %v13934_v50, %v13320_v8  ;;  %v13959_v48 = vmul.f32 %v13934_v50, %v13327_v17 }
 0x570   :  { %v13962_v10 = vrot.slane %v4053_v58, %v13928_v6  ;;  %v13966_v54 = vmul.f32 %v13934_v50, %v13338_v33  ;;  %v13970_v32 = vmul.f32 %v13934_v50, %v13345_v36  ;;  %v13974_v57 = vmul.f32 %v13934_v50, %v13359_v55  ;;  %v16778_v6 = vld [vmem:[#allocation17_spill] sm:$0xff] }
 0x571   :  { %v13978_v8 = vmul.f32 %v13934_v50, %v13368_v31  ;;  %v13982_v17 = vmul.f32 %v13934_v50, %v13378_v11  ;;  %v13986_v33 = vmul.f32 %v13934_v50, %v13381_v39  ;;  %v13990_v36 = vmul.f32 %v13934_v50, %v13388_v61 }
 0x572   :  { %v4193_v28 = vadd.f32 %v13962_v10, %v4123_v42  ;;  %v13995_v55 = vmul.f32 %v13934_v50, %v13391_v15  ;;  %v13999_v31 = vmul.f32 %v13934_v50, %v13398_v60  ;;  %v14003_v11 = vmul.f32 %v13934_v50, %v13402_v16  ;;  %v16767_v42 = vld [vmem:[#allocation32_spill] sm:$0xff] }
 0x573   :  { %v14007_v39 = vmul.f32 %v13934_v50, %v13409_v56  ;;  %v14011_v61 = vmul.f32 %v13934_v50, %v13413_v24  ;;  %v14015_v15 = vmul.f32 %v13934_v50, %v13420_v63  ;;  %v14019_v60 = vmul.f32 %v13934_v50, %v13424_v13 }
 0x574   :  { %v4257_v22 = vmax.f32 %v4193_v28, 0.0  ;;  %v14023_v16 = vmul.f32 %v13934_v50, %v13431_v53  ;;  %v14027_v56 = vmul.f32 %v13934_v50, %v13435_v29  ;;  %v14031_v24 = vmul.f32 %v13934_v50, %v13442_v9  ;;  %v16768_v28 = vld [vmem:[#allocation33_spill] sm:$0xff] }
 0x575   :  { %v14035_v63 = vmul.f32 %v13934_v50, %v13446_v62  ;;  %v14039_v13 = vmul.f32 %v13934_v50, %v13453_v38  ;;  %v14043_v53 = vmul.f32 %v13934_v50, %v13457_v41  ;;  %v14047_v29 = vmul.f32 %v13934_v50, %v13464_v45 }
 0x576   :  { %4322 = vst [vmem:[#allocation3 + $0x339] sm:$0xff] %v4257_v22  ;;  %v14051_v9 = vmul.f32 %v13934_v50, %v13468_v51  ;;  %v14055_v62 = vmul.f32 %v13934_v50, %v16762_v2  ;;  %v14059_v38 = vmul.f32 %v13934_v50, %v13479_v59  ;;  %v14063_v41 = vmul.f32 %v13934_v50, %v13486_v14  ;;  %v16769_v2 = vld [vmem:[#allocation34_spill] sm:$0xff] }
 0x577   :  { %v14067_v45 = vmul.f32 %v13934_v50, %v13490_v18  ;;  %v14071_v51 = vmul.f32 %v13934_v50, %v13501_v5  ;;  %v14075_v47 = vmul.f32 %v13934_v50, %v16763_v19  ;;  %v14079_v59 = vmul.f32 %v13934_v50, %v13520_v0 }
 0x578   :  { %v14083_v14 = vmul.f32 %v13934_v50, %v13529_v7  ;;  %v14087_v18 = vmul.f32 %v13934_v50, %v16764_v52  ;;  %v14091_v5 = vmul.f32 %v13934_v50, %v16765_v30  ;;  %v14095_v58 = vmul.f32 %v13934_v50, %v16766_v40  ;;  %v16770_v52 = vld [vmem:[#allocation35_spill] sm:$0xff] }
 0x579   :  { %v14099_v0 = vmul.f32 %v13934_v50, %v16767_v42  ;;  %v14103_v7 = vmul.f32 %v13934_v50, %v13574_v1  ;;  %v14107_v43 = vmul.f32 %v13934_v50, %v13583_v26  ;;  %v14111_v12 = vmul.f32 %v13934_v50, %v13592_v25 }
 0x57a   :  { %v14115_v22 = vmul.f32 %v13934_v50, %v16768_v28  ;;  %v14119_v19 = vmul.f32 %v13934_v50, %v16769_v2  ;;  %v14123_v1 = vmul.f32 %v13934_v50, %v16770_v52  ;;  %v14127_v26 = vmul.f32 %v13934_v50, %v13628_v44  ;;  %v16771_v28 = vld [vmem:[#allocation13_spill] sm:$0xff]  ;;  %v16773_v2 = vld [vmem:[#allocation16_spill] sm:$0xff]  ;;  %v16775_v52 = vld [vmem:[#allocation15_spill] sm:$0xff] }
 0x57b   :  { %v14131_v25 = vmul.f32 %v13934_v50, %v13637_v49  ;;  %v14135_v30 = vmul.f32 %v13934_v50, %v13649_v21  ;;  %v14139_v40 = vmul.f32 %v13934_v50, %v13663_v4  ;;  %v14143_v42 = vmul.f32 %v13934_v50, %v13681_v34 }
 0x57c   :  { %v14147_v44 = vmul.f32 %v13934_v50, %v16771_v28  ;;  %v14151_v49 = vmul.f32 %v13934_v50, %v16773_v2  ;;  %v14155_v21 = vmul.f32 %v13934_v50, %v16775_v52  ;;  %v14159_v4 = vmul.f32 %v13934_v50, %v13837_v20 }
 0x57d   :  { %v14163_v34 = vmul.f32 %v13934_v50, %v16778_v6  ;;  %v14167_v28 = vmul.f32 %v13934_v50, %v16780_v3 }
 0x57e   :  { %16772 = vst [vmem:[#allocation10_spill] sm:$0xff] %v14147_v44  ;;  %16774 = vst [vmem:[#allocation11_spill] sm:$0xff] %v14151_v49  ;;  %v16782_v44 = vld [vmem:[#allocation19_spill] sm:$0xff]  ;;  %v16783_v49 = vld [vmem:[#allocation22_spill] sm:$0xff] }
 0x57f   :  { %16776 = vst [vmem:[#allocation25_spill] sm:$0xff] %v14155_v21  ;;  %16777 = vst [vmem:[#allocation28_spill] sm:$0xff] %v14159_v4  ;;  %v14171_v2 = vmul.f32 %v13934_v50, %v16782_v44  ;;  %v14175_v52 = vmul.f32 %v13934_v50, %v16783_v49  ;;  %v16784_v21 = vld [vmem:[#allocation21_spill] sm:$0xff]  ;;  %v16785_v4 = vld [vmem:[#allocation24_spill] sm:$0xff]  ;;  %v14195_v49 = vadd.f32 %v13962_v10, %v13939_v35 }
 0x580   :  { %16779 = vst [vmem:[#allocation29_spill] sm:$0xff] %v14163_v34  ;;  %16781 = vst [vmem:[#allocation30_spill] sm:$0xff] %v14167_v28  ;;  %v14179_v20 = vmul.f32 %v13934_v50, %v16784_v21  ;;  %v14183_v6 = vmul.f32 %v13934_v50, %v16785_v4  ;;  %v16786_v34 = vld [vmem:[#allocation23_spill] sm:$0xff]  ;;  %v14199_v21 = vadd.f32 %v13962_v10, %v13943_v46 }
 0x581   :  { %v14187_v3 = vmul.f32 %v13934_v50, %v16786_v34  ;;  %v16787_v28 = vld [vmem:[#allocation27_spill] sm:$0xff]  ;;  %v14203_v4 = vadd.f32 %v13962_v10, %v13947_v27  ;;  %v14207_v34 = vadd.f32 %v13962_v10, %v13951_v23  ;;  %v14215_v35 = vadd.f32 %v13962_v10, %v13959_v48 }
 0x582   :  { %v14191_v44 = vmul.f32 %v13934_v50, %v16787_v28  ;;  %v14211_v50 = vadd.f32 %v13962_v10, %v13955_v37  ;;  %v14219_v46 = vadd.f32 %v13962_v10, %v13966_v54  ;;  %v14223_v27 = vadd.f32 %v13962_v10, %v13970_v32 }
 0x583   :  { %v14227_v23 = vadd.f32 %v13962_v10, %v13974_v57  ;;  %v14231_v37 = vadd.f32 %v13962_v10, %v13978_v8  ;;  %v14235_v48 = vadd.f32 %v13962_v10, %v13982_v17  ;;  %v14239_v54 = vadd.f32 %v13962_v10, %v13986_v33 }
 0x584   :  { %v14243_v32 = vadd.f32 %v13962_v10, %v13990_v36  ;;  %v14247_v57 = vadd.f32 %v13962_v10, %v13995_v55  ;;  %v14251_v8 = vadd.f32 %v13962_v10, %v13999_v31  ;;  %v14255_v17 = vadd.f32 %v13962_v10, %v14003_v11 }
 0x585   :  { %v14259_v33 = vadd.f32 %v13962_v10, %v14007_v39  ;;  %v14263_v36 = vadd.f32 %v13962_v10, %v14011_v61  ;;  %v14267_v55 = vadd.f32 %v13962_v10, %v14015_v15  ;;  %v14271_v31 = vadd.f32 %v13962_v10, %v14019_v60  ;;  %v16795_v28 = vld [vmem:[#allocation10_spill] sm:$0xff] }
 0x586   :  { %v14275_v11 = vadd.f32 %v13962_v10, %v14023_v16  ;;  %v14279_v39 = vadd.f32 %v13962_v10, %v14027_v56  ;;  %v14283_v61 = vadd.f32 %v13962_v10, %v14031_v24  ;;  %v14287_v15 = vadd.f32 %v13962_v10, %v14035_v63 }
 0x587   :  { %v14291_v60 = vadd.f32 %v13962_v10, %v14039_v13  ;;  %v14295_v16 = vadd.f32 %v13962_v10, %v14043_v53  ;;  %v14299_v56 = vadd.f32 %v13962_v10, %v14047_v29  ;;  %v14303_v24 = vadd.f32 %v13962_v10, %v14051_v9 }
 0x588   :  { %v14307_v63 = vadd.f32 %v13962_v10, %v14055_v62  ;;  %v14311_v13 = vadd.f32 %v13962_v10, %v14059_v38  ;;  %v14315_v53 = vadd.f32 %v13962_v10, %v14063_v41  ;;  %v14319_v29 = vadd.f32 %v13962_v10, %v14067_v45 }
 0x589   :  { %v14323_v9 = vadd.f32 %v13962_v10, %v14071_v51  ;;  %v14327_v62 = vadd.f32 %v13962_v10, %v14075_v47  ;;  %v14331_v38 = vadd.f32 %v13962_v10, %v14079_v59  ;;  %v14335_v41 = vadd.f32 %v13962_v10, %v14083_v14 }
 0x58a   :  { %v14339_v45 = vadd.f32 %v13962_v10, %v14087_v18  ;;  %v14343_v51 = vadd.f32 %v13962_v10, %v14091_v5  ;;  %v14347_v47 = vadd.f32 %v13962_v10, %v14095_v58  ;;  %v14351_v59 = vadd.f32 %v13962_v10, %v14099_v0 }
 0x58b   :  { %v14355_v14 = vadd.f32 %v13962_v10, %v14103_v7  ;;  %v14359_v18 = vadd.f32 %v13962_v10, %v14107_v43  ;;  %v14363_v5 = vadd.f32 %v13962_v10, %v14111_v12  ;;  %v14367_v58 = vadd.f32 %v13962_v10, %v14115_v22 }
 0x58c   :  { %v14371_v0 = vadd.f32 %v13962_v10, %v14119_v19  ;;  %v14375_v7 = vadd.f32 %v13962_v10, %v14123_v1  ;;  %v14379_v43 = vadd.f32 %v13962_v10, %v14127_v26  ;;  %v14383_v12 = vadd.f32 %v13962_v10, %v14131_v25 }
 0x58d   :  { %16788 = vst [vmem:[#allocation31_spill] sm:$0xff] %v14359_v18  ;;  %16789 = vst [vmem:[#allocation32_spill] sm:$0xff] %v14363_v5  ;;  %v14387_v22 = vadd.f32 %v13962_v10, %v14135_v30  ;;  %v14391_v19 = vadd.f32 %v13962_v10, %v14139_v40  ;;  %v14395_v1 = vadd.f32 %v13962_v10, %v14143_v42 }
 0x58e   :  { %16790 = vst [vmem:[#allocation33_spill] sm:$0xff] %v14379_v43  ;;  %16791 = vst [vmem:[#allocation34_spill] sm:$0xff] %v14383_v12  ;;  %v14399_v26 = vadd.f32 %v13962_v10, %v16795_v28  ;;  %v16796_v43 = vld [vmem:[#allocation11_spill] sm:$0xff]  ;;  %v16797_v12 = vld [vmem:[#allocation25_spill] sm:$0xff] }
 0x58f   :  { %16792 = vst [vmem:[#allocation35_spill] sm:$0xff] %v14387_v22  ;;  %16793 = vst [vmem:[#allocation13_spill] sm:$0xff] %v14391_v19  ;;  %v14403_v25 = vadd.f32 %v13962_v10, %v16796_v43  ;;  %v14407_v30 = vadd.f32 %v13962_v10, %v16797_v12  ;;  %v16798_v22 = vld [vmem:[#allocation28_spill] sm:$0xff]  ;;  %v16799_v19 = vld [vmem:[#allocation29_spill] sm:$0xff]  ;;  %v14423_v43 = vadd.f32 %v13962_v10, %v14171_v2 }
 0x590   :  { %16794 = vst [vmem:[#allocation16_spill] sm:$0xff] %v14395_v1  ;;  %v14411_v40 = vadd.f32 %v13962_v10, %v16798_v22  ;;  %v14415_v42 = vadd.f32 %v13962_v10, %v16799_v19  ;;  %v16800_v1 = vld [vmem:[#allocation30_spill] sm:$0xff]  ;;  %v14427_v12 = vadd.f32 %v13962_v10, %v14175_v52  ;;  %v14431_v22 = vadd.f32 %v13962_v10, %v14179_v20 }
 0x591   :  { %v14419_v28 = vadd.f32 %v13962_v10, %v16800_v1  ;;  %16801 = vst [vmem:[#allocation15_spill] sm:$0xff] %v14423_v43  ;;  %v14435_v19 = vadd.f32 %v13962_v10, %v14183_v6  ;;  %v14439_v1 = vadd.f32 %v13962_v10, %v14187_v3  ;;  %v14443_v2 = vadd.f32 %v13962_v10, %v14191_v44 }
 0x592   :  { %16802 = vst [vmem:[#allocation17_spill] sm:$0xff] %v14427_v12  ;;  %16803 = vst [vmem:[#allocation20_spill] sm:$0xff] %v14431_v22  ;;  %v4194_v43 = vmax.f32 %v14195_v49, 0.0  ;;  %v16607_v52 = vmax.f32 %v14199_v21, 0.0  ;;  %v16605_v12 = vmax.f32 %v14203_v4, 0.0  ;;  %v16606_v22 = vmax.f32 %v14211_v50, 0.0 }
 0x593   :  { %16804 = vst [vmem:[#allocation19_spill] sm:$0xff] %v14435_v19  ;;  %16805 = vst [vmem:[#allocation22_spill] sm:$0xff] %v14439_v1  ;;  %v16608_v6 = vmax.f32 %v14215_v35, 0.0  ;;  %v16609_v19 = vmax.f32 %v14219_v46, 0.0  ;;  %v16610_v1 = vmax.f32 %v14227_v23, 0.0  ;;  %v16611_v10 = vmax.f32 %v14231_v37, 0.0 }
 0x594   :  { %4259 = vst [vmem:[#allocation3 + $0x19] sm:$0xff] %v4194_v43  ;;  %6347 = vmatprep.mubr.f32.mxu1 %v4194_v43  ;;  %4260 = vst [vmem:[#allocation3 + $0x21] sm:$0xff] %v16607_v52  ;;  %v16806_v3 = vmax.f32 %v14207_v34, 0.0  ;;  %v16612_v43 = vmax.f32 %v14247_v57, 0.0  ;;  %v16613_v44 = vmax.f32 %v14251_v8, 0.0  ;;  %v16614_v49 = vmax.f32 %v14255_v17, 0.0 }
 0x595   :  { %4261 = vst [vmem:[#allocation3 + $0x31] sm:$0xff] %v16605_v12  ;;  %4263 = vst [vmem:[#allocation3 + $0x49] sm:$0xff] %v16606_v22  ;;  %v16807_v12 = vmax.f32 %v14223_v27, 0.0  ;;  %v16616_v22 = vmax.f32 %v14283_v61, 0.0  ;;  %v16617_v52 = vmax.f32 %v14287_v15, 0.0  ;;  %v16620_v20 = vmax.f32 %v14323_v9, 0.0 }
 0x596   :  { %4262 = vst [vmem:[#allocation3 + $0x39] sm:$0xff] %v16806_v3  ;;  %4264 = vst [vmem:[#allocation3 + $0x51] sm:$0xff] %v16608_v6  ;;  %v16618_v3 = vmax.f32 %v14263_v36, 0.0  ;;  %v16808_v6 = vmax.f32 %v14235_v48, 0.0 }
 0x597   :  { %4265 = vst [vmem:[#allocation3 + $0x61] sm:$0xff] %v16609_v19  ;;  %4266 = vst [vmem:[#allocation3 + $0x69] sm:$0xff] %v16807_v12  ;;  %v16809_v19 = vmax.f32 %v14239_v54, 0.0  ;;  %v16810_v12 = vmax.f32 %v14243_v32, 0.0 }
 0x598   :  { %4267 = vst [vmem:[#allocation3 + $0x79] sm:$0xff] %v16610_v1  ;;  %4268 = vst [vmem:[#allocation3 + $0x81] sm:$0xff] %v16611_v10  ;;  %v16615_v1 = vmax.f32 %v14279_v39, 0.0  ;;  %v4225_v10 = vmax.f32 %v14319_v29, 0.0  ;;  %v16828_v29 = vld [vmem:[#allocation35_spill] sm:$0xff] }
 0x599   :  { %4269 = vst [vmem:[#allocation3 + $0x91] sm:$0xff] %v16808_v6  ;;  %4270 = vst [vmem:[#allocation3 + $0x99] sm:$0xff] %v16809_v19  ;;  %v16811_v19 = vmax.f32 %v14259_v33, 0.0  ;;  %v16619_v6 = vmax.f32 %v14295_v16, 0.0 }
 0x59a   :  { %4271 = vst [vmem:[#allocation3 + $0xa9] sm:$0xff] %v16810_v12  ;;  %4272 = vst [vmem:[#allocation3 + $0xb1] sm:$0xff] %v16612_v43  ;;  %v16812_v43 = vmax.f32 %v14267_v55, 0.0  ;;  %v4224_v12 = vmax.f32 %v14315_v53, 0.0  ;;  %v4237_v53 = vmax.f32 %v14367_v58, 0.0  ;;  %v4239_v58 = vmax.f32 %v14375_v7, 0.0 }
 0x59b   :  { %4273 = vst [vmem:[#allocation3 + $0xc1] sm:$0xff] %v16613_v44  ;;  %4274 = vst [vmem:[#allocation3 + $0xc9] sm:$0xff] %v16614_v49  ;;  %v16813_v44 = vmax.f32 %v14271_v31, 0.0  ;;  %v16814_v49 = vmax.f32 %v14275_v11, 0.0 }
 0x59c   :  { %4275 = vst [vmem:[#allocation3 + $0xd9] sm:$0xff] %v16811_v19  ;;  %4276 = vst [vmem:[#allocation3 + $0xe1] sm:$0xff] %v16618_v3  ;;  %v16621_v19 = vmax.f32 %v14311_v13, 0.0  ;;  %v4242_v3 = vmax.f32 %v16828_v29, 0.0  ;;  %v16835_v29 = vld [vmem:[#allocation16_spill] sm:$0xff] }
 0x59d   :  { %4277 = vst [vmem:[#allocation3 + $0xf1] sm:$0xff] %v16812_v43  ;;  %4278 = vst [vmem:[#allocation3 + $0xf9] sm:$0xff] %v16813_v44  ;;  %v16815_v44 = vmax.f32 %v14291_v60, 0.0  ;;  %v4238_v43 = vmax.f32 %v14371_v0, 0.0  ;;  %v16826_v0 = vld [vmem:[#allocation33_spill] sm:$0xff]  ;;  %v14581_v7 = vld [vmem:[#allocation3 + $0x4a] sm:$0xff] }
 0x59e   :  { %4279 = vst [vmem:[#allocation3 + $0x109] sm:$0xff] %v16814_v49  ;;  %4280 = vst [vmem:[#allocation3 + $0x111] sm:$0xff] %v16615_v1  ;;  %v16622_v49 = vmax.f32 %v14327_v62, 0.0  ;;  %v16816_v1 = vmax.f32 %v14299_v56, 0.0 }
 0x59f   :  { %4281 = vst [vmem:[#allocation3 + $0x121] sm:$0xff] %v16616_v22  ;;  %4282 = vst [vmem:[#allocation3 + $0x129] sm:$0xff] %v16617_v52  ;;  %v16817_v22 = vmax.f32 %v14303_v24, 0.0  ;;  %v16818_v52 = vmax.f32 %v14307_v63, 0.0 }
 0x5a0   :  { %4283 = vst [vmem:[#allocation3 + $0x139] sm:$0xff] %v16815_v44  ;;  %4284 = vst [vmem:[#allocation3 + $0x141] sm:$0xff] %v16619_v6  ;;  %v14538_v44 = vld [vmem:[#allocation3 + $0x18] sm:$0xff]  ;;  %v4240_v6 = vmax.f32 %v16826_v0, 0.0 }
 0x5a1   :  { %4285 = vst [vmem:[#allocation3 + $0x151] sm:$0xff] %v16816_v1  ;;  %4286 = vst [vmem:[#allocation3 + $0x159] sm:$0xff] %v16817_v22  ;;  %v14548_v22 = vld [vmem:[#allocation3 + $0x32] sm:$0xff]  ;;  %6348 = vmatmul.mubr.f32.gmra.mrb[68].mxu1 %v14538_v44  ;;  %v14551_v1 = vld [vmem:[#allocation3 + $0x3a] sm:$0xff] }
 0x5a2   :  { %4287 = vst [vmem:[#allocation3 + $0x169] sm:$0xff] %v16818_v52  ;;  %16819 = vst [vmem:[#allocation21_spill] sm:$0xff] %v14538_v44  ;;  %9401 = vmatprep.mubr.f32.mxu0 %v14548_v22  ;;  %v16827_v52 = vld [vmem:[#allocation34_spill] sm:$0xff]  ;;  %v4246_v44 = vmax.f32 %v14403_v25, 0.0  ;;  %v4250_v25 = vmax.f32 %v14419_v28, 0.0 }
 0x5a3   :  { %4288 = vst [vmem:[#allocation3 + $0x171] sm:$0xff] %v16621_v19  ;;  %4289 = vst [vmem:[#allocation3 + $0x181] sm:$0xff] %v4224_v12  ;;  %v16823_v12 = vmax.f32 %v14335_v41, 0.0  ;;  %v16825_v19 = vmax.f32 %v14199_v21, 0.0  ;;  %v16832_v21 = vmax.f32 %v14355_v14, 0.0  ;;  %9402 = vmatmul.mubr.f32.vlgmr.msra.gmra.mrb[128].mxu0 %v14551_v1  ;;  %v16843_v28 = vld [vmem:[#allocation22_spill] sm:$0xff] }
 0x5a4   :  { %4290 = vst [vmem:[#allocation3 + $0x189] sm:$0xff] %v4225_v10  ;;  %4291 = vst [vmem:[#allocation3 + $0x1c9] sm:$0xff] %v16620_v20  ;;  %v16822_v10 = vmax.f32 %v14331_v38, 0.0  ;;  %v16824_v20 = vmax.f32 %v14339_v45, 0.0  ;;  %9404 = vmatprep.mubr.f32.mxu0 %v14581_v7 }
 0x5a5   :  { %16820 = vst [vmem:[#allocation24_spill] sm:$0xff] %v14548_v22  ;;  %16821 = vst [vmem:[#allocation23_spill] sm:$0xff] %v14551_v1  ;;  %6352 = vmatprep.mubr.f32.mxu1 %v16825_v19  ;;  %v6173_v19 = vld [vmem:[#allocation4 + $0x160] sm:$0xff]  ;;  %v4244_v22 = vmax.f32 %v16835_v29, 0.0  ;;  %v6174_v1 = vld [vmem:[#allocation4 + $0x168] sm:$0xff]  ;;  %v4248_v29 = vmax.f32 %v14411_v40, 0.0 }
 0x5a6   :  { %4292 = vst [vmem:[#allocation3 + $0x1d1] sm:$0xff] %v16622_v49  ;;  %4293 = vst [vmem:[#allocation3 + $0x1e1] sm:$0xff] %v16822_v10  ;;  %v4241_v49 = vmax.f32 %v16827_v52, 0.0  ;;  %v16829_v10 = vmax.f32 %v14343_v51, 0.0  ;;  %v16834_v52 = vld [vmem:[#allocation13_spill] sm:$0xff] }
 0x5a7   :  { %4294 = vst [vmem:[#allocation3 + $0x1e9] sm:$0xff] %v16823_v12  ;;  %4295 = vst [vmem:[#allocation3 + $0x1f9] sm:$0xff] %v16824_v20  ;;  %v16830_v12 = vmax.f32 %v14347_v47, 0.0  ;;  %v16831_v20 = vmax.f32 %v14351_v59, 0.0  ;;  %v4243_v0 = vmax.f32 %v16834_v52, 0.0  ;;  %v4247_v52 = vmax.f32 %v14407_v30, 0.0 }
 0x5a8   :  { %4296 = vst [vmem:[#allocation3 + $0x201] sm:$0xff] %v16829_v10  ;;  %4299 = vst [vmem:[#allocation3 + $0x229] sm:$0xff] %v16832_v21  ;;  %v4245_v10 = vmax.f32 %v14399_v26, 0.0  ;;  %v14592_v21 = vld [vmem:[#allocation3 + $0x20] sm:$0xff]  ;;  %v4249_v26 = vmax.f32 %v14415_v42, 0.0  ;;  %v14603_v40 = vld [vmem:[#allocation3 + $0x52] sm:$0xff] }
 0x5a9   :  { %4297 = vst [vmem:[#allocation3 + $0x211] sm:$0xff] %v16830_v12  ;;  %4298 = vst [vmem:[#allocation3 + $0x219] sm:$0xff] %v16831_v20  ;;  %v16836_v12 = vmax.f32 %v14359_v18, 0.0  ;;  %v16837_v20 = vmax.f32 %v14363_v5, 0.0  ;;  %6353 = vmatmul.mubr.f32.gmra.mrb[70].mxu1 %v14592_v21  ;;  %v16841_v18 = vld [vmem:[#allocation19_spill] sm:$0xff]  ;;  %v16842_v42 = vmax.f32 %v14203_v4, 0.0  ;;  %9405 = vmatmul.mubr.f32.gmra.mrb[130].mxu0 %v14603_v40 }
 0x5aa   :  { %16833 = vst [vmem:[#allocation27_spill] sm:$0xff] %v14581_v7  ;;  %4302 = vst [vmem:[#allocation3 + $0x249] sm:$0xff] %v4237_v53  ;;  %v16838_v53 = vld [vmem:[#allocation15_spill] sm:$0xff]  ;;  %v16840_v7 = vld [vmem:[#allocation20_spill] sm:$0xff]  ;;  %v4254_v30 = vmax.f32 %v16841_v18, 0.0 }
 0x5ab   :  { %4300 = vst [vmem:[#allocation3 + $0x231] sm:$0xff] %v16836_v12  ;;  %4301 = vst [vmem:[#allocation3 + $0x241] sm:$0xff] %v16837_v20  ;;  %v16839_v12 = vld [vmem:[#allocation17_spill] sm:$0xff]  ;;  %v4253_v5 = vmax.f32 %v16840_v7, 0.0  ;;  %6357 = vmatprep.mubr.f32.mxu1 %v16842_v42  ;;  %v14610_v18 = vld [vmem:[#allocation3 + $0x62] sm:$0xff] }
 0x5ac   :  { %4303 = vst [vmem:[#allocation3 + $0x259] sm:$0xff] %v4238_v43  ;;  %4304 = vst [vmem:[#allocation3 + $0x261] sm:$0xff] %v4239_v58  ;;  %v4251_v43 = vmax.f32 %v16838_v53, 0.0  ;;  %v4252_v20 = vmax.f32 %v16839_v12, 0.0  ;;  %9407 = vmatprep.mubr.f32.mxu0 %v14610_v18  ;;  %v14613_v4 = vld [vmem:[#allocation3 + $0x30] sm:$0xff]  ;;  %v16844_v58 = vmax.f32 %v14207_v34, 0.0 }
 0x5ad   :  { %4305 = vst [vmem:[#allocation3 + $0x271] sm:$0xff] %v4240_v6  ;;  %4306 = vst [vmem:[#allocation3 + $0x279] sm:$0xff] %v4241_v49  ;;  %v4256_v6 = vmax.f32 %v14443_v2, 0.0  ;;  %v9788_v49 = vpack.c.bf16 %v6174_v1, %v6173_v19  ;;  %6358 = vmatmul.mubr.f32.gmra.mrb[72].mxu1 %v14613_v4  ;;  %v14616_v2 = vld [vmem:[#allocation3 + $0x6a] sm:$0xff]  ;;  %v14621_v7 = vld [vmem:[#allocation3 + $0x7a] sm:$0xff]  ;;  %v16846_v34 = vmax.f32 %v14211_v50, 0.0 }
 0x5ae   :  { %4307 = vst [vmem:[#allocation3 + $0x289] sm:$0xff] %v4242_v3  ;;  %4308 = vst [vmem:[#allocation3 + $0x291] sm:$0xff] %v4243_v0  ;;  %v4255_v3 = vmax.f32 %v16843_v28, 0.0  ;;  %6362 = vmatprep.mubr.f32.mxu1 %v16844_v58  ;;  %9408 = vmatmul.mubr.f32.gmra.mrb[132].mxu0 %v14616_v2  ;;  %v6177_v19 = vld [vmem:[#allocation4 + $0x180] sm:$0xff]  ;;  %v6178_v0 = vld [vmem:[#allocation4 + $0x188] sm:$0xff] }
 0x5af   :  { %4309 = vst [vmem:[#allocation3 + $0x2a1] sm:$0xff] %v4244_v22  ;;  %4310 = vst [vmem:[#allocation3 + $0x2a9] sm:$0xff] %v4245_v10  ;;  %v6175_v22 = vld [vmem:[#allocation4 + $0x170] sm:$0xff]  ;;  %9789 = vmatpush1.bf16.msra.mxu1 %v9788_v49  ;;  %9410 = vmatprep.mubr.f32.mxu0 %v14621_v7  ;;  %v14625_v10 = vld [vmem:[#allocation3 + $0x38] sm:$0xff] }
 0x5b0   :  { %4311 = vst [vmem:[#allocation3 + $0x2b9] sm:$0xff] %v4246_v44  ;;  %4312 = vst [vmem:[#allocation3 + $0x2c1] sm:$0xff] %v4247_v52  ;;  %v6176_v44 = vld [vmem:[#allocation4 + $0x178] sm:$0xff]  ;;  %v14628_v52 = vld [vmem:[#allocation3 + $0x82] sm:$0xff] }
 0x5b1   :  { %4313 = vst [vmem:[#allocation3 + $0x2d1] sm:$0xff] %v4248_v29  ;;  %4314 = vst [vmem:[#allocation3 + $0x2d9] sm:$0xff] %v4249_v26  ;;  %v9791_v1 = vpack.c.bf16 %v6176_v44, %v6175_v22  ;;  %6363 = vmatmul.mubr.f32.gmra.mrb[74].mxu1 %v14625_v10  ;;  %v9794_v29 = vpack.c.bf16 %v6178_v0, %v6177_v19  ;;  %v14633_v26 = vld [vmem:[#allocation3 + $0x92] sm:$0xff]  ;;  %v14640_v53 = vld [vmem:[#allocation3 + $0x9a] sm:$0xff]  ;;  %v16850_v22 = vmax.f32 %v14227_v23, 0.0 }
 0x5b2   :  { %4315 = vst [vmem:[#allocation3 + $0x2e9] sm:$0xff] %v4250_v25  ;;  %4316 = vst [vmem:[#allocation3 + $0x2f1] sm:$0xff] %v4251_v43  ;;  %6367 = vmatprep.mubr.f32.mxu1 %v16846_v34  ;;  %9411 = vmatmul.mubr.f32.gmra.mrb[134].mxu0 %v14628_v52  ;;  %v14637_v25 = vld [vmem:[#allocation3 + $0x48] sm:$0xff]  ;;  %v16847_v43 = vmax.f32 %v14215_v35, 0.0  ;;  %v14646_v12 = vld [vmem:[#allocation3 + $0x50] sm:$0xff] }
 0x5b3   :  { %4317 = vst [vmem:[#allocation3 + $0x301] sm:$0xff] %v4252_v20  ;;  %4318 = vst [vmem:[#allocation3 + $0x309] sm:$0xff] %v4253_v5  ;;  %v16845_v5 = vmov 0.0|0.0   ;;  %9413 = vmatprep.mubr.f32.mxu0 %v14633_v26  ;;  %v5435_v50 = vld [vmem:[#allocation3 + $0xaa] sm:$0xff]  ;;  %v5436_v20 = vld [vmem:[#allocation3 + $0xb2] sm:$0xff] }
 0x5b4   :  { %4319 = vst [vmem:[#allocation3 + $0x319] sm:$0xff] %v4254_v30  ;;  %4320 = vst [vmem:[#allocation3 + $0x321] sm:$0xff] %v4255_v3  ;;  %9790 = vmatprep.subr.bf16.mxu1 %v16845_v5  ;;  %v16848_v30 = vmax.f32 %v14219_v46, 0.0  ;;  %v5437_v42 = vld [vmem:[#allocation3 + $0xc2] sm:$0xff]  ;;  %v5438_v28 = vld [vmem:[#allocation3 + $0xca] sm:$0xff]  ;;  %v16849_v3 = vmax.f32 %v14223_v27, 0.0 }
 0x5b5   :  { %4321 = vst [vmem:[#allocation3 + $0x331] sm:$0xff] %v4256_v6  ;;  %9792 = vmatpush1.bf16.msra.mxu1 %v9791_v1  ;;  %v14651_v35 = vld [vmem:[#allocation3 + $0x60] sm:$0xff]  ;;  %v14656_v49 = vld [vmem:[#allocation3 + $0x68] sm:$0xff]  ;;  %v5441_v44 = vld [vmem:[#allocation3 + $0xf2] sm:$0xff] }
 0x5b6   :  { %9793 = vmatprep.subr.bf16.mxu1 %v16845_v5  ;;  %6368 = vmatmul.mubr.f32.gmra.mrb[76].mxu1 %v14637_v25  ;;  %v5439_v6 = vld [vmem:[#allocation3 + $0xda] sm:$0xff]  ;;  %v5440_v46 = vld [vmem:[#allocation3 + $0xe2] sm:$0xff]  ;;  %v6179_v58 = vld [vmem:[#allocation4 + $0x190] sm:$0xff] }
 0x5b7   :  { %6372 = vmatprep.mubr.f32.mxu1 %v16847_v43  ;;  %9414 = vmatmul.mubr.f32.gmra.mrb[136].mxu0 %v14640_v53  ;;  %v14661_v1 = vld [vmem:[#allocation3 + $0x78] sm:$0xff]  ;;  %v6181_v0 = vld [vmem:[#allocation4 + $0x1a0] sm:$0xff]  ;;  %v6182_v43 = vld [vmem:[#allocation4 + $0x1a8] sm:$0xff] }
 0x5b8   :  { %9416 = vmatprep.mubr.f32.mxu0 %v5435_v50  ;;  %v6180_v19 = vld [vmem:[#allocation4 + $0x198] sm:$0xff]  ;;  %v5443_v50 = vld [vmem:[#allocation3 + $0x10a] sm:$0xff]  ;;  %v9800_v23 = vpack.c.bf16 %v6182_v43, %v6181_v0 }
 0x5b9   :  { %9795 = vmatpush1.bf16.msra.mxu1 %v9794_v29  ;;  %v9797_v27 = vpack.c.bf16 %v6180_v19, %v6179_v58  ;;  %v5442_v34 = vld [vmem:[#allocation3 + $0xfa] sm:$0xff]  ;;  %v16851_v29 = vmax.f32 %v14231_v37, 0.0  ;;  %v14672_v37 = vld [vmem:[#allocation3 + $0x90] sm:$0xff]  ;;  %v5448_v19 = vld [vmem:[#allocation3 + $0x142] sm:$0xff] }
 0x5ba   :  { %9796 = vmatprep.subr.bf16.mxu1 %v16845_v5  ;;  %6373 = vmatmul.mubr.f32.gmra.mrb[78].mxu1 %v14646_v12  ;;  %v14678_v58 = vld [vmem:[#allocation3 + $0x98] sm:$0xff]  ;;  %v5451_v43 = vld [vmem:[#allocation3 + $0x16a] sm:$0xff] }
 0x5bb   :  { %6377 = vmatprep.mubr.f32.mxu1 %v16848_v30  ;;  %9417 = vmatmul.mubr.f32.gmra.mrb[138].mxu0 %v5436_v20  ;;  %v14666_v20 = vld [vmem:[#allocation3 + $0x80] sm:$0xff]  ;;  %v5444_v30 = vld [vmem:[#allocation3 + $0x112] sm:$0xff] }
 0x5bc   :  { %9419 = vmatprep.mubr.f32.mxu0 %v5437_v42  ;;  %v16852_v42 = vmax.f32 %v14235_v48, 0.0  ;;  %v5449_v0 = vld [vmem:[#allocation3 + $0x152] sm:$0xff] }
 0x5bd   :  { %9798 = vmatpush1.bf16.msra.mxu1 %v9797_v27  ;;  %v16854_v27 = vmax.f32 %v14243_v32, 0.0  ;;  %v5452_v32 = vld [vmem:[#allocation3 + $0x172] sm:$0xff] }
 0x5be   :  { %6378 = vmatmul.mubr.f32.gmra.mrb[80].mxu1 %v14651_v35  ;;  %9799 = vmatprep.subr.bf16.mxu1 %v16845_v5 }
 0x5bf   :  { %6382 = vmatprep.mubr.f32.mxu1 %v16849_v3  ;;  %9420 = vmatmul.mubr.f32.gmra.mrb[140].mxu0 %v5438_v28  ;;  %v5445_v28 = vld [vmem:[#allocation3 + $0x122] sm:$0xff]  ;;  %v5446_v3 = vld [vmem:[#allocation3 + $0x12a] sm:$0xff] }
 0x5c0   :  { %9422 = vmatprep.mubr.f32.mxu0 %v5439_v6  ;;  %v16853_v6 = vmax.f32 %v14239_v54, 0.0  ;;  %v14684_v54 = vld [vmem:[#allocation3 + $0xa8] sm:$0xff] }
 0x5c1   :  { %9801 = vmatpush1.bf16.msra.mxu1 %v9800_v23  ;;  %v16856_v23 = vmax.f32 %v14251_v8, 0.0  ;;  %v5456_v8 = vld [vmem:[#allocation3 + $0x1a2] sm:$0xff] }
 0x5c2   :  { %6383 = vmatmul.mubr.f32.gmra.mrb[82].mxu1 %v14656_v49  ;;  %9802 = vmatprep.subr.bf16.mxu1 %v16845_v5 }
 0x5c3   :  { %6387 = vmatprep.mubr.f32.mxu1 %v16850_v22  ;;  %9423 = vmatmul.mubr.f32.gmra.mrb[142].mxu0 %v5440_v46  ;;  %v6183_v46 = vld [vmem:[#allocation4 + $0x1b0] sm:$0xff]  ;;  %v6184_v22 = vld [vmem:[#allocation4 + $0x1b8] sm:$0xff] }
 0x5c4   :  { %9425 = vmatprep.mubr.f32.mxu0 %v5441_v44  ;;  %v5447_v44 = vld [vmem:[#allocation3 + $0x13a] sm:$0xff]  ;;  %v9803_v48 = vpack.c.bf16 %v6184_v22, %v6183_v46  ;;  %v6186_v46 = vld [vmem:[#allocation4 + $0x1c8] sm:$0xff] }
 0x5c6   :  { %6388 = vmatmul.mubr.f32.gmra.mrb[84].mxu1 %v14661_v1 }
 0x5c7   :  { %6392 = vmatprep.mubr.f32.mxu1 %v16851_v29  ;;  %9426 = vmatmul.mubr.f32.gmra.mrb[144].mxu0 %v5442_v34  ;;  %v5450_v34 = vld [vmem:[#allocation3 + $0x15a] sm:$0xff]  ;;  %v16855_v29 = vmax.f32 %v14247_v57, 0.0 }
 0x5c8   :  { %9428 = vmatprep.mubr.f32.mxu0 %v5443_v50  ;;  %9804 = vmatpush1.bf16.msra.mxu1 %v9803_v48  ;;  %v14689_v50 = vld [vmem:[#allocation3 + $0xb0] sm:$0xff]  ;;  %v5455_v57 = vld [vmem:[#allocation3 + $0x19a] sm:$0xff]  ;;  %v16858_v48 = vmax.f32 %v14259_v33, 0.0  ;;  %v5460_v33 = vld [vmem:[#allocation3 + $0x202] sm:$0xff] }
 0x5c9   :  { %9805 = vmatprep.subr.bf16.mxu1 %v16845_v5 }
 0x5ca   :  { %6393 = vmatmul.mubr.f32.gmra.mrb[86].mxu1 %v14666_v20 }
 0x5cb   :  { %6397 = vmatprep.mubr.f32.mxu1 %v16852_v42  ;;  %9429 = vmatmul.mubr.f32.gmra.mrb[146].mxu0 %v5444_v30  ;;  %v5453_v30 = vld [vmem:[#allocation3 + $0x182] sm:$0xff] }
 0x5cc   :  { %9431 = vmatprep.mubr.f32.mxu0 %v5445_v28  ;;  %v14694_v42 = vld [vmem:[#allocation3 + $0xc0] sm:$0xff]  ;;  %v5454_v28 = vld [vmem:[#allocation3 + $0x18a] sm:$0xff] }
 0x5ce   :  { %6398 = vmatmul.mubr.f32.gmra.mrb[88].mxu1 %v14672_v37 }
 0x5cf   :  { %6402 = vmatprep.mubr.f32.mxu1 %v16853_v6  ;;  %9432 = vmatmul.mubr.f32.gmra.mrb[148].mxu0 %v5446_v3  ;;  %v16857_v3 = vmax.f32 %v14255_v17, 0.0  ;;  %v6185_v6 = vld [vmem:[#allocation4 + $0x1c0] sm:$0xff]  ;;  %v14705_v17 = vld [vmem:[#allocation3 + $0xd8] sm:$0xff] }
 0x5d0   :  { %9434 = vmatprep.mubr.f32.mxu0 %v5447_v44  ;;  %v9806_v22 = vpack.c.bf16 %v6186_v46, %v6185_v6  ;;  %v14699_v44 = vld [vmem:[#allocation3 + $0xc8] sm:$0xff]  ;;  %v14720_v46 = vld [vmem:[#allocation3 + $0xf8] sm:$0xff] }
 0x5d2   :  { %6403 = vmatmul.mubr.f32.gmra.mrb[90].mxu1 %v14678_v58 }
 0x5d3   :  { %6407 = vmatprep.mubr.f32.mxu1 %v16854_v27  ;;  %9435 = vmatmul.mubr.f32.gmra.mrb[150].mxu0 %v5448_v19  ;;  %v5457_v19 = vld [vmem:[#allocation3 + $0x1e2] sm:$0xff]  ;;  %v5458_v27 = vld [vmem:[#allocation3 + $0x1ea] sm:$0xff] }
 0x5d4   :  { %9437 = vmatprep.mubr.f32.mxu0 %v5449_v0  ;;  %9807 = vmatpush1.bf16.msra.mxu1 %v9806_v22  ;;  %v16859_v0 = vmax.f32 %v14263_v36, 0.0  ;;  %v5462_v36 = vld [vmem:[#allocation3 + $0x21a] sm:$0xff]  ;;  %v16862_v22 = vmax.f32 %v14275_v11, 0.0  ;;  %v5468_v11 = vld [vmem:[#allocation3 + $0x262] sm:$0xff] }
 0x5d5   :  { %9808 = vmatprep.subr.bf16.mxu1 %v16845_v5 }
 0x5d6   :  { %6408 = vmatmul.mubr.f32.gmra.mrb[92].mxu1 %v14684_v54 }
 0x5d7   :  { %6412 = vmatprep.mubr.f32.mxu1 %v16855_v29  ;;  %9438 = vmatmul.mubr.f32.gmra.mrb[152].mxu0 %v5450_v34  ;;  %v5459_v34 = vld [vmem:[#allocation3 + $0x1fa] sm:$0xff] }
 0x5d8   :  { %9440 = vmatprep.mubr.f32.mxu0 %v5451_v43  ;;  %v14710_v29 = vld [vmem:[#allocation3 + $0xe0] sm:$0xff]  ;;  %v16860_v43 = vmax.f32 %v14267_v55, 0.0  ;;  %v5464_v55 = vld [vmem:[#allocation3 + $0x232] sm:$0xff] }
 0x5da   :  { %6413 = vmatmul.mubr.f32.gmra.mrb[94].mxu1 %v14689_v50 }
 0x5db   :  { %6417 = vmatprep.mubr.f32.mxu1 %v16856_v23  ;;  %9441 = vmatmul.mubr.f32.gmra.mrb[154].mxu0 %v5452_v32  ;;  %v5461_v32 = vld [vmem:[#allocation3 + $0x212] sm:$0xff] }
 0x5dc   :  { %9443 = vmatprep.mubr.f32.mxu0 %v5453_v30  ;;  %v14715_v23 = vld [vmem:[#allocation3 + $0xf0] sm:$0xff]  ;;  %v16861_v30 = vmax.f32 %v14271_v31, 0.0  ;;  %v14726_v31 = vld [vmem:[#allocation3 + $0x108] sm:$0xff] }
 0x5de   :  { %6418 = vmatmul.mubr.f32.gmra.mrb[96].mxu1 %v14694_v42 }
 0x5df   :  { %6422 = vmatprep.mubr.f32.mxu1 %v16857_v3  ;;  %9444 = vmatmul.mubr.f32.gmra.mrb[156].mxu0 %v5454_v28  ;;  %v6188_v28 = vld [vmem:[#allocation4 + $0x1d8] sm:$0xff]  ;;  %v5463_v3 = vld [vmem:[#allocation3 + $0x22a] sm:$0xff] }
 0x5e0   :  { %9446 = vmatprep.mubr.f32.mxu0 %v5455_v57  ;;  %v6187_v57 = vld [vmem:[#allocation4 + $0x1d0] sm:$0xff] }
 0x5e1   :  { %v9809_v6 = vpack.c.bf16 %v6188_v28, %v6187_v57  ;;  %v6190_v57 = vld [vmem:[#allocation4 + $0x1e8] sm:$0xff] }
 0x5e2   :  { %6423 = vmatmul.mubr.f32.gmra.mrb[98].mxu1 %v14699_v44  ;;  %v14741_v28 = vld [vmem:[#allocation3 + $0x128] sm:$0xff] }
 0x5e3   :  { %6427 = vmatprep.mubr.f32.mxu1 %v16858_v48  ;;  %9447 = vmatmul.mubr.f32.gmra.mrb[158].mxu0 %v5456_v8  ;;  %v5465_v8 = vld [vmem:[#allocation3 + $0x242] sm:$0xff]  ;;  %v5466_v48 = vld [vmem:[#allocation3 + $0x24a] sm:$0xff] }
 0x5e4   :  { %9449 = vmatprep.mubr.f32.mxu0 %v5457_v19  ;;  %9810 = vmatpush1.bf16.msra.mxu1 %v9809_v6  ;;  %v16863_v19 = vmax.f32 %v14279_v39, 0.0  ;;  %v5470_v39 = vld [vmem:[#allocation3 + $0x27a] sm:$0xff]  ;;  %v16866_v6 = vmax.f32 %v14291_v60, 0.0  ;;  %v5476_v60 = vld [vmem:[#allocation3 + $0x2c2] sm:$0xff] }
 0x5e5   :  { %9811 = vmatprep.subr.bf16.mxu1 %v16845_v5 }
 0x5e6   :  { %6428 = vmatmul.mubr.f32.gmra.mrb[100].mxu1 %v14705_v17 }
 0x5e7   :  { %6432 = vmatprep.mubr.f32.mxu1 %v16859_v0  ;;  %9450 = vmatmul.mubr.f32.gmra.mrb[160].mxu0 %v5458_v27  ;;  %v5467_v27 = vld [vmem:[#allocation3 + $0x25a] sm:$0xff]  ;;  %v14731_v0 = vld [vmem:[#allocation3 + $0x110] sm:$0xff] }
 0x5e8   :  { %9452 = vmatprep.mubr.f32.mxu0 %v5459_v34  ;;  %v16864_v34 = vmax.f32 %v14283_v61, 0.0 }
 0x5ea   :  { %6433 = vmatmul.mubr.f32.gmra.mrb[102].mxu1 %v14710_v29 }
 0x5eb   :  { %6437 = vmatprep.mubr.f32.mxu1 %v16860_v43  ;;  %9453 = vmatmul.mubr.f32.gmra.mrb[162].mxu0 %v5460_v33  ;;  %v5469_v33 = vld [vmem:[#allocation3 + $0x272] sm:$0xff]  ;;  %v14736_v43 = vld [vmem:[#allocation3 + $0x120] sm:$0xff] }
 0x5ec   :  { %9455 = vmatprep.mubr.f32.mxu0 %v5461_v32  ;;  %v16865_v32 = vmax.f32 %v14287_v15, 0.0  ;;  %v14747_v15 = vld [vmem:[#allocation3 + $0x138] sm:$0xff] }
 0x5ee   :  { %6438 = vmatmul.mubr.f32.gmra.mrb[104].mxu1 %v14715_v23 }
 0x5ef   :  { %6442 = vmatprep.mubr.f32.mxu1 %v16861_v30  ;;  %9456 = vmatmul.mubr.f32.gmra.mrb[164].mxu0 %v5462_v36  ;;  %v5471_v36 = vld [vmem:[#allocation3 + $0x28a] sm:$0xff]  ;;  %v6189_v30 = vld [vmem:[#allocation4 + $0x1e0] sm:$0xff] }
 0x5f0   :  { %9458 = vmatprep.mubr.f32.mxu0 %v5463_v3  ;;  %v9812_v61 = vpack.c.bf16 %v6190_v57, %v6189_v30  ;;  %v5472_v3 = vld [vmem:[#allocation3 + $0x292] sm:$0xff] }
 0x5f1   :  { %v14762_v30 = vld [vmem:[#allocation3 + $0x158] sm:$0xff] }
 0x5f2   :  { %6443 = vmatmul.mubr.f32.gmra.mrb[106].mxu1 %v14720_v46  ;;  %v5480_v57 = vld [vmem:[#allocation3 + $0x2f2] sm:$0xff] }
 0x5f3   :  { %6447 = vmatprep.mubr.f32.mxu1 %v16862_v22  ;;  %9459 = vmatmul.mubr.f32.gmra.mrb[166].mxu0 %v5464_v55  ;;  %v5473_v55 = vld [vmem:[#allocation3 + $0x2a2] sm:$0xff]  ;;  %v5474_v22 = vld [vmem:[#allocation3 + $0x2aa] sm:$0xff] }
 0x5f4   :  { %9461 = vmatprep.mubr.f32.mxu0 %v5465_v8  ;;  %9813 = vmatpush1.bf16.msra.mxu1 %v9812_v61  ;;  %v16867_v8 = vmax.f32 %v14295_v16, 0.0  ;;  %v5478_v16 = vld [vmem:[#allocation3 + $0x2da] sm:$0xff]  ;;  %v16870_v61 = vmax.f32 %v14307_v63, 0.0 }
 0x5f5   :  { %9814 = vmatprep.subr.bf16.mxu1 %v16845_v5  ;;  %v10739_v63 = vld [vmem:[#allocation3] sm:$0xff] }
 0x5f6   :  { %6448 = vmatmul.mubr.f32.gmra.mrb[108].mxu1 %v14726_v31 }
 0x5f7   :  { %6452 = vmatprep.mubr.f32.mxu1 %v16863_v19  ;;  %9462 = vmatmul.mubr.f32.gmra.mrb[168].mxu0 %v5466_v48  ;;  %v5475_v48 = vld [vmem:[#allocation3 + $0x2ba] sm:$0xff] }
 0x5f8   :  { %9464 = vmatprep.mubr.f32.mxu0 %v5467_v27  ;;  %v14752_v19 = vld [vmem:[#allocation3 + $0x140] sm:$0xff]  ;;  %v16868_v27 = vmax.f32 %v14299_v56, 0.0 }
 0x5fa   :  { %6453 = vmatmul.mubr.f32.gmra.mrb[110].mxu1 %v14731_v0 }
 0x5fb   :  { %6457 = vmatprep.mubr.f32.mxu1 %v16864_v34  ;;  %9465 = vmatmul.mubr.f32.gmra.mrb[170].mxu0 %v5468_v11  ;;  %v5477_v11 = vld [vmem:[#allocation3 + $0x2d2] sm:$0xff] }
 0x5fc   :  { %9467 = vmatprep.mubr.f32.mxu0 %v5469_v33  ;;  %v14757_v34 = vld [vmem:[#allocation3 + $0x150] sm:$0xff]  ;;  %v16869_v33 = vmax.f32 %v14303_v24, 0.0  ;;  %v14768_v24 = vld [vmem:[#allocation3 + $0x168] sm:$0xff] }
 0x5fe   :  { %6458 = vmatmul.mubr.f32.gmra.mrb[112].mxu1 %v14736_v43 }
 0x5ff   :  { %6462 = vmatprep.mubr.f32.mxu1 %v16865_v32  ;;  %9468 = vmatmul.mubr.f32.gmra.mrb[172].mxu0 %v5470_v39  ;;  %v5479_v39 = vld [vmem:[#allocation3 + $0x2ea] sm:$0xff] }
 0x600   :  { %9470 = vmatprep.mubr.f32.mxu0 %v5471_v36  ;;  %v6191_v32 = vld [vmem:[#allocation4 + $0x1f0] sm:$0xff]  ;;  %v6192_v36 = vld [vmem:[#allocation4 + $0x1f8] sm:$0xff] }
 0x601   :  { %v9815_v56 = vpack.c.bf16 %v6192_v36, %v6191_v32  ;;  %v14808_v32 = vld [vmem:[#allocation3 + $0x210] sm:$0xff]  ;;  %v14813_v36 = vld [vmem:[#allocation3 + $0x218] sm:$0xff] }
 0x602   :  { %6463 = vmatmul.mubr.f32.gmra.mrb[114].mxu1 %v14741_v28 }
 0x603   :  { %6467 = vmatprep.mubr.f32.mxu1 %v16866_v6  ;;  %9471 = vmatmul.mubr.f32.gmra.mrb[174].mxu0 %v5472_v3  ;;  %v16871_v3 = vmax.f32 %v14311_v13, 0.0  ;;  %v4560_v6 = vld [vmem:[#allocation3 + $0x1b1] sm:$0xff]  ;;  %v16873_v13 = vmax.f32 %v14327_v62, 0.0  ;;  %v16876_v62 = vmax.f32 %v14339_v45, 0.0  ;;  %v16879_v45 = vmax.f32 %v14351_v59, 0.0 }
 0x604   :  { %9473 = vmatprep.mubr.f32.mxu0 %v5473_v55  ;;  %9816 = vmatpush1.bf16.msra.mxu1 %v9815_v56  ;;  %v14773_v55 = vld [vmem:[#allocation3 + $0x170] sm:$0xff]  ;;  %v14818_v56 = vld [vmem:[#allocation3 + $0x228] sm:$0xff] }
 0x605   :  { %9817 = vmatprep.subr.bf16.mxu1 %v16845_v5  ;;  %v16883_v59 = vld [vmem:[#allocation32_spill] sm:$0xff] }
 0x606   :  { %6468 = vmatmul.mubr.f32.gmra.mrb[116].mxu1 %v14747_v15 }
 0x607   :  { %6472 = vmatprep.mubr.f32.mxu1 %v16867_v8  ;;  %9474 = vmatmul.mubr.f32.gmra.mrb[176].mxu0 %v5474_v22  ;;  %v4561_v22 = vld [vmem:[#allocation3 + $0x1b9] sm:$0xff]  ;;  %v16872_v8 = vmax.f32 %v14323_v9, 0.0  ;;  %v16875_v9 = vmax.f32 %v14335_v41, 0.0  ;;  %v16878_v41 = vmax.f32 %v14347_v47, 0.0  ;;  %v16881_v47 = vld [vmem:[#allocation31_spill] sm:$0xff] }
 0x608   :  { %9476 = vmatprep.mubr.f32.mxu0 %v5475_v48  ;;  %v14778_v48 = vld [vmem:[#allocation3 + $0x1c8] sm:$0xff] }
 0x60a   :  { %6473 = vmatmul.mubr.f32.gmra.mrb[118].mxu1 %v14752_v19 }
 0x60b   :  { %6477 = vmatprep.mubr.f32.mxu1 %v16868_v27  ;;  %9477 = vmatmul.mubr.f32.gmra.mrb[178].mxu0 %v5476_v60  ;;  %v14783_v60 = vld [vmem:[#allocation3 + $0x1d0] sm:$0xff]  ;;  %v16874_v27 = vmax.f32 %v14331_v38, 0.0  ;;  %v16877_v38 = vmax.f32 %v14343_v51, 0.0  ;;  %v16880_v51 = vmax.f32 %v14355_v14, 0.0 }
 0x60c   :  { %9479 = vmatprep.mubr.f32.mxu0 %v5477_v11  ;;  %v14788_v11 = vld [vmem:[#allocation3 + $0x1e0] sm:$0xff]  ;;  %v4573_v14 = vld [vmem:[#allocation3 + $0x249] sm:$0xff] }
 0x60e   :  { %6478 = vmatmul.mubr.f32.gmra.mrb[120].mxu1 %v14757_v34 }
 0x60f   :  { %6482 = vmatprep.mubr.f32.mxu1 %v16869_v33  ;;  %9480 = vmatmul.mubr.f32.gmra.mrb[180].mxu0 %v5478_v16  ;;  %v14793_v16 = vld [vmem:[#allocation3 + $0x1e8] sm:$0xff]  ;;  %v14798_v33 = vld [vmem:[#allocation3 + $0x1f8] sm:$0xff] }
 0x610   :  { %9482 = vmatprep.mubr.f32.mxu0 %v5479_v39  ;;  %v14803_v39 = vld [vmem:[#allocation3 + $0x200] sm:$0xff] }
 0x612   :  { %6483 = vmatmul.mubr.f32.gmra.mrb[122].mxu1 %v14762_v30 }
 0x613   :  { %6487 = vmatprep.mubr.f32.mxu1 %v16870_v61  ;;  %9483 = vmatmul.mubr.f32.gmra.mrb[182].mxu0 %v5480_v57  ;;  %v16882_v57 = vmax.f32 %v16881_v47, 0.0  ;;  %v14823_v61 = vld [vmem:[#allocation3 + $0x230] sm:$0xff] }
 0x614   :  { %v4579_v47 = vld [vmem:[#allocation3 + $0x291] sm:$0xff] }
 0x616   :  { %6488 = vmatmul.mubr.f32.gmra.mrb[124].mxu1 %v14768_v24 }
 0x617   :  { %6492 = vmatprep.mubr.f32.mxu1 %v16871_v3  ;;  %v16884_v3 = vmax.f32 %v16883_v59, 0.0  ;;  %v4580_v59 = vld [vmem:[#allocation3 + $0x2a1] sm:$0xff] }
 0x61a   :  { %6493 = vmatmul.mubr.f32.gmra.mrb[126].mxu1 %v14773_v55 }
 0x61b   :  { %6497 = vmatprep.mubr.f32.mxu1 %v4560_v6  ;;  %v14828_v6 = vld [vmem:[#allocation3 + $0x240] sm:$0xff] }
 0x61e   :  { %6498 = vmatmul.mubr.f32.gmra.mrb[128].mxu1 %v10739_v63 }
 0x61f   :  { %6502 = vmatprep.mubr.f32.mxu1 %v4561_v22  ;;  %v14831_v22 = vld [vmem:[#allocation3 + $0x248] sm:$0xff] }
 0x622   :  { %6503 = vmatmul.mubr.f32.gmra.mrb[130].mxu1 %v10739_v63  ;;  %v4574_v63 = vld [vmem:[#allocation3 + $0x259] sm:$0xff] }
 0x623   :  { %6507 = vmatprep.mubr.f32.mxu1 %v16872_v8  ;;  %v14834_v8 = vld [vmem:[#allocation3 + $0x258] sm:$0xff] }
 0x626   :  { %6508 = vmatmul.mubr.f32.gmra.mrb[132].mxu1 %v14778_v48 }
 0x627   :  { %6512 = vmatprep.mubr.f32.mxu1 %v16873_v13  ;;  %v4575_v13 = vld [vmem:[#allocation3 + $0x261] sm:$0xff] }
 0x62a   :  { %6513 = vmatmul.mubr.f32.gmra.mrb[134].mxu1 %v14783_v60 }
 0x62b   :  { %6517 = vmatprep.mubr.f32.mxu1 %v16874_v27  ;;  %v14837_v27 = vld [vmem:[#allocation3 + $0x260] sm:$0xff] }
 0x62c   :  { %16885 = vst [vmem:[#allocation10_spill] sm:$0xff] %v14837_v27 }
 0x62e   :  { %6518 = vmatmul.mubr.f32.gmra.mrb[136].mxu1 %v14788_v11 }
 0x62f   :  { %6522 = vmatprep.mubr.f32.mxu1 %v16875_v9  ;;  %v4576_v9 = vld [vmem:[#allocation3 + $0x271] sm:$0xff] }
 0x632   :  { %6523 = vmatmul.mubr.f32.gmra.mrb[138].mxu1 %v14793_v16 }
 0x633   :  { %6527 = vmatprep.mubr.f32.mxu1 %v16876_v62  ;;  %v14840_v62 = vld [vmem:[#allocation3 + $0x270] sm:$0xff] }
 0x634   :  { %16886 = vst [vmem:[#allocation11_spill] sm:$0xff] %v14840_v62 }
 0x636   :  { %6528 = vmatmul.mubr.f32.gmra.mrb[140].mxu1 %v14798_v33 }
 0x637   :  { %6532 = vmatprep.mubr.f32.mxu1 %v16877_v38  ;;  %v4577_v38 = vld [vmem:[#allocation3 + $0x279] sm:$0xff] }
 0x63a   :  { %6533 = vmatmul.mubr.f32.gmra.mrb[142].mxu1 %v14803_v39 }
 0x63b   :  { %6537 = vmatprep.mubr.f32.mxu1 %v16878_v41  ;;  %v14843_v41 = vld [vmem:[#allocation3 + $0x278] sm:$0xff] }
 0x63c   :  { %16887 = vst [vmem:[#allocation25_spill] sm:$0xff] %v14843_v41 }
 0x63e   :  { %6538 = vmatmul.mubr.f32.gmra.mrb[144].mxu1 %v14808_v32 }
 0x63f   :  { %6542 = vmatprep.mubr.f32.mxu1 %v16879_v45  ;;  %v4578_v45 = vld [vmem:[#allocation3 + $0x289] sm:$0xff] }
 0x642   :  { %6543 = vmatmul.mubr.f32.gmra.mrb[146].mxu1 %v14813_v36 }
 0x643   :  { %6547 = vmatprep.mubr.f32.mxu1 %v16880_v51  ;;  %v14846_v51 = vld [vmem:[#allocation3 + $0x288] sm:$0xff] }
 0x644   :  { %16888 = vst [vmem:[#allocation28_spill] sm:$0xff] %v14846_v51 }
 0x646   :  { %6548 = vmatmul.mubr.f32.gmra.mrb[148].mxu1 %v14818_v56 }
 0x647   :  { %6552 = vmatprep.mubr.f32.mxu1 %v16882_v57  ;;  %v14849_v57 = vld [vmem:[#allocation3 + $0x290] sm:$0xff] }
 0x648   :  { %16889 = vst [vmem:[#allocation29_spill] sm:$0xff] %v14849_v57 }
 0x64a   :  { %6553 = vmatmul.mubr.f32.gmra.mrb[150].mxu1 %v14823_v61 }
 0x64b   :  { %6557 = vmatprep.mubr.f32.mxu1 %v16884_v3  ;;  %v14852_v3 = vld [vmem:[#allocation3 + $0x2a0] sm:$0xff] }
 0x64c   :  { %16890 = vst [vmem:[#allocation30_spill] sm:$0xff] %v14852_v3 }
 0x64e   :  { %6558 = vmatmul.mubr.f32.gmra.mrb[152].mxu1 %v14828_v6 }
 0x64f   :  { %6562 = vmatprep.mubr.f32.mxu1 %v4573_v14  ;;  %v4581_v14 = vld [vmem:[#allocation3 + $0x2a9] sm:$0xff] }
 0x652   :  { %6563 = vmatmul.mubr.f32.gmra.mrb[154].mxu1 %v14831_v22 }
 0x653   :  { %6567 = vmatprep.mubr.f32.mxu1 %v4574_v63  ;;  %v14855_v63 = vld [vmem:[#allocation3 + $0x2a8] sm:$0xff] }
 0x654   :  { %16891 = vst [vmem:[#allocation33_spill] sm:$0xff] %v14855_v63 }
 0x656   :  { %6568 = vmatmul.mubr.f32.gmra.mrb[156].mxu1 %v14834_v8 }
 0x657   :  { %6572 = vmatprep.mubr.f32.mxu1 %v4575_v13  ;;  %v4582_v13 = vld [vmem:[#allocation3 + $0x2b9] sm:$0xff] }
 0x65a   :  { %6573 = vmatmul.mubr.f32.gmra.mrb[158].mxu1 %v14837_v27 }
 0x65b   :  { %6577 = vmatprep.mubr.f32.mxu1 %v4576_v9  ;;  %v14858_v9 = vld [vmem:[#allocation3 + $0x2b8] sm:$0xff] }
 0x65c   :  { %16892 = vst [vmem:[#allocation34_spill] sm:$0xff] %v14858_v9 }
 0x65e   :  { %6578 = vmatmul.mubr.f32.gmra.mrb[160].mxu1 %v14840_v62  ;;  %v6196_v62 = vld [vmem:[#allocation4 + $0x218] sm:$0xff] }
 0x65f   :  { %6582 = vmatprep.mubr.f32.mxu1 %v4577_v38  ;;  %v4583_v38 = vld [vmem:[#allocation3 + $0x2c1] sm:$0xff] }
 0x662   :  { %6583 = vmatmul.mubr.f32.gmra.mrb[162].mxu1 %v14843_v41 }
 0x663   :  { %6587 = vmatprep.mubr.f32.mxu1 %v4578_v45  ;;  %v14861_v45 = vld [vmem:[#allocation3 + $0x2c0] sm:$0xff] }
 0x664   :  { %16893 = vst [vmem:[#allocation35_spill] sm:$0xff] %v14861_v45 }
 0x666   :  { %6588 = vmatmul.mubr.f32.gmra.mrb[164].mxu1 %v14846_v51  ;;  %v14917_v51 = vld [vmem:[#allocation3 + $0x320] sm:$0xff] }
 0x667   :  { %6592 = vmatprep.mubr.f32.mxu1 %v4579_v47  ;;  %v4584_v47 = vld [vmem:[#allocation3 + $0x2d1] sm:$0xff] }
 0x66a   :  { %6593 = vmatmul.mubr.f32.gmra.mrb[166].mxu1 %v14849_v57 }
 0x66b   :  { %6597 = vmatprep.mubr.f32.mxu1 %v4580_v59 }
 0x66e   :  { %6598 = vmatmul.mubr.f32.gmra.mrb[168].mxu1 %v14852_v3  ;;  %v14868_v3 = vld [vmem:[#allocation3 + $0x2d0] sm:$0xff] }
 0x66f   :  { %6602 = vmatprep.mubr.f32.mxu1 %v4581_v14  ;;  %16896 = vst [vmem:[#allocation15_spill] sm:$0xff] %v14868_v3 }
 0x672   :  { %6603 = vmatmul.mubr.f32.gmra.mrb[170].mxu1 %v14855_v63 }
 0x673   :  { %6607 = vmatprep.mubr.f32.mxu1 %v4582_v13  ;;  %v4585_v13 = vld [vmem:[#allocation3 + $0x2d9] sm:$0xff] }
 0x676   :  { %6608 = vmatmul.mubr.f32.gmra.mrb[172].mxu1 %v14858_v9  ;;  %v14864_v59 = vpop.f32.mrb[128].mxu0 }
 0x677   :  { %6612 = vmatprep.mubr.f32.mxu1 %v4583_v38  ;;  %16894 = vst [vmem:[#allocation13_spill] sm:$0xff] %v14864_v59  ;;  %v14866_v14 = vpop.f32.mrb[129].mxu0  ;;  %v14875_v38 = vld [vmem:[#allocation3 + $0x2d8] sm:$0xff]  ;;  %v14882_v59 = vld [vmem:[#allocation3 + $0x2e8] sm:$0xff] }
 0x678   :  { %16895 = vst [vmem:[#allocation16_spill] sm:$0xff] %v14866_v14  ;;  %16899 = vst [vmem:[#allocation19_spill] sm:$0xff] %v14875_v38  ;;  %v4587_v14 = vld [vmem:[#allocation3 + $0x2f1] sm:$0xff] }
 0x679   :  { %16902 = vst [vmem:[#allocation32_spill] sm:$0xff] %v14882_v59 }
 0x67a   :  { %6613 = vmatmul.mubr.f32.gmra.mrb[174].mxu1 %v14861_v45  ;;  %v4586_v45 = vld [vmem:[#allocation3 + $0x2e9] sm:$0xff] }
 0x67b   :  { %6617 = vmatprep.mubr.f32.mxu1 %v4584_v47 }
 0x67c   :  { %v14871_v63 = vpop.f32.mrb[130].mxu0 }
 0x67d   :  { %16897 = vst [vmem:[#allocation17_spill] sm:$0xff] %v14871_v63  ;;  %v14873_v9 = vpop.f32.mrb[131].mxu0  ;;  %v14889_v63 = vld [vmem:[#allocation3 + $0x2f0] sm:$0xff] }
 0x67e   :  { %6618 = vmatmul.mubr.f32.gmra.mrb[176].mxu1 %v14868_v3  ;;  %16898 = vst [vmem:[#allocation20_spill] sm:$0xff] %v14873_v9  ;;  %16905 = vst [vmem:[#allocation43_spill] sm:$0xff] %v14889_v63  ;;  %v4588_v9 = vld [vmem:[#allocation3 + $0x301] sm:$0xff] }
 0x67f   :  { %6622 = vmatprep.mubr.f32.mxu1 %v4585_v13 }
 0x681   :  { %v14878_v57 = vpop.f32.mrb[132].mxu0 }
 0x682   :  { %6623 = vmatmul.mubr.f32.gmra.mrb[178].mxu1 %v14875_v38  ;;  %16900 = vst [vmem:[#allocation22_spill] sm:$0xff] %v14878_v57  ;;  %v14880_v47 = vpop.f32.mrb[133].mxu0  ;;  %v14896_v57 = vld [vmem:[#allocation3 + $0x300] sm:$0xff] }
 0x683   :  { %6627 = vmatprep.mubr.f32.mxu1 %v4586_v45  ;;  %16901 = vst [vmem:[#allocation31_spill] sm:$0xff] %v14880_v47  ;;  %16908 = vst [vmem:[#allocation46_spill] sm:$0xff] %v14896_v57  ;;  %v4589_v47 = vld [vmem:[#allocation3 + $0x309] sm:$0xff] }
 0x685   :  { %v14885_v3 = vpop.f32.mrb[134].mxu0 }
 0x686   :  { %6628 = vmatmul.mubr.f32.gmra.mrb[180].mxu1 %v14882_v59  ;;  %16903 = vst [vmem:[#allocation41_spill] sm:$0xff] %v14885_v3  ;;  %v14887_v13 = vpop.f32.mrb[135].mxu0  ;;  %v14903_v3 = vld [vmem:[#allocation3 + $0x308] sm:$0xff] }
 0x687   :  { %6632 = vmatprep.mubr.f32.mxu1 %v4587_v14  ;;  %16904 = vst [vmem:[#allocation42_spill] sm:$0xff] %v14887_v13  ;;  %16911 = vst [vmem:[#allocation49_spill] sm:$0xff] %v14903_v3  ;;  %v4590_v13 = vld [vmem:[#allocation3 + $0x319] sm:$0xff] }
 0x68a   :  { %6633 = vmatmul.mubr.f32.gmra.mrb[182].mxu1 %v14889_v63  ;;  %v14892_v38 = vpop.f32.mrb[136].mxu0 }
 0x68b   :  { %16906 = vst [vmem:[#allocation44_spill] sm:$0xff] %v14892_v38  ;;  %6637 = vmatprep.mubr.f32.mxu1 %v4588_v9  ;;  %v14894_v45 = vpop.f32.mrb[137].mxu0  ;;  %v14910_v38 = vld [vmem:[#allocation3 + $0x318] sm:$0xff] }
 0x68c   :  { %16907 = vst [vmem:[#allocation45_spill] sm:$0xff] %v14894_v45  ;;  %16914 = vst [vmem:[#allocation52_spill] sm:$0xff] %v14910_v38  ;;  %v4591_v45 = vld [vmem:[#allocation3 + $0x321] sm:$0xff] }
 0x68e   :  { %6638 = vmatmul.mubr.f32.gmra.mrb[184].mxu1 %v14896_v57  ;;  %v14899_v59 = vpop.f32.mrb[138].mxu0 }
 0x68f   :  { %16909 = vst [vmem:[#allocation47_spill] sm:$0xff] %v14899_v59  ;;  %6642 = vmatprep.mubr.f32.mxu1 %v4589_v47  ;;  %v14901_v14 = vpop.f32.mrb[139].mxu0  ;;  %v6193_v59 = vld [vmem:[#allocation4 + $0x200] sm:$0xff] }
 0x690   :  { %16910 = vst [vmem:[#allocation48_spill] sm:$0xff] %v14901_v14  ;;  %v6194_v14 = vld [vmem:[#allocation4 + $0x208] sm:$0xff] }
 0x692   :  { %6643 = vmatmul.mubr.f32.gmra.mrb[186].mxu1 %v14903_v3  ;;  %v14906_v63 = vpop.f32.mrb[140].mxu0  ;;  %v9818_v3 = vpack.c.bf16 %v6194_v14, %v6193_v59 }
 0x693   :  { %16912 = vst [vmem:[#allocation50_spill] sm:$0xff] %v14906_v63  ;;  %6647 = vmatprep.mubr.f32.mxu1 %v4590_v13  ;;  %v14908_v9 = vpop.f32.mrb[141].mxu0  ;;  %v16918_v13 = vld [vmem:[#allocation21_spill] sm:$0xff] }
 0x694   :  { %16913 = vst [vmem:[#allocation51_spill] sm:$0xff] %v14908_v9  ;;  %v4656_v9 = vld [vmem:[#allocation3 + $0x2] sm:$0xff] }
 0x696   :  { %6648 = vmatmul.mubr.f32.gmra.mrb[188].mxu1 %v14910_v38  ;;  %v14913_v57 = vpop.f32.mrb[142].mxu0  ;;  %v6195_v38 = vld [vmem:[#allocation4 + $0x210] sm:$0xff] }
 0x697   :  { %16915 = vst [vmem:[#allocation53_spill] sm:$0xff] %v14913_v57  ;;  %6652 = vmatprep.mubr.f32.mxu1 %v4591_v45  ;;  %v14915_v47 = vpop.f32.mrb[143].mxu0  ;;  %v4657_v57 = vld [vmem:[#allocation3 + $0xa] sm:$0xff] }
 0x698   :  { %16916 = vst [vmem:[#allocation54_spill] sm:$0xff] %v14915_v47  ;;  %v9821_v47 = vpack.c.bf16 %v6196_v62, %v6195_v38  ;;  %v14937_v62 = vld [vmem:[#allocation3 + $0x1a] sm:$0xff] }
 0x69a   :  { %6653 = vmatmul.mubr.f32.gmra.mrb[190].mxu1 %v14917_v51  ;;  %v14920_v63 = vpop.f32.mrb[144].mxu0 }
 0x69b   :  { %16917 = vst [vmem:[#allocation55_spill] sm:$0xff] %v14920_v63  ;;  %6722 = vmatprep.mubr.f32.mxu1 %v16918_v13  ;;  %v14923_v41 = vpop.f32.mrb[145].mxu0  ;;  %v6197_v63 = vld [vmem:[#allocation4 + $0x220] sm:$0xff]  ;;  %v6198_v13 = vld [vmem:[#allocation4 + $0x228] sm:$0xff] }
 0x69c   :  { %16919 = vst [vmem:[#allocation21_spill] sm:$0xff] %v14923_v41  ;;  %v9824_v14 = vpack.c.bf16 %v6198_v13, %v6197_v63  ;;  %v6202_v63 = vld [vmem:[#allocation4 + $0x248] sm:$0xff]  ;;  %v15252_v41 = vld [vmem:[#allocation3 + $0x51] sm:$0xff] }
 0x69e   :  { %6723 = vmatmul.mubr.f32.vlgmr.msra.gmra.mrb[64].mxu1 %v4656_v9  ;;  %v14925_v45 = vpop.f32.mrb[146].mxu0 }
 0x69f   :  { %16920 = vst [vmem:[#allocation56_spill] sm:$0xff] %v14925_v45  ;;  %6727 = vmatprep.mubr.f32.mxu1 %v14592_v21  ;;  %9819 = vmatpush1.bf16.msra.mxu1 %v9818_v3  ;;  %v14928_v27 = vpop.f32.mrb[147].mxu0  ;;  %v6199_v21 = vld [vmem:[#allocation4 + $0x230] sm:$0xff]  ;;  %v6200_v3 = vld [vmem:[#allocation4 + $0x238] sm:$0xff] }
 0x6a0   :  { %16921 = vst [vmem:[#allocation57_spill] sm:$0xff] %v14928_v27  ;;  %9820 = vmatprep.subr.bf16.mxu1 %v16845_v5 }
 0x6a2   :  { %6728 = vmatmul.mubr.f32.gmra.mrb[66].mxu1 %v4657_v57  ;;  %v14931_v59 = vpop.f32.mrb[148].mxu0  ;;  %v9827_v57 = vpack.c.bf16 %v6200_v3, %v6199_v21  ;;  %v16928_v21 = vld [vmem:[#allocation24_spill] sm:$0xff] }
 0x6a3   :  { %16922 = vst [vmem:[#allocation58_spill] sm:$0xff] %v14931_v59  ;;  %6732 = vmatprep.mubr.f32.mxu1 %v14613_v4  ;;  %9822 = vmatpush1.bf16.msra.mxu1 %v9821_v47  ;;  %v14934_v9 = vpop.f32.mrb[149].mxu0  ;;  %v6201_v4 = vld [vmem:[#allocation4 + $0x240] sm:$0xff] }
 0x6a4   :  { %16923 = vst [vmem:[#allocation59_spill] sm:$0xff] %v14934_v9  ;;  %9823 = vmatprep.subr.bf16.mxu1 %v16845_v5  ;;  %v14946_v47 = vld [vmem:[#allocation3 + $0x22] sm:$0xff] }
 0x6a6   :  { %6733 = vmatmul.mubr.f32.gmra.mrb[68].mxu1 %v14937_v62  ;;  %v14940_v38 = vpop.f32.mrb[150].mxu0 }
 0x6a7   :  { %16924 = vst [vmem:[#allocation60_spill] sm:$0xff] %v14940_v38  ;;  %6737 = vmatprep.mubr.f32.mxu1 %v14625_v10  ;;  %9825 = vmatpush1.bf16.msra.mxu1 %v9824_v14  ;;  %v14943_v59 = vpop.f32.mrb[151].mxu0  ;;  %v9830_v38 = vpack.c.bf16 %v6202_v63, %v6201_v4  ;;  %v6203_v10 = vld [vmem:[#allocation4 + $0x250] sm:$0xff]  ;;  %v6204_v14 = vld [vmem:[#allocation4 + $0x258] sm:$0xff]  ;;  %v16931_v4 = vld [vmem:[#allocation23_spill] sm:$0xff] }
 0x6a8   :  { %16925 = vst [vmem:[#allocation61_spill] sm:$0xff] %v14943_v59  ;;  %9826 = vmatprep.subr.bf16.mxu1 %v16845_v5  ;;  %v9833_v59 = vpack.c.bf16 %v6204_v14, %v6203_v10  ;;  %v16934_v10 = vld [vmem:[#allocation27_spill] sm:$0xff] }
 0x6aa   :  { %6738 = vmatmul.mubr.f32.gmra.mrb[70].mxu1 %v14946_v47  ;;  %v14949_v13 = vpop.f32.mrb[152].mxu0 }
 0x6ab   :  { %16926 = vst [vmem:[#allocation62_spill] sm:$0xff] %v14949_v13  ;;  %6742 = vmatprep.mubr.f32.mxu1 %v14637_v25  ;;  %9828 = vmatpush1.bf16.msra.mxu1 %v9827_v57  ;;  %v14952_v9 = vpop.f32.mrb[153].mxu0  ;;  %v6205_v25 = vld [vmem:[#allocation4 + $0x260] sm:$0xff]  ;;  %v6206_v57 = vld [vmem:[#allocation4 + $0x268] sm:$0xff] }
 0x6ac   :  { %16927 = vst [vmem:[#allocation63_spill] sm:$0xff] %v14952_v9  ;;  %9829 = vmatprep.subr.bf16.mxu1 %v16845_v5  ;;  %v5042_v9 = vld [vmem:[#allocation3 + $0x32] sm:$0xff] }
 0x6ae   :  { %6743 = vmatmul.mubr.f32.gmra.mrb[72].mxu1 %v16928_v21  ;;  %v14956_v3 = vpop.f32.mrb[154].mxu0  ;;  %v9836_v21 = vpack.c.bf16 %v6206_v57, %v6205_v25 }
 0x6af   :  { %16929 = vst [vmem:[#allocation24_spill] sm:$0xff] %v14956_v3  ;;  %6747 = vmatprep.mubr.f32.mxu1 %v14646_v12  ;;  %9831 = vmatpush1.bf16.msra.mxu1 %v9830_v38  ;;  %v14959_v45 = vpop.f32.mrb[155].mxu0  ;;  %v6207_v12 = vld [vmem:[#allocation4 + $0x270] sm:$0xff]  ;;  %v6208_v38 = vld [vmem:[#allocation4 + $0x278] sm:$0xff] }
 0x6b0   :  { %16930 = vst [vmem:[#allocation64_spill] sm:$0xff] %v14959_v45  ;;  %9832 = vmatprep.subr.bf16.mxu1 %v16845_v5  ;;  %v4913_v45 = vld [vmem:[#allocation3 + $0x21] sm:$0xff] }
 0x6b2   :  { %6748 = vmatmul.mubr.f32.gmra.mrb[74].mxu1 %v16931_v4  ;;  %v14963_v63 = vpop.f32.mrb[156].mxu0  ;;  %v9839_v4 = vpack.c.bf16 %v6208_v38, %v6207_v12 }
 0x6b3   :  { %16932 = vst [vmem:[#allocation23_spill] sm:$0xff] %v14963_v63  ;;  %6752 = vmatprep.mubr.f32.mxu1 %v14651_v35  ;;  %9834 = vmatpush1.bf16.msra.mxu1 %v9833_v59  ;;  %v14966_v13 = vpop.f32.mrb[157].mxu0  ;;  %v6209_v35 = vld [vmem:[#allocation4 + $0x280] sm:$0xff]  ;;  %v6210_v59 = vld [vmem:[#allocation4 + $0x288] sm:$0xff] }
 0x6b4   :  { %16933 = vst [vmem:[#allocation65_spill] sm:$0xff] %v14966_v13  ;;  %9835 = vmatprep.subr.bf16.mxu1 %v16845_v5  ;;  %v9842_v57 = vpack.c.bf16 %v6210_v59, %v6209_v35  ;;  %v4912_v63 = vld [vmem:[#allocation3 + $0x19] sm:$0xff]  ;;  %v6230_v13 = vld [vmem:[#allocation4 + $0x328] sm:$0xff] }
 0x6b6   :  { %6753 = vmatmul.mubr.f32.gmra.mrb[76].mxu1 %v16934_v10  ;;  %v14971_v14 = vpop.f32.mrb[158].mxu0 }
 0x6b7   :  { %6757 = vmatprep.mubr.f32.mxu1 %v14656_v49  ;;  %16935 = vst [vmem:[#allocation27_spill] sm:$0xff] %v14971_v14  ;;  %9837 = vmatpush1.bf16.msra.mxu1 %v9836_v21  ;;  %v14973_v3 = vpop.f32.mrb[159].mxu0  ;;  %v6211_v49 = vld [vmem:[#allocation4 + $0x290] sm:$0xff]  ;;  %v6212_v21 = vld [vmem:[#allocation4 + $0x298] sm:$0xff] }
 0x6b8   :  { %16936 = vst [vmem:[#allocation66_spill] sm:$0xff] %v14973_v3  ;;  %9838 = vmatprep.subr.bf16.mxu1 %v16845_v5  ;;  %v6227_v14 = vld [vmem:[#allocation4 + $0x310] sm:$0xff]  ;;  %v6228_v3 = vld [vmem:[#allocation4 + $0x318] sm:$0xff] }
 0x6ba   :  { %6758 = vmatmul.mubr.f32.gmra.mrb[78].mxu1 %v14603_v40  ;;  %v14977_v25 = vpop.f32.mrb[160].mxu0  ;;  %v9845_v40 = vpack.c.bf16 %v6212_v21, %v6211_v49  ;;  %v6216_v49 = vld [vmem:[#allocation4 + $0x2b8] sm:$0xff] }
 0x6bb   :  { %16937 = vst [vmem:[#allocation67_spill] sm:$0xff] %v14977_v25  ;;  %6762 = vmatprep.mubr.f32.mxu1 %v14661_v1  ;;  %9840 = vmatpush1.bf16.msra.mxu1 %v9839_v4  ;;  %v14980_v10 = vpop.f32.mrb[161].mxu0  ;;  %v6213_v1 = vld [vmem:[#allocation4 + $0x2a0] sm:$0xff]  ;;  %v6214_v4 = vld [vmem:[#allocation4 + $0x2a8] sm:$0xff] }
 0x6bc   :  { %16938 = vst [vmem:[#allocation68_spill] sm:$0xff] %v14980_v10  ;;  %9841 = vmatprep.subr.bf16.mxu1 %v16845_v5  ;;  %v6225_v25 = vld [vmem:[#allocation4 + $0x300] sm:$0xff] }
 0x6bd   :  { %v15233_v10 = vld [vmem:[#allocation3 + $0x322] sm:$0xff] }
 0x6be   :  { %6763 = vmatmul.mubr.f32.gmra.mrb[80].mxu1 %v14610_v18  ;;  %v14984_v12 = vpop.f32.mrb[162].mxu0  ;;  %v9848_v18 = vpack.c.bf16 %v6214_v4, %v6213_v1 }
 0x6bf   :  { %16939 = vst [vmem:[#allocation69_spill] sm:$0xff] %v14984_v12  ;;  %6767 = vmatprep.mubr.f32.mxu1 %v14666_v20  ;;  %9843 = vmatpush1.bf16.msra.mxu1 %v9842_v57  ;;  %v14987_v38 = vpop.f32.mrb[163].mxu0  ;;  %v15223_v12 = vld [vmem:[#allocation3 + $0x302] sm:$0xff] }
 0x6c0   :  { %16940 = vst [vmem:[#allocation70_spill] sm:$0xff] %v14987_v38  ;;  %9844 = vmatprep.subr.bf16.mxu1 %v16845_v5  ;;  %v15230_v38 = vld [vmem:[#allocation3 + $0x31a] sm:$0xff] }
 0x6c2   :  { %6768 = vmatmul.mubr.f32.gmra.mrb[82].mxu1 %v14616_v2  ;;  %v14991_v35 = vpop.f32.mrb[164].mxu0 }
 0x6c3   :  { %16941 = vst [vmem:[#allocation71_spill] sm:$0xff] %v14991_v35  ;;  %6772 = vmatprep.mubr.f32.mxu1 %v14672_v37  ;;  %9846 = vmatpush1.bf16.msra.mxu1 %v9845_v40  ;;  %v14994_v59 = vpop.f32.mrb[165].mxu0  ;;  %v15215_v35 = vld [vmem:[#allocation3 + $0x2ea] sm:$0xff] }
 0x6c4   :  { %16942 = vst [vmem:[#allocation72_spill] sm:$0xff] %v14994_v59  ;;  %9847 = vmatprep.subr.bf16.mxu1 %v16845_v5  ;;  %v15219_v59 = vld [vmem:[#allocation3 + $0x2f2] sm:$0xff] }
 0x6c6   :  { %6773 = vmatmul.mubr.f32.gmra.mrb[84].mxu1 %v14621_v7  ;;  %v14998_v20 = vpop.f32.mrb[166].mxu0 }
 0x6c7   :  { %16943 = vst [vmem:[#allocation73_spill] sm:$0xff] %v14998_v20  ;;  %6777 = vmatprep.mubr.f32.mxu1 %v14678_v58  ;;  %9849 = vmatpush1.bf16.msra.mxu1 %v9848_v18  ;;  %v15001_v57 = vpop.f32.mrb[167].mxu0  ;;  %v6215_v58 = vld [vmem:[#allocation4 + $0x2b0] sm:$0xff]  ;;  %v15039_v18 = vld [vmem:[#allocation3 + $0xc2] sm:$0xff] }
 0x6c8   :  { %16944 = vst [vmem:[#allocation74_spill] sm:$0xff] %v15001_v57  ;;  %9850 = vmatprep.subr.bf16.mxu1 %v16845_v5  ;;  %v9851_v40 = vpack.c.bf16 %v6216_v49, %v6215_v58  ;;  %v6218_v49 = vld [vmem:[#allocation4 + $0x2c8] sm:$0xff]  ;;  %v15207_v20 = vld [vmem:[#allocation3 + $0x2d2] sm:$0xff]  ;;  %v15211_v57 = vld [vmem:[#allocation3 + $0x2da] sm:$0xff] }
 0x6ca   :  { %6778 = vmatmul.mubr.f32.gmra.mrb[86].mxu1 %v14628_v52  ;;  %v15005_v2 = vpop.f32.mrb[168].mxu0 }
 0x6cb   :  { %16945 = vst [vmem:[#allocation75_spill] sm:$0xff] %v15005_v2  ;;  %6782 = vmatprep.mubr.f32.mxu1 %v14684_v54  ;;  %v15008_v37 = vpop.f32.mrb[169].mxu0  ;;  %9852 = vmatpush1.bf16.msra.mxu1 %v9851_v40  ;;  %v15199_v2 = vld [vmem:[#allocation3 + $0x2ba] sm:$0xff] }
 0x6cc   :  { %16946 = vst [vmem:[#allocation76_spill] sm:$0xff] %v15008_v37  ;;  %9853 = vmatprep.subr.bf16.mxu1 %v16845_v5  ;;  %v15203_v37 = vld [vmem:[#allocation3 + $0x2c2] sm:$0xff] }
 0x6ce   :  { %6783 = vmatmul.mubr.f32.gmra.mrb[88].mxu1 %v14633_v26  ;;  %v15011_v7 = vpop.f32.mrb[170].mxu0  ;;  %v15023_v26 = vld [vmem:[#allocation3 + $0xaa] sm:$0xff] }
 0x6cf   :  { %16947 = vst [vmem:[#allocation77_spill] sm:$0xff] %v15011_v7  ;;  %6787 = vmatprep.mubr.f32.mxu1 %v14689_v50  ;;  %v15014_v21 = vpop.f32.mrb[171].mxu0  ;;  %v15191_v7 = vld [vmem:[#allocation3 + $0x2a2] sm:$0xff] }
 0x6d0   :  { %16948 = vst [vmem:[#allocation78_spill] sm:$0xff] %v15014_v21  ;;  %v15195_v21 = vld [vmem:[#allocation3 + $0x2aa] sm:$0xff] }
 0x6d2   :  { %6788 = vmatmul.mubr.f32.gmra.mrb[90].mxu1 %v14640_v53  ;;  %v15017_v52 = vpop.f32.mrb[172].mxu0  ;;  %v15031_v53 = vld [vmem:[#allocation3 + $0xb2] sm:$0xff] }
 0x6d3   :  { %16949 = vst [vmem:[#allocation79_spill] sm:$0xff] %v15017_v52  ;;  %6792 = vmatprep.mubr.f32.mxu1 %v14694_v42  ;;  %v15020_v54 = vpop.f32.mrb[173].mxu0  ;;  %v15183_v52 = vld [vmem:[#allocation3 + $0x28a] sm:$0xff] }
 0x6d4   :  { %16950 = vst [vmem:[#allocation80_spill] sm:$0xff] %v15020_v54  ;;  %v15187_v54 = vld [vmem:[#allocation3 + $0x292] sm:$0xff] }
 0x6d6   :  { %6793 = vmatmul.mubr.f32.gmra.mrb[92].mxu1 %v15023_v26  ;;  %v15026_v50 = vpop.f32.mrb[174].mxu0 }
 0x6d7   :  { %16951 = vst [vmem:[#allocation81_spill] sm:$0xff] %v15026_v50  ;;  %6797 = vmatprep.mubr.f32.mxu1 %v14699_v44  ;;  %v15029_v1 = vpop.f32.mrb[175].mxu0  ;;  %v6217_v44 = vld [vmem:[#allocation4 + $0x2c0] sm:$0xff] }
 0x6d8   :  { %16952 = vst [vmem:[#allocation82_spill] sm:$0xff] %v15029_v1  ;;  %v9854_v50 = vpack.c.bf16 %v6218_v49, %v6217_v44  ;;  %v15047_v1 = vld [vmem:[#allocation3 + $0xca] sm:$0xff]  ;;  %v15064_v49 = vld [vmem:[#allocation3 + $0xe2] sm:$0xff] }
 0x6da   :  { %6798 = vmatmul.mubr.f32.gmra.mrb[94].mxu1 %v15031_v53  ;;  %v15034_v42 = vpop.f32.mrb[176].mxu0 }
 0x6db   :  { %16953 = vst [vmem:[#allocation83_spill] sm:$0xff] %v15034_v42  ;;  %6802 = vmatprep.mubr.f32.mxu1 %v14705_v17  ;;  %v15037_v4 = vpop.f32.mrb[177].mxu0  ;;  %9855 = vmatpush1.bf16.msra.mxu1 %v9854_v50  ;;  %v6219_v50 = vld [vmem:[#allocation4 + $0x2d0] sm:$0xff] }
 0x6dc   :  { %16954 = vst [vmem:[#allocation84_spill] sm:$0xff] %v15037_v4  ;;  %9856 = vmatprep.subr.bf16.mxu1 %v16845_v5  ;;  %v15179_v4 = vld [vmem:[#allocation3 + $0x27a] sm:$0xff] }
 0x6de   :  { %6803 = vmatmul.mubr.f32.gmra.mrb[96].mxu1 %v15039_v18  ;;  %v15042_v58 = vpop.f32.mrb[178].mxu0 }
 0x6df   :  { %16955 = vst [vmem:[#allocation85_spill] sm:$0xff] %v15042_v58  ;;  %6807 = vmatprep.mubr.f32.mxu1 %v14710_v29  ;;  %v15045_v40 = vpop.f32.mrb[179].mxu0  ;;  %v15056_v58 = vld [vmem:[#allocation3 + $0xda] sm:$0xff] }
 0x6e0   :  { %16956 = vst [vmem:[#allocation86_spill] sm:$0xff] %v15045_v40  ;;  %v15113_v40 = vld [vmem:[#allocation3 + $0x172] sm:$0xff] }
 0x6e2   :  { %6808 = vmatmul.mubr.f32.gmra.mrb[98].mxu1 %v15047_v1  ;;  %v15050_v17 = vpop.f32.mrb[180].mxu0 }
 0x6e3   :  { %16957 = vst [vmem:[#allocation87_spill] sm:$0xff] %v15050_v17  ;;  %6812 = vmatprep.mubr.f32.mxu1 %v14715_v23  ;;  %v15053_v42 = vpop.f32.mrb[181].mxu0  ;;  %v15068_v23 = vld [vmem:[#allocation3 + $0xf2] sm:$0xff] }
 0x6e4   :  { %16958 = vst [vmem:[#allocation88_spill] sm:$0xff] %v15053_v42  ;;  %v6220_v17 = vld [vmem:[#allocation4 + $0x2d8] sm:$0xff] }
 0x6e5   :  { %v9857_v42 = vpack.c.bf16 %v6220_v17, %v6219_v50  ;;  %v15089_v50 = vld [vmem:[#allocation3 + $0x12a] sm:$0xff] }
 0x6e6   :  { %6813 = vmatmul.mubr.f32.gmra.mrb[100].mxu1 %v15056_v58  ;;  %v15059_v29 = vpop.f32.mrb[182].mxu0 }
 0x6e7   :  { %16959 = vst [vmem:[#allocation89_spill] sm:$0xff] %v15059_v29  ;;  %6817 = vmatprep.mubr.f32.mxu1 %v14720_v46  ;;  %v15062_v44 = vpop.f32.mrb[183].mxu0  ;;  %v15072_v29 = vld [vmem:[#allocation3 + $0xfa] sm:$0xff]  ;;  %9858 = vmatpush1.bf16.msra.mxu1 %v9857_v42  ;;  %v15077_v46 = vld [vmem:[#allocation3 + $0x10a] sm:$0xff] }
 0x6e8   :  { %16960 = vst [vmem:[#allocation90_spill] sm:$0xff] %v15062_v44  ;;  %9859 = vmatprep.subr.bf16.mxu1 %v16845_v5  ;;  %v6222_v42 = vld [vmem:[#allocation4 + $0x2e8] sm:$0xff] }
 0x6e9   :  { %v15110_v44 = vld [vmem:[#allocation3 + $0x16a] sm:$0xff] }
 0x6ea   :  { %6818 = vmatmul.mubr.f32.gmra.mrb[102].mxu1 %v15064_v49 }
 0x6eb   :  { %6822 = vmatprep.mubr.f32.mxu1 %v14726_v31  ;;  %v15081_v31 = vld [vmem:[#allocation3 + $0x112] sm:$0xff] }
 0x6ee   :  { %6823 = vmatmul.mubr.f32.gmra.mrb[104].mxu1 %v15068_v23 }
 0x6ef   :  { %6827 = vmatprep.mubr.f32.mxu1 %v14731_v0  ;;  %v15085_v0 = vld [vmem:[#allocation3 + $0x122] sm:$0xff] }
 0x6f2   :  { %6828 = vmatmul.mubr.f32.gmra.mrb[106].mxu1 %v15072_v29 }
 0x6f3   :  { %6832 = vmatprep.mubr.f32.mxu1 %v14736_v43  ;;  %v6221_v43 = vld [vmem:[#allocation4 + $0x2e0] sm:$0xff] }
 0x6f4   :  { %v9860_v17 = vpack.c.bf16 %v6222_v42, %v6221_v43  ;;  %v6224_v43 = vld [vmem:[#allocation4 + $0x2f8] sm:$0xff] }
 0x6f6   :  { %6833 = vmatmul.mubr.f32.gmra.mrb[108].mxu1 %v15077_v46 }
 0x6f7   :  { %6837 = vmatprep.mubr.f32.mxu1 %v14741_v28  ;;  %9861 = vmatpush1.bf16.msra.mxu1 %v9860_v17  ;;  %v15094_v28 = vld [vmem:[#allocation3 + $0x13a] sm:$0xff] }
 0x6f8   :  { %9862 = vmatprep.subr.bf16.mxu1 %v16845_v5  ;;  %v15106_v17 = vld [vmem:[#allocation3 + $0x15a] sm:$0xff] }
 0x6fa   :  { %6838 = vmatmul.mubr.f32.gmra.mrb[110].mxu1 %v15081_v31 }
 0x6fb   :  { %6842 = vmatprep.mubr.f32.mxu1 %v14747_v15  ;;  %v15098_v15 = vld [vmem:[#allocation3 + $0x142] sm:$0xff] }
 0x6fe   :  { %6843 = vmatmul.mubr.f32.gmra.mrb[112].mxu1 %v15085_v0 }
 0x6ff   :  { %6847 = vmatprep.mubr.f32.mxu1 %v14752_v19  ;;  %v15102_v19 = vld [vmem:[#allocation3 + $0x152] sm:$0xff] }
 0x702   :  { %6848 = vmatmul.mubr.f32.gmra.mrb[114].mxu1 %v15089_v50 }
 0x703   :  { %6852 = vmatprep.mubr.f32.mxu1 %v14757_v34  ;;  %v6223_v34 = vld [vmem:[#allocation4 + $0x2f0] sm:$0xff] }
 0x704   :  { %v9863_v42 = vpack.c.bf16 %v6224_v43, %v6223_v34  ;;  %v4689_v34 = vld [vmem:[#allocation3 + $0x1ba] sm:$0xff]  ;;  %v15119_v43 = vld [vmem:[#allocation3 + $0x1ca] sm:$0xff] }
 0x706   :  { %6853 = vmatmul.mubr.f32.gmra.mrb[116].mxu1 %v15094_v28 }
 0x707   :  { %6857 = vmatprep.mubr.f32.mxu1 %v14762_v30  ;;  %v4814_v30 = vld [vmem:[#allocation3 + $0x180] sm:$0xff]  ;;  %9864 = vmatpush1.bf16.msra.mxu1 %v9863_v42  ;;  %v15123_v42 = vld [vmem:[#allocation3 + $0x1d2] sm:$0xff] }
 0x708   :  { %9865 = vmatprep.subr.bf16.mxu1 %v16845_v5 }
 0x70a   :  { %6858 = vmatmul.mubr.f32.gmra.mrb[118].mxu1 %v15098_v15 }
 0x70b   :  { %6862 = vmatprep.mubr.f32.mxu1 %v14768_v24  ;;  %v4815_v24 = vld [vmem:[#allocation3 + $0x188] sm:$0xff] }
 0x70e   :  { %6863 = vmatmul.mubr.f32.gmra.mrb[120].mxu1 %v15102_v19 }
 0x70f   :  { %6867 = vmatprep.mubr.f32.mxu1 %v14773_v55  ;;  %v4688_v55 = vld [vmem:[#allocation3 + $0x1b2] sm:$0xff] }
 0x712   :  { %6868 = vmatmul.mubr.f32.gmra.mrb[122].mxu1 %v15106_v17 }
 0x713   :  { %6872 = vmatprep.mubr.f32.mxu1 %v4814_v30  ;;  %v15163_v30 = vld [vmem:[#allocation3 + $0x24a] sm:$0xff] }
 0x716   :  { %6873 = vmatmul.mubr.f32.gmra.mrb[124].mxu1 %v15110_v44 }
 0x717   :  { %6877 = vmatprep.mubr.f32.mxu1 %v4815_v24  ;;  %v15167_v24 = vld [vmem:[#allocation3 + $0x25a] sm:$0xff] }
 0x71a   :  { %6878 = vmatmul.mubr.f32.gmra.mrb[126].mxu1 %v15113_v40 }
 0x71b   :  { %6882 = vmatprep.mubr.f32.mxu1 %v14778_v48  ;;  %v15127_v48 = vld [vmem:[#allocation3 + $0x1e2] sm:$0xff] }
 0x71e   :  { %6883 = vmatmul.mubr.f32.gmra.mrb[128].mxu1 %v4688_v55  ;;  %v15171_v55 = vld [vmem:[#allocation3 + $0x262] sm:$0xff] }
 0x71f   :  { %6887 = vmatprep.mubr.f32.mxu1 %v14783_v60  ;;  %v15131_v60 = vld [vmem:[#allocation3 + $0x1ea] sm:$0xff] }
 0x722   :  { %6888 = vmatmul.mubr.f32.gmra.mrb[130].mxu1 %v4689_v34  ;;  %v15175_v34 = vld [vmem:[#allocation3 + $0x272] sm:$0xff] }
 0x723   :  { %6892 = vmatprep.mubr.f32.mxu1 %v14788_v11  ;;  %v15135_v11 = vld [vmem:[#allocation3 + $0x1fa] sm:$0xff] }
 0x726   :  { %6893 = vmatmul.mubr.f32.gmra.mrb[132].mxu1 %v15119_v43 }
 0x727   :  { %6897 = vmatprep.mubr.f32.mxu1 %v14793_v16  ;;  %v15139_v16 = vld [vmem:[#allocation3 + $0x202] sm:$0xff] }
 0x72a   :  { %6898 = vmatmul.mubr.f32.gmra.mrb[134].mxu1 %v15123_v42 }
 0x72b   :  { %6902 = vmatprep.mubr.f32.mxu1 %v14798_v33  ;;  %v15143_v33 = vld [vmem:[#allocation3 + $0x212] sm:$0xff] }
 0x72e   :  { %6903 = vmatmul.mubr.f32.gmra.mrb[136].mxu1 %v15127_v48 }
 0x72f   :  { %6907 = vmatprep.mubr.f32.mxu1 %v14803_v39  ;;  %v15147_v39 = vld [vmem:[#allocation3 + $0x21a] sm:$0xff] }
 0x732   :  { %6908 = vmatmul.mubr.f32.gmra.mrb[138].mxu1 %v15131_v60 }
 0x733   :  { %6912 = vmatprep.mubr.f32.mxu1 %v14808_v32  ;;  %v15151_v32 = vld [vmem:[#allocation3 + $0x22a] sm:$0xff] }
 0x736   :  { %6913 = vmatmul.mubr.f32.gmra.mrb[140].mxu1 %v15135_v11 }
 0x737   :  { %6917 = vmatprep.mubr.f32.mxu1 %v14813_v36  ;;  %v15155_v36 = vld [vmem:[#allocation3 + $0x232] sm:$0xff] }
 0x73a   :  { %6918 = vmatmul.mubr.f32.gmra.mrb[142].mxu1 %v15139_v16 }
 0x73b   :  { %6922 = vmatprep.mubr.f32.mxu1 %v14818_v56  ;;  %v15159_v56 = vld [vmem:[#allocation3 + $0x242] sm:$0xff] }
 0x73e   :  { %6923 = vmatmul.mubr.f32.gmra.mrb[144].mxu1 %v15143_v33 }
 0x73f   :  { %6927 = vmatprep.mubr.f32.mxu1 %v14823_v61  ;;  %v16961_v61 = vld [vmem:[#allocation10_spill] sm:$0xff] }
 0x742   :  { %6928 = vmatmul.mubr.f32.gmra.mrb[146].mxu1 %v15147_v39 }
 0x743   :  { %6932 = vmatprep.mubr.f32.mxu1 %v14828_v6  ;;  %v16962_v6 = vld [vmem:[#allocation11_spill] sm:$0xff] }
 0x744   :  { %16978 = vst [vmem:[#allocation11_spill] sm:$0xff] %v15252_v41 }
 0x746   :  { %6933 = vmatmul.mubr.f32.gmra.mrb[148].mxu1 %v15151_v32 }
 0x747   :  { %6937 = vmatprep.mubr.f32.mxu1 %v14831_v22  ;;  %v16963_v22 = vld [vmem:[#allocation25_spill] sm:$0xff] }
 0x74a   :  { %6938 = vmatmul.mubr.f32.gmra.mrb[150].mxu1 %v15155_v36 }
 0x74b   :  { %6942 = vmatprep.mubr.f32.mxu1 %v14834_v8  ;;  %v16964_v8 = vld [vmem:[#allocation28_spill] sm:$0xff] }
 0x74e   :  { %6943 = vmatmul.mubr.f32.gmra.mrb[152].mxu1 %v15159_v56 }
 0x74f   :  { %6947 = vmatprep.mubr.f32.mxu1 %v16961_v61  ;;  %v16965_v61 = vld [vmem:[#allocation29_spill] sm:$0xff] }
 0x752   :  { %6948 = vmatmul.mubr.f32.gmra.mrb[154].mxu1 %v15163_v30 }
 0x753   :  { %6952 = vmatprep.mubr.f32.mxu1 %v16962_v6  ;;  %v16966_v6 = vld [vmem:[#allocation30_spill] sm:$0xff] }
 0x756   :  { %6953 = vmatmul.mubr.f32.gmra.mrb[156].mxu1 %v15167_v24 }
 0x757   :  { %6957 = vmatprep.mubr.f32.mxu1 %v16963_v22  ;;  %v16967_v22 = vld [vmem:[#allocation33_spill] sm:$0xff] }
 0x75a   :  { %6958 = vmatmul.mubr.f32.gmra.mrb[158].mxu1 %v15171_v55 }
 0x75b   :  { %6962 = vmatprep.mubr.f32.mxu1 %v16964_v8  ;;  %v16968_v8 = vld [vmem:[#allocation34_spill] sm:$0xff] }
 0x75e   :  { %6963 = vmatmul.mubr.f32.gmra.mrb[160].mxu1 %v15175_v34 }
 0x75f   :  { %6967 = vmatprep.mubr.f32.mxu1 %v16965_v61  ;;  %v16969_v61 = vld [vmem:[#allocation35_spill] sm:$0xff] }
 0x762   :  { %6968 = vmatmul.mubr.f32.gmra.mrb[162].mxu1 %v15179_v4 }
 0x763   :  { %6972 = vmatprep.mubr.f32.mxu1 %v16966_v6  ;;  %v16970_v6 = vld [vmem:[#allocation15_spill] sm:$0xff] }
 0x766   :  { %6973 = vmatmul.mubr.f32.gmra.mrb[164].mxu1 %v15183_v52 }
 0x767   :  { %6977 = vmatprep.mubr.f32.mxu1 %v16967_v22  ;;  %v16971_v22 = vld [vmem:[#allocation19_spill] sm:$0xff] }
 0x76a   :  { %6978 = vmatmul.mubr.f32.gmra.mrb[166].mxu1 %v15187_v54 }
 0x76b   :  { %6982 = vmatprep.mubr.f32.mxu1 %v16968_v8  ;;  %v16972_v8 = vld [vmem:[#allocation32_spill] sm:$0xff] }
 0x76e   :  { %6983 = vmatmul.mubr.f32.gmra.mrb[168].mxu1 %v15191_v7 }
 0x76f   :  { %6987 = vmatprep.mubr.f32.mxu1 %v16969_v61  ;;  %v16973_v61 = vld [vmem:[#allocation43_spill] sm:$0xff] }
 0x772   :  { %6988 = vmatmul.mubr.f32.gmra.mrb[170].mxu1 %v15195_v21 }
 0x773   :  { %6992 = vmatprep.mubr.f32.mxu1 %v16970_v6  ;;  %v16974_v6 = vld [vmem:[#allocation46_spill] sm:$0xff] }
 0x776   :  { %6993 = vmatmul.mubr.f32.gmra.mrb[172].mxu1 %v15199_v2 }
 0x777   :  { %6997 = vmatprep.mubr.f32.mxu1 %v16971_v22  ;;  %v16975_v22 = vld [vmem:[#allocation49_spill] sm:$0xff] }
 0x77a   :  { %6998 = vmatmul.mubr.f32.gmra.mrb[174].mxu1 %v15203_v37 }
 0x77b   :  { %7002 = vmatprep.mubr.f32.mxu1 %v16972_v8  ;;  %v16976_v8 = vld [vmem:[#allocation52_spill] sm:$0xff] }
 0x77e   :  { %7003 = vmatmul.mubr.f32.gmra.mrb[176].mxu1 %v15207_v20 }
 0x77f   :  { %7007 = vmatprep.mubr.f32.mxu1 %v16973_v61  ;;  %v15227_v61 = vld [vmem:[#allocation3 + $0x30a] sm:$0xff] }
 0x782   :  { %7008 = vmatmul.mubr.f32.gmra.mrb[178].mxu1 %v15211_v57 }
 0x783   :  { %7012 = vmatprep.mubr.f32.mxu1 %v16974_v6  ;;  %v4846_v6 = vld [vmem:[#allocation3 + $0x330] sm:$0xff] }
 0x786   :  { %7013 = vmatmul.mubr.f32.gmra.mrb[180].mxu1 %v15215_v35 }
 0x787   :  { %7017 = vmatprep.mubr.f32.mxu1 %v16975_v22  ;;  %v4847_v22 = vld [vmem:[#allocation3 + $0x338] sm:$0xff] }
 0x78a   :  { %7018 = vmatmul.mubr.f32.gmra.mrb[182].mxu1 %v15219_v59 }
 0x78b   :  { %7022 = vmatprep.mubr.f32.mxu1 %v16976_v8  ;;  %v6226_v8 = vld [vmem:[#allocation4 + $0x308] sm:$0xff] }
 0x78e   :  { %7023 = vmatmul.mubr.f32.gmra.mrb[184].mxu1 %v15223_v12 }
 0x78f   :  { %7027 = vmatprep.mubr.f32.mxu1 %v14917_v51  ;;  %v9866_v51 = vpack.c.bf16 %v6226_v8, %v6225_v25  ;;  %v6232_v25 = vld [vmem:[#allocation4 + $0x338] sm:$0xff] }
 0x790   :  { %v15240_v8 = vld [vmem:[#allocation3 + $0x31] sm:$0xff] }
 0x792   :  { %7028 = vmatmul.mubr.f32.gmra.mrb[186].mxu1 %v15227_v61 }
 0x793   :  { %7032 = vmatprep.mubr.f32.mxu1 %v4846_v6  ;;  %v9869_v6 = vpack.c.bf16 %v6228_v3, %v6227_v14  ;;  %v15244_v14 = vld [vmem:[#allocation3 + $0x39] sm:$0xff] }
 0x796   :  { %7033 = vmatmul.mubr.f32.gmra.mrb[188].mxu1 %v15230_v38 }
 0x797   :  { %7037 = vmatprep.mubr.f32.mxu1 %v4847_v22  ;;  %v6229_v22 = vld [vmem:[#allocation4 + $0x320] sm:$0xff] }
 0x798   :  { %v9872_v27 = vpack.c.bf16 %v6230_v13, %v6229_v22  ;;  %v15248_v22 = vld [vmem:[#allocation3 + $0x49] sm:$0xff] }
 0x799   :  { %16977 = vst [vmem:[#allocation10_spill] sm:$0xff] %v15248_v22 }
 0x79a   :  { %7038 = vmatmul.mubr.f32.gmra.mrb[190].mxu1 %v15233_v10 }
 0x79b   :  { %7107 = vmatprep.mubr.f32.mxu1 %v14937_v62  ;;  %v6231_v62 = vld [vmem:[#allocation4 + $0x330] sm:$0xff] }
 0x79c   :  { %v9875_v3 = vpack.c.bf16 %v6232_v25, %v6231_v62  ;;  %v6237_v25 = vld [vmem:[#allocation4 + $0x360] sm:$0xff] }
 0x79e   :  { %7108 = vmatmul.mubr.f32.vlgmr.msra.gmra.mrb[64].mxu1 %v4912_v63  ;;  %v6233_v63 = vld [vmem:[#allocation4 + $0x340] sm:$0xff] }
 0x79f   :  { %7112 = vmatprep.mubr.f32.mxu1 %v14946_v47  ;;  %9867 = vmatpush1.bf16.msra.mxu1 %v9866_v51  ;;  %v5043_v47 = vld [vmem:[#allocation3 + $0x3a] sm:$0xff]  ;;  %v6235_v51 = vld [vmem:[#allocation4 + $0x350] sm:$0xff] }
 0x7a0   :  { %9868 = vmatprep.subr.bf16.mxu1 %v16845_v5 }
 0x7a2   :  { %7113 = vmatmul.mubr.f32.gmra.mrb[66].mxu1 %v4913_v45  ;;  %v6234_v45 = vld [vmem:[#allocation4 + $0x348] sm:$0xff] }
 0x7a3   :  { %7117 = vmatprep.mubr.f32.mxu1 %v5042_v9  ;;  %9870 = vmatpush1.bf16.msra.mxu1 %v9869_v6  ;;  %v5044_v9 = vld [vmem:[#allocation3 + $0x4a] sm:$0xff]  ;;  %v9878_v13 = vpack.c.bf16 %v6234_v45, %v6233_v63  ;;  %v6236_v6 = vld [vmem:[#allocation4 + $0x358] sm:$0xff] }
 0x7a4   :  { %9871 = vmatprep.subr.bf16.mxu1 %v16845_v5  ;;  %v9881_v62 = vpack.c.bf16 %v6236_v6, %v6235_v51  ;;  %v6239_v45 = vld [vmem:[#allocation4 + $0x370] sm:$0xff]  ;;  %v6241_v6 = vld [vmem:[#allocation4 + $0x380] sm:$0xff] }
 0x7a6   :  { %7118 = vmatmul.mubr.f32.gmra.mrb[68].mxu1 %v15240_v8 }
 0x7a7   :  { %7122 = vmatprep.mubr.f32.mxu1 %v5043_v47  ;;  %9873 = vmatpush1.bf16.msra.mxu1 %v9872_v27  ;;  %v5045_v27 = vld [vmem:[#allocation3 + $0x52] sm:$0xff]  ;;  %v6238_v47 = vld [vmem:[#allocation4 + $0x368] sm:$0xff] }
 0x7a8   :  { %9874 = vmatprep.subr.bf16.mxu1 %v16845_v5  ;;  %v9884_v63 = vpack.c.bf16 %v6238_v47, %v6237_v25  ;;  %v6243_v47 = vld [vmem:[#allocation4 + $0x390] sm:$0xff] }
 0x7aa   :  { %7123 = vmatmul.mubr.f32.gmra.mrb[70].mxu1 %v15244_v14 }
 0x7ab   :  { %7127 = vmatprep.mubr.f32.mxu1 %v5044_v9  ;;  %9876 = vmatpush1.bf16.msra.mxu1 %v9875_v3  ;;  %v5046_v3 = vld [vmem:[#allocation3 + $0x62] sm:$0xff]  ;;  %v6240_v9 = vld [vmem:[#allocation4 + $0x378] sm:$0xff] }
 0x7ac   :  { %9877 = vmatprep.subr.bf16.mxu1 %v16845_v5  ;;  %v9887_v51 = vpack.c.bf16 %v6240_v9, %v6239_v45  ;;  %v6245_v9 = vld [vmem:[#allocation4 + $0x3a0] sm:$0xff] }
 0x7ae   :  { %7128 = vmatmul.mubr.f32.gmra.mrb[72].mxu1 %v15248_v22  ;;  %v15256_v22 = vld [vmem:[#allocation3 + $0x61] sm:$0xff] }
 0x7af   :  { %7132 = vmatprep.mubr.f32.mxu1 %v5045_v27  ;;  %9879 = vmatpush1.bf16.msra.mxu1 %v9878_v13  ;;  %16979 = vst [vmem:[#allocation25_spill] sm:$0xff] %v15256_v22  ;;  %v5047_v13 = vld [vmem:[#allocation3 + $0x6a] sm:$0xff] }
 0x7b0   :  { %9880 = vmatprep.subr.bf16.mxu1 %v16845_v5  ;;  %v6242_v27 = vld [vmem:[#allocation4 + $0x388] sm:$0xff] }
 0x7b1   :  { %v9890_v25 = vpack.c.bf16 %v6242_v27, %v6241_v6  ;;  %v15272_v27 = vld [vmem:[#allocation3 + $0x91] sm:$0xff] }
 0x7b2   :  { %7133 = vmatmul.mubr.f32.gmra.mrb[74].mxu1 %v15252_v41  ;;  %v15260_v41 = vld [vmem:[#allocation3 + $0x69] sm:$0xff] }
 0x7b3   :  { %7137 = vmatprep.mubr.f32.mxu1 %v5046_v3  ;;  %9882 = vmatpush1.bf16.msra.mxu1 %v9881_v62  ;;  %16980 = vst [vmem:[#allocation28_spill] sm:$0xff] %v15260_v41  ;;  %v5048_v62 = vld [vmem:[#allocation3 + $0x7a] sm:$0xff] }
 0x7b4   :  { %9883 = vmatprep.subr.bf16.mxu1 %v16845_v5  ;;  %v6244_v3 = vld [vmem:[#allocation4 + $0x398] sm:$0xff] }
 0x7b5   :  { %v9893_v45 = vpack.c.bf16 %v6244_v3, %v6243_v47  ;;  %v15280_v47 = vld [vmem:[#allocation3 + $0xa9] sm:$0xff] }
 0x7b6   :  { %7138 = vmatmul.mubr.f32.gmra.mrb[76].mxu1 %v15256_v22  ;;  %v15264_v22 = vld [vmem:[#allocation3 + $0x79] sm:$0xff]  ;;  %v6247_v3 = vld [vmem:[#allocation4 + $0x3b0] sm:$0xff] }
 0x7b7   :  { %7142 = vmatprep.mubr.f32.mxu1 %v5047_v13  ;;  %9885 = vmatpush1.bf16.msra.mxu1 %v9884_v63  ;;  %v5049_v63 = vld [vmem:[#allocation3 + $0x82] sm:$0xff] }
 0x7b8   :  { %9886 = vmatprep.subr.bf16.mxu1 %v16845_v5  ;;  %v6246_v13 = vld [vmem:[#allocation4 + $0x3a8] sm:$0xff] }
 0x7b9   :  { %v9896_v6 = vpack.c.bf16 %v6246_v13, %v6245_v9  ;;  %v15284_v9 = vld [vmem:[#allocation3 + $0xb1] sm:$0xff]  ;;  %v15289_v13 = vld [vmem:[#allocation3 + $0xc1] sm:$0xff] }
 0x7ba   :  { %7143 = vmatmul.mubr.f32.gmra.mrb[78].mxu1 %v15260_v41  ;;  %v15268_v41 = vld [vmem:[#allocation3 + $0x81] sm:$0xff] }
 0x7bb   :  { %7147 = vmatprep.mubr.f32.mxu1 %v5048_v62  ;;  %9888 = vmatpush1.bf16.msra.mxu1 %v9887_v51  ;;  %v5050_v51 = vld [vmem:[#allocation3 + $0x92] sm:$0xff]  ;;  %v5051_v62 = vld [vmem:[#allocation3 + $0x9a] sm:$0xff] }
 0x7bc   :  { %9889 = vmatprep.subr.bf16.mxu1 %v16845_v5 }
 0x7be   :  { %7148 = vmatmul.mubr.f32.gmra.mrb[80].mxu1 %v15264_v22 }
 0x7bf   :  { %7152 = vmatprep.mubr.f32.mxu1 %v5049_v63  ;;  %9891 = vmatpush1.bf16.msra.mxu1 %v9890_v25  ;;  %v15276_v25 = vld [vmem:[#allocation3 + $0x99] sm:$0xff] }
 0x7c0   :  { %9892 = vmatprep.subr.bf16.mxu1 %v16845_v5  ;;  %v6248_v63 = vld [vmem:[#allocation4 + $0x3b8] sm:$0xff] }
 0x7c2   :  { %7153 = vmatmul.mubr.f32.gmra.mrb[82].mxu1 %v15268_v41 }
 0x7c3   :  { %7157 = vmatprep.mubr.f32.mxu1 %v5050_v51  ;;  %9894 = vmatpush1.bf16.msra.mxu1 %v9893_v45  ;;  %v9899_v45 = vpack.c.bf16 %v6248_v63, %v6247_v3  ;;  %v6250_v51 = vld [vmem:[#allocation4 + $0x3c8] sm:$0xff]  ;;  %v6252_v3 = vld [vmem:[#allocation4 + $0x3d8] sm:$0xff] }
 0x7c4   :  { %9895 = vmatprep.subr.bf16.mxu1 %v16845_v5 }
 0x7c6   :  { %7158 = vmatmul.mubr.f32.gmra.mrb[84].mxu1 %v15272_v27 }
 0x7c7   :  { %7162 = vmatprep.mubr.f32.mxu1 %v5051_v62  ;;  %9897 = vmatpush1.bf16.msra.mxu1 %v9896_v6  ;;  %v15301_v62 = vld [vmem:[#allocation3 + $0xe1] sm:$0xff] }
 0x7c8   :  { %9898 = vmatprep.subr.bf16.mxu1 %v16845_v5 }
 0x7ca   :  { %7163 = vmatmul.mubr.f32.gmra.mrb[86].mxu1 %v15276_v25 }
 0x7cb   :  { %7167 = vmatprep.mubr.f32.mxu1 %v15023_v26  ;;  %9900 = vmatpush1.bf16.msra.mxu1 %v9899_v45  ;;  %v15293_v26 = vld [vmem:[#allocation3 + $0xc9] sm:$0xff]  ;;  %v15318_v45 = vld [vmem:[#allocation3 + $0x111] sm:$0xff] }
 0x7cc   :  { %9901 = vmatprep.subr.bf16.mxu1 %v16845_v5 }
 0x7ce   :  { %7168 = vmatmul.mubr.f32.gmra.mrb[88].mxu1 %v15280_v47 }
 0x7cf   :  { %7172 = vmatprep.mubr.f32.mxu1 %v15031_v53  ;;  %v15297_v53 = vld [vmem:[#allocation3 + $0xd9] sm:$0xff] }
 0x7d2   :  { %7173 = vmatmul.mubr.f32.gmra.mrb[90].mxu1 %v15284_v9 }
 0x7d3   :  { %7177 = vmatprep.mubr.f32.mxu1 %v15039_v18  ;;  %v6249_v18 = vld [vmem:[#allocation4 + $0x3c0] sm:$0xff] }
 0x7d4   :  { %v9902_v6 = vpack.c.bf16 %v6250_v51, %v6249_v18  ;;  %v6254_v18 = vld [vmem:[#allocation4 + $0x3e8] sm:$0xff] }
 0x7d6   :  { %7178 = vmatmul.mubr.f32.gmra.mrb[92].mxu1 %v15289_v13 }
 0x7d7   :  { %7182 = vmatprep.mubr.f32.mxu1 %v15047_v1  ;;  %9903 = vmatpush1.bf16.msra.mxu1 %v9902_v6  ;;  %v15306_v1 = vld [vmem:[#allocation3 + $0xf1] sm:$0xff]  ;;  %v15335_v6 = vld [vmem:[#allocation3 + $0x141] sm:$0xff] }
 0x7d8   :  { %9904 = vmatprep.subr.bf16.mxu1 %v16845_v5 }
 0x7da   :  { %7183 = vmatmul.mubr.f32.gmra.mrb[94].mxu1 %v15293_v26 }
 0x7db   :  { %7187 = vmatprep.mubr.f32.mxu1 %v15056_v58  ;;  %v15310_v58 = vld [vmem:[#allocation3 + $0xf9] sm:$0xff] }
 0x7de   :  { %7188 = vmatmul.mubr.f32.gmra.mrb[96].mxu1 %v15297_v53 }
 0x7df   :  { %7192 = vmatprep.mubr.f32.mxu1 %v15064_v49  ;;  %v15314_v49 = vld [vmem:[#allocation3 + $0x109] sm:$0xff] }
 0x7e2   :  { %7193 = vmatmul.mubr.f32.gmra.mrb[98].mxu1 %v15301_v62 }
 0x7e3   :  { %7197 = vmatprep.mubr.f32.mxu1 %v15068_v23  ;;  %v6251_v23 = vld [vmem:[#allocation4 + $0x3d0] sm:$0xff] }
 0x7e4   :  { %v9905_v63 = vpack.c.bf16 %v6252_v3, %v6251_v23  ;;  %v15352_v3 = vld [vmem:[#allocation3 + $0x171] sm:$0xff] }
 0x7e6   :  { %7198 = vmatmul.mubr.f32.gmra.mrb[100].mxu1 %v15306_v1 }
 0x7e7   :  { %7202 = vmatprep.mubr.f32.mxu1 %v15072_v29  ;;  %9906 = vmatpush1.bf16.msra.mxu1 %v9905_v63  ;;  %v15323_v29 = vld [vmem:[#allocation3 + $0x121] sm:$0xff]  ;;  %v16981_v63 = vld [vmem:[#allocation36_spill] sm:$0xff] }
 0x7e8   :  { %9907 = vmatprep.subr.bf16.mxu1 %v16845_v5 }
 0x7ea   :  { %7203 = vmatmul.mubr.f32.gmra.mrb[102].mxu1 %v15310_v58 }
 0x7eb   :  { %7207 = vmatprep.mubr.f32.mxu1 %v15077_v46  ;;  %v15327_v46 = vld [vmem:[#allocation3 + $0x129] sm:$0xff] }
 0x7ee   :  { %7208 = vmatmul.mubr.f32.gmra.mrb[104].mxu1 %v15314_v49 }
 0x7ef   :  { %7212 = vmatprep.mubr.f32.mxu1 %v15081_v31  ;;  %v15331_v31 = vld [vmem:[#allocation3 + $0x139] sm:$0xff] }
 0x7f2   :  { %7213 = vmatmul.mubr.f32.gmra.mrb[106].mxu1 %v15318_v45 }
 0x7f3   :  { %7217 = vmatprep.mubr.f32.mxu1 %v15085_v0  ;;  %v6253_v0 = vld [vmem:[#allocation4 + $0x3e0] sm:$0xff] }
 0x7f4   :  { %v9908_v51 = vpack.c.bf16 %v6254_v18, %v6253_v0  ;;  %v15356_v0 = vld [vmem:[#allocation3 + $0x181] sm:$0xff]  ;;  %v15359_v18 = vld [vmem:[#allocation3 + $0x189] sm:$0xff] }
 0x7f6   :  { %7218 = vmatmul.mubr.f32.gmra.mrb[108].mxu1 %v15323_v29 }
 0x7f7   :  { %7222 = vmatprep.mubr.f32.mxu1 %v15089_v50  ;;  %9909 = vmatpush1.bf16.msra.mxu1 %v9908_v51  ;;  %v15340_v50 = vld [vmem:[#allocation3 + $0x151] sm:$0xff] }
 0x7f8   :  { %9910 = vmatprep.subr.bf16.mxu1 %v16845_v5  ;;  %v6256_v5 = vld [vmem:[#allocation4 + $0x3f8] sm:$0xff] }
 0x7f9   :  { %v4945_v51 = vld [vmem:[#allocation3 + $0x1d1] sm:$0xff] }
 0x7fa   :  { %7223 = vmatmul.mubr.f32.gmra.mrb[110].mxu1 %v15327_v46 }
 0x7fb   :  { %7227 = vmatprep.mubr.f32.mxu1 %v15094_v28  ;;  %v15344_v28 = vld [vmem:[#allocation3 + $0x159] sm:$0xff] }
 0x7fe   :  { %7228 = vmatmul.mubr.f32.gmra.mrb[112].mxu1 %v15331_v31 }
 0x7ff   :  { %7232 = vmatprep.mubr.f32.mxu1 %v15098_v15  ;;  %v15348_v15 = vld [vmem:[#allocation3 + $0x169] sm:$0xff] }
 0x802   :  { %7233 = vmatmul.mubr.f32.gmra.mrb[114].mxu1 %v15335_v6 }
 0x803   :  { %7237 = vmatprep.mubr.f32.mxu1 %v15102_v19  ;;  %v6255_v19 = vld [vmem:[#allocation4 + $0x3f0] sm:$0xff] }
 0x804   :  { %v9911_v23 = vpack.c.bf16 %v6256_v5, %v6255_v19  ;;  %v15365_v19 = vld [vmem:[#allocation3 + $0x1e1] sm:$0xff]  ;;  %v15369_v5 = vld [vmem:[#allocation3 + $0x1e9] sm:$0xff] }
 0x806   :  { %7238 = vmatmul.mubr.f32.gmra.mrb[116].mxu1 %v15340_v50 }
 0x807   :  { %7242 = vmatprep.mubr.f32.mxu1 %v15106_v17  ;;  %v5070_v17 = vld [vmem:[#allocation3 + $0x182] sm:$0xff]  ;;  %9912 = vmatpush1.bf16.msra.mxu1 %v9911_v23  ;;  %v15482_v23 = vld [vmem:[#allocation3 + $0x33a] sm:$0xff] }
 0x808   :  { %9945 = vmatprep.subr.bf16.mxu1 %v16981_v63  ;;  %16983 = vst [vmem:[#allocation30_spill] sm:$0xff] %v15482_v23 }
 0x80a   :  { %7243 = vmatmul.mubr.f32.gmra.mrb[118].mxu1 %v15344_v28 }
 0x80b   :  { %7247 = vmatprep.mubr.f32.mxu1 %v15110_v44  ;;  %v5071_v44 = vld [vmem:[#allocation3 + $0x18a] sm:$0xff] }
 0x80e   :  { %7248 = vmatmul.mubr.f32.gmra.mrb[120].mxu1 %v15348_v15 }
 0x80f   :  { %7252 = vmatprep.mubr.f32.mxu1 %v15113_v40  ;;  %v4944_v40 = vld [vmem:[#allocation3 + $0x1c9] sm:$0xff] }
 0x812   :  { %7253 = vmatmul.mubr.f32.gmra.mrb[122].mxu1 %v15352_v3 }
 0x813   :  { %7257 = vmatprep.mubr.f32.mxu1 %v5070_v17  ;;  %v16984_v17 = vld [vmem:[#allocation37_spill] sm:$0xff] }
 0x816   :  { %7258 = vmatmul.mubr.f32.gmra.mrb[124].mxu1 %v15356_v0 }
 0x817   :  { %7262 = vmatprep.mubr.f32.mxu1 %v5071_v44  ;;  %v5170_v44 = vld [vmem:[#allocation3 + $0x38] sm:$0xff] }
 0x81a   :  { %7263 = vmatmul.mubr.f32.gmra.mrb[126].mxu1 %v15359_v18 }
 0x81b   :  { %7267 = vmatprep.mubr.f32.mxu1 %v15119_v43  ;;  %v15373_v43 = vld [vmem:[#allocation3 + $0x1f9] sm:$0xff] }
 0x81e   :  { %7268 = vmatmul.mubr.f32.gmra.mrb[128].mxu1 %v4944_v40  ;;  %v16985_v40 = vld [vmem:[#allocation10_spill] sm:$0xff] }
 0x81f   :  { %7272 = vmatprep.mubr.f32.mxu1 %v15123_v42  ;;  %v15377_v42 = vld [vmem:[#allocation3 + $0x201] sm:$0xff] }
 0x822   :  { %7273 = vmatmul.mubr.f32.gmra.mrb[130].mxu1 %v4945_v51  ;;  %v16986_v51 = vld [vmem:[#allocation12_spill] sm:$0xff] }
 0x823   :  { %7277 = vmatprep.mubr.f32.mxu1 %v15127_v48  ;;  %v15381_v48 = vld [vmem:[#allocation3 + $0x211] sm:$0xff] }
 0x826   :  { %7278 = vmatmul.mubr.f32.gmra.mrb[132].mxu1 %v15365_v19 }
 0x827   :  { %7282 = vmatprep.mubr.f32.mxu1 %v15131_v60  ;;  %v15385_v60 = vld [vmem:[#allocation3 + $0x219] sm:$0xff] }
 0x82a   :  { %7283 = vmatmul.mubr.f32.gmra.mrb[134].mxu1 %v15369_v5 }
 0x82b   :  { %7287 = vmatprep.mubr.f32.mxu1 %v15135_v11  ;;  %v15389_v11 = vld [vmem:[#allocation3 + $0x229] sm:$0xff] }
 0x82e   :  { %7288 = vmatmul.mubr.f32.gmra.mrb[136].mxu1 %v15373_v43 }
 0x82f   :  { %7292 = vmatprep.mubr.f32.mxu1 %v15139_v16  ;;  %v15393_v16 = vld [vmem:[#allocation3 + $0x231] sm:$0xff] }
 0x832   :  { %7293 = vmatmul.mubr.f32.gmra.mrb[138].mxu1 %v15377_v42 }
 0x833   :  { %7297 = vmatprep.mubr.f32.mxu1 %v15143_v33  ;;  %v15397_v33 = vld [vmem:[#allocation3 + $0x241] sm:$0xff] }
 0x836   :  { %7298 = vmatmul.mubr.f32.gmra.mrb[140].mxu1 %v15381_v48 }
 0x837   :  { %7302 = vmatprep.mubr.f32.mxu1 %v15147_v39  ;;  %v15401_v39 = vld [vmem:[#allocation3 + $0x249] sm:$0xff] }
 0x83a   :  { %7303 = vmatmul.mubr.f32.gmra.mrb[142].mxu1 %v15385_v60 }
 0x83b   :  { %7307 = vmatprep.mubr.f32.mxu1 %v15151_v32  ;;  %v15405_v32 = vld [vmem:[#allocation3 + $0x259] sm:$0xff] }
 0x83e   :  { %7308 = vmatmul.mubr.f32.gmra.mrb[144].mxu1 %v15389_v11 }
 0x83f   :  { %7312 = vmatprep.mubr.f32.mxu1 %v15155_v36  ;;  %v15409_v36 = vld [vmem:[#allocation3 + $0x261] sm:$0xff] }
 0x842   :  { %7313 = vmatmul.mubr.f32.gmra.mrb[146].mxu1 %v15393_v16 }
 0x843   :  { %7317 = vmatprep.mubr.f32.mxu1 %v15159_v56  ;;  %v15413_v56 = vld [vmem:[#allocation3 + $0x271] sm:$0xff] }
 0x846   :  { %7318 = vmatmul.mubr.f32.gmra.mrb[148].mxu1 %v15397_v33 }
 0x847   :  { %7322 = vmatprep.mubr.f32.mxu1 %v15163_v30  ;;  %v15417_v30 = vld [vmem:[#allocation3 + $0x279] sm:$0xff] }
 0x84a   :  { %7323 = vmatmul.mubr.f32.gmra.mrb[150].mxu1 %v15401_v39 }
 0x84b   :  { %7327 = vmatprep.mubr.f32.mxu1 %v15167_v24  ;;  %v15421_v24 = vld [vmem:[#allocation3 + $0x289] sm:$0xff] }
 0x84e   :  { %7328 = vmatmul.mubr.f32.gmra.mrb[152].mxu1 %v15405_v32 }
 0x84f   :  { %7332 = vmatprep.mubr.f32.mxu1 %v15171_v55  ;;  %v15425_v55 = vld [vmem:[#allocation3 + $0x291] sm:$0xff] }
 0x852   :  { %7333 = vmatmul.mubr.f32.gmra.mrb[154].mxu1 %v15409_v36 }
 0x853   :  { %7337 = vmatprep.mubr.f32.mxu1 %v15175_v34  ;;  %v15429_v34 = vld [vmem:[#allocation3 + $0x2a1] sm:$0xff] }
 0x856   :  { %7338 = vmatmul.mubr.f32.gmra.mrb[156].mxu1 %v15413_v56 }
 0x857   :  { %7342 = vmatprep.mubr.f32.mxu1 %v15179_v4  ;;  %v15433_v4 = vld [vmem:[#allocation3 + $0x2a9] sm:$0xff] }
 0x85a   :  { %7343 = vmatmul.mubr.f32.gmra.mrb[158].mxu1 %v15417_v30 }
 0x85b   :  { %7347 = vmatprep.mubr.f32.mxu1 %v15183_v52  ;;  %v15437_v52 = vld [vmem:[#allocation3 + $0x2b9] sm:$0xff] }
 0x85e   :  { %7348 = vmatmul.mubr.f32.gmra.mrb[160].mxu1 %v15421_v24 }
 0x85f   :  { %7352 = vmatprep.mubr.f32.mxu1 %v15187_v54  ;;  %v15441_v54 = vld [vmem:[#allocation3 + $0x2c1] sm:$0xff] }
 0x862   :  { %7353 = vmatmul.mubr.f32.gmra.mrb[162].mxu1 %v15425_v55 }
 0x863   :  { %7357 = vmatprep.mubr.f32.mxu1 %v15191_v7  ;;  %v15445_v7 = vld [vmem:[#allocation3 + $0x2d1] sm:$0xff] }
 0x866   :  { %7358 = vmatmul.mubr.f32.gmra.mrb[164].mxu1 %v15429_v34 }
 0x867   :  { %7362 = vmatprep.mubr.f32.mxu1 %v15195_v21  ;;  %v15449_v21 = vld [vmem:[#allocation3 + $0x2d9] sm:$0xff] }
 0x86a   :  { %7363 = vmatmul.mubr.f32.gmra.mrb[166].mxu1 %v15433_v4 }
 0x86b   :  { %7367 = vmatprep.mubr.f32.mxu1 %v15199_v2  ;;  %v15453_v2 = vld [vmem:[#allocation3 + $0x2e9] sm:$0xff] }
 0x86e   :  { %7368 = vmatmul.mubr.f32.gmra.mrb[168].mxu1 %v15437_v52 }
 0x86f   :  { %7372 = vmatprep.mubr.f32.mxu1 %v15203_v37  ;;  %v15457_v37 = vld [vmem:[#allocation3 + $0x2f1] sm:$0xff] }
 0x872   :  { %7373 = vmatmul.mubr.f32.gmra.mrb[170].mxu1 %v15441_v54 }
 0x873   :  { %7377 = vmatprep.mubr.f32.mxu1 %v15207_v20  ;;  %v15461_v20 = vld [vmem:[#allocation3 + $0x301] sm:$0xff] }
 0x876   :  { %7378 = vmatmul.mubr.f32.gmra.mrb[172].mxu1 %v15445_v7 }
 0x877   :  { %7382 = vmatprep.mubr.f32.mxu1 %v15211_v57  ;;  %v15465_v57 = vld [vmem:[#allocation3 + $0x309] sm:$0xff] }
 0x87a   :  { %7383 = vmatmul.mubr.f32.gmra.mrb[174].mxu1 %v15449_v21 }
 0x87b   :  { %7387 = vmatprep.mubr.f32.mxu1 %v15215_v35  ;;  %v15469_v35 = vld [vmem:[#allocation3 + $0x319] sm:$0xff] }
 0x87e   :  { %7388 = vmatmul.mubr.f32.gmra.mrb[176].mxu1 %v15453_v2 }
 0x87f   :  { %7392 = vmatprep.mubr.f32.mxu1 %v15219_v59  ;;  %v15473_v59 = vld [vmem:[#allocation3 + $0x321] sm:$0xff] }
 0x882   :  { %7393 = vmatmul.mubr.f32.gmra.mrb[178].mxu1 %v15457_v37 }
 0x883   :  { %7397 = vmatprep.mubr.f32.mxu1 %v15223_v12  ;;  %v15476_v12 = vld [vmem:[#allocation3 + $0x332] sm:$0xff] }
 0x884   :  { %16982 = vst [vmem:[#allocation29_spill] sm:$0xff] %v15476_v12 }
 0x886   :  { %7398 = vmatmul.mubr.f32.gmra.mrb[180].mxu1 %v15461_v20 }
 0x887   :  { %7402 = vmatprep.mubr.f32.mxu1 %v15227_v61  ;;  %v15479_v61 = vld [vmem:[#allocation3 + $0x331] sm:$0xff] }
 0x88a   :  { %7403 = vmatmul.mubr.f32.gmra.mrb[182].mxu1 %v15465_v57 }
 0x88b   :  { %7407 = vmatprep.mubr.f32.mxu1 %v15230_v38  ;;  %v15485_v38 = vld [vmem:[#allocation3 + $0x339] sm:$0xff] }
 0x88e   :  { %7408 = vmatmul.mubr.f32.gmra.mrb[184].mxu1 %v15469_v35 }
 0x88f   :  { %7412 = vmatprep.mubr.f32.mxu1 %v15233_v10  ;;  %v5169_v10 = vld [vmem:[#allocation3 + $0x30] sm:$0xff] }
 0x892   :  { %7413 = vmatmul.mubr.f32.gmra.mrb[186].mxu1 %v15473_v59 }
 0x893   :  { %7417 = vmatprep.mubr.f32.mxu1 %v15476_v12  ;;  %v16987_v12 = vld [vmem:[#allocation11_spill] sm:$0xff] }
 0x896   :  { %7418 = vmatmul.mubr.f32.gmra.mrb[188].mxu1 %v15479_v61 }
 0x897   :  { %7422 = vmatprep.mubr.f32.mxu1 %v15482_v23  ;;  %v5171_v23 = vld [vmem:[#allocation3 + $0x48] sm:$0xff] }
 0x89a   :  { %7423 = vmatmul.mubr.f32.gmra.mrb[190].mxu1 %v15485_v38 }
 0x89b   :  { %7492 = vmatprep.mubr.f32.mxu1 %v15240_v8  ;;  %v16988_v8 = vld [vmem:[#allocation14_spill] sm:$0xff] }
 0x89e   :  { %7493 = vmatmul.mubr.f32.vlgmr.msra.gmra.mrb[64].mxu1 %v5169_v10  ;;  %v16990_v10 = vld [vmem:[#allocation38_spill] sm:$0xff] }
 0x89f   :  { %7497 = vmatprep.mubr.f32.mxu1 %v15244_v14  ;;  %9953 = vmatpush3.bf16.msra.mxu1 %v16981_v63  ;;  %v5172_v14 = vld [vmem:[#allocation3 + $0x50] sm:$0xff]  ;;  %v16989_v63 = vld [vmem:[#allocation25_spill] sm:$0xff] }
 0x8a0   :  { %9946 = vmatprep.subr.bf16.mxu1 %v16984_v17 }
 0x8a2   :  { %7498 = vmatmul.mubr.f32.gmra.mrb[66].mxu1 %v5170_v44  ;;  %v5173_v44 = vld [vmem:[#allocation3 + $0x60] sm:$0xff] }
 0x8a3   :  { %7502 = vmatprep.mubr.f32.mxu1 %v16985_v40  ;;  %9954 = vmatpush3.bf16.msra.mxu1 %v16984_v17  ;;  %v16991_v17 = vld [vmem:[#allocation28_spill] sm:$0xff] }
 0x8a4   :  { %9947 = vmatprep.subr.bf16.mxu1 %v16986_v51  ;;  %v16993_v40 = vld [vmem:[#allocation40_spill] sm:$0xff] }
 0x8a6   :  { %7503 = vmatmul.mubr.f32.gmra.mrb[68].mxu1 %v5171_v23  ;;  %v16992_v23 = vld [vmem:[#allocation39_spill] sm:$0xff] }
 0x8a7   :  { %7507 = vmatprep.mubr.f32.mxu1 %v16987_v12  ;;  %9955 = vmatpush3.bf16.msra.mxu1 %v16986_v51  ;;  %v5174_v12 = vld [vmem:[#allocation3 + $0x68] sm:$0xff]  ;;  %v5175_v51 = vld [vmem:[#allocation3 + $0x78] sm:$0xff] }
 0x8a8   :  { %9948 = vmatprep.subr.bf16.mxu1 %v16988_v8 }
 0x8aa   :  { %7508 = vmatmul.mubr.f32.gmra.mrb[70].mxu1 %v5172_v14  ;;  %v5176_v14 = vld [vmem:[#allocation3 + $0x80] sm:$0xff] }
 0x8ab   :  { %7512 = vmatprep.mubr.f32.mxu1 %v16989_v63  ;;  %9956 = vmatpush3.bf16.msra.mxu1 %v16988_v8  ;;  %v16994_v8 = vld [vmem:[#allocation18_spill] sm:$0xff]  ;;  %v5177_v63 = vld [vmem:[#allocation3 + $0x90] sm:$0xff] }
 0x8ac   :  { %9949 = vmatprep.subr.bf16.mxu1 %v16990_v10 }
 0x8ae   :  { %7513 = vmatmul.mubr.f32.gmra.mrb[72].mxu1 %v5173_v44  ;;  %v5181_v44 = vld [vmem:[#allocation3 + $0xc0] sm:$0xff] }
 0x8af   :  { %7517 = vmatprep.mubr.f32.mxu1 %v16991_v17  ;;  %9957 = vmatpush3.bf16.msra.mxu1 %v16990_v10  ;;  %v5179_v10 = vld [vmem:[#allocation3 + $0xa8] sm:$0xff] }
 0x8b0   :  { %9950 = vmatprep.subr.bf16.mxu1 %v16992_v23  ;;  %v5198_v17 = vld [vmem:[#allocation3 + $0x188] sm:$0xff] }
 0x8b2   :  { %7518 = vmatmul.mubr.f32.gmra.mrb[74].mxu1 %v5174_v12  ;;  %v5205_v12 = vld [vmem:[#allocation3 + $0x210] sm:$0xff] }
 0x8b3   :  { %7522 = vmatprep.mubr.f32.mxu1 %v15264_v22  ;;  %9958 = vmatpush3.bf16.msra.mxu1 %v16992_v23  ;;  %v5178_v22 = vld [vmem:[#allocation3 + $0x98] sm:$0xff]  ;;  %v15533_v23 = vld [vmem:[#allocation3] sm:$0xff] }
 0x8b4   :  { %9951 = vmatprep.subr.bf16.mxu1 %v16993_v40 }
 0x8b6   :  { %7523 = vmatmul.mubr.f32.gmra.mrb[76].mxu1 %v5175_v51  ;;  %v16995_v51 = vld [vmem:[#allocation16_spill] sm:$0xff] }
 0x8b7   :  { %7527 = vmatprep.mubr.f32.mxu1 %v15268_v41  ;;  %9959 = vmatpush3.bf16.msra.mxu1 %v16993_v40  ;;  %v5180_v41 = vld [vmem:[#allocation3 + $0xb0] sm:$0xff]  ;;  %v5222_v40 = vld [vmem:[#allocation3 + $0x2d8] sm:$0xff] }
 0x8b8   :  { %9952 = vmatprep.subr.bf16.mxu1 %v16994_v8 }
 0x8ba   :  { %7528 = vmatmul.mubr.f32.gmra.mrb[78].mxu1 %v5176_v14  ;;  %v5223_v14 = vld [vmem:[#allocation3 + $0x2e8] sm:$0xff] }
 0x8bb   :  { %7532 = vmatprep.mubr.f32.mxu1 %v15272_v27  ;;  %9960 = vmatpush3.bf16.msra.mxu1 %v16994_v8  ;;  %v5182_v27 = vld [vmem:[#allocation3 + $0xc8] sm:$0xff] }
 0x8be   :  { %7533 = vmatmul.mubr.f32.gmra.mrb[80].mxu1 %v5177_v63 }
 0x8bf   :  { %7537 = vmatprep.mubr.f32.mxu1 %v15276_v25  ;;  %v5183_v25 = vld [vmem:[#allocation3 + $0xd8] sm:$0xff] }
 0x8c2   :  { %7538 = vmatmul.mubr.f32.gmra.mrb[82].mxu1 %v5178_v22 }
 0x8c3   :  { %7542 = vmatprep.mubr.f32.mxu1 %v15280_v47  ;;  %v5184_v47 = vld [vmem:[#allocation3 + $0xe0] sm:$0xff] }
 0x8c6   :  { %7543 = vmatmul.mubr.f32.gmra.mrb[84].mxu1 %v5179_v10  ;;  %v16997_v10 = vld [vmem:[#allocation20_spill] sm:$0xff] }
 0x8c7   :  { %7547 = vmatprep.mubr.f32.mxu1 %v15284_v9  ;;  %v5185_v9 = vld [vmem:[#allocation3 + $0xf0] sm:$0xff] }
 0x8ca   :  { %7548 = vmatmul.mubr.f32.gmra.mrb[86].mxu1 %v5180_v41 }
 0x8cb   :  { %7552 = vmatprep.mubr.f32.mxu1 %v15289_v13  ;;  %v5186_v13 = vld [vmem:[#allocation3 + $0xf8] sm:$0xff] }
 0x8ce   :  { %7553 = vmatmul.mubr.f32.gmra.mrb[88].mxu1 %v5181_v44 }
 0x8cf   :  { %7557 = vmatprep.mubr.f32.mxu1 %v15293_v26  ;;  %v5187_v26 = vld [vmem:[#allocation3 + $0x108] sm:$0xff] }
 0x8d2   :  { %7558 = vmatmul.mubr.f32.gmra.mrb[90].mxu1 %v5182_v27 }
 0x8d3   :  { %7562 = vmatprep.mubr.f32.mxu1 %v15297_v53  ;;  %v5188_v53 = vld [vmem:[#allocation3 + $0x110] sm:$0xff] }
 0x8d6   :  { %7563 = vmatmul.mubr.f32.gmra.mrb[92].mxu1 %v5183_v25  ;;  %v16998_v25 = vld [vmem:[#allocation17_spill] sm:$0xff] }
 0x8d7   :  { %7567 = vmatprep.mubr.f32.mxu1 %v15301_v62  ;;  %v5189_v62 = vld [vmem:[#allocation3 + $0x120] sm:$0xff] }
 0x8da   :  { %7568 = vmatmul.mubr.f32.gmra.mrb[94].mxu1 %v5184_v47 }
 0x8db   :  { %7572 = vmatprep.mubr.f32.mxu1 %v15306_v1  ;;  %v5190_v1 = vld [vmem:[#allocation3 + $0x128] sm:$0xff] }
 0x8de   :  { %7573 = vmatmul.mubr.f32.gmra.mrb[96].mxu1 %v5185_v9 }
 0x8df   :  { %7577 = vmatprep.mubr.f32.mxu1 %v15310_v58  ;;  %v5191_v58 = vld [vmem:[#allocation3 + $0x138] sm:$0xff] }
 0x8e2   :  { %7578 = vmatmul.mubr.f32.gmra.mrb[98].mxu1 %v5186_v13 }
 0x8e3   :  { %7582 = vmatprep.mubr.f32.mxu1 %v15314_v49  ;;  %v5192_v49 = vld [vmem:[#allocation3 + $0x140] sm:$0xff] }
 0x8e6   :  { %7583 = vmatmul.mubr.f32.gmra.mrb[100].mxu1 %v5187_v26  ;;  %v16999_v26 = vld [vmem:[#allocation31_spill] sm:$0xff] }
 0x8e7   :  { %7587 = vmatprep.mubr.f32.mxu1 %v15318_v45  ;;  %v5193_v45 = vld [vmem:[#allocation3 + $0x150] sm:$0xff] }
 0x8ea   :  { %7588 = vmatmul.mubr.f32.gmra.mrb[102].mxu1 %v5188_v53 }
 0x8eb   :  { %7592 = vmatprep.mubr.f32.mxu1 %v15323_v29  ;;  %v5194_v29 = vld [vmem:[#allocation3 + $0x158] sm:$0xff] }
 0x8ee   :  { %7593 = vmatmul.mubr.f32.gmra.mrb[104].mxu1 %v5189_v62 }
 0x8ef   :  { %7597 = vmatprep.mubr.f32.mxu1 %v15327_v46  ;;  %v5195_v46 = vld [vmem:[#allocation3 + $0x168] sm:$0xff] }
 0x8f2   :  { %7598 = vmatmul.mubr.f32.gmra.mrb[106].mxu1 %v5190_v1 }
 0x8f3   :  { %7602 = vmatprep.mubr.f32.mxu1 %v15331_v31  ;;  %v5196_v31 = vld [vmem:[#allocation3 + $0x170] sm:$0xff] }
 0x8f6   :  { %7603 = vmatmul.mubr.f32.gmra.mrb[108].mxu1 %v5191_v58  ;;  %v17000_v58 = vld [vmem:[#allocation22_spill] sm:$0xff] }
 0x8f7   :  { %7607 = vmatprep.mubr.f32.mxu1 %v15335_v6  ;;  %v5197_v6 = vld [vmem:[#allocation3 + $0x180] sm:$0xff] }
 0x8fa   :  { %7608 = vmatmul.mubr.f32.gmra.mrb[110].mxu1 %v5192_v49 }
 0x8fb   :  { %7612 = vmatprep.mubr.f32.mxu1 %v15340_v50  ;;  %v5327_v50 = vld [vmem:[#allocation3 + $0x199] sm:$0xff] }
 0x8fe   :  { %7613 = vmatmul.mubr.f32.gmra.mrb[112].mxu1 %v5193_v45 }
 0x8ff   :  { %7617 = vmatprep.mubr.f32.mxu1 %v15344_v28  ;;  %v5328_v28 = vld [vmem:[#allocation3 + $0x1a1] sm:$0xff] }
 0x902   :  { %7618 = vmatmul.mubr.f32.gmra.mrb[114].mxu1 %v5194_v29 }
 0x903   :  { %7622 = vmatprep.mubr.f32.mxu1 %v15348_v15  ;;  %v5201_v15 = vld [vmem:[#allocation3 + $0x1e0] sm:$0xff] }
 0x906   :  { %7623 = vmatmul.mubr.f32.gmra.mrb[116].mxu1 %v5195_v46  ;;  %v17001_v46 = vld [vmem:[#allocation42_spill] sm:$0xff] }
 0x907   :  { %7627 = vmatprep.mubr.f32.mxu1 %v15352_v3  ;;  %v5202_v3 = vld [vmem:[#allocation3 + $0x1e8] sm:$0xff] }
 0x90a   :  { %7628 = vmatmul.mubr.f32.gmra.mrb[118].mxu1 %v5196_v31 }
 0x90b   :  { %7632 = vmatprep.mubr.f32.mxu1 %v15356_v0  ;;  %v5203_v0 = vld [vmem:[#allocation3 + $0x1f8] sm:$0xff] }
 0x90e   :  { %7633 = vmatmul.mubr.f32.gmra.mrb[120].mxu1 %v5197_v6 }
 0x90f   :  { %7637 = vmatprep.mubr.f32.mxu1 %v15359_v18  ;;  %v5204_v18 = vld [vmem:[#allocation3 + $0x200] sm:$0xff] }
 0x912   :  { %7638 = vmatmul.mubr.f32.gmra.mrb[122].mxu1 %v5198_v17  ;;  %v17002_v17 = vld [vmem:[#allocation41_spill] sm:$0xff] }
 0x913   :  { %7642 = vmatprep.mubr.f32.mxu1 %v5327_v50 }
 0x916   :  { %7643 = vmatmul.mubr.f32.gmra.mrb[124].mxu1 %v15533_v23 }
 0x917   :  { %7647 = vmatprep.mubr.f32.mxu1 %v5328_v28 }
 0x91a   :  { %7648 = vmatmul.mubr.f32.gmra.mrb[126].mxu1 %v15533_v23 }
 0x91b   :  { %7652 = vmatprep.mubr.f32.mxu1 %v15365_v19  ;;  %v5206_v19 = vld [vmem:[#allocation3 + $0x218] sm:$0xff] }
 0x91e   :  { %7653 = vmatmul.mubr.f32.gmra.mrb[128].mxu1 %v5201_v15 }
 0x91f   :  { %7657 = vmatprep.mubr.f32.mxu1 %v15369_v5  ;;  %v5207_v5 = vld [vmem:[#allocation3 + $0x228] sm:$0xff] }
 0x922   :  { %7658 = vmatmul.mubr.f32.gmra.mrb[130].mxu1 %v5202_v3  ;;  %v5359_v3 = vld [vmem:[#allocation3 + $0x349] sm:$0xff] }
 0x923   :  { %7662 = vmatprep.mubr.f32.mxu1 %v15373_v43  ;;  %v5208_v43 = vld [vmem:[#allocation3 + $0x230] sm:$0xff] }
 0x926   :  { %7663 = vmatmul.mubr.f32.gmra.mrb[132].mxu1 %v5203_v0  ;;  %v5230_v0 = vld [vmem:[#allocation3 + $0x338] sm:$0xff] }
 0x927   :  { %7667 = vmatprep.mubr.f32.mxu1 %v15377_v42  ;;  %v5209_v42 = vld [vmem:[#allocation3 + $0x240] sm:$0xff] }
 0x92a   :  { %7668 = vmatmul.mubr.f32.gmra.mrb[134].mxu1 %v5204_v18  ;;  %v17003_v18 = vld [vmem:[#allocation45_spill] sm:$0xff] }
 0x92b   :  { %7672 = vmatprep.mubr.f32.mxu1 %v15381_v48  ;;  %v5210_v48 = vld [vmem:[#allocation3 + $0x248] sm:$0xff] }
 0x92e   :  { %7673 = vmatmul.mubr.f32.gmra.mrb[136].mxu1 %v5205_v12 }
 0x92f   :  { %7677 = vmatprep.mubr.f32.mxu1 %v15385_v60  ;;  %v5211_v60 = vld [vmem:[#allocation3 + $0x258] sm:$0xff] }
 0x932   :  { %7678 = vmatmul.mubr.f32.gmra.mrb[138].mxu1 %v5206_v19 }
 0x933   :  { %7682 = vmatprep.mubr.f32.mxu1 %v15389_v11  ;;  %v5212_v11 = vld [vmem:[#allocation3 + $0x260] sm:$0xff] }
 0x936   :  { %7683 = vmatmul.mubr.f32.gmra.mrb[140].mxu1 %v5207_v5  ;;  %v5360_v5 = vld [vmem:[#allocation3 + $0x351] sm:$0xff] }
 0x937   :  { %7687 = vmatprep.mubr.f32.mxu1 %v15393_v16  ;;  %v5213_v16 = vld [vmem:[#allocation3 + $0x270] sm:$0xff] }
 0x93a   :  { %7688 = vmatmul.mubr.f32.gmra.mrb[142].mxu1 %v5208_v43  ;;  %v17004_v43 = vld [vmem:[#allocation44_spill] sm:$0xff] }
 0x93b   :  { %7692 = vmatprep.mubr.f32.mxu1 %v15397_v33  ;;  %v5214_v33 = vld [vmem:[#allocation3 + $0x278] sm:$0xff] }
 0x93e   :  { %7693 = vmatmul.mubr.f32.gmra.mrb[144].mxu1 %v5209_v42 }
 0x93f   :  { %7697 = vmatprep.mubr.f32.mxu1 %v15401_v39  ;;  %v5215_v39 = vld [vmem:[#allocation3 + $0x288] sm:$0xff] }
 0x942   :  { %7698 = vmatmul.mubr.f32.gmra.mrb[146].mxu1 %v5210_v48 }
 0x943   :  { %7702 = vmatprep.mubr.f32.mxu1 %v15405_v32  ;;  %v5216_v32 = vld [vmem:[#allocation3 + $0x290] sm:$0xff] }
 0x946   :  { %7703 = vmatmul.mubr.f32.gmra.mrb[148].mxu1 %v5211_v60 }
 0x947   :  { %7707 = vmatprep.mubr.f32.mxu1 %v15409_v36  ;;  %v5217_v36 = vld [vmem:[#allocation3 + $0x2a0] sm:$0xff] }
 0x94a   :  { %7708 = vmatmul.mubr.f32.gmra.mrb[150].mxu1 %v5212_v11 }
 0x94b   :  { %7712 = vmatprep.mubr.f32.mxu1 %v15413_v56  ;;  %v5218_v56 = vld [vmem:[#allocation3 + $0x2a8] sm:$0xff] }
 0x94e   :  { %7713 = vmatmul.mubr.f32.gmra.mrb[152].mxu1 %v5213_v16 }
 0x94f   :  { %7717 = vmatprep.mubr.f32.mxu1 %v15417_v30  ;;  %v5219_v30 = vld [vmem:[#allocation3 + $0x2b8] sm:$0xff] }
 0x952   :  { %7718 = vmatmul.mubr.f32.gmra.mrb[154].mxu1 %v5214_v33  ;;  %v5481_v33 = vld [vmem:[#allocation3 + $0x302] sm:$0xff] }
 0x953   :  { %7722 = vmatprep.mubr.f32.mxu1 %v15421_v24  ;;  %v5220_v24 = vld [vmem:[#allocation3 + $0x2c0] sm:$0xff] }
 0x956   :  { %7723 = vmatmul.mubr.f32.gmra.mrb[156].mxu1 %v5215_v39 }
 0x957   :  { %7727 = vmatprep.mubr.f32.mxu1 %v15425_v55  ;;  %v5221_v55 = vld [vmem:[#allocation3 + $0x2d0] sm:$0xff] }
 0x95a   :  { %7728 = vmatmul.mubr.f32.gmra.mrb[158].mxu1 %v5216_v32  ;;  %v5482_v32 = vld [vmem:[#allocation3 + $0x30a] sm:$0xff] }
 0x95b   :  { %7732 = vmatprep.mubr.f32.mxu1 %v15429_v34 }
 0x95e   :  { %7733 = vmatmul.mubr.f32.gmra.mrb[160].mxu1 %v5217_v36  ;;  %v17006_v36 = vld [vmem:[#allocation47_spill] sm:$0xff] }
 0x95f   :  { %7737 = vmatprep.mubr.f32.mxu1 %v15433_v4 }
 0x962   :  { %7738 = vmatmul.mubr.f32.gmra.mrb[162].mxu1 %v5218_v56 }
 0x963   :  { %7742 = vmatprep.mubr.f32.mxu1 %v15437_v52 }
 0x966   :  { %7743 = vmatmul.mubr.f32.gmra.mrb[164].mxu1 %v5219_v30 }
 0x967   :  { %7747 = vmatprep.mubr.f32.mxu1 %v15441_v54  ;;  %v16996_v54 = vld [vmem:[#allocation13_spill] sm:$0xff] }
 0x96a   :  { %7748 = vmatmul.mubr.f32.gmra.mrb[166].mxu1 %v5220_v24  ;;  %v5483_v24 = vld [vmem:[#allocation3 + $0x31a] sm:$0xff] }
 0x96b   :  { %7752 = vmatprep.mubr.f32.mxu1 %v15445_v7 }
 0x96e   :  { %7753 = vmatmul.mubr.f32.gmra.mrb[168].mxu1 %v5221_v55 }
 0x96f   :  { %7757 = vmatprep.mubr.f32.mxu1 %v15449_v21  ;;  %v5224_v21 = vld [vmem:[#allocation3 + $0x2f0] sm:$0xff] }
 0x971   :  { %v7494_v34 = vpop.f32.mrb[64].mxu1 }
 0x972   :  { %v15560_v4 = vadd.f32 %v16995_v51, %v7494_v34  ;;  %v7496_v8 = vpop.f32.mrb[65].mxu1  ;;  %7758 = vmatmul.mubr.f32.gmra.mrb[170].mxu1 %v5222_v40  ;;  %v5484_v34 = vld [vmem:[#allocation3 + $0x322] sm:$0xff] }
 0x973   :  { %7762 = vmatprep.mubr.f32.mxu1 %v15453_v2  ;;  %v5225_v2 = vld [vmem:[#allocation3 + $0x300] sm:$0xff]  ;;  %v17007_v40 = vld [vmem:[#allocation51_spill] sm:$0xff] }
 0x975   :  { %v7499_v52 = vpop.f32.mrb[66].mxu1 }
 0x976   :  { %v15564_v63 = vadd.f32 %v16996_v54, %v7499_v52  ;;  %v7501_v22 = vpop.f32.mrb[67].mxu1  ;;  %7763 = vmatmul.mubr.f32.gmra.mrb[172].mxu1 %v5223_v14  ;;  %v17008_v52 = vld [vmem:[#allocation29_spill] sm:$0xff]  ;;  %v17009_v54 = vld [vmem:[#allocation50_spill] sm:$0xff] }
 0x977   :  { %7767 = vmatprep.mubr.f32.mxu1 %v15457_v37  ;;  %v5226_v37 = vld [vmem:[#allocation3 + $0x308] sm:$0xff] }
 0x979   :  { %v7504_v7 = vpop.f32.mrb[68].mxu1 }
 0x97a   :  { %v15568_v41 = vadd.f32 %v16997_v10, %v7504_v7  ;;  %v7506_v44 = vpop.f32.mrb[69].mxu1  ;;  %7768 = vmatmul.mubr.f32.gmra.mrb[174].mxu1 %v5224_v21  ;;  %v17010_v21 = vld [vmem:[#allocation30_spill] sm:$0xff]  ;;  %v5488_v10 = vld [vmem:[#allocation3 + $0x352] sm:$0xff] }
 0x97b   :  { %7772 = vmatprep.mubr.f32.mxu1 %v15461_v20  ;;  %v5227_v20 = vld [vmem:[#allocation3 + $0x318] sm:$0xff] }
 0x97d   :  { %v7509_v27 = vpop.f32.mrb[70].mxu1 }
 0x97e   :  { %v15572_v47 = vadd.f32 %v16998_v25, %v7509_v27  ;;  %v7511_v9 = vpop.f32.mrb[71].mxu1  ;;  %7773 = vmatmul.mubr.f32.gmra.mrb[176].mxu1 %v5225_v2  ;;  %v17011_v27 = vld [vmem:[#allocation54_spill] sm:$0xff] }
 0x97f   :  { %7777 = vmatprep.mubr.f32.mxu1 %v15465_v57  ;;  %v5228_v57 = vld [vmem:[#allocation3 + $0x320] sm:$0xff] }
 0x981   :  { %v7514_v13 = vpop.f32.mrb[72].mxu1 }
 0x982   :  { %v15576_v53 = vadd.f32 %v16999_v26, %v7514_v13  ;;  %v7516_v62 = vpop.f32.mrb[73].mxu1  ;;  %7778 = vmatmul.mubr.f32.gmra.mrb[178].mxu1 %v5226_v37  ;;  %v17012_v13 = vld [vmem:[#allocation53_spill] sm:$0xff] }
 0x983   :  { %7782 = vmatprep.mubr.f32.mxu1 %v15469_v35  ;;  %v5229_v35 = vld [vmem:[#allocation3 + $0x330] sm:$0xff] }
 0x985   :  { %v7519_v1 = vpop.f32.mrb[74].mxu1 }
 0x986   :  { %v15580_v49 = vadd.f32 %v17000_v58, %v7519_v1  ;;  %v7521_v45 = vpop.f32.mrb[75].mxu1  ;;  %7783 = vmatmul.mubr.f32.gmra.mrb[180].mxu1 %v5227_v20  ;;  %v17013_v1 = vld [vmem:[#allocation21_spill] sm:$0xff] }
 0x987   :  { %7787 = vmatprep.mubr.f32.mxu1 %v15473_v59 }
 0x989   :  { %v7524_v29 = vpop.f32.mrb[76].mxu1 }
 0x98a   :  { %v15584_v31 = vadd.f32 %v17001_v46, %v7524_v29  ;;  %v7526_v6 = vpop.f32.mrb[77].mxu1  ;;  %7788 = vmatmul.mubr.f32.gmra.mrb[182].mxu1 %v5228_v57  ;;  %v17014_v29 = vld [vmem:[#allocation55_spill] sm:$0xff] }
 0x98b   :  { %7792 = vmatprep.mubr.f32.mxu1 %v15479_v61 }
 0x98d   :  { %v7529_v50 = vpop.f32.mrb[78].mxu1 }
 0x98e   :  { %v15588_v28 = vadd.f32 %v17002_v17, %v7529_v50  ;;  %v7531_v15 = vpop.f32.mrb[79].mxu1  ;;  %7793 = vmatmul.mubr.f32.gmra.mrb[184].mxu1 %v5229_v35  ;;  %v17015_v50 = vld [vmem:[#allocation57_spill] sm:$0xff] }
 0x98f   :  { %7797 = vmatprep.mubr.f32.mxu1 %v15485_v38  ;;  %v17005_v38 = vld [vmem:[#allocation48_spill] sm:$0xff] }
 0x991   :  { %v7534_v59 = vpop.f32.mrb[80].mxu1 }
 0x992   :  { %v15592_v12 = vadd.f32 %v17003_v18, %v7534_v59  ;;  %v7536_v19 = vpop.f32.mrb[81].mxu1  ;;  %7798 = vmatmul.mubr.f32.gmra.mrb[186].mxu1 %v5230_v0 }
 0x993   :  { %7802 = vmatprep.mubr.f32.mxu1 %v5359_v3  ;;  %v17016_v3 = vld [vmem:[#allocation56_spill] sm:$0xff]  ;;  %v17017_v19 = vld [vmem:[#allocation59_spill] sm:$0xff] }
 0x995   :  { %v7539_v61 = vpop.f32.mrb[82].mxu1 }
 0x996   :  { %v15595_v42 = vadd.f32 %v17004_v43, %v7539_v61  ;;  %v7541_v48 = vpop.f32.mrb[83].mxu1  ;;  %7803 = vmatmul.mubr.f32.gmra.mrb[188].mxu1 %v15533_v23 }
 0x997   :  { %7807 = vmatprep.mubr.f32.mxu1 %v5360_v5  ;;  %v17019_v48 = vld [vmem:[#allocation58_spill] sm:$0xff] }
 0x999   :  { %v7544_v60 = vpop.f32.mrb[84].mxu1 }
 0x99a   :  { %v15599_v11 = vadd.f32 %v17005_v38, %v7544_v60  ;;  %v7546_v16 = vpop.f32.mrb[85].mxu1  ;;  %7808 = vmatmul.mubr.f32.gmra.mrb[190].mxu1 %v15533_v23  ;;  %v5487_v23 = vld [vmem:[#allocation3 + $0x34a] sm:$0xff] }
 0x99b   :  { %9485 = vmatprep.mubr.f32.mxu1 %v5481_v33  ;;  %v17020_v33 = vld [vmem:[#allocation61_spill] sm:$0xff] }
 0x99d   :  { %v7549_v39 = vpop.f32.mrb[86].mxu1 }
 0x99e   :  { %v15603_v56 = vadd.f32 %v17006_v36, %v7549_v39  ;;  %v7551_v30 = vpop.f32.mrb[87].mxu1  ;;  %9486 = vmatmul.mubr.f32.vlgmr.msra.gmra.mrb[192].mxu1 %v5482_v32 }
 0x99f   :  { %9488 = vmatprep.mubr.f32.mxu1 %v5483_v24  ;;  %v17022_v30 = vld [vmem:[#allocation60_spill] sm:$0xff] }
 0x9a1   :  { %v7554_v55 = vpop.f32.mrb[88].mxu1 }
 0x9a2   :  { %v15606_v51 = vadd.f32 %v17007_v40, %v7554_v55  ;;  %v7556_v8 = vpop.f32.mrb[89].mxu1  ;;  %9489 = vmatmul.mubr.f32.gmra.mrb[194].mxu1 %v5484_v34  ;;  %v17023_v40 = vld [vmem:[#allocation63_spill] sm:$0xff] }
 0x9a3   :  { %9491 = vmatprep.mubr.f32.mxu1 %v17008_v52 }
 0x9a5   :  { %v7559_v14 = vpop.f32.mrb[90].mxu1 }
 0x9a6   :  { %v15610_v22 = vadd.f32 %v17009_v54, %v7559_v14  ;;  %v7561_v7 = vpop.f32.mrb[91].mxu1  ;;  %9492 = vmatmul.mubr.f32.gmra.mrb[196].mxu1 %v17010_v21  ;;  %v17025_v14 = vld [vmem:[#allocation62_spill] sm:$0xff] }
 0x9a7   :  { %9494 = vmatprep.mubr.f32.mxu1 %v5487_v23 }
 0x9a9   :  { %v7564_v44 = vpop.f32.mrb[92].mxu1 }
 0x9aa   :  { %v15614_v2 = vadd.f32 %v17011_v27, %v7564_v44  ;;  %v7566_v25 = vpop.f32.mrb[93].mxu1  ;;  %9495 = vmatmul.mubr.f32.gmra.mrb[198].mxu1 %v5488_v10  ;;  %v17026_v10 = vld [vmem:[#allocation64_spill] sm:$0xff] }
 0x9ad   :  { %v7569_v9 = vpop.f32.mrb[94].mxu1 }
 0x9ae   :  { %v15617_v37 = vadd.f32 %v17012_v13, %v7569_v9  ;;  %v7571_v26 = vpop.f32.mrb[95].mxu1  ;;  %v17028_v9 = vld [vmem:[#allocation24_spill] sm:$0xff] }
 0x9b1   :  { %v7574_v62 = vpop.f32.mrb[96].mxu1 }
 0x9b2   :  { %v15620_v20 = vadd.f32 %v17013_v1, %v7574_v62  ;;  %v7576_v58 = vpop.f32.mrb[97].mxu1  ;;  %v17029_v1 = vld [vmem:[#allocation65_spill] sm:$0xff] }
 0x9b5   :  { %v7579_v45 = vpop.f32.mrb[98].mxu1 }
 0x9b6   :  { %v15623_v57 = vadd.f32 %v17014_v29, %v7579_v45  ;;  %v7581_v46 = vpop.f32.mrb[99].mxu1 }
 0x9b7   :  { %v17031_v46 = vld [vmem:[#allocation23_spill] sm:$0xff] }
 0x9b9   :  { %v7584_v6 = vpop.f32.mrb[100].mxu1 }
 0x9ba   :  { %v15626_v35 = vadd.f32 %v17015_v50, %v7584_v6  ;;  %v7586_v17 = vpop.f32.mrb[101].mxu1 }
 0x9bd   :  { %v7589_v15 = vpop.f32.mrb[102].mxu1 }
 0x9be   :  { %v15629_v59 = vadd.f32 %v17016_v3, %v7589_v15  ;;  %v7591_v0 = vpop.f32.mrb[103].mxu1  ;;  %v17032_v15 = vld [vmem:[#allocation66_spill] sm:$0xff] }
 0x9c1   :  { %v7594_v18 = vpop.f32.mrb[104].mxu1 }
 0x9c2   :  { %v15632_v5 = vadd.f32 %v17017_v19, %v7594_v18  ;;  %v7596_v61 = vpop.f32.mrb[105].mxu1  ;;  %v17034_v19 = vld [vmem:[#allocation27_spill] sm:$0xff] }
 0x9c4   :  { %17018 = vst [vmem:[#allocation33_spill] sm:$0xff] %v15632_v5 }
 0x9c5   :  { %v7599_v43 = vpop.f32.mrb[106].mxu1 }
 0x9c6   :  { %v15635_v60 = vadd.f32 %v17019_v48, %v7599_v43  ;;  %v7601_v38 = vpop.f32.mrb[107].mxu1 }
 0x9c7   :  { %v17035_v38 = vld [vmem:[#allocation68_spill] sm:$0xff] }
 0x9c9   :  { %v7604_v16 = vpop.f32.mrb[108].mxu1 }
 0x9ca   :  { %v15638_v39 = vadd.f32 %v17020_v33, %v7604_v16  ;;  %v7606_v32 = vpop.f32.mrb[109].mxu1 }
 0x9cc   :  { %17021 = vst [vmem:[#allocation34_spill] sm:$0xff] %v15638_v39 }
 0x9cd   :  { %v7609_v36 = vpop.f32.mrb[110].mxu1 }
 0x9ce   :  { %v15641_v24 = vadd.f32 %v17022_v30, %v7609_v36  ;;  %v7611_v55 = vpop.f32.mrb[111].mxu1  ;;  %v17037_v36 = vld [vmem:[#allocation67_spill] sm:$0xff] }
 0x9d1   :  { %v7614_v34 = vpop.f32.mrb[112].mxu1 }
 0x9d2   :  { %v15644_v8 = vadd.f32 %v17023_v40, %v7614_v34  ;;  %v7616_v52 = vpop.f32.mrb[113].mxu1  ;;  %v17038_v40 = vld [vmem:[#allocation70_spill] sm:$0xff] }
 0x9d4   :  { %17024 = vst [vmem:[#allocation35_spill] sm:$0xff] %v15644_v8 }
 0x9d5   :  { %v7619_v23 = vpop.f32.mrb[114].mxu1 }
 0x9d6   :  { %v15647_v54 = vadd.f32 %v17025_v14, %v7619_v23  ;;  %v7621_v7 = vpop.f32.mrb[115].mxu1 }
 0x9d7   :  { %v17040_v7 = vld [vmem:[#allocation69_spill] sm:$0xff] }
 0x9d9   :  { %v7624_v21 = vpop.f32.mrb[116].mxu1 }
 0x9da   :  { %v15650_v44 = vadd.f32 %v17026_v10, %v7624_v21  ;;  %v7626_v27 = vpop.f32.mrb[117].mxu1 }
 0x9dc   :  { %17027 = vst [vmem:[#allocation15_spill] sm:$0xff] %v15650_v44 }
 0x9dd   :  { %v7629_v25 = vpop.f32.mrb[118].mxu1 }
 0x9de   :  { %v15653_v13 = vadd.f32 %v17028_v9, %v7629_v25  ;;  %v7631_v26 = vpop.f32.mrb[119].mxu1  ;;  %v17041_v25 = vld [vmem:[#allocation72_spill] sm:$0xff] }
 0x9e1   :  { %v7634_v62 = vpop.f32.mrb[120].mxu1 }
 0x9e2   :  { %v15656_v58 = vadd.f32 %v17029_v1, %v7634_v62  ;;  %v7636_v45 = vpop.f32.mrb[121].mxu1  ;;  %v8269_v62 = vmul.f32 %v15564_v63, %v15564_v63 }
 0x9e3   :  { %v17042_v45 = vld [vmem:[#allocation71_spill] sm:$0xff] }
 0x9e4   :  { %17030 = vst [vmem:[#allocation19_spill] sm:$0xff] %v15656_v58 }
 0x9e5   :  { %v7639_v29 = vpop.f32.mrb[122].mxu1 }
 0x9e6   :  { %v15659_v6 = vadd.f32 %v17031_v46, %v7639_v29  ;;  %v7641_v50 = vpop.f32.mrb[123].mxu1 }
 0x9e7   :  { %v8268_v50 = vmul.f32 %v15560_v4, %v15560_v4 }
 0x9e9   :  { %v7644_v17 = vpop.f32.mrb[124].mxu1 }
 0x9ea   :  { %v15662_v3 = vadd.f32 %v17032_v15, %v7644_v17  ;;  %v7646_v0 = vpop.f32.mrb[125].mxu1  ;;  %v8198_v17 = vadd.f32 %v15564_v63, %v15560_v4  ;;  %v8270_v15 = vmul.f32 %v15568_v41, %v15568_v41 }
 0x9eb   :  { %v8332_v0 = vadd.f32 %v8269_v62, %v8268_v50  ;;  %v8274_v62 = vmul.f32 %v15584_v31, %v15584_v31 }
 0x9ec   :  { %17033 = vst [vmem:[#allocation32_spill] sm:$0xff] %v15662_v3 }
 0x9ed   :  { %v7649_v18 = vpop.f32.mrb[126].mxu1 }
 0x9ee   :  { %v15665_v61 = vadd.f32 %v17034_v19, %v7649_v18  ;;  %v7651_v43 = vpop.f32.mrb[127].mxu1  ;;  %v8199_v18 = vadd.f32 %v8198_v17, %v15568_v41  ;;  %v8271_v19 = vmul.f32 %v15572_v47, %v15572_v47  ;;  %v17045_v17 = vld [vmem:[#allocation76_spill] sm:$0xff] }
 0x9f1   :  { %v7654_v48 = vpop.f32.mrb[128].mxu1 }
 0x9f2   :  { %v15668_v16 = vadd.f32 %v17035_v38, %v7654_v48  ;;  %v7656_v33 = vpop.f32.mrb[129].mxu1  ;;  %v17043_v48 = vld [vmem:[#allocation74_spill] sm:$0xff] }
 0x9f4   :  { %17036 = vst [vmem:[#allocation43_spill] sm:$0xff] %v15668_v16 }
 0x9f5   :  { %v7659_v32 = vpop.f32.mrb[130].mxu1 }
 0x9f6   :  { %v15671_v30 = vadd.f32 %v17037_v36, %v7659_v32  ;;  %v7661_v55 = vpop.f32.mrb[131].mxu1  ;;  %v8333_v32 = vadd.f32 %v8332_v0, %v8270_v15  ;;  %v8200_v36 = vadd.f32 %v8199_v18, %v15572_v47 }
 0x9f7   :  { %v8272_v55 = vmul.f32 %v15576_v53, %v15576_v53 }
 0x9f9   :  { %v7664_v34 = vpop.f32.mrb[132].mxu1 }
 0x9fa   :  { %v15674_v52 = vadd.f32 %v17038_v40, %v7664_v34  ;;  %v7666_v23 = vpop.f32.mrb[133].mxu1  ;;  %v8334_v34 = vadd.f32 %v8333_v32, %v8271_v19  ;;  %v8201_v40 = vadd.f32 %v8200_v36, %v15576_v53  ;;  %v8277_v32 = vmul.f32 %v15595_v42, %v15595_v42 }
 0x9fb   :  { %v8273_v23 = vmul.f32 %v15580_v49, %v15580_v49 }
 0x9fc   :  { %17039 = vst [vmem:[#allocation46_spill] sm:$0xff] %v15674_v52 }
 0x9fd   :  { %v7669_v14 = vpop.f32.mrb[134].mxu1 }
 0x9fe   :  { %v15677_v21 = vadd.f32 %v17040_v7, %v7669_v14  ;;  %v7671_v10 = vpop.f32.mrb[135].mxu1  ;;  %v17044_v7 = vld [vmem:[#allocation73_spill] sm:$0xff] }
 0xa01   :  { %v7674_v27 = vpop.f32.mrb[136].mxu1 }
 0xa02   :  { %v15680_v9 = vadd.f32 %v17041_v25, %v7674_v27  ;;  %v7676_v26 = vpop.f32.mrb[137].mxu1  ;;  %v8335_v25 = vadd.f32 %v8334_v34, %v8272_v55  ;;  %v17047_v55 = vld [vmem:[#allocation75_spill] sm:$0xff] }
 0xa03   :  { %v8202_v26 = vadd.f32 %v8201_v40, %v15580_v49 }
 0xa05   :  { %v7679_v1 = vpop.f32.mrb[138].mxu1 }
 0xa06   :  { %v15685_v29 = vadd.f32 %v17042_v45, %v7679_v1  ;;  %v7681_v46 = vpop.f32.mrb[139].mxu1  ;;  %v8336_v1 = vadd.f32 %v8335_v25, %v8273_v23  ;;  %v8203_v45 = vadd.f32 %v8202_v26, %v15584_v31  ;;  %v8279_v26 = vmul.f32 %v15603_v56, %v15603_v56 }
 0xa07   :  { %v8275_v46 = vmul.f32 %v15588_v28, %v15588_v28 }
 0xa08   :  { %v8337_v18 = vadd.f32 %v8336_v1, %v8274_v62  ;;  %v8204_v19 = vadd.f32 %v8203_v45, %v15588_v28  ;;  %v17048_v1 = vld [vmem:[#allocation78_spill] sm:$0xff] }
 0xa09   :  { %v7684_v43 = vpop.f32.mrb[140].mxu1 }
 0xa0a   :  { %v15697_v38 = vadd.f32 %v17043_v48, %v7684_v43  ;;  %v7686_v33 = vpop.f32.mrb[141].mxu1  ;;  %v8276_v43 = vmul.f32 %v15592_v12, %v15592_v12  ;;  %v8338_v48 = vadd.f32 %v8337_v18, %v8275_v46 }
 0xa0b   :  { %v8205_v33 = vadd.f32 %v8204_v19, %v15592_v12 }
 0xa0c   :  { %v8339_v23 = vadd.f32 %v8338_v48, %v8276_v43  ;;  %v8281_v43 = vmul.f32 %v15610_v22, %v15610_v22 }
 0xa0d   :  { %v7689_v14 = vpop.f32.mrb[142].mxu1 }
 0xa0e   :  { %v15706_v10 = vadd.f32 %v17044_v7, %v7689_v14  ;;  %v7691_v27 = vpop.f32.mrb[143].mxu1  ;;  %v8206_v14 = vadd.f32 %v8205_v33, %v15595_v42  ;;  %v8278_v7 = vmul.f32 %v15599_v11, %v15599_v11  ;;  %v17050_v33 = vld [vmem:[#allocation77_spill] sm:$0xff] }
 0xa0f   :  { %v8340_v27 = vadd.f32 %v8339_v23, %v8277_v32  ;;  %v8282_v23 = vmul.f32 %v15614_v2, %v15614_v2 }
 0xa10   :  { %v8207_v25 = vadd.f32 %v8206_v14, %v15599_v11 }
 0xa11   :  { %v7694_v50 = vpop.f32.mrb[144].mxu1 }
 0xa12   :  { %v15715_v15 = vadd.f32 %v17045_v17, %v7694_v50  ;;  %v7696_v0 = vpop.f32.mrb[145].mxu1  ;;  %v8341_v50 = vadd.f32 %v8340_v27, %v8278_v7  ;;  %v8208_v17 = vadd.f32 %v8207_v25, %v15603_v56  ;;  %v8283_v27 = vmul.f32 %v15617_v37, %v15617_v37 }
 0xa13   :  { %v8280_v0 = vmul.f32 %v15606_v51, %v15606_v51 }
 0xa14   :  { %17046 = vst [vmem:[#allocation49_spill] sm:$0xff] %v15715_v15  ;;  %v8342_v18 = vadd.f32 %v8341_v50, %v8279_v26  ;;  %v8209_v19 = vadd.f32 %v8208_v17, %v15606_v51  ;;  %v17051_v26 = vld [vmem:[#allocation80_spill] sm:$0xff]  ;;  %v8284_v17 = vmul.f32 %v15620_v20, %v15620_v20 }
 0xa15   :  { %v7699_v36 = vpop.f32.mrb[146].mxu1 }
 0xa16   :  { %v15724_v34 = vadd.f32 %v17047_v55, %v7699_v36  ;;  %v7701_v40 = vpop.f32.mrb[147].mxu1  ;;  %v8343_v55 = vadd.f32 %v8342_v18, %v8280_v0 }
 0xa17   :  { %v8210_v40 = vadd.f32 %v8209_v19, %v15610_v22  ;;  %v8285_v19 = vmul.f32 %v15623_v57, %v15623_v57 }
 0xa18   :  { %v8344_v14 = vadd.f32 %v8343_v55, %v8281_v43 }
 0xa19   :  { %v7704_v62 = vpop.f32.mrb[148].mxu1  ;;  %v8211_v7 = vadd.f32 %v8210_v40, %v15614_v2 }
 0xa1a   :  { %v15733_v45 = vadd.f32 %v17048_v1, %v7704_v62  ;;  %v7706_v46 = vpop.f32.mrb[149].mxu1 }
 0xa1b   :  { %v8345_v46 = vadd.f32 %v8344_v14, %v8282_v23  ;;  %v8212_v50 = vadd.f32 %v8211_v7, %v15617_v37  ;;  %v8286_v23 = vmul.f32 %v15626_v35, %v15626_v35 }
 0xa1c   :  { %17049 = vst [vmem:[#allocation52_spill] sm:$0xff] %v15733_v45 }
 0xa1d   :  { %v7709_v48 = vpop.f32.mrb[150].mxu1  ;;  %v8346_v0 = vadd.f32 %v8345_v46, %v8283_v27  ;;  %v8213_v18 = vadd.f32 %v8212_v50, %v15620_v20  ;;  %v8287_v27 = vmul.f32 %v15629_v59, %v15629_v59 }
 0xa1e   :  { %v15742_v32 = vadd.f32 %v17050_v33, %v7709_v48  ;;  %v7711_v36 = vpop.f32.mrb[151].mxu1  ;;  %v17053_v48 = vld [vmem:[#allocation79_spill] sm:$0xff] }
 0xa1f   :  { %v8347_v55 = vadd.f32 %v8346_v0, %v8284_v17  ;;  %v8214_v40 = vadd.f32 %v8213_v18, %v15623_v57  ;;  %v8288_v17 = vmul.f32 %v15632_v5, %v15632_v5 }
 0xa21   :  { %v7714_v25 = vpop.f32.mrb[152].mxu1  ;;  %v8348_v14 = vadd.f32 %v8347_v55, %v8285_v19  ;;  %v8215_v7 = vadd.f32 %v8214_v40, %v15626_v35  ;;  %v8289_v19 = vmul.f32 %v15635_v60, %v15635_v60 }
 0xa22   :  { %v15751_v62 = vadd.f32 %v17051_v26, %v7714_v25  ;;  %v7716_v1 = vpop.f32.mrb[153].mxu1  ;;  %v17054_v26 = vld [vmem:[#allocation82_spill] sm:$0xff] }
 0xa23   :  { %v8349_v50 = vadd.f32 %v8348_v14, %v8286_v23  ;;  %v8290_v23 = vmul.f32 %v15638_v39, %v15638_v39 }
 0xa24   :  { %17052 = vst [vmem:[#allocation36_spill] sm:$0xff] %v15751_v62 }
 0xa25   :  { %v7719_v43 = vpop.f32.mrb[154].mxu1  ;;  %v8350_v0 = vadd.f32 %v8349_v50, %v8287_v27  ;;  %v8291_v27 = vmul.f32 %v15641_v24, %v15641_v24  ;;  %v17057_v50 = vld [vmem:[#allocation84_spill] sm:$0xff] }
 0xa26   :  { %v15760_v33 = vadd.f32 %v17053_v48, %v7719_v43  ;;  %v7721_v36 = vpop.f32.mrb[155].mxu1  ;;  %v8216_v43 = vadd.f32 %v8215_v7, %v15629_v59 }
 0xa27   :  { %v17056_v36 = vld [vmem:[#allocation81_spill] sm:$0xff] }
 0xa28   :  { %v8217_v18 = vadd.f32 %v8216_v43, %v15632_v5 }
 0xa29   :  { %v7724_v25 = vpop.f32.mrb[156].mxu1 }
 0xa2a   :  { %v15769_v1 = vadd.f32 %v17054_v26, %v7724_v25  ;;  %v7726_v46 = vpop.f32.mrb[157].mxu1  ;;  %v8351_v25 = vadd.f32 %v8350_v0, %v8288_v17  ;;  %v8218_v26 = vadd.f32 %v8217_v18, %v15635_v60  ;;  %v8292_v17 = vmul.f32 %v15644_v8, %v15644_v8 }
 0xa2c   :  { %17055 = vst [vmem:[#allocation37_spill] sm:$0xff] %v15769_v1  ;;  %v8352_v14 = vadd.f32 %v8351_v25, %v8289_v19  ;;  %v8219_v7 = vadd.f32 %v8218_v26, %v15638_v39  ;;  %v8293_v19 = vmul.f32 %v15647_v54, %v15647_v54  ;;  %v17059_v25 = vld [vmem:[#allocation83_spill] sm:$0xff] }
 0xa2d   :  { %v7729_v48 = vpop.f32.mrb[158].mxu1 }
 0xa2e   :  { %v15778_v55 = vadd.f32 %v17056_v36, %v7729_v48  ;;  %v7731_v40 = vpop.f32.mrb[159].mxu1  ;;  %v8353_v48 = vadd.f32 %v8352_v14, %v8290_v23  ;;  %v8220_v36 = vadd.f32 %v8219_v7, %v15641_v24  ;;  %v8294_v23 = vmul.f32 %v15650_v44, %v15650_v44 }
 0xa30   :  { %v8354_v0 = vadd.f32 %v8353_v48, %v8291_v27  ;;  %v8221_v18 = vadd.f32 %v8220_v36, %v15644_v8  ;;  %v8295_v27 = vmul.f32 %v15653_v13, %v15653_v13  ;;  %v17060_v48 = vld [vmem:[#allocation86_spill] sm:$0xff] }
 0xa31   :  { %v7734_v46 = vpop.f32.mrb[160].mxu1 }
 0xa32   :  { %v15787_v43 = vadd.f32 %v17057_v50, %v7734_v46  ;;  %v7736_v5 = vpop.f32.mrb[161].mxu1  ;;  %v8355_v46 = vadd.f32 %v8354_v0, %v8292_v17  ;;  %v8296_v17 = vmul.f32 %v15656_v58, %v15656_v58 }
 0xa33   :  { %v8222_v5 = vadd.f32 %v8221_v18, %v15647_v54 }
 0xa34   :  { %17058 = vst [vmem:[#allocation10_spill] sm:$0xff] %v15787_v43  ;;  %v8356_v14 = vadd.f32 %v8355_v46, %v8293_v19  ;;  %v8297_v19 = vmul.f32 %v15659_v6, %v15659_v6  ;;  %v17062_v46 = vld [vmem:[#allocation85_spill] sm:$0xff] }
 0xa35   :  { %v7739_v40 = vpop.f32.mrb[162].mxu1  ;;  %v8223_v7 = vadd.f32 %v8222_v5, %v15650_v44 }
 0xa36   :  { %v15796_v26 = vadd.f32 %v17059_v25, %v7739_v40  ;;  %v7741_v39 = vpop.f32.mrb[163].mxu1  ;;  %v8357_v40 = vadd.f32 %v8356_v14, %v8294_v23  ;;  %v8298_v23 = vmul.f32 %v15662_v3, %v15662_v3 }
 0xa37   :  { %v8224_v39 = vadd.f32 %v8223_v7, %v15653_v13 }
 0xa38   :  { %v8358_v0 = vadd.f32 %v8357_v40, %v8295_v27  ;;  %v8299_v27 = vmul.f32 %v15665_v61, %v15665_v61  ;;  %v17064_v40 = vld [vmem:[#allocation88_spill] sm:$0xff] }
 0xa39   :  { %v7744_v50 = vpop.f32.mrb[164].mxu1  ;;  %v8225_v18 = vadd.f32 %v8224_v39, %v15656_v58 }
 0xa3a   :  { %v15805_v36 = vadd.f32 %v17060_v48, %v7744_v50  ;;  %v7746_v8 = vpop.f32.mrb[165].mxu1  ;;  %v8359_v50 = vadd.f32 %v8358_v0, %v8296_v17  ;;  %v8300_v17 = vmul.f32 %v15668_v16, %v15668_v16 }
 0xa3b   :  { %v8226_v8 = vadd.f32 %v8225_v18, %v15659_v6 }
 0xa3c   :  { %17061 = vst [vmem:[#allocation12_spill] sm:$0xff] %v15805_v36  ;;  %v8360_v14 = vadd.f32 %v8359_v50, %v8297_v19  ;;  %v8301_v19 = vmul.f32 %v15671_v30, %v15671_v30  ;;  %v17066_v50 = vld [vmem:[#allocation87_spill] sm:$0xff] }
 0xa3d   :  { %v7749_v25 = vpop.f32.mrb[166].mxu1  ;;  %v8227_v7 = vadd.f32 %v8226_v8, %v15662_v3 }
 0xa3e   :  { %v15814_v5 = vadd.f32 %v17062_v46, %v7749_v25  ;;  %v7751_v44 = vpop.f32.mrb[167].mxu1  ;;  %v8361_v25 = vadd.f32 %v8360_v14, %v8298_v23  ;;  %v8302_v23 = vmul.f32 %v15674_v52, %v15674_v52 }
 0xa3f   :  { %v8228_v44 = vadd.f32 %v8227_v7, %v15665_v61 }
 0xa40   :  { %17063 = vst [vmem:[#allocation11_spill] sm:$0xff] %v15814_v5  ;;  %v8362_v0 = vadd.f32 %v8361_v25, %v8299_v27  ;;  %v8303_v27 = vmul.f32 %v15677_v21, %v15677_v21  ;;  %v17067_v25 = vld [vmem:[#allocation90_spill] sm:$0xff] }
 0xa41   :  { %v7754_v48 = vpop.f32.mrb[168].mxu1  ;;  %v8229_v18 = vadd.f32 %v8228_v44, %v15668_v16 }
 0xa42   :  { %v15823_v39 = vadd.f32 %v17064_v40, %v7754_v48  ;;  %v7756_v58 = vpop.f32.mrb[169].mxu1  ;;  %v8363_v48 = vadd.f32 %v8362_v0, %v8300_v17  ;;  %v8304_v17 = vmul.f32 %v15680_v9, %v15680_v9 }
 0xa43   :  { %v8230_v58 = vadd.f32 %v8229_v18, %v15671_v30 }
 0xa44   :  { %17065 = vst [vmem:[#allocation14_spill] sm:$0xff] %v15823_v39  ;;  %v8364_v14 = vadd.f32 %v8363_v48, %v8301_v19  ;;  %v8305_v19 = vmul.f32 %v15685_v29, %v15685_v29  ;;  %v17069_v48 = vld [vmem:[#allocation89_spill] sm:$0xff] }
 0xa45   :  { %v7759_v46 = vpop.f32.mrb[170].mxu1  ;;  %v8231_v7 = vadd.f32 %v8230_v58, %v15674_v52 }
 0xa46   :  { %v15832_v8 = vadd.f32 %v17066_v50, %v7759_v46  ;;  %v7761_v3 = vpop.f32.mrb[171].mxu1  ;;  %v8365_v46 = vadd.f32 %v8364_v14, %v8302_v23  ;;  %v8306_v23 = vmul.f32 %v15697_v38, %v15697_v38 }
 0xa47   :  { %v8232_v3 = vadd.f32 %v8231_v7, %v15677_v21 }
 0xa48   :  { %v8366_v0 = vadd.f32 %v8365_v46, %v8303_v27  ;;  %v8307_v27 = vmul.f32 %v15706_v10, %v15706_v10 }
 0xa49   :  { %v7764_v40 = vpop.f32.mrb[172].mxu1  ;;  %v8233_v18 = vadd.f32 %v8232_v3, %v15680_v9 }
 0xa4a   :  { %v15841_v44 = vadd.f32 %v17067_v25, %v7764_v40  ;;  %v7766_v16 = vpop.f32.mrb[173].mxu1  ;;  %v8367_v40 = vadd.f32 %v8366_v0, %v8304_v17 }
 0xa4b   :  { %v8234_v16 = vadd.f32 %v8233_v18, %v15685_v29  ;;  %v8309_v18 = vmul.f32 %v15724_v34, %v15724_v34 }
 0xa4c   :  { %17068 = vst [vmem:[#allocation25_spill] sm:$0xff] %v15841_v44  ;;  %v8368_v14 = vadd.f32 %v8367_v40, %v8305_v19 }
 0xa4d   :  { %v7769_v50 = vpop.f32.mrb[174].mxu1  ;;  %v8235_v7 = vadd.f32 %v8234_v16, %v15697_v38 }
 0xa4e   :  { %v15850_v58 = vadd.f32 %v17069_v48, %v7769_v50  ;;  %v7771_v52 = vpop.f32.mrb[175].mxu1  ;;  %v8369_v3 = vadd.f32 %v8368_v14, %v8306_v23 }
 0xa4f   :  { %v8236_v50 = vadd.f32 %v8235_v7, %v15706_v10  ;;  %v8308_v52 = vmul.f32 %v15715_v15, %v15715_v15  ;;  %v8311_v7 = vmul.f32 %v15742_v32, %v15742_v32 }
 0xa50   :  { %17070 = vst [vmem:[#allocation38_spill] sm:$0xff] %v15850_v58  ;;  %v8370_v17 = vadd.f32 %v8369_v3, %v8307_v27 }
 0xa51   :  { %v15858_v25 = vpop.f32.mrb[176].mxu1  ;;  %v8237_v0 = vadd.f32 %v8236_v50, %v15715_v15 }
 0xa52   :  { %v7776_v46 = vpop.f32.mrb[177].mxu1  ;;  %v8371_v40 = vadd.f32 %v8370_v17, %v8308_v52 }
 0xa53   :  { %v8238_v16 = vadd.f32 %v8237_v0, %v15724_v34  ;;  %v8310_v46 = vmul.f32 %v15733_v45, %v15733_v45  ;;  %v8313_v0 = vmul.f32 %v15760_v33, %v15760_v33 }
 0xa54   :  { %v8372_v23 = vadd.f32 %v8371_v40, %v8309_v18 }
 0xa55   :  { %v7779_v19 = vpop.f32.mrb[178].mxu1  ;;  %v8239_v14 = vadd.f32 %v8238_v16, %v15733_v45 }
 0xa56   :  { %v7781_v48 = vpop.f32.mrb[179].mxu1  ;;  %v8373_v50 = vadd.f32 %v8372_v23, %v8310_v46 }
 0xa57   :  { %v8240_v15 = vadd.f32 %v8239_v14, %v15742_v32  ;;  %v8312_v48 = vmul.f32 %v15751_v62, %v15751_v62  ;;  %v8315_v14 = vmul.f32 %v15778_v55, %v15778_v55 }
 0xa58   :  { %v8374_v52 = vadd.f32 %v8373_v50, %v8311_v7 }
 0xa59   :  { %v7784_v27 = vpop.f32.mrb[180].mxu1  ;;  %v8241_v17 = vadd.f32 %v8240_v15, %v15751_v62 }
 0xa5a   :  { %v7786_v3 = vpop.f32.mrb[181].mxu1  ;;  %v8375_v16 = vadd.f32 %v8374_v52, %v8312_v48 }
 0xa5b   :  { %v8242_v45 = vadd.f32 %v8241_v17, %v15760_v33  ;;  %v8314_v3 = vmul.f32 %v15769_v1, %v15769_v1  ;;  %v8317_v17 = vmul.f32 %v15796_v26, %v15796_v26 }
 0xa5c   :  { %v8376_v46 = vadd.f32 %v8375_v16, %v8313_v0 }
 0xa5d   :  { %v7789_v18 = vpop.f32.mrb[182].mxu1  ;;  %v8243_v23 = vadd.f32 %v8242_v45, %v15769_v1 }
 0xa5e   :  { %v7791_v40 = vpop.f32.mrb[183].mxu1  ;;  %v8377_v15 = vadd.f32 %v8376_v46, %v8314_v3 }
 0xa5f   :  { %v8244_v62 = vadd.f32 %v8243_v23, %v15778_v55  ;;  %v8316_v40 = vmul.f32 %v15787_v43, %v15787_v43  ;;  %v8319_v23 = vmul.f32 %v15814_v5, %v15814_v5 }
 0xa60   :  { %v8378_v48 = vadd.f32 %v8377_v15, %v8315_v14 }
 0xa61   :  { %v7794_v7 = vpop.f32.mrb[184].mxu1  ;;  %v8245_v52 = vadd.f32 %v8244_v62, %v15787_v43 }
 0xa62   :  { %v7796_v50 = vpop.f32.mrb[185].mxu1  ;;  %v8379_v45 = vadd.f32 %v8378_v48, %v8316_v40 }
 0xa63   :  { %v8246_v1 = vadd.f32 %v8245_v52, %v15796_v26  ;;  %v8318_v50 = vmul.f32 %v15805_v36, %v15805_v36  ;;  %v8321_v52 = vmul.f32 %v15832_v8, %v15832_v8 }
 0xa64   :  { %v8380_v3 = vadd.f32 %v8379_v45, %v8317_v17 }
 0xa65   :  { %v7799_v0 = vpop.f32.mrb[186].mxu1  ;;  %v8247_v46 = vadd.f32 %v8246_v1, %v15805_v36 }
 0xa66   :  { %v7801_v16 = vpop.f32.mrb[187].mxu1  ;;  %v8381_v62 = vadd.f32 %v8380_v3, %v8318_v50 }
 0xa67   :  { %v8248_v43 = vadd.f32 %v8247_v46, %v15814_v5  ;;  %v8320_v16 = vmul.f32 %v15823_v39, %v15823_v39  ;;  %v8323_v46 = vmul.f32 %v15850_v58, %v15850_v58 }
 0xa68   :  { %v8382_v40 = vadd.f32 %v8381_v62, %v8319_v23 }
 0xa69   :  { %v7804_v14 = vpop.f32.mrb[188].mxu1  ;;  %v8249_v48 = vadd.f32 %v8248_v43, %v15823_v39 }
 0xa6a   :  { %v7806_v15 = vpop.f32.mrb[189].mxu1  ;;  %v8383_v1 = vadd.f32 %v8382_v40, %v8320_v16 }
 0xa6b   :  { %v8250_v36 = vadd.f32 %v8249_v48, %v15832_v8  ;;  %v8322_v15 = vmul.f32 %v15841_v44, %v15841_v44 }
 0xa6c   :  { %v8384_v50 = vadd.f32 %v8383_v1, %v8321_v52 }
 0xa6d   :  { %v7809_v17 = vpop.f32.mrb[190].mxu1  ;;  %v8251_v3 = vadd.f32 %v8250_v36, %v15841_v44 }
 0xa6e   :  { %v7811_v45 = vpop.f32.mrb[191].mxu1  ;;  %v8385_v39 = vadd.f32 %v8384_v50, %v8322_v15 }
 0xa6f   :  { %v8252_v5 = vadd.f32 %v8251_v3, %v15850_v58 }
 0xa70   :  { %v8386_v40 = vadd.f32 %v8385_v39, %v8323_v46 }
 0xa71   :  { %v9487_v23 = vpop.f32.mrb[192].mxu1 }
 0xa72   :  { %v15908_v62 = vadd.f32 %v9487_v23, %v7779_v19  ;;  %v8159_v43 = vpop.f32.mrb[193].mxu1 }
 0xa73   :  { %v15912_v16 = vadd.f32 %v8159_v43, %v15858_v25 }
 0xa74   :  { %17071 = vst [vmem:[#allocation28_spill] sm:$0xff] %v15908_v62  ;;  %v8325_v19 = vmul.f32 %v15908_v62, %v15908_v62 }
 0xa75   :  { %17072 = vst [vmem:[#allocation39_spill] sm:$0xff] %v15912_v16  ;;  %v8253_v48 = vadd.f32 %v8252_v5, %v15912_v16  ;;  %v8324_v52 = vmul.f32 %v15912_v16, %v15912_v16  ;;  %v9490_v36 = vpop.f32.mrb[194].mxu1 }
 0xa76   :  { %v15917_v45 = vadd.f32 %v9490_v36, %v7789_v18  ;;  %v8169_v1 = vpop.f32.mrb[195].mxu1 }
 0xa77   :  { %v8387_v23 = vadd.f32 %v8386_v40, %v8324_v52  ;;  %v15921_v15 = vadd.f32 %v8169_v1, %v7784_v27  ;;  %v8254_v50 = vadd.f32 %v8253_v48, %v15908_v62 }
 0xa78   :  { %17073 = vst [vmem:[#allocation40_spill] sm:$0xff] %v15917_v45  ;;  %v8327_v43 = vmul.f32 %v15917_v45, %v15917_v45 }
 0xa79   :  { %17074 = vst [vmem:[#allocation18_spill] sm:$0xff] %v15921_v15  ;;  %v8255_v25 = vadd.f32 %v8254_v50, %v15921_v15  ;;  %v8326_v5 = vmul.f32 %v15921_v15, %v15921_v15  ;;  %v8388_v39 = vadd.f32 %v8387_v23, %v8325_v19  ;;  %v9493_v3 = vpop.f32.mrb[196].mxu1 }
 0xa7a   :  { %v15927_v46 = vadd.f32 %v9493_v3, %v7799_v0  ;;  %v8179_v18 = vpop.f32.mrb[197].mxu1 }
 0xa7b   :  { %v8389_v36 = vadd.f32 %v8388_v39, %v8326_v5  ;;  %v15931_v16 = vadd.f32 %v8179_v18, %v7794_v7  ;;  %v8256_v27 = vadd.f32 %v8255_v25, %v15917_v45 }
 0xa7c   :  { %17075 = vst [vmem:[#allocation16_spill] sm:$0xff] %v15927_v46  ;;  %v8329_v23 = vmul.f32 %v15927_v46, %v15927_v46 }
 0xa7d   :  { %17076 = vst [vmem:[#allocation13_spill] sm:$0xff] %v15931_v16  ;;  %v8257_v40 = vadd.f32 %v8256_v27, %v15931_v16  ;;  %v8328_v48 = vmul.f32 %v15931_v16, %v15931_v16  ;;  %v8390_v52 = vadd.f32 %v8389_v36, %v8327_v43  ;;  %v9496_v1 = vpop.f32.mrb[198].mxu1 }
 0xa7e   :  { %v15937_v19 = vadd.f32 %v9496_v1, %v7809_v17  ;;  %v8189_v0 = vpop.f32.mrb[199].mxu1 }
 0xa7f   :  { %v8391_v50 = vadd.f32 %v8390_v52, %v8328_v48  ;;  %v8190_v3 = vadd.f32 %v8189_v0, %v7804_v14  ;;  %v8258_v7 = vadd.f32 %v8257_v40, %v15927_v46 }
 0xa80   :  { %v8331_v18 = vmul.f32 %v15937_v19, %v15937_v19 }
 0xa81   :  { %v8259_v5 = vadd.f32 %v8258_v7, %v8190_v3  ;;  %v8330_v39 = vmul.f32 %v8190_v3, %v8190_v3  ;;  %v8392_v25 = vadd.f32 %v8391_v50, %v8329_v23 }
 0xa83   :  { %v8260_v27 = vadd.f32 %v8259_v5, %v15937_v19  ;;  %v8393_v43 = vadd.f32 %v8392_v25, %v8330_v39  ;;  %v8405_v39 = vld [vmem:[%s16546_s5] sm:$0x1]  ;;  %s10794_s5 = smov [#allocation7]  }
 0xa85   :  { %v8261_v36 = vrot.slane %v8260_v27, 4  ;;  %v8394_v17 = vadd.f32 %v8393_v43, %v8331_v18 }
 0xa87   :  { %v8262_v1 = vadd.f32 %v8261_v36, %v8260_v27  ;;  %v8395_v16 = vrot.slane %v8394_v17, 4 }
 0xa89   :  { %v8263_v45 = vrot.slane %v8262_v1, 2  ;;  %v8396_v15 = vadd.f32 %v8395_v16, %v8394_v17 }
 0xa8b   :  { %v8264_v62 = vadd.f32 %v8263_v45, %v8262_v1  ;;  %v8397_v48 = vrot.slane %v8396_v15, 2  ;;  %v8409_v45 = vld [vmem:[%s16547_s6] sm:$0x1]  ;;  %s8685_s6 = sshll.u32 %s10794_s5, 4  ;;  %s8686_s6 = int_to_ptr.vmem [resolvable:$true] %s8685_s6 }
 0xa8c   :  { %s10763_s21 = scalar_lea.vmem %s8686_s6, 8192  ;;  %p10768_p9 = scmp.lt.s32.totalorder %s8686_s6, %s8686_s6 }
 0xa8d   :  { %v8265_v14 = vrot.slane %v8264_v62, 1  ;;  %v8398_v52 = vadd.f32 %v8397_v48, %v8396_v15  ;;  %v17077_v15 = vld [vmem:[#allocation26_spill] sm:$0xff]  ;;  %p10764_p8 = scmp.ne.s32.totalorder %s8686_s6, %s10763_s21  ;;  %p10769_p10 = scmp.lt.s32.totalorder %s10763_s21, %s10763_s21 }
 0xa8f   :  { %v8266_v40 = vadd.f32 %v8265_v14, %v8264_v62  ;;  %v8399_v0 = vrot.slane %v8398_v52, 1  ;;  %v17078_v14 = vld [vmem:[#allocation33_spill] sm:$0xff]  ;;  %p10770_p11 = por %p10769_p10, %p10768_p9 }
 0xa91   :  { %v8267_v7 = vmul.f32 0.001953125, %v8266_v40  ;;  %v8400_v23 = vadd.f32 %v8399_v0, %v8398_v52  ;;  %v17079_v52 = vld [vmem:[#allocation34_spill] sm:$0xff]  ;;  %v17080_v40 = vld [vmem:[#allocation35_spill] sm:$0xff]  ;;  %p10771_p12 = pnand %p10770_p11, %p10764_p8 }
 0xa93   :  { %v8401_v50 = vmul.f32 0.001953125, %v8400_v23  ;;  %v8402_v46 = vmul.f32 %v8267_v7, %v8267_v7 }
 0xa95   :  { %v8403_v58 = vsub.f32 %v8401_v50, %v8402_v46  ;;  %v17082_v50 = vld [vmem:[#allocation19_spill] sm:$0xff] }
 0xa97   :  { %v8404_v44 = vmax.f32 %v8403_v58, 0.0 }
 0xa99   :  { %v8406_v5 = vadd.f32 1e-05, %v8404_v44 }
 0xa9b   :  { %10737 = vrsqrt.f32 %v8406_v5 }
 0xaa5   :  { %v10738_v25 = vpop.eup %10737 }
 0xaa6   :  { %v8408_v16 = vmul.f32 %v10738_v25, %v8405_v39  ;;  %v17083_v39 = vld [vmem:[#allocation32_spill] sm:$0xff] }
 0xaa8   :  { %v8410_v62 = vmul.f32 %v8408_v16, %v8267_v7  ;;  %v15952_v18 = vrot.slane %v8408_v16, %v17077_v15  ;;  %v17081_v7 = vld [vmem:[#allocation15_spill] sm:$0xff] }
 0xaa9   :  { %v17084_v16 = vld [vmem:[#allocation43_spill] sm:$0xff] }
 0xaaa   :  { %v8411_v27 = vsub.f32 %v8409_v45, %v8410_v62  ;;  %v8480_v46 = vmul.f32 %v15952_v18, %v8190_v3  ;;  %v15957_v44 = vmul.f32 %v15952_v18, %v15560_v4  ;;  %v15961_v58 = vmul.f32 %v15952_v18, %v15564_v63  ;;  %v17085_v62 = vld [vmem:[#allocation46_spill] sm:$0xff] }
 0xaab   :  { %v15965_v43 = vmul.f32 %v15952_v18, %v15568_v41  ;;  %v15969_v36 = vmul.f32 %v15952_v18, %v15572_v47  ;;  %v15973_v17 = vmul.f32 %v15952_v18, %v15576_v53  ;;  %v15977_v4 = vmul.f32 %v15952_v18, %v15580_v49 }
 0xaac   :  { %v15980_v3 = vrot.slane %v8411_v27, %v17077_v15  ;;  %v15984_v63 = vmul.f32 %v15952_v18, %v15584_v31  ;;  %v15988_v41 = vmul.f32 %v15952_v18, %v15588_v28  ;;  %v15992_v47 = vmul.f32 %v15952_v18, %v15592_v12 }
 0xaad   :  { %v15996_v53 = vmul.f32 %v15952_v18, %v15595_v42  ;;  %v16000_v49 = vmul.f32 %v15952_v18, %v15599_v11  ;;  %v16004_v31 = vmul.f32 %v15952_v18, %v15603_v56  ;;  %v16008_v28 = vmul.f32 %v15952_v18, %v15606_v51 }
 0xaae   :  { %v8550_v1 = vadd.f32 %v15980_v3, %v8480_v46  ;;  %v16013_v12 = vmul.f32 %v15952_v18, %v15610_v22  ;;  %v16017_v42 = vmul.f32 %v15952_v18, %v15614_v2  ;;  %v16021_v11 = vmul.f32 %v15952_v18, %v15617_v37 }
 0xaaf   :  { %v16025_v56 = vmul.f32 %v15952_v18, %v15620_v20  ;;  %v16029_v51 = vmul.f32 %v15952_v18, %v15623_v57  ;;  %v16033_v22 = vmul.f32 %v15952_v18, %v15626_v35  ;;  %v16037_v2 = vmul.f32 %v15952_v18, %v15629_v59 }
 0xab0   :  { %v8614_v48 = vmax.f32 %v8550_v1, 0.0  ;;  %v16041_v37 = vmul.f32 %v15952_v18, %v17078_v14  ;;  %v16045_v20 = vmul.f32 %v15952_v18, %v15635_v60  ;;  %v16049_v57 = vmul.f32 %v15952_v18, %v17079_v52  ;;  %v17086_v1 = vld [vmem:[#allocation49_spill] sm:$0xff]  ;;  %v17088_v14 = vld [vmem:[#allocation36_spill] sm:$0xff] }
 0xab1   :  { %v16053_v35 = vmul.f32 %v15952_v18, %v15641_v24  ;;  %v16057_v59 = vmul.f32 %v15952_v18, %v17080_v40  ;;  %v16061_v0 = vmul.f32 %v15952_v18, %v15647_v54  ;;  %v16065_v60 = vmul.f32 %v15952_v18, %v17081_v7  ;;  %v17089_v40 = vld [vmem:[#allocation37_spill] sm:$0xff] }
 0xab2   :  { %8678 = vst [vmem:[#allocation7 + $0x1f0] sm:$0xff] %v8614_v48  ;;  %v16069_v23 = vmul.f32 %v15952_v18, %v15653_v13  ;;  %v16073_v24 = vmul.f32 %v15952_v18, %v17082_v50  ;;  %v16077_v5 = vmul.f32 %v15952_v18, %v15659_v6  ;;  %v16081_v54 = vmul.f32 %v15952_v18, %v17083_v39  ;;  %v17087_v48 = vld [vmem:[#allocation52_spill] sm:$0xff]  ;;  %v17090_v50 = vld [vmem:[#allocation10_spill] sm:$0xff] }
 0xab3   :  { %v16085_v25 = vmul.f32 %v15952_v18, %v15665_v61  ;;  %v16089_v13 = vmul.f32 %v15952_v18, %v17084_v16  ;;  %v16093_v45 = vmul.f32 %v15952_v18, %v15671_v30  ;;  %v16097_v6 = vmul.f32 %v15952_v18, %v17085_v62  ;;  %v17091_v16 = vld [vmem:[#allocation12_spill] sm:$0xff]  ;;  %v17093_v62 = vld [vmem:[#allocation11_spill] sm:$0xff] }
 0xab4   :  { %v16101_v15 = vmul.f32 %v15952_v18, %v15677_v21  ;;  %v16105_v61 = vmul.f32 %v15952_v18, %v15680_v9  ;;  %v16109_v27 = vmul.f32 %v15952_v18, %v15685_v29  ;;  %v16113_v30 = vmul.f32 %v15952_v18, %v15697_v38 }
 0xab5   :  { %v16117_v46 = vmul.f32 %v15952_v18, %v15706_v10  ;;  %v16121_v21 = vmul.f32 %v15952_v18, %v17086_v1  ;;  %v16125_v9 = vmul.f32 %v15952_v18, %v15724_v34  ;;  %v16129_v29 = vmul.f32 %v15952_v18, %v17087_v48  ;;  %v17095_v48 = vld [vmem:[#allocation14_spill] sm:$0xff] }
 0xab6   :  { %v16133_v38 = vmul.f32 %v15952_v18, %v15742_v32  ;;  %v16137_v10 = vmul.f32 %v15952_v18, %v17088_v14  ;;  %v16141_v52 = vmul.f32 %v15952_v18, %v15760_v33  ;;  %v16145_v34 = vmul.f32 %v15952_v18, %v17089_v40  ;;  %v17098_v40 = vld [vmem:[#allocation25_spill] sm:$0xff] }
 0xab7   :  { %v16149_v7 = vmul.f32 %v15952_v18, %v15778_v55  ;;  %v16153_v32 = vmul.f32 %v15952_v18, %v17090_v50  ;;  %v16157_v39 = vmul.f32 %v15952_v18, %v15796_v26  ;;  %v16161_v33 = vmul.f32 %v15952_v18, %v17091_v16  ;;  %v17100_v50 = vld [vmem:[#allocation38_spill] sm:$0xff] }
 0xab8   :  { %v16165_v1 = vmul.f32 %v15952_v18, %v17093_v62  ;;  %v16169_v55 = vmul.f32 %v15952_v18, %v17095_v48  ;;  %v16173_v14 = vmul.f32 %v15952_v18, %v15832_v8  ;;  %v16177_v26 = vmul.f32 %v15952_v18, %v17098_v40 }
 0xab9   :  { %17092 = vst [vmem:[#allocation20_spill] sm:$0xff] %v16161_v33  ;;  %v16181_v16 = vmul.f32 %v15952_v18, %v17100_v50  ;;  %v17102_v33 = vld [vmem:[#allocation39_spill] sm:$0xff] }
 0xaba   :  { %17094 = vst [vmem:[#allocation17_spill] sm:$0xff] %v16165_v1  ;;  %17096 = vst [vmem:[#allocation31_spill] sm:$0xff] %v16169_v55  ;;  %v16185_v62 = vmul.f32 %v15952_v18, %v17102_v33  ;;  %v17103_v1 = vld [vmem:[#allocation28_spill] sm:$0xff]  ;;  %v17104_v55 = vld [vmem:[#allocation18_spill] sm:$0xff] }
 0xabb   :  { %17097 = vst [vmem:[#allocation22_spill] sm:$0xff] %v16173_v14  ;;  %17099 = vst [vmem:[#allocation42_spill] sm:$0xff] %v16177_v26  ;;  %v16189_v48 = vmul.f32 %v15952_v18, %v17103_v1  ;;  %v16193_v8 = vmul.f32 %v15952_v18, %v17104_v55  ;;  %v17105_v14 = vld [vmem:[#allocation40_spill] sm:$0xff]  ;;  %v17106_v26 = vld [vmem:[#allocation13_spill] sm:$0xff]  ;;  %v16209_v1 = vmul.f32 %v15952_v18, %v15937_v19 }
 0xabc   :  { %17101 = vst [vmem:[#allocation41_spill] sm:$0xff] %v16181_v16  ;;  %v16197_v40 = vmul.f32 %v15952_v18, %v17105_v14  ;;  %v16201_v50 = vmul.f32 %v15952_v18, %v17106_v26  ;;  %v17107_v16 = vld [vmem:[#allocation16_spill] sm:$0xff]  ;;  %v16213_v55 = vadd.f32 %v15980_v3, %v15957_v44  ;;  %v16217_v14 = vadd.f32 %v15980_v3, %v15961_v58 }
 0xabd   :  { %v16205_v33 = vmul.f32 %v15952_v18, %v17107_v16  ;;  %v16221_v26 = vadd.f32 %v15980_v3, %v15965_v43  ;;  %v16225_v16 = vadd.f32 %v15980_v3, %v15969_v36  ;;  %v16229_v19 = vadd.f32 %v15980_v3, %v15973_v17 }
 0xabe   :  { %v16233_v18 = vadd.f32 %v15980_v3, %v15977_v4  ;;  %v16237_v44 = vadd.f32 %v15980_v3, %v15984_v63  ;;  %v16241_v58 = vadd.f32 %v15980_v3, %v15988_v41  ;;  %v16245_v43 = vadd.f32 %v15980_v3, %v15992_v47 }
 0xabf   :  { %v16249_v36 = vadd.f32 %v15980_v3, %v15996_v53  ;;  %v16253_v17 = vadd.f32 %v15980_v3, %v16000_v49  ;;  %v16257_v4 = vadd.f32 %v15980_v3, %v16004_v31  ;;  %v16261_v63 = vadd.f32 %v15980_v3, %v16008_v28 }
 0xac0   :  { %v16265_v41 = vadd.f32 %v15980_v3, %v16013_v12  ;;  %v16269_v47 = vadd.f32 %v15980_v3, %v16017_v42  ;;  %v16273_v53 = vadd.f32 %v15980_v3, %v16021_v11  ;;  %v16277_v49 = vadd.f32 %v15980_v3, %v16025_v56 }
 0xac1   :  { %v16281_v31 = vadd.f32 %v15980_v3, %v16029_v51  ;;  %v16285_v28 = vadd.f32 %v15980_v3, %v16033_v22  ;;  %v16289_v12 = vadd.f32 %v15980_v3, %v16037_v2  ;;  %v16293_v42 = vadd.f32 %v15980_v3, %v16041_v37 }
 0xac2   :  { %v16297_v11 = vadd.f32 %v15980_v3, %v16045_v20  ;;  %v16301_v56 = vadd.f32 %v15980_v3, %v16049_v57  ;;  %v16305_v51 = vadd.f32 %v15980_v3, %v16053_v35  ;;  %v16309_v22 = vadd.f32 %v15980_v3, %v16057_v59 }
 0xac3   :  { %v16313_v2 = vadd.f32 %v15980_v3, %v16061_v0  ;;  %v16317_v37 = vadd.f32 %v15980_v3, %v16065_v60  ;;  %v16321_v20 = vadd.f32 %v15980_v3, %v16069_v23  ;;  %v16325_v57 = vadd.f32 %v15980_v3, %v16073_v24 }
 0xac4   :  { %v16329_v35 = vadd.f32 %v15980_v3, %v16077_v5  ;;  %v16333_v59 = vadd.f32 %v15980_v3, %v16081_v54  ;;  %v16337_v0 = vadd.f32 %v15980_v3, %v16085_v25  ;;  %v16341_v60 = vadd.f32 %v15980_v3, %v16089_v13 }
 0xac5   :  { %v16345_v23 = vadd.f32 %v15980_v3, %v16093_v45  ;;  %v16349_v24 = vadd.f32 %v15980_v3, %v16097_v6  ;;  %v16353_v5 = vadd.f32 %v15980_v3, %v16101_v15  ;;  %v16357_v54 = vadd.f32 %v15980_v3, %v16105_v61 }
 0xac6   :  { %v16361_v25 = vadd.f32 %v15980_v3, %v16109_v27  ;;  %v16365_v13 = vadd.f32 %v15980_v3, %v16113_v30  ;;  %v16369_v45 = vadd.f32 %v15980_v3, %v16117_v46  ;;  %v16373_v6 = vadd.f32 %v15980_v3, %v16121_v21 }
 0xac7   :  { %v16377_v15 = vadd.f32 %v15980_v3, %v16125_v9  ;;  %v16381_v61 = vadd.f32 %v15980_v3, %v16129_v29  ;;  %v16385_v27 = vadd.f32 %v15980_v3, %v16133_v38  ;;  %v16389_v30 = vadd.f32 %v15980_v3, %v16137_v10  ;;  %v17113_v10 = vld [vmem:[#allocation20_spill] sm:$0xff] }
 0xac8   :  { %v16393_v46 = vadd.f32 %v15980_v3, %v16141_v52  ;;  %v16397_v21 = vadd.f32 %v15980_v3, %v16145_v34  ;;  %v16401_v9 = vadd.f32 %v15980_v3, %v16149_v7  ;;  %v16405_v29 = vadd.f32 %v15980_v3, %v16153_v32 }
 0xac9   :  { %v16409_v38 = vadd.f32 %v15980_v3, %v16157_v39  ;;  %v16413_v52 = vadd.f32 %v15980_v3, %v17113_v10 }
 0xaca   :  { %17108 = vst [vmem:[#allocation45_spill] sm:$0xff] %v16393_v46  ;;  %17109 = vst [vmem:[#allocation44_spill] sm:$0xff] %v16397_v21  ;;  %v17114_v46 = vld [vmem:[#allocation17_spill] sm:$0xff]  ;;  %v17115_v21 = vld [vmem:[#allocation31_spill] sm:$0xff] }
 0xacb   :  { %17110 = vst [vmem:[#allocation48_spill] sm:$0xff] %v16401_v9  ;;  %17111 = vst [vmem:[#allocation47_spill] sm:$0xff] %v16405_v29  ;;  %v16417_v34 = vadd.f32 %v15980_v3, %v17114_v46  ;;  %v16421_v7 = vadd.f32 %v15980_v3, %v17115_v21  ;;  %v17116_v9 = vld [vmem:[#allocation22_spill] sm:$0xff]  ;;  %v16437_v46 = vadd.f32 %v15980_v3, %v16185_v62 }
 0xacc   :  { %17112 = vst [vmem:[#allocation51_spill] sm:$0xff] %v16409_v38  ;;  %v16425_v32 = vadd.f32 %v15980_v3, %v17116_v9  ;;  %v17117_v29 = vld [vmem:[#allocation42_spill] sm:$0xff]  ;;  %v17118_v38 = vld [vmem:[#allocation41_spill] sm:$0xff]  ;;  %v16441_v21 = vadd.f32 %v15980_v3, %v16189_v48  ;;  %v16445_v9 = vadd.f32 %v15980_v3, %v16193_v8  ;;  %v16457_v62 = vadd.f32 %v15980_v3, %v16205_v33 }
 0xacd   :  { %v16429_v39 = vadd.f32 %v15980_v3, %v17117_v29  ;;  %v16433_v10 = vadd.f32 %v15980_v3, %v17118_v38  ;;  %v16449_v29 = vadd.f32 %v15980_v3, %v16197_v40  ;;  %v16453_v38 = vadd.f32 %v15980_v3, %v16201_v50 }
 0xace   :  { %17119 = vst [vmem:[#allocation29_spill] sm:$0xff] %v16441_v21  ;;  %17120 = vst [vmem:[#allocation50_spill] sm:$0xff] %v16445_v9  ;;  %v16461_v48 = vadd.f32 %v15980_v3, %v16209_v1  ;;  %v8552_v21 = vmax.f32 %v16213_v55, 0.0  ;;  %v8553_v8 = vmax.f32 %v16217_v14, 0.0  ;;  %v8554_v9 = vmax.f32 %v16221_v26, 0.0 }
 0xacf   :  { %17121 = vst [vmem:[#allocation30_spill] sm:$0xff] %v16449_v29  ;;  %17122 = vst [vmem:[#allocation54_spill] sm:$0xff] %v16453_v38  ;;  %v8555_v40 = vmax.f32 %v16225_v16, 0.0  ;;  %v8556_v29 = vmax.f32 %v16229_v19, 0.0  ;;  %v8557_v50 = vmax.f32 %v16233_v18, 0.0  ;;  %v8558_v38 = vmax.f32 %v16237_v44, 0.0 }
 0xad0   :  { %17123 = vst [vmem:[#allocation53_spill] sm:$0xff] %v16457_v62  ;;  %v8559_v33 = vmax.f32 %v16241_v58, 0.0  ;;  %v8560_v62 = vmax.f32 %v16245_v43, 0.0  ;;  %8616 = vst [vmem:[#allocation7] sm:$0xff] %v8552_v21  ;;  %v8561_v3 = vmax.f32 %v16249_v36, 0.0  ;;  %v8562_v1 = vmax.f32 %v16253_v17, 0.0 }
 0xad1   :  { %v8563_v55 = vmax.f32 %v16257_v4, 0.0  ;;  %v8564_v14 = vmax.f32 %v16261_v63, 0.0  ;;  %8617 = vst [vmem:[#allocation7 + $0x8] sm:$0xff] %v8553_v8  ;;  %8618 = vst [vmem:[#allocation7 + $0x10] sm:$0xff] %v8554_v9  ;;  %v8565_v26 = vmax.f32 %v16265_v41, 0.0  ;;  %v8566_v16 = vmax.f32 %v16269_v47, 0.0 }
 0xad2   :  { %8619 = vst [vmem:[#allocation7 + $0x18] sm:$0xff] %v8555_v40  ;;  %8620 = vst [vmem:[#allocation7 + $0x20] sm:$0xff] %v8556_v29  ;;  %v8567_v19 = vmax.f32 %v16273_v53, 0.0  ;;  %v8568_v18 = vmax.f32 %v16277_v49, 0.0  ;;  %v8569_v44 = vmax.f32 %v16281_v31, 0.0  ;;  %v8570_v58 = vmax.f32 %v16285_v28, 0.0 }
 0xad3   :  { %8621 = vst [vmem:[#allocation7 + $0x28] sm:$0xff] %v8557_v50  ;;  %8622 = vst [vmem:[#allocation7 + $0x30] sm:$0xff] %v8558_v38  ;;  %v8571_v43 = vmax.f32 %v16289_v12, 0.0  ;;  %v8572_v36 = vmax.f32 %v16293_v42, 0.0  ;;  %v8573_v17 = vmax.f32 %v16297_v11, 0.0  ;;  %v8574_v4 = vmax.f32 %v16301_v56, 0.0 }
 0xad4   :  { %8623 = vst [vmem:[#allocation7 + $0x38] sm:$0xff] %v8559_v33  ;;  %8624 = vst [vmem:[#allocation7 + $0x40] sm:$0xff] %v8560_v62  ;;  %v8575_v63 = vmax.f32 %v16305_v51, 0.0  ;;  %v8576_v41 = vmax.f32 %v16309_v22, 0.0  ;;  %v8577_v47 = vmax.f32 %v16313_v2, 0.0  ;;  %v8578_v53 = vmax.f32 %v16317_v37, 0.0 }
 0xad5   :  { %8625 = vst [vmem:[#allocation7 + $0x48] sm:$0xff] %v8561_v3  ;;  %8626 = vst [vmem:[#allocation7 + $0x50] sm:$0xff] %v8562_v1  ;;  %v8579_v49 = vmax.f32 %v16321_v20, 0.0  ;;  %v8580_v31 = vmax.f32 %v16325_v57, 0.0  ;;  %v8581_v28 = vmax.f32 %v16329_v35, 0.0  ;;  %v8582_v12 = vmax.f32 %v16333_v59, 0.0 }
 0xad6   :  { %8627 = vst [vmem:[#allocation7 + $0x58] sm:$0xff] %v8563_v55  ;;  %8628 = vst [vmem:[#allocation7 + $0x60] sm:$0xff] %v8564_v14  ;;  %v8583_v42 = vmax.f32 %v16337_v0, 0.0  ;;  %v8584_v11 = vmax.f32 %v16341_v60, 0.0  ;;  %v8585_v56 = vmax.f32 %v16345_v23, 0.0  ;;  %v8586_v51 = vmax.f32 %v16349_v24, 0.0 }
 0xad7   :  { %8629 = vst [vmem:[#allocation7 + $0x68] sm:$0xff] %v8565_v26  ;;  %8630 = vst [vmem:[#allocation7 + $0x70] sm:$0xff] %v8566_v16  ;;  %v8587_v22 = vmax.f32 %v16353_v5, 0.0  ;;  %v8588_v2 = vmax.f32 %v16357_v54, 0.0  ;;  %v8589_v37 = vmax.f32 %v16361_v25, 0.0  ;;  %v8590_v20 = vmax.f32 %v16365_v13, 0.0 }
 0xad8   :  { %8631 = vst [vmem:[#allocation7 + $0x78] sm:$0xff] %v8567_v19  ;;  %8632 = vst [vmem:[#allocation7 + $0x80] sm:$0xff] %v8568_v18  ;;  %v8591_v57 = vmax.f32 %v16369_v45, 0.0  ;;  %v8592_v35 = vmax.f32 %v16373_v6, 0.0  ;;  %v8593_v59 = vmax.f32 %v16377_v15, 0.0  ;;  %v8594_v0 = vmax.f32 %v16381_v61, 0.0 }
 0xad9   :  { %8633 = vst [vmem:[#allocation7 + $0x88] sm:$0xff] %v8569_v44  ;;  %8634 = vst [vmem:[#allocation7 + $0x90] sm:$0xff] %v8570_v58  ;;  %v8595_v60 = vmax.f32 %v16385_v27, 0.0  ;;  %v8596_v23 = vmax.f32 %v16389_v30, 0.0  ;;  %v17124_v24 = vld [vmem:[#allocation45_spill] sm:$0xff]  ;;  %v17125_v54 = vld [vmem:[#allocation44_spill] sm:$0xff] }
 0xada   :  { %8635 = vst [vmem:[#allocation7 + $0x98] sm:$0xff] %v8571_v43  ;;  %8636 = vst [vmem:[#allocation7 + $0xa0] sm:$0xff] %v8572_v36  ;;  %v8597_v5 = vmax.f32 %v17124_v24, 0.0  ;;  %v8598_v25 = vmax.f32 %v17125_v54, 0.0  ;;  %v17126_v13 = vld [vmem:[#allocation48_spill] sm:$0xff]  ;;  %v17127_v6 = vld [vmem:[#allocation47_spill] sm:$0xff] }
 0xadb   :  { %8637 = vst [vmem:[#allocation7 + $0xa8] sm:$0xff] %v8573_v17  ;;  %8638 = vst [vmem:[#allocation7 + $0xb0] sm:$0xff] %v8574_v4  ;;  %v8599_v45 = vmax.f32 %v17126_v13, 0.0  ;;  %v8600_v21 = vmax.f32 %v17127_v6, 0.0  ;;  %v17128_v15 = vld [vmem:[#allocation51_spill] sm:$0xff]  ;;  %v8602_v27 = vmax.f32 %v16413_v52, 0.0 }
 0xadc   :  { %8639 = vst [vmem:[#allocation7 + $0xb8] sm:$0xff] %v8575_v63  ;;  %8640 = vst [vmem:[#allocation7 + $0xc0] sm:$0xff] %v8576_v41  ;;  %v8601_v61 = vmax.f32 %v17128_v15, 0.0  ;;  %v8603_v30 = vmax.f32 %v16417_v34, 0.0  ;;  %v8604_v9 = vmax.f32 %v16421_v7, 0.0  ;;  %v8605_v29 = vmax.f32 %v16425_v32, 0.0 }
 0xadd   :  { %8641 = vst [vmem:[#allocation7 + $0xc8] sm:$0xff] %v8577_v47  ;;  %8642 = vst [vmem:[#allocation7 + $0xd0] sm:$0xff] %v8578_v53  ;;  %v8606_v38 = vmax.f32 %v16429_v39, 0.0  ;;  %v8607_v62 = vmax.f32 %v16433_v10, 0.0  ;;  %v8608_v8 = vmax.f32 %v16437_v46, 0.0  ;;  %v17129_v52 = vld [vmem:[#allocation29_spill] sm:$0xff] }
 0xade   :  { %8643 = vst [vmem:[#allocation7 + $0xd8] sm:$0xff] %v8579_v49  ;;  %8644 = vst [vmem:[#allocation7 + $0xe0] sm:$0xff] %v8580_v31  ;;  %v8609_v34 = vmax.f32 %v17129_v52, 0.0  ;;  %v17130_v7 = vld [vmem:[#allocation50_spill] sm:$0xff]  ;;  %v17133_v32 = vld [vmem:[#allocation53_spill] sm:$0xff]  ;;  %v8615_v10 = vmax.f32 %v16461_v48, 0.0 }
 0xadf   :  { %8645 = vst [vmem:[#allocation7 + $0xe8] sm:$0xff] %v8581_v28  ;;  %8646 = vst [vmem:[#allocation7 + $0xf0] sm:$0xff] %v8582_v12  ;;  %v8610_v40 = vmax.f32 %v17130_v7, 0.0  ;;  %v17131_v50 = vld [vmem:[#allocation30_spill] sm:$0xff]  ;;  %v8613_v39 = vmax.f32 %v17133_v32, 0.0 }
 0xae0   :  { %8647 = vst [vmem:[#allocation7 + $0xf8] sm:$0xff] %v8583_v42  ;;  %8648 = vst [vmem:[#allocation7 + $0x100] sm:$0xff] %v8584_v11  ;;  %v8611_v33 = vmax.f32 %v17131_v50, 0.0  ;;  %v17132_v3 = vld [vmem:[#allocation54_spill] sm:$0xff] }
 0xae1   :  { %8649 = vst [vmem:[#allocation7 + $0x108] sm:$0xff] %v8585_v56  ;;  %8650 = vst [vmem:[#allocation7 + $0x110] sm:$0xff] %v8586_v51  ;;  %v8612_v1 = vmax.f32 %v17132_v3, 0.0 }
 0xae2   :  { %8651 = vst [vmem:[#allocation7 + $0x118] sm:$0xff] %v8587_v22  ;;  %8652 = vst [vmem:[#allocation7 + $0x120] sm:$0xff] %v8588_v2 }
 0xae3   :  { %8653 = vst [vmem:[#allocation7 + $0x128] sm:$0xff] %v8589_v37  ;;  %8654 = vst [vmem:[#allocation7 + $0x130] sm:$0xff] %v8590_v20 }
 0xae4   :  { %8655 = vst [vmem:[#allocation7 + $0x138] sm:$0xff] %v8591_v57  ;;  %8656 = vst [vmem:[#allocation7 + $0x140] sm:$0xff] %v8592_v35 }
 0xae5   :  { %8657 = vst [vmem:[#allocation7 + $0x148] sm:$0xff] %v8593_v59  ;;  %8658 = vst [vmem:[#allocation7 + $0x150] sm:$0xff] %v8594_v0 }
 0xae6   :  { %8659 = vst [vmem:[#allocation7 + $0x158] sm:$0xff] %v8595_v60  ;;  %8660 = vst [vmem:[#allocation7 + $0x160] sm:$0xff] %v8596_v23 }
 0xae7   :  { %8661 = vst [vmem:[#allocation7 + $0x168] sm:$0xff] %v8597_v5  ;;  %8662 = vst [vmem:[#allocation7 + $0x170] sm:$0xff] %v8598_v25 }
 0xae8   :  { %8663 = vst [vmem:[#allocation7 + $0x178] sm:$0xff] %v8599_v45  ;;  %8664 = vst [vmem:[#allocation7 + $0x180] sm:$0xff] %v8600_v21 }
 0xae9   :  { %8665 = vst [vmem:[#allocation7 + $0x188] sm:$0xff] %v8601_v61  ;;  %8666 = vst [vmem:[#allocation7 + $0x190] sm:$0xff] %v8602_v27 }
 0xaea   :  { %8667 = vst [vmem:[#allocation7 + $0x198] sm:$0xff] %v8603_v30  ;;  %8668 = vst [vmem:[#allocation7 + $0x1a0] sm:$0xff] %v8604_v9 }
 0xaeb   :  { %8669 = vst [vmem:[#allocation7 + $0x1a8] sm:$0xff] %v8605_v29  ;;  %8670 = vst [vmem:[#allocation7 + $0x1b0] sm:$0xff] %v8606_v38 }
 0xaec   :  { %8671 = vst [vmem:[#allocation7 + $0x1b8] sm:$0xff] %v8607_v62  ;;  %8672 = vst [vmem:[#allocation7 + $0x1c0] sm:$0xff] %v8608_v8 }
 0xaed   :  { %8673 = vst [vmem:[#allocation7 + $0x1c8] sm:$0xff] %v8609_v34  ;;  %8674 = vst [vmem:[#allocation7 + $0x1d0] sm:$0xff] %v8610_v40 }
 0xaee   :  { %8675 = vst [vmem:[#allocation7 + $0x1d8] sm:$0xff] %v8611_v33  ;;  %8676 = vst [vmem:[#allocation7 + $0x1e0] sm:$0xff] %v8612_v1 }
 0xaef   :  { %8677 = vst [vmem:[#allocation7 + $0x1e8] sm:$0xff] %v8613_v39  ;;  %8679 = vst [vmem:[#allocation7 + $0x1f8] sm:$0xff] %v8615_v10 }
 0xaf0   :  { %10774 = shalt.err (!%p10771_p12)
}
 0xaf1   :  { %s10775_s23 = scalar_lea.hbm %s16548_s7, 8192 }
 0xaf2   :  { %p10776_p13 = scmp.ne.s32.totalorder %s16548_s7, %s10775_s23  ;;  %p10779_p0 = scmp.lt.u32.totalorder %s10775_s23, %s16548_s7 }
 0xaf4   :  { %p10781_p1 = pnand %p10779_p0, %p10776_p13 }
 0xaf6   :  { %10784 = shalt.err (!%p10781_p1)
}
 0xaf7   :  { %8691 = dma.vmem_to_hbm [thread:$0]  %s8686_s6, 8192, %s16548_s7, [#allocation6], %s10790_s11, %s10790_s11, %s10791_s12  }
 0xaf8   :  { %10787 = dma.done.wait [#allocation6], 8192  }
 0xaf9   :  { %10788 = vsyncadd [#allocation6], 4294959104 }
 0xafa   :  { %8695 = vsyncpa [#allocation5], 1 }
 0xafb   :  { %8696 = vsyncpa [#allocation6], 1 }

</bundles_post_ra>
